<compile_context>
chip_gen: v6e
topology: v6e:2x2x1
jax: 0.10.0
libtpu: 0.0.40
codegen_flags: <defaults>
</compile_context>

<pallas_src>
import functools

import jax
import jax.numpy as jnp
from jax.experimental import pallas as pl
from jax.experimental.pallas import tpu as pltpu

_VMEM_LIMIT = 48 * 1024 * 1024  # below v7x's 64 MiB physical, above v5e default


def _largest_divisor(n, cap):
    for d in range(min(n, cap), 0, -1):
        if n % d == 0:
            return d
    return 1


def _col_tile(n, cap=1024):
    """Largest divisor of n that is a multiple of 128 and <= cap, else n."""
    if n <= cap:
        return n
    d = (cap // 128) * 128
    while d >= 128:
        if n % d == 0:
            return d
        d -= 128
    return n


# --------------------------------------------------------------------------
# Generic row/column-tiled  (M, K) @ (K, N) + bias  kernel (convT head).
# --------------------------------------------------------------------------
def rows_matmul_bias_kernel(x_ref, w_ref, b_ref, y_ref):
    y_ref[...] = (jnp.dot(x_ref[...], w_ref[...],
                          preferred_element_type=jnp.float32)
                  + b_ref[...]).astype(y_ref.dtype)


def rows_matmul_bias(x2d, w, bias_vec, out_dtype, row_tile=512, col_tile=1024):
    """(M, K) @ (K, N) + bias, tiled over rows and columns on a parallel grid."""
    M, K = x2d.shape
    N = w.shape[1]
    tm = M if M <= row_tile else row_tile
    Mp = ((M + tm - 1) // tm) * tm
    if Mp != M:
        x2d = jnp.pad(x2d, ((0, Mp - M), (0, 0)))
    tn = _col_tile(N, col_tile)
    y = pl.pallas_call(
        rows_matmul_bias_kernel,
        out_shape=jax.ShapeDtypeStruct((Mp, N), out_dtype),
        grid_spec=pltpu.PrefetchScalarGridSpec(
            num_scalar_prefetch=0,
            grid=(Mp // tm, N // tn),
            in_specs=[
                pl.BlockSpec((tm, K), lambda i, j: (i, 0)),
                pl.BlockSpec((K, tn), lambda i, j: (0, j)),
                pl.BlockSpec((1, tn), lambda i, j: (0, j)),
            ],
            out_specs=pl.BlockSpec((tm, tn), lambda i, j: (i, j)),
        ),
        compiler_params=pltpu.CompilerParams(
            dimension_semantics=("parallel", "parallel"),
            vmem_limit_bytes=_VMEM_LIMIT),
    )(x2d, w, bias_vec.reshape(1, N).astype(jnp.float32))
    return y if Mp == M else y[:M]


# --------------------------------------------------------------------------
# Fused bidirectional LSTM layer: input projection + recurrence in ONE kernel.
# The backward direction reads/writes its blocks via time-reversed index maps.
# --------------------------------------------------------------------------
def _lstm_cell(gates, c_prev, hidden):
    # NOTE: for hidden < 128 these gate slices split a lane register; at
    # production hidden (multiples of 128) they are lane-aligned slabs.
    i_g = jax.nn.sigmoid(gates[:, 0 * hidden:1 * hidden])
    f_g = jax.nn.sigmoid(gates[:, 1 * hidden:2 * hidden])
    g_g = jnp.tanh(gates[:, 2 * hidden:3 * hidden])
    o_g = jax.nn.sigmoid(gates[:, 3 * hidden:4 * hidden])
    c_new = f_g * c_prev + i_g * g_g
    h_new = o_g * jnp.tanh(c_new)
    return h_new, c_new


def bilstm_fused_kernel(xf_ref, xb_ref, wxf_ref, wxb_ref, bf_ref, bb_ref,
                        whf_ref, whb_ref, of_ref, ob_ref,
                        hf_s, cf_s, hb_s, cb_s, *, ts, batch, hidden):
    g = pl.program_id(0)

    @pl.when(g == 0)
    def _():
        hf_s[...] = jnp.zeros_like(hf_s)
        cf_s[...] = jnp.zeros_like(cf_s)
        hb_s[...] = jnp.zeros_like(hb_s)
        cb_s[...] = jnp.zeros_like(cb_s)

    # Chunk-level input projection: one weight push per direction per chunk.
    # Bias (f32) is added once per chunk (not per unrolled step).
    gxf = (jnp.dot(xf_ref[...], wxf_ref[...],
                   preferred_element_type=jnp.float32) + bf_ref[...])  # (ts*B, 4H) f32
    gxb = (jnp.dot(xb_ref[...], wxb_ref[...],
                   preferred_element_type=jnp.float32) + bb_ref[...])

    whf = whf_ref[...]                     # (H, 4H) bf16, hoisted out of the loop
    whb = whb_ref[...]
    h_f = hf_s[...]                        # f32 carried state
    c_f = cf_s[...]
    h_b = hb_s[...]
    c_b = cb_s[...]

    for s in range(ts):                    # static unroll over the time chunk
        # forward direction: within-block index s (absolute time increasing)
        gates_f = gxf[s * batch:(s + 1) * batch] + jnp.dot(
            h_f.astype(whf.dtype), whf, preferred_element_type=jnp.float32)
        h_f, c_f = _lstm_cell(gates_f, c_f, hidden)
        of_ref[s] = h_f.astype(of_ref.dtype)

        # backward direction: its block is time-reversed via index_map, so walk
        # it back-to-front (absolute time decreasing).
        sb = ts - 1 - s
        gates_b = gxb[sb * batch:(sb + 1) * batch] + jnp.dot(
            h_b.astype(whb.dtype), whb, preferred_element_type=jnp.float32)
        h_b, c_b = _lstm_cell(gates_b, c_b, hidden)
        ob_ref[sb] = h_b.astype(ob_ref.dtype)

    hf_s[...] = h_f
    cf_s[...] = c_f
    hb_s[...] = h_b
    cb_s[...] = c_b


def bilstm_fused(x_tbd, wxf, wxb, bf, bb, whf_t, whb_t, hidden,
                 out_dtype=jnp.bfloat16):
    """x_tbd: (T, B, Din) bf16. Weights pre-transposed / bf16, biases f32.
    Returns (out_f, out_b), each (T, B, H) in forward time order (out_dtype)."""
    T, B, Din = x_tbd.shape
    assert (4 * hidden) % 128 == 0, (
        "per-direction gate width 4H must be a multiple of 128 lanes")
    ts = _largest_divisor(T, 16)           # time chunk per grid step
    G = T // ts
    x_flat = x_tbd.reshape(G, ts * B, Din)  # free row-major regrouping
    kern = functools.partial(bilstm_fused_kernel, ts=ts, batch=B, hidden=hidden)
    return pl.pallas_call(
        kern,
        out_shape=(jax.ShapeDtypeStruct((T, B, hidden), out_dtype),
                   jax.ShapeDtypeStruct((T, B, hidden), out_dtype)),
        grid_spec=pltpu.PrefetchScalarGridSpec(
            num_scalar_prefetch=0,
            grid=(G,),
            in_specs=[
                # fwd input block: time block g
                pl.BlockSpec((None, ts * B, Din), lambda g: (g, 0, 0)),
                # bwd input block: time block reversed
                pl.BlockSpec((None, ts * B, Din), lambda g: (G - 1 - g, 0, 0)),
                pl.BlockSpec((Din, 4 * hidden), lambda g: (0, 0)),     # W_ih fwd (resident)
                pl.BlockSpec((Din, 4 * hidden), lambda g: (0, 0)),     # W_ih bwd (resident)
                pl.BlockSpec((1, 4 * hidden), lambda g: (0, 0)),       # bias fwd
                pl.BlockSpec((1, 4 * hidden), lambda g: (0, 0)),       # bias bwd
                pl.BlockSpec((hidden, 4 * hidden), lambda g: (0, 0)),  # W_hh fwd
                pl.BlockSpec((hidden, 4 * hidden), lambda g: (0, 0)),  # W_hh bwd
            ],
            out_specs=(pl.BlockSpec((ts, B, hidden), lambda g: (g, 0, 0)),
                       pl.BlockSpec((ts, B, hidden), lambda g: (G - 1 - g, 0, 0))),
            scratch_shapes=[pltpu.VMEM((B, hidden), jnp.float32)] * 4,
        ),
        compiler_params=pltpu.CompilerParams(
            dimension_semantics=("arbitrary",),      # serial recurrence
            vmem_limit_bytes=_VMEM_LIMIT),
    )(x_flat, x_flat, wxf, wxb, bf, bb, whf_t, whb_t)


def pyramid_pack(out_f, out_b):
    """Build the pBLSTM input: lane-concat [f(2t'), b(2t'), f(2t'+1), b(2t'+1)].
    Pure layout op (leading-index frame selection + lane concat), left to XLA."""
    T, B, H = out_f.shape
    T2 = T // 2
    f2 = out_f[: 2 * T2].reshape(T2, 2, B, H)   # truncate odd trailing frame
    b2 = out_b[: 2 * T2].reshape(T2, 2, B, H)
    return jnp.concatenate([f2[:, 0], b2[:, 0], f2[:, 1], b2[:, 1]], axis=-1)


# --------------------------------------------------------------------------
# ConvTranspose1d(kernel=2, stride=2): one matmul against the two taps
# concatenated on the lane axis; the time interleave is a free reshape.
# --------------------------------------------------------------------------
def conv_transpose1d_k2s2(x_btc, weight, bias_vec, out_dtype):
    """x: (B, T, Cin) bf16; weight: (Cin, Cout, 2) (PyTorch layout); bias (Cout,)."""
    B, Tc, Ci = x_btc.shape
    Co = weight.shape[1]
    w_cat = jnp.concatenate([weight[:, :, 0], weight[:, :, 1]],
                            axis=1).astype(jnp.bfloat16)          # (Ci, 2Co)
    b_cat = jnp.concatenate([bias_vec, bias_vec])                 # (2Co,) f32
    y = rows_matmul_bias(x_btc.reshape(B * Tc, Ci), w_cat, b_cat, out_dtype)
    # row (b,t) lanes [0:Co] -> output time 2t, [Co:2Co] -> 2t+1  (free view)
    return y.reshape(B, 2 * Tc, Co)


# --------------------------------------------------------------------------
# Parameter construction (deterministic, PyTorch-shaped, f32 master copies)
# --------------------------------------------------------------------------
def _uniform(key, shape, scale):
    return jax.random.uniform(key, shape, jnp.float32, -scale, scale)


def init_bilstm_params(key, input_size, hidden_size):
    scale = 1.0 / float(hidden_size) ** 0.5
    ks = jax.random.split(key, 8)
    def one_dir(kk):
        return (_uniform(kk[0], (4 * hidden_size, input_size), scale),   # W_ih
                _uniform(kk[1], (4 * hidden_size, hidden_size), scale),  # W_hh
                _uniform(kk[2], (4 * hidden_size,), scale),              # b_ih
                _uniform(kk[3], (4 * hidden_size,), scale))              # b_hh
    return {"fwd": one_dir(ks[:4]), "bwd": one_dir(ks[4:])}


def init_convt_params(key, c_in, c_out):
    scale = 1.0 / float(c_in * 2) ** 0.5
    k_w, k_b = jax.random.split(key)
    return (_uniform(k_w, (c_in, c_out, 2), scale),   # PyTorch ConvTranspose1d weight
            _uniform(k_b, (c_out,), scale))


def init_listener_pretrainer_params(key, input_dim, encoder_hidden_dim):
    H = encoder_hidden_dim
    keys = jax.random.split(key, 7)
    params = {
        "lstm0": init_bilstm_params(keys[0], input_dim, H),   # base BLSTM
        "lstm1": init_bilstm_params(keys[1], 4 * H, H),       # pBLSTM 1
        "lstm2": init_bilstm_params(keys[2], 4 * H, H),       # pBLSTM 2
        "lstm3": init_bilstm_params(keys[3], 4 * H, H),       # pBLSTM 3
    }
    params["ct1_w"], params["ct1_b"] = init_convt_params(keys[4], 2 * H, 2 * H)
    params["ct2_w"], params["ct2_b"] = init_convt_params(keys[5], 2 * H, H)
    params["ct3_w"], params["ct3_b"] = init_convt_params(keys[6], H, input_dim)
    return params


def _prep_layer(layer):
    """Transpose weights to (in, 4H), fold biases; cast MXU operands to bf16."""
    w_ihf, w_hhf, b_ihf, b_hhf = layer["fwd"]
    w_ihb, w_hhb, b_ihb, b_hhb = layer["bwd"]
    wxf = w_ihf.T.astype(jnp.bfloat16)                 # (Din, 4H)
    wxb = w_ihb.T.astype(jnp.bfloat16)
    bf = (b_ihf + b_hhf).reshape(1, -1)                # f32 (1, 4H)
    bb = (b_ihb + b_hhb).reshape(1, -1)
    whf = w_hhf.T.astype(jnp.bfloat16)                 # (H, 4H)
    whb = w_hhb.T.astype(jnp.bfloat16)
    return wxf, wxb, bf, bb, whf, whb


# --------------------------------------------------------------------------
# Full forward pass (ListenerPreTrainer.forward)
# --------------------------------------------------------------------------
@jax.jit
def listener_pre_trainer_forward(params, x, x_len):
    # TODO(synk): x_len is unused (pack_padded_sequence masking not modeled).
    del x_len
    B, T, D = x.shape
    H = params["lstm0"]["fwd"][1].shape[1]

    # ---- Encoder (pre_train=True path), time-major bf16 throughout ----
    xt = jnp.transpose(x, (1, 0, 2)).astype(jnp.bfloat16)      # (T, B, D)

    wxf, wxb, bf, bb, whf, whb = _prep_layer(params["lstm0"])
    out_f, out_b = bilstm_fused(xt, wxf, wxb, bf, bb, whf, whb, H)

    for name in ("lstm1", "lstm2", "lstm3"):                   # pyramidal BLSTMs
        xp = pyramid_pack(out_f, out_b)                        # (T/2, B, 4H) bf16
        wxf, wxb, bf, bb, whf, whb = _prep_layer(params[name])
        out_f, out_b = bilstm_fused(xp, wxf, wxb, bf, bb, whf, whb, H)

    enc = jnp.concatenate([out_f, out_b], axis=-1)             # (T/8, B, 2H) bf16
    enc = jnp.transpose(enc, (1, 0, 2))                        # (B, T/8, 2H): conv head batch-major

    # ---- pre-train upsampling head (permutes absorbed into channel-last) ----
    out = conv_transpose1d_k2s2(enc, params["ct1_w"], params["ct1_b"], jnp.bfloat16)  # (B, T/4, 2H)
    out = conv_transpose1d_k2s2(out, params["ct2_w"], params["ct2_b"], jnp.bfloat16)  # (B, T/2, H)
    out = conv_transpose1d_k2s2(out, params["ct3_w"], params["ct3_b"], jnp.float32)   # (B, T, D)
    return out


if __name__ == "__main__":
    INPUT_DIM = 16
    ENC_HIDDEN = 32   # 4H = 128 lanes per direction
    B, T = 2, 16      # T divisible by 8 (three pyramidal reductions)

    key = jax.random.PRNGKey(0)
    k_param, k_x = jax.random.split(key)

    params = init_listener_pretrainer_params(k_param, INPUT_DIM, ENC_HIDDEN)
    x = jax.random.normal(k_x, (B, T, INPUT_DIM), jnp.float32)
    x_len = jnp.full((B,), T, jnp.int32)

    out = listener_pre_trainer_forward(params, x, x_len)
    out = jax.block_until_ready(out)

    assert out.shape == (B, T, INPUT_DIM), out.shape
    assert bool(jnp.all(jnp.isfinite(out)))
    print("KERNEL_OK")
</pallas_src>

<mosaic_0001>
module attributes {stable_mosaic.version = 11 : i64} {
  func.func @bilstm_fused_kernel(%arg0: i32, %arg1: memref<1x16x128xbf16, #tpu.memory_space<vmem>>, %arg2: memref<1x16x128xbf16, #tpu.memory_space<vmem>>, %arg3: memref<128x128xbf16, #tpu.memory_space<vmem>>, %arg4: memref<128x128xbf16, #tpu.memory_space<vmem>>, %arg5: memref<1x128xf32, #tpu.memory_space<vmem>>, %arg6: memref<1x128xf32, #tpu.memory_space<vmem>>, %arg7: memref<32x128xbf16, #tpu.memory_space<vmem>>, %arg8: memref<32x128xbf16, #tpu.memory_space<vmem>>, %arg9: memref<8x2x32xbf16, #tpu.memory_space<vmem>>, %arg10: memref<8x2x32xbf16, #tpu.memory_space<vmem>>, %arg11: memref<2x32xf32, #tpu.memory_space<vmem>>, %arg12: memref<2x32xf32, #tpu.memory_space<vmem>>, %arg13: memref<2x32xf32, #tpu.memory_space<vmem>>, %arg14: memref<2x32xf32, #tpu.memory_space<vmem>>) attributes {dimension_semantics = [#tpu.dimension_semantics<arbitrary>], iteration_bounds = array<i64: 1>, scalar_prefetch = 0 : i64, scratch_operands = 4 : i64, tpu.core_type = #tpu.core_type<tc>, window_params = [{transform_indices = @transform_0, window_bounds = array<i64: 1, 16, 128>}, {transform_indices = @transform_1, window_bounds = array<i64: 1, 16, 128>}, {pipeline_mode = #tpu.pipeline_mode<synchronous>, transform_indices = @transform_2, window_bounds = array<i64: 128, 128>}, {pipeline_mode = #tpu.pipeline_mode<synchronous>, transform_indices = @transform_3, window_bounds = array<i64: 128, 128>}, {pipeline_mode = #tpu.pipeline_mode<synchronous>, transform_indices = @transform_4, window_bounds = array<i64: 1, 128>}, {pipeline_mode = #tpu.pipeline_mode<synchronous>, transform_indices = @transform_5, window_bounds = array<i64: 1, 128>}, {pipeline_mode = #tpu.pipeline_mode<synchronous>, transform_indices = @transform_6, window_bounds = array<i64: 32, 128>}, {pipeline_mode = #tpu.pipeline_mode<synchronous>, transform_indices = @transform_7, window_bounds = array<i64: 32, 128>}, {transform_indices = @transform_8, window_bounds = array<i64: 8, 2, 32>}, {transform_indices = @transform_9, window_bounds = array<i64: 8, 2, 32>}]} {
    %c0_i32 = arith.constant 0 : i32
    %0 = arith.cmpi eq, %arg0, %c0_i32 : i32
    %1 = arith.extui %0 : i1 to i32
    %c0_i32_0 = arith.constant 0 : i32
    %2 = arith.cmpi ne, %1, %c0_i32_0 : i32
    scf.if %2 {
      %cst_140 = arith.constant 0.000000e+00 : f32
      %555 = vector.broadcast %cst_140 : f32 to vector<2x32xf32>
      %c0_141 = arith.constant 0 : index
      %c0_142 = arith.constant 0 : index
      %556 = vector.load %arg11[%c0_141, %c0_142] : memref<2x32xf32, #tpu.memory_space<vmem>>, vector<2x32xf32>
      tpu.vector_store %arg11[%c0_141, %c0_142], %555 {strides = array<i32>} : memref<2x32xf32, #tpu.memory_space<vmem>>, vector<2x32xf32>,
      %cst_143 = arith.constant 0.000000e+00 : f32
      %557 = vector.broadcast %cst_143 : f32 to vector<2x32xf32>
      %c0_144 = arith.constant 0 : index
      %c0_145 = arith.constant 0 : index
      %558 = vector.load %arg12[%c0_144, %c0_145] : memref<2x32xf32, #tpu.memory_space<vmem>>, vector<2x32xf32>
      tpu.vector_store %arg12[%c0_144, %c0_145], %557 {strides = array<i32>} : memref<2x32xf32, #tpu.memory_space<vmem>>, vector<2x32xf32>,
      %cst_146 = arith.constant 0.000000e+00 : f32
      %559 = vector.broadcast %cst_146 : f32 to vector<2x32xf32>
      %c0_147 = arith.constant 0 : index
      %c0_148 = arith.constant 0 : index
      %560 = vector.load %arg13[%c0_147, %c0_148] : memref<2x32xf32, #tpu.memory_space<vmem>>, vector<2x32xf32>
      tpu.vector_store %arg13[%c0_147, %c0_148], %559 {strides = array<i32>} : memref<2x32xf32, #tpu.memory_space<vmem>>, vector<2x32xf32>,
      %cst_149 = arith.constant 0.000000e+00 : f32
      %561 = vector.broadcast %cst_149 : f32 to vector<2x32xf32>
      %c0_150 = arith.constant 0 : index
      %c0_151 = arith.constant 0 : index
      %562 = vector.load %arg14[%c0_150, %c0_151] : memref<2x32xf32, #tpu.memory_space<vmem>>, vector<2x32xf32>
      tpu.vector_store %arg14[%c0_150, %c0_151], %561 {strides = array<i32>} : memref<2x32xf32, #tpu.memory_space<vmem>>, vector<2x32xf32>,
    } else {
    }
    %c0 = arith.constant 0 : index
    %c0_1 = arith.constant 0 : index
    %c0_2 = arith.constant 0 : index
    %3 = vector.load %arg1[%c0, %c0_1, %c0_2] : memref<1x16x128xbf16, #tpu.memory_space<vmem>>, vector<1x16x128xbf16>
    %4 = vector.shape_cast %3 : vector<1x16x128xbf16> to vector<16x128xbf16>
    %c0_3 = arith.constant 0 : index
    %c0_4 = arith.constant 0 : index
    %5 = vector.load %arg3[%c0_3, %c0_4] : memref<128x128xbf16, #tpu.memory_space<vmem>>, vector<128x128xbf16>
    %cst = arith.constant dense<0.000000e+00> : vector<16x128xf32>
    %6 = tpu.matmul %4, %5, %cst {dimension_numbers = #tpu.dot_dimension_numbers<[1], [0], [0], [1], [0, 0, 1, 1], [], []>} : vector<16x128xbf16>, vector<128x128xbf16>, vector<16x128xf32> -> vector<16x128xf32>
    %c0_5 = arith.constant 0 : index
    %c0_6 = arith.constant 0 : index
    %7 = vector.load %arg5[%c0_5, %c0_6] : memref<1x128xf32, #tpu.memory_space<vmem>>, vector<1x128xf32>
    %8 = vector.broadcast %7 : vector<1x128xf32> to vector<16x128xf32>
    %9 = arith.addf %6, %8 : vector<16x128xf32>
    %c0_7 = arith.constant 0 : index
    %c0_8 = arith.constant 0 : index
    %c0_9 = arith.constant 0 : index
    %10 = vector.load %arg2[%c0_7, %c0_8, %c0_9] : memref<1x16x128xbf16, #tpu.memory_space<vmem>>, vector<1x16x128xbf16>
    %11 = vector.shape_cast %10 : vector<1x16x128xbf16> to vector<16x128xbf16>
    %c0_10 = arith.constant 0 : index
    %c0_11 = arith.constant 0 : index
    %12 = vector.load %arg4[%c0_10, %c0_11] : memref<128x128xbf16, #tpu.memory_space<vmem>>, vector<128x128xbf16>
    %cst_12 = arith.constant dense<0.000000e+00> : vector<16x128xf32>
    %13 = tpu.matmul %11, %12, %cst_12 {dimension_numbers = #tpu.dot_dimension_numbers<[1], [0], [0], [1], [0, 0, 1, 1], [], []>} : vector<16x128xbf16>, vector<128x128xbf16>, vector<16x128xf32> -> vector<16x128xf32>
    %c0_13 = arith.constant 0 : index
    %c0_14 = arith.constant 0 : index
    %14 = vector.load %arg6[%c0_13, %c0_14] : memref<1x128xf32, #tpu.memory_space<vmem>>, vector<1x128xf32>
    %15 = vector.broadcast %14 : vector<1x128xf32> to vector<16x128xf32>
    %16 = arith.addf %13, %15 : vector<16x128xf32>
    %c0_15 = arith.constant 0 : index
    %c0_16 = arith.constant 0 : index
    %17 = vector.load %arg7[%c0_15, %c0_16] : memref<32x128xbf16, #tpu.memory_space<vmem>>, vector<32x128xbf16>
    %c0_17 = arith.constant 0 : index
    %c0_18 = arith.constant 0 : index
    %18 = vector.load %arg8[%c0_17, %c0_18] : memref<32x128xbf16, #tpu.memory_space<vmem>>, vector<32x128xbf16>
    %c0_19 = arith.constant 0 : index
    %c0_20 = arith.constant 0 : index
    %19 = vector.load %arg11[%c0_19, %c0_20] : memref<2x32xf32, #tpu.memory_space<vmem>>, vector<2x32xf32>
    %c0_21 = arith.constant 0 : index
    %c0_22 = arith.constant 0 : index
    %20 = vector.load %arg12[%c0_21, %c0_22] : memref<2x32xf32, #tpu.memory_space<vmem>>, vector<2x32xf32>
    %c0_23 = arith.constant 0 : index
    %c0_24 = arith.constant 0 : index
    %21 = vector.load %arg13[%c0_23, %c0_24] : memref<2x32xf32, #tpu.memory_space<vmem>>, vector<2x32xf32>
    %c0_25 = arith.constant 0 : index
    %c0_26 = arith.constant 0 : index
    %22 = vector.load %arg14[%c0_25, %c0_26] : memref<2x32xf32, #tpu.memory_space<vmem>>, vector<2x32xf32>
    %23 = vector.extract_strided_slice %9 {offsets = [0, 0], sizes = [2, 128], strides = [1, 1]} : vector<16x128xf32> to vector<2x128xf32>
    %24 = arith.truncf %19 : vector<2x32xf32> to vector<2x32xbf16>
    %cst_27 = arith.constant dense<0.000000e+00> : vector<2x128xf32>
    %25 = tpu.matmul %24, %17, %cst_27 {dimension_numbers = #tpu.dot_dimension_numbers<[1], [0], [0], [1], [0, 0, 1, 1], [], []>} : vector<2x32xbf16>, vector<32x128xbf16>, vector<2x128xf32> -> vector<2x128xf32>
    %26 = arith.addf %23, %25 : vector<2x128xf32>
    %27 = vector.extract_strided_slice %26 {offsets = [0, 0], sizes = [2, 32], strides = [1, 1]} : vector<2x128xf32> to vector<2x32xf32>
    %28 = arith.negf %27 : vector<2x32xf32>
    %29 = math.exp %28 : vector<2x32xf32>
    %cst_28 = arith.constant 1.000000e+00 : f32
    %30 = vector.broadcast %cst_28 : f32 to vector<2x32xf32>
    %31 = arith.addf %30, %29 : vector<2x32xf32>
    %32 = arith.divf %30, %31 : vector<2x32xf32>
    %33 = vector.extract_strided_slice %26 {offsets = [0, 32], sizes = [2, 32], strides = [1, 1]} : vector<2x128xf32> to vector<2x32xf32>
    %34 = arith.negf %33 : vector<2x32xf32>
    %35 = math.exp %34 : vector<2x32xf32>
    %cst_29 = arith.constant 1.000000e+00 : f32
    %36 = vector.broadcast %cst_29 : f32 to vector<2x32xf32>
    %37 = arith.addf %36, %35 : vector<2x32xf32>
    %38 = arith.divf %36, %37 : vector<2x32xf32>
    %39 = vector.extract_strided_slice %26 {offsets = [0, 64], sizes = [2, 32], strides = [1, 1]} : vector<2x128xf32> to vector<2x32xf32>
    %40 = math.tanh %39 : vector<2x32xf32>
    %41 = vector.extract_strided_slice %26 {offsets = [0, 96], sizes = [2, 32], strides = [1, 1]} : vector<2x128xf32> to vector<2x32xf32>
    %42 = arith.negf %41 : vector<2x32xf32>
    %43 = math.exp %42 : vector<2x32xf32>
    %cst_30 = arith.constant 1.000000e+00 : f32
    %44 = vector.broadcast %cst_30 : f32 to vector<2x32xf32>
    %45 = arith.addf %44, %43 : vector<2x32xf32>
    %46 = arith.divf %44, %45 : vector<2x32xf32>
    %47 = arith.mulf %38, %20 : vector<2x32xf32>
    %48 = arith.mulf %32, %40 : vector<2x32xf32>
    %49 = arith.addf %47, %48 : vector<2x32xf32>
    %50 = math.tanh %49 : vector<2x32xf32>
    %51 = arith.mulf %46, %50 : vector<2x32xf32>
    %52 = arith.truncf %51 : vector<2x32xf32> to vector<2x32xbf16>
    %c0_31 = arith.constant 0 : index
    %c0_32 = arith.constant 0 : index
    %c0_33 = arith.constant 0 : index
    %53 = vector.load %arg9[%c0_31, %c0_32, %c0_33] : memref<8x2x32xbf16, #tpu.memory_space<vmem>>, vector<1x2x32xbf16>
    %54 = vector.shape_cast %53 : vector<1x2x32xbf16> to vector<2x32xbf16>
    %55 = vector.shape_cast %52 : vector<2x32xbf16> to vector<1x2x32xbf16>
    tpu.vector_store %arg9[%c0_31, %c0_32, %c0_33], %55 {strides = array<i32>} : memref<8x2x32xbf16, #tpu.memory_space<vmem>>, vector<1x2x32xbf16>,
    %56 = vector.extract_strided_slice %16 {offsets = [14, 0], sizes = [2, 128], strides = [1, 1]} : vector<16x128xf32> to vector<2x128xf32>
    %57 = arith.truncf %21 : vector<2x32xf32> to vector<2x32xbf16>
    %cst_34 = arith.constant dense<0.000000e+00> : vector<2x128xf32>
    %58 = tpu.matmul %57, %18, %cst_34 {dimension_numbers = #tpu.dot_dimension_numbers<[1], [0], [0], [1], [0, 0, 1, 1], [], []>} : vector<2x32xbf16>, vector<32x128xbf16>, vector<2x128xf32> -> vector<2x128xf32>
    %59 = arith.addf %56, %58 : vector<2x128xf32>
    %60 = vector.extract_strided_slice %59 {offsets = [0, 0], sizes = [2, 32], strides = [1, 1]} : vector<2x128xf32> to vector<2x32xf32>
    %61 = arith.negf %60 : vector<2x32xf32>
    %62 = math.exp %61 : vector<2x32xf32>
    %cst_35 = arith.constant 1.000000e+00 : f32
    %63 = vector.broadcast %cst_35 : f32 to vector<2x32xf32>
    %64 = arith.addf %63, %62 : vector<2x32xf32>
    %65 = arith.divf %63, %64 : vector<2x32xf32>
    %66 = vector.extract_strided_slice %59 {offsets = [0, 32], sizes = [2, 32], strides = [1, 1]} : vector<2x128xf32> to vector<2x32xf32>
    %67 = arith.negf %66 : vector<2x32xf32>
    %68 = math.exp %67 : vector<2x32xf32>
    %cst_36 = arith.constant 1.000000e+00 : f32
    %69 = vector.broadcast %cst_36 : f32 to vector<2x32xf32>
    %70 = arith.addf %69, %68 : vector<2x32xf32>
    %71 = arith.divf %69, %70 : vector<2x32xf32>
    %72 = vector.extract_strided_slice %59 {offsets = [0, 64], sizes = [2, 32], strides = [1, 1]} : vector<2x128xf32> to vector<2x32xf32>
    %73 = math.tanh %72 : vector<2x32xf32>
    %74 = vector.extract_strided_slice %59 {offsets = [0, 96], sizes = [2, 32], strides = [1, 1]} : vector<2x128xf32> to vector<2x32xf32>
    %75 = arith.negf %74 : vector<2x32xf32>
    %76 = math.exp %75 : vector<2x32xf32>
    %cst_37 = arith.constant 1.000000e+00 : f32
    %77 = vector.broadcast %cst_37 : f32 to vector<2x32xf32>
    %78 = arith.addf %77, %76 : vector<2x32xf32>
    %79 = arith.divf %77, %78 : vector<2x32xf32>
    %80 = arith.mulf %71, %22 : vector<2x32xf32>
    %81 = arith.mulf %65, %73 : vector<2x32xf32>
    %82 = arith.addf %80, %81 : vector<2x32xf32>
    %83 = math.tanh %82 : vector<2x32xf32>
    %84 = arith.mulf %79, %83 : vector<2x32xf32>
    %85 = arith.truncf %84 : vector<2x32xf32> to vector<2x32xbf16>
    %c7 = arith.constant 7 : index
    %c0_38 = arith.constant 0 : index
    %c0_39 = arith.constant 0 : index
    %86 = vector.load %arg10[%c7, %c0_38, %c0_39] : memref<8x2x32xbf16, #tpu.memory_space<vmem>>, vector<1x2x32xbf16>
    %87 = vector.shape_cast %86 : vector<1x2x32xbf16> to vector<2x32xbf16>
    %88 = vector.shape_cast %85 : vector<2x32xbf16> to vector<1x2x32xbf16>
    tpu.vector_store %arg10[%c7, %c0_38, %c0_39], %88 {strides = array<i32>} : memref<8x2x32xbf16, #tpu.memory_space<vmem>>, vector<1x2x32xbf16>,
    %89 = vector.extract_strided_slice %9 {offsets = [2, 0], sizes = [2, 128], strides = [1, 1]} : vector<16x128xf32> to vector<2x128xf32>
    %90 = arith.truncf %51 : vector<2x32xf32> to vector<2x32xbf16>
    %cst_40 = arith.constant dense<0.000000e+00> : vector<2x128xf32>
    %91 = tpu.matmul %90, %17, %cst_40 {dimension_numbers = #tpu.dot_dimension_numbers<[1], [0], [0], [1], [0, 0, 1, 1], [], []>} : vector<2x32xbf16>, vector<32x128xbf16>, vector<2x128xf32> -> vector<2x128xf32>
    %92 = arith.addf %89, %91 : vector<2x128xf32>
    %93 = vector.extract_strided_slice %92 {offsets = [0, 0], sizes = [2, 32], strides = [1, 1]} : vector<2x128xf32> to vector<2x32xf32>
    %94 = arith.negf %93 : vector<2x32xf32>
    %95 = math.exp %94 : vector<2x32xf32>
    %cst_41 = arith.constant 1.000000e+00 : f32
    %96 = vector.broadcast %cst_41 : f32 to vector<2x32xf32>
    %97 = arith.addf %96, %95 : vector<2x32xf32>
    %98 = arith.divf %96, %97 : vector<2x32xf32>
    %99 = vector.extract_strided_slice %92 {offsets = [0, 32], sizes = [2, 32], strides = [1, 1]} : vector<2x128xf32> to vector<2x32xf32>
    %100 = arith.negf %99 : vector<2x32xf32>
    %101 = math.exp %100 : vector<2x32xf32>
    %cst_42 = arith.constant 1.000000e+00 : f32
    %102 = vector.broadcast %cst_42 : f32 to vector<2x32xf32>
    %103 = arith.addf %102, %101 : vector<2x32xf32>
    %104 = arith.divf %102, %103 : vector<2x32xf32>
    %105 = vector.extract_strided_slice %92 {offsets = [0, 64], sizes = [2, 32], strides = [1, 1]} : vector<2x128xf32> to vector<2x32xf32>
    %106 = math.tanh %105 : vector<2x32xf32>
    %107 = vector.extract_strided_slice %92 {offsets = [0, 96], sizes = [2, 32], strides = [1, 1]} : vector<2x128xf32> to vector<2x32xf32>
    %108 = arith.negf %107 : vector<2x32xf32>
    %109 = math.exp %108 : vector<2x32xf32>
    %cst_43 = arith.constant 1.000000e+00 : f32
    %110 = vector.broadcast %cst_43 : f32 to vector<2x32xf32>
    %111 = arith.addf %110, %109 : vector<2x32xf32>
    %112 = arith.divf %110, %111 : vector<2x32xf32>
    %113 = arith.mulf %104, %49 : vector<2x32xf32>
    %114 = arith.mulf %98, %106 : vector<2x32xf32>
    %115 = arith.addf %113, %114 : vector<2x32xf32>
    %116 = math.tanh %115 : vector<2x32xf32>
    %117 = arith.mulf %112, %116 : vector<2x32xf32>
    %118 = arith.truncf %117 : vector<2x32xf32> to vector<2x32xbf16>
    %c1 = arith.constant 1 : index
    %c0_44 = arith.constant 0 : index
    %c0_45 = arith.constant 0 : index
    %119 = vector.load %arg9[%c1, %c0_44, %c0_45] : memref<8x2x32xbf16, #tpu.memory_space<vmem>>, vector<1x2x32xbf16>
    %120 = vector.shape_cast %119 : vector<1x2x32xbf16> to vector<2x32xbf16>
    %121 = vector.shape_cast %118 : vector<2x32xbf16> to vector<1x2x32xbf16>
    tpu.vector_store %arg9[%c1, %c0_44, %c0_45], %121 {strides = array<i32>} : memref<8x2x32xbf16, #tpu.memory_space<vmem>>, vector<1x2x32xbf16>,
    %122 = vector.extract_strided_slice %16 {offsets = [12, 0], sizes = [2, 128], strides = [1, 1]} : vector<16x128xf32> to vector<2x128xf32>
    %123 = arith.truncf %84 : vector<2x32xf32> to vector<2x32xbf16>
    %cst_46 = arith.constant dense<0.000000e+00> : vector<2x128xf32>
    %124 = tpu.matmul %123, %18, %cst_46 {dimension_numbers = #tpu.dot_dimension_numbers<[1], [0], [0], [1], [0, 0, 1, 1], [], []>} : vector<2x32xbf16>, vector<32x128xbf16>, vector<2x128xf32> -> vector<2x128xf32>
    %125 = arith.addf %122, %124 : vector<2x128xf32>
    %126 = vector.extract_strided_slice %125 {offsets = [0, 0], sizes = [2, 32], strides = [1, 1]} : vector<2x128xf32> to vector<2x32xf32>
    %127 = arith.negf %126 : vector<2x32xf32>
    %128 = math.exp %127 : vector<2x32xf32>
    %cst_47 = arith.constant 1.000000e+00 : f32
    %129 = vector.broadcast %cst_47 : f32 to vector<2x32xf32>
    %130 = arith.addf %129, %128 : vector<2x32xf32>
    %131 = arith.divf %129, %130 : vector<2x32xf32>
    %132 = vector.extract_strided_slice %125 {offsets = [0, 32], sizes = [2, 32], strides = [1, 1]} : vector<2x128xf32> to vector<2x32xf32>
    %133 = arith.negf %132 : vector<2x32xf32>
    %134 = math.exp %133 : vector<2x32xf32>
    %cst_48 = arith.constant 1.000000e+00 : f32
    %135 = vector.broadcast %cst_48 : f32 to vector<2x32xf32>
    %136 = arith.addf %135, %134 : vector<2x32xf32>
    %137 = arith.divf %135, %136 : vector<2x32xf32>
    %138 = vector.extract_strided_slice %125 {offsets = [0, 64], sizes = [2, 32], strides = [1, 1]} : vector<2x128xf32> to vector<2x32xf32>
    %139 = math.tanh %138 : vector<2x32xf32>
    %140 = vector.extract_strided_slice %125 {offsets = [0, 96], sizes = [2, 32], strides = [1, 1]} : vector<2x128xf32> to vector<2x32xf32>
    %141 = arith.negf %140 : vector<2x32xf32>
    %142 = math.exp %141 : vector<2x32xf32>
    %cst_49 = arith.constant 1.000000e+00 : f32
    %143 = vector.broadcast %cst_49 : f32 to vector<2x32xf32>
    %144 = arith.addf %143, %142 : vector<2x32xf32>
    %145 = arith.divf %143, %144 : vector<2x32xf32>
    %146 = arith.mulf %137, %82 : vector<2x32xf32>
    %147 = arith.mulf %131, %139 : vector<2x32xf32>
    %148 = arith.addf %146, %147 : vector<2x32xf32>
    %149 = math.tanh %148 : vector<2x32xf32>
    %150 = arith.mulf %145, %149 : vector<2x32xf32>
    %151 = arith.truncf %150 : vector<2x32xf32> to vector<2x32xbf16>
    %c6 = arith.constant 6 : index
    %c0_50 = arith.constant 0 : index
    %c0_51 = arith.constant 0 : index
    %152 = vector.load %arg10[%c6, %c0_50, %c0_51] : memref<8x2x32xbf16, #tpu.memory_space<vmem>>, vector<1x2x32xbf16>
    %153 = vector.shape_cast %152 : vector<1x2x32xbf16> to vector<2x32xbf16>
    %154 = vector.shape_cast %151 : vector<2x32xbf16> to vector<1x2x32xbf16>
    tpu.vector_store %arg10[%c6, %c0_50, %c0_51], %154 {strides = array<i32>} : memref<8x2x32xbf16, #tpu.memory_space<vmem>>, vector<1x2x32xbf16>,
    %155 = vector.extract_strided_slice %9 {offsets = [4, 0], sizes = [2, 128], strides = [1, 1]} : vector<16x128xf32> to vector<2x128xf32>
    %156 = arith.truncf %117 : vector<2x32xf32> to vector<2x32xbf16>
    %cst_52 = arith.constant dense<0.000000e+00> : vector<2x128xf32>
    %157 = tpu.matmul %156, %17, %cst_52 {dimension_numbers = #tpu.dot_dimension_numbers<[1], [0], [0], [1], [0, 0, 1, 1], [], []>} : vector<2x32xbf16>, vector<32x128xbf16>, vector<2x128xf32> -> vector<2x128xf32>
    %158 = arith.addf %155, %157 : vector<2x128xf32>
    %159 = vector.extract_strided_slice %158 {offsets = [0, 0], sizes = [2, 32], strides = [1, 1]} : vector<2x128xf32> to vector<2x32xf32>
    %160 = arith.negf %159 : vector<2x32xf32>
    %161 = math.exp %160 : vector<2x32xf32>
    %cst_53 = arith.constant 1.000000e+00 : f32
    %162 = vector.broadcast %cst_53 : f32 to vector<2x32xf32>
    %163 = arith.addf %162, %161 : vector<2x32xf32>
    %164 = arith.divf %162, %163 : vector<2x32xf32>
    %165 = vector.extract_strided_slice %158 {offsets = [0, 32], sizes = [2, 32], strides = [1, 1]} : vector<2x128xf32> to vector<2x32xf32>
    %166 = arith.negf %165 : vector<2x32xf32>
    %167 = math.exp %166 : vector<2x32xf32>
    %cst_54 = arith.constant 1.000000e+00 : f32
    %168 = vector.broadcast %cst_54 : f32 to vector<2x32xf32>
    %169 = arith.addf %168, %167 : vector<2x32xf32>
    %170 = arith.divf %168, %169 : vector<2x32xf32>
    %171 = vector.extract_strided_slice %158 {offsets = [0, 64], sizes = [2, 32], strides = [1, 1]} : vector<2x128xf32> to vector<2x32xf32>
    %172 = math.tanh %171 : vector<2x32xf32>
    %173 = vector.extract_strided_slice %158 {offsets = [0, 96], sizes = [2, 32], strides = [1, 1]} : vector<2x128xf32> to vector<2x32xf32>
    %174 = arith.negf %173 : vector<2x32xf32>
    %175 = math.exp %174 : vector<2x32xf32>
    %cst_55 = arith.constant 1.000000e+00 : f32
    %176 = vector.broadcast %cst_55 : f32 to vector<2x32xf32>
    %177 = arith.addf %176, %175 : vector<2x32xf32>
    %178 = arith.divf %176, %177 : vector<2x32xf32>
    %179 = arith.mulf %170, %115 : vector<2x32xf32>
    %180 = arith.mulf %164, %172 : vector<2x32xf32>
    %181 = arith.addf %179, %180 : vector<2x32xf32>
    %182 = math.tanh %181 : vector<2x32xf32>
    %183 = arith.mulf %178, %182 : vector<2x32xf32>
    %184 = arith.truncf %183 : vector<2x32xf32> to vector<2x32xbf16>
    %c2 = arith.constant 2 : index
    %c0_56 = arith.constant 0 : index
    %c0_57 = arith.constant 0 : index
    %185 = vector.load %arg9[%c2, %c0_56, %c0_57] : memref<8x2x32xbf16, #tpu.memory_space<vmem>>, vector<1x2x32xbf16>
    %186 = vector.shape_cast %185 : vector<1x2x32xbf16> to vector<2x32xbf16>
    %187 = vector.shape_cast %184 : vector<2x32xbf16> to vector<1x2x32xbf16>
    tpu.vector_store %arg9[%c2, %c0_56, %c0_57], %187 {strides = array<i32>} : memref<8x2x32xbf16, #tpu.memory_space<vmem>>, vector<1x2x32xbf16>,
    %188 = vector.extract_strided_slice %16 {offsets = [10, 0], sizes = [2, 128], strides = [1, 1]} : vector<16x128xf32> to vector<2x128xf32>
    %189 = arith.truncf %150 : vector<2x32xf32> to vector<2x32xbf16>
    %cst_58 = arith.constant dense<0.000000e+00> : vector<2x128xf32>
    %190 = tpu.matmul %189, %18, %cst_58 {dimension_numbers = #tpu.dot_dimension_numbers<[1], [0], [0], [1], [0, 0, 1, 1], [], []>} : vector<2x32xbf16>, vector<32x128xbf16>, vector<2x128xf32> -> vector<2x128xf32>
    %191 = arith.addf %188, %190 : vector<2x128xf32>
    %192 = vector.extract_strided_slice %191 {offsets = [0, 0], sizes = [2, 32], strides = [1, 1]} : vector<2x128xf32> to vector<2x32xf32>
    %193 = arith.negf %192 : vector<2x32xf32>
    %194 = math.exp %193 : vector<2x32xf32>
    %cst_59 = arith.constant 1.000000e+00 : f32
    %195 = vector.broadcast %cst_59 : f32 to vector<2x32xf32>
    %196 = arith.addf %195, %194 : vector<2x32xf32>
    %197 = arith.divf %195, %196 : vector<2x32xf32>
    %198 = vector.extract_strided_slice %191 {offsets = [0, 32], sizes = [2, 32], strides = [1, 1]} : vector<2x128xf32> to vector<2x32xf32>
    %199 = arith.negf %198 : vector<2x32xf32>
    %200 = math.exp %199 : vector<2x32xf32>
    %cst_60 = arith.constant 1.000000e+00 : f32
    %201 = vector.broadcast %cst_60 : f32 to vector<2x32xf32>
    %202 = arith.addf %201, %200 : vector<2x32xf32>
    %203 = arith.divf %201, %202 : vector<2x32xf32>
    %204 = vector.extract_strided_slice %191 {offsets = [0, 64], sizes = [2, 32], strides = [1, 1]} : vector<2x128xf32> to vector<2x32xf32>
    %205 = math.tanh %204 : vector<2x32xf32>
    %206 = vector.extract_strided_slice %191 {offsets = [0, 96], sizes = [2, 32], strides = [1, 1]} : vector<2x128xf32> to vector<2x32xf32>
    %207 = arith.negf %206 : vector<2x32xf32>
    %208 = math.exp %207 : vector<2x32xf32>
    %cst_61 = arith.constant 1.000000e+00 : f32
    %209 = vector.broadcast %cst_61 : f32 to vector<2x32xf32>
    %210 = arith.addf %209, %208 : vector<2x32xf32>
    %211 = arith.divf %209, %210 : vector<2x32xf32>
    %212 = arith.mulf %203, %148 : vector<2x32xf32>
    %213 = arith.mulf %197, %205 : vector<2x32xf32>
    %214 = arith.addf %212, %213 : vector<2x32xf32>
    %215 = math.tanh %214 : vector<2x32xf32>
    %216 = arith.mulf %211, %215 : vector<2x32xf32>
    %217 = arith.truncf %216 : vector<2x32xf32> to vector<2x32xbf16>
    %c5 = arith.constant 5 : index
    %c0_62 = arith.constant 0 : index
    %c0_63 = arith.constant 0 : index
    %218 = vector.load %arg10[%c5, %c0_62, %c0_63] : memref<8x2x32xbf16, #tpu.memory_space<vmem>>, vector<1x2x32xbf16>
    %219 = vector.shape_cast %218 : vector<1x2x32xbf16> to vector<2x32xbf16>
    %220 = vector.shape_cast %217 : vector<2x32xbf16> to vector<1x2x32xbf16>
    tpu.vector_store %arg10[%c5, %c0_62, %c0_63], %220 {strides = array<i32>} : memref<8x2x32xbf16, #tpu.memory_space<vmem>>, vector<1x2x32xbf16>,
    %221 = vector.extract_strided_slice %9 {offsets = [6, 0], sizes = [2, 128], strides = [1, 1]} : vector<16x128xf32> to vector<2x128xf32>
    %222 = arith.truncf %183 : vector<2x32xf32> to vector<2x32xbf16>
    %cst_64 = arith.constant dense<0.000000e+00> : vector<2x128xf32>
    %223 = tpu.matmul %222, %17, %cst_64 {dimension_numbers = #tpu.dot_dimension_numbers<[1], [0], [0], [1], [0, 0, 1, 1], [], []>} : vector<2x32xbf16>, vector<32x128xbf16>, vector<2x128xf32> -> vector<2x128xf32>
    %224 = arith.addf %221, %223 : vector<2x128xf32>
    %225 = vector.extract_strided_slice %224 {offsets = [0, 0], sizes = [2, 32], strides = [1, 1]} : vector<2x128xf32> to vector<2x32xf32>
    %226 = arith.negf %225 : vector<2x32xf32>
    %227 = math.exp %226 : vector<2x32xf32>
    %cst_65 = arith.constant 1.000000e+00 : f32
    %228 = vector.broadcast %cst_65 : f32 to vector<2x32xf32>
    %229 = arith.addf %228, %227 : vector<2x32xf32>
    %230 = arith.divf %228, %229 : vector<2x32xf32>
    %231 = vector.extract_strided_slice %224 {offsets = [0, 32], sizes = [2, 32], strides = [1, 1]} : vector<2x128xf32> to vector<2x32xf32>
    %232 = arith.negf %231 : vector<2x32xf32>
    %233 = math.exp %232 : vector<2x32xf32>
    %cst_66 = arith.constant 1.000000e+00 : f32
    %234 = vector.broadcast %cst_66 : f32 to vector<2x32xf32>
    %235 = arith.addf %234, %233 : vector<2x32xf32>
    %236 = arith.divf %234, %235 : vector<2x32xf32>
    %237 = vector.extract_strided_slice %224 {offsets = [0, 64], sizes = [2, 32], strides = [1, 1]} : vector<2x128xf32> to vector<2x32xf32>
    %238 = math.tanh %237 : vector<2x32xf32>
    %239 = vector.extract_strided_slice %224 {offsets = [0, 96], sizes = [2, 32], strides = [1, 1]} : vector<2x128xf32> to vector<2x32xf32>
    %240 = arith.negf %239 : vector<2x32xf32>
    %241 = math.exp %240 : vector<2x32xf32>
    %cst_67 = arith.constant 1.000000e+00 : f32
    %242 = vector.broadcast %cst_67 : f32 to vector<2x32xf32>
    %243 = arith.addf %242, %241 : vector<2x32xf32>
    %244 = arith.divf %242, %243 : vector<2x32xf32>
    %245 = arith.mulf %236, %181 : vector<2x32xf32>
    %246 = arith.mulf %230, %238 : vector<2x32xf32>
    %247 = arith.addf %245, %246 : vector<2x32xf32>
    %248 = math.tanh %247 : vector<2x32xf32>
    %249 = arith.mulf %244, %248 : vector<2x32xf32>
    %250 = arith.truncf %249 : vector<2x32xf32> to vector<2x32xbf16>
    %c3 = arith.constant 3 : index
    %c0_68 = arith.constant 0 : index
    %c0_69 = arith.constant 0 : index
    %251 = vector.load %arg9[%c3, %c0_68, %c0_69] : memref<8x2x32xbf16, #tpu.memory_space<vmem>>, vector<1x2x32xbf16>
    %252 = vector.shape_cast %251 : vector<1x2x32xbf16> to vector<2x32xbf16>
    %253 = vector.shape_cast %250 : vector<2x32xbf16> to vector<1x2x32xbf16>
    tpu.vector_store %arg9[%c3, %c0_68, %c0_69], %253 {strides = array<i32>} : memref<8x2x32xbf16, #tpu.memory_space<vmem>>, vector<1x2x32xbf16>,
    %254 = vector.extract_strided_slice %16 {offsets = [8, 0], sizes = [2, 128], strides = [1, 1]} : vector<16x128xf32> to vector<2x128xf32>
    %255 = arith.truncf %216 : vector<2x32xf32> to vector<2x32xbf16>
    %cst_70 = arith.constant dense<0.000000e+00> : vector<2x128xf32>
    %256 = tpu.matmul %255, %18, %cst_70 {dimension_numbers = #tpu.dot_dimension_numbers<[1], [0], [0], [1], [0, 0, 1, 1], [], []>} : vector<2x32xbf16>, vector<32x128xbf16>, vector<2x128xf32> -> vector<2x128xf32>
    %257 = arith.addf %254, %256 : vector<2x128xf32>
    %258 = vector.extract_strided_slice %257 {offsets = [0, 0], sizes = [2, 32], strides = [1, 1]} : vector<2x128xf32> to vector<2x32xf32>
    %259 = arith.negf %258 : vector<2x32xf32>
    %260 = math.exp %259 : vector<2x32xf32>
    %cst_71 = arith.constant 1.000000e+00 : f32
    %261 = vector.broadcast %cst_71 : f32 to vector<2x32xf32>
    %262 = arith.addf %261, %260 : vector<2x32xf32>
    %263 = arith.divf %261, %262 : vector<2x32xf32>
    %264 = vector.extract_strided_slice %257 {offsets = [0, 32], sizes = [2, 32], strides = [1, 1]} : vector<2x128xf32> to vector<2x32xf32>
    %265 = arith.negf %264 : vector<2x32xf32>
    %266 = math.exp %265 : vector<2x32xf32>
    %cst_72 = arith.constant 1.000000e+00 : f32
    %267 = vector.broadcast %cst_72 : f32 to vector<2x32xf32>
    %268 = arith.addf %267, %266 : vector<2x32xf32>
    %269 = arith.divf %267, %268 : vector<2x32xf32>
    %270 = vector.extract_strided_slice %257 {offsets = [0, 64], sizes = [2, 32], strides = [1, 1]} : vector<2x128xf32> to vector<2x32xf32>
    %271 = math.tanh %270 : vector<2x32xf32>
    %272 = vector.extract_strided_slice %257 {offsets = [0, 96], sizes = [2, 32], strides = [1, 1]} : vector<2x128xf32> to vector<2x32xf32>
    %273 = arith.negf %272 : vector<2x32xf32>
    %274 = math.exp %273 : vector<2x32xf32>
    %cst_73 = arith.constant 1.000000e+00 : f32
    %275 = vector.broadcast %cst_73 : f32 to vector<2x32xf32>
    %276 = arith.addf %275, %274 : vector<2x32xf32>
    %277 = arith.divf %275, %276 : vector<2x32xf32>
    %278 = arith.mulf %269, %214 : vector<2x32xf32>
    %279 = arith.mulf %263, %271 : vector<2x32xf32>
    %280 = arith.addf %278, %279 : vector<2x32xf32>
    %281 = math.tanh %280 : vector<2x32xf32>
    %282 = arith.mulf %277, %281 : vector<2x32xf32>
    %283 = arith.truncf %282 : vector<2x32xf32> to vector<2x32xbf16>
    %c4 = arith.constant 4 : index
    %c0_74 = arith.constant 0 : index
    %c0_75 = arith.constant 0 : index
    %284 = vector.load %arg10[%c4, %c0_74, %c0_75] : memref<8x2x32xbf16, #tpu.memory_space<vmem>>, vector<1x2x32xbf16>
    %285 = vector.shape_cast %284 : vector<1x2x32xbf16> to vector<2x32xbf16>
    %286 = vector.shape_cast %283 : vector<2x32xbf16> to vector<1x2x32xbf16>
    tpu.vector_store %arg10[%c4, %c0_74, %c0_75], %286 {strides = array<i32>} : memref<8x2x32xbf16, #tpu.memory_space<vmem>>, vector<1x2x32xbf16>,
    %287 = vector.extract_strided_slice %9 {offsets = [8, 0], sizes = [2, 128], strides = [1, 1]} : vector<16x128xf32> to vector<2x128xf32>
    %288 = arith.truncf %249 : vector<2x32xf32> to vector<2x32xbf16>
    %cst_76 = arith.constant dense<0.000000e+00> : vector<2x128xf32>
    %289 = tpu.matmul %288, %17, %cst_76 {dimension_numbers = #tpu.dot_dimension_numbers<[1], [0], [0], [1], [0, 0, 1, 1], [], []>} : vector<2x32xbf16>, vector<32x128xbf16>, vector<2x128xf32> -> vector<2x128xf32>
    %290 = arith.addf %287, %289 : vector<2x128xf32>
    %291 = vector.extract_strided_slice %290 {offsets = [0, 0], sizes = [2, 32], strides = [1, 1]} : vector<2x128xf32> to vector<2x32xf32>
    %292 = arith.negf %291 : vector<2x32xf32>
    %293 = math.exp %292 : vector<2x32xf32>
    %cst_77 = arith.constant 1.000000e+00 : f32
    %294 = vector.broadcast %cst_77 : f32 to vector<2x32xf32>
    %295 = arith.addf %294, %293 : vector<2x32xf32>
    %296 = arith.divf %294, %295 : vector<2x32xf32>
    %297 = vector.extract_strided_slice %290 {offsets = [0, 32], sizes = [2, 32], strides = [1, 1]} : vector<2x128xf32> to vector<2x32xf32>
    %298 = arith.negf %297 : vector<2x32xf32>
    %299 = math.exp %298 : vector<2x32xf32>
    %cst_78 = arith.constant 1.000000e+00 : f32
    %300 = vector.broadcast %cst_78 : f32 to vector<2x32xf32>
    %301 = arith.addf %300, %299 : vector<2x32xf32>
    %302 = arith.divf %300, %301 : vector<2x32xf32>
    %303 = vector.extract_strided_slice %290 {offsets = [0, 64], sizes = [2, 32], strides = [1, 1]} : vector<2x128xf32> to vector<2x32xf32>
    %304 = math.tanh %303 : vector<2x32xf32>
    %305 = vector.extract_strided_slice %290 {offsets = [0, 96], sizes = [2, 32], strides = [1, 1]} : vector<2x128xf32> to vector<2x32xf32>
    %306 = arith.negf %305 : vector<2x32xf32>
    %307 = math.exp %306 : vector<2x32xf32>
    %cst_79 = arith.constant 1.000000e+00 : f32
    %308 = vector.broadcast %cst_79 : f32 to vector<2x32xf32>
    %309 = arith.addf %308, %307 : vector<2x32xf32>
    %310 = arith.divf %308, %309 : vector<2x32xf32>
    %311 = arith.mulf %302, %247 : vector<2x32xf32>
    %312 = arith.mulf %296, %304 : vector<2x32xf32>
    %313 = arith.addf %311, %312 : vector<2x32xf32>
    %314 = math.tanh %313 : vector<2x32xf32>
    %315 = arith.mulf %310, %314 : vector<2x32xf32>
    %316 = arith.truncf %315 : vector<2x32xf32> to vector<2x32xbf16>
    %c4_80 = arith.constant 4 : index
    %c0_81 = arith.constant 0 : index
    %c0_82 = arith.constant 0 : index
    %317 = vector.load %arg9[%c4_80, %c0_81, %c0_82] : memref<8x2x32xbf16, #tpu.memory_space<vmem>>, vector<1x2x32xbf16>
    %318 = vector.shape_cast %317 : vector<1x2x32xbf16> to vector<2x32xbf16>
    %319 = vector.shape_cast %316 : vector<2x32xbf16> to vector<1x2x32xbf16>
    tpu.vector_store %arg9[%c4_80, %c0_81, %c0_82], %319 {strides = array<i32>} : memref<8x2x32xbf16, #tpu.memory_space<vmem>>, vector<1x2x32xbf16>,
    %320 = vector.extract_strided_slice %16 {offsets = [6, 0], sizes = [2, 128], strides = [1, 1]} : vector<16x128xf32> to vector<2x128xf32>
    %321 = arith.truncf %282 : vector<2x32xf32> to vector<2x32xbf16>
    %cst_83 = arith.constant dense<0.000000e+00> : vector<2x128xf32>
    %322 = tpu.matmul %321, %18, %cst_83 {dimension_numbers = #tpu.dot_dimension_numbers<[1], [0], [0], [1], [0, 0, 1, 1], [], []>} : vector<2x32xbf16>, vector<32x128xbf16>, vector<2x128xf32> -> vector<2x128xf32>
    %323 = arith.addf %320, %322 : vector<2x128xf32>
    %324 = vector.extract_strided_slice %323 {offsets = [0, 0], sizes = [2, 32], strides = [1, 1]} : vector<2x128xf32> to vector<2x32xf32>
    %325 = arith.negf %324 : vector<2x32xf32>
    %326 = math.exp %325 : vector<2x32xf32>
    %cst_84 = arith.constant 1.000000e+00 : f32
    %327 = vector.broadcast %cst_84 : f32 to vector<2x32xf32>
    %328 = arith.addf %327, %326 : vector<2x32xf32>
    %329 = arith.divf %327, %328 : vector<2x32xf32>
    %330 = vector.extract_strided_slice %323 {offsets = [0, 32], sizes = [2, 32], strides = [1, 1]} : vector<2x128xf32> to vector<2x32xf32>
    %331 = arith.negf %330 : vector<2x32xf32>
    %332 = math.exp %331 : vector<2x32xf32>
    %cst_85 = arith.constant 1.000000e+00 : f32
    %333 = vector.broadcast %cst_85 : f32 to vector<2x32xf32>
    %334 = arith.addf %333, %332 : vector<2x32xf32>
    %335 = arith.divf %333, %334 : vector<2x32xf32>
    %336 = vector.extract_strided_slice %323 {offsets = [0, 64], sizes = [2, 32], strides = [1, 1]} : vector<2x128xf32> to vector<2x32xf32>
    %337 = math.tanh %336 : vector<2x32xf32>
    %338 = vector.extract_strided_slice %323 {offsets = [0, 96], sizes = [2, 32], strides = [1, 1]} : vector<2x128xf32> to vector<2x32xf32>
    %339 = arith.negf %338 : vector<2x32xf32>
    %340 = math.exp %339 : vector<2x32xf32>
    %cst_86 = arith.constant 1.000000e+00 : f32
    %341 = vector.broadcast %cst_86 : f32 to vector<2x32xf32>
    %342 = arith.addf %341, %340 : vector<2x32xf32>
    %343 = arith.divf %341, %342 : vector<2x32xf32>
    %344 = arith.mulf %335, %280 : vector<2x32xf32>
    %345 = arith.mulf %329, %337 : vector<2x32xf32>
    %346 = arith.addf %344, %345 : vector<2x32xf32>
    %347 = math.tanh %346 : vector<2x32xf32>
    %348 = arith.mulf %343, %347 : vector<2x32xf32>
    %349 = arith.truncf %348 : vector<2x32xf32> to vector<2x32xbf16>
    %c3_87 = arith.constant 3 : index
    %c0_88 = arith.constant 0 : index
    %c0_89 = arith.constant 0 : index
    %350 = vector.load %arg10[%c3_87, %c0_88, %c0_89] : memref<8x2x32xbf16, #tpu.memory_space<vmem>>, vector<1x2x32xbf16>
    %351 = vector.shape_cast %350 : vector<1x2x32xbf16> to vector<2x32xbf16>
    %352 = vector.shape_cast %349 : vector<2x32xbf16> to vector<1x2x32xbf16>
    tpu.vector_store %arg10[%c3_87, %c0_88, %c0_89], %352 {strides = array<i32>} : memref<8x2x32xbf16, #tpu.memory_space<vmem>>, vector<1x2x32xbf16>,
    %353 = vector.extract_strided_slice %9 {offsets = [10, 0], sizes = [2, 128], strides = [1, 1]} : vector<16x128xf32> to vector<2x128xf32>
    %354 = arith.truncf %315 : vector<2x32xf32> to vector<2x32xbf16>
    %cst_90 = arith.constant dense<0.000000e+00> : vector<2x128xf32>
    %355 = tpu.matmul %354, %17, %cst_90 {dimension_numbers = #tpu.dot_dimension_numbers<[1], [0], [0], [1], [0, 0, 1, 1], [], []>} : vector<2x32xbf16>, vector<32x128xbf16>, vector<2x128xf32> -> vector<2x128xf32>
    %356 = arith.addf %353, %355 : vector<2x128xf32>
    %357 = vector.extract_strided_slice %356 {offsets = [0, 0], sizes = [2, 32], strides = [1, 1]} : vector<2x128xf32> to vector<2x32xf32>
    %358 = arith.negf %357 : vector<2x32xf32>
    %359 = math.exp %358 : vector<2x32xf32>
    %cst_91 = arith.constant 1.000000e+00 : f32
    %360 = vector.broadcast %cst_91 : f32 to vector<2x32xf32>
    %361 = arith.addf %360, %359 : vector<2x32xf32>
    %362 = arith.divf %360, %361 : vector<2x32xf32>
    %363 = vector.extract_strided_slice %356 {offsets = [0, 32], sizes = [2, 32], strides = [1, 1]} : vector<2x128xf32> to vector<2x32xf32>
    %364 = arith.negf %363 : vector<2x32xf32>
    %365 = math.exp %364 : vector<2x32xf32>
    %cst_92 = arith.constant 1.000000e+00 : f32
    %366 = vector.broadcast %cst_92 : f32 to vector<2x32xf32>
    %367 = arith.addf %366, %365 : vector<2x32xf32>
    %368 = arith.divf %366, %367 : vector<2x32xf32>
    %369 = vector.extract_strided_slice %356 {offsets = [0, 64], sizes = [2, 32], strides = [1, 1]} : vector<2x128xf32> to vector<2x32xf32>
    %370 = math.tanh %369 : vector<2x32xf32>
    %371 = vector.extract_strided_slice %356 {offsets = [0, 96], sizes = [2, 32], strides = [1, 1]} : vector<2x128xf32> to vector<2x32xf32>
    %372 = arith.negf %371 : vector<2x32xf32>
    %373 = math.exp %372 : vector<2x32xf32>
    %cst_93 = arith.constant 1.000000e+00 : f32
    %374 = vector.broadcast %cst_93 : f32 to vector<2x32xf32>
    %375 = arith.addf %374, %373 : vector<2x32xf32>
    %376 = arith.divf %374, %375 : vector<2x32xf32>
    %377 = arith.mulf %368, %313 : vector<2x32xf32>
    %378 = arith.mulf %362, %370 : vector<2x32xf32>
    %379 = arith.addf %377, %378 : vector<2x32xf32>
    %380 = math.tanh %379 : vector<2x32xf32>
    %381 = arith.mulf %376, %380 : vector<2x32xf32>
    %382 = arith.truncf %381 : vector<2x32xf32> to vector<2x32xbf16>
    %c5_94 = arith.constant 5 : index
    %c0_95 = arith.constant 0 : index
    %c0_96 = arith.constant 0 : index
    %383 = vector.load %arg9[%c5_94, %c0_95, %c0_96] : memref<8x2x32xbf16, #tpu.memory_space<vmem>>, vector<1x2x32xbf16>
    %384 = vector.shape_cast %383 : vector<1x2x32xbf16> to vector<2x32xbf16>
    %385 = vector.shape_cast %382 : vector<2x32xbf16> to vector<1x2x32xbf16>
    tpu.vector_store %arg9[%c5_94, %c0_95, %c0_96], %385 {strides = array<i32>} : memref<8x2x32xbf16, #tpu.memory_space<vmem>>, vector<1x2x32xbf16>,
    %386 = vector.extract_strided_slice %16 {offsets = [4, 0], sizes = [2, 128], strides = [1, 1]} : vector<16x128xf32> to vector<2x128xf32>
    %387 = arith.truncf %348 : vector<2x32xf32> to vector<2x32xbf16>
    %cst_97 = arith.constant dense<0.000000e+00> : vector<2x128xf32>
    %388 = tpu.matmul %387, %18, %cst_97 {dimension_numbers = #tpu.dot_dimension_numbers<[1], [0], [0], [1], [0, 0, 1, 1], [], []>} : vector<2x32xbf16>, vector<32x128xbf16>, vector<2x128xf32> -> vector<2x128xf32>
    %389 = arith.addf %386, %388 : vector<2x128xf32>
    %390 = vector.extract_strided_slice %389 {offsets = [0, 0], sizes = [2, 32], strides = [1, 1]} : vector<2x128xf32> to vector<2x32xf32>
    %391 = arith.negf %390 : vector<2x32xf32>
    %392 = math.exp %391 : vector<2x32xf32>
    %cst_98 = arith.constant 1.000000e+00 : f32
    %393 = vector.broadcast %cst_98 : f32 to vector<2x32xf32>
    %394 = arith.addf %393, %392 : vector<2x32xf32>
    %395 = arith.divf %393, %394 : vector<2x32xf32>
    %396 = vector.extract_strided_slice %389 {offsets = [0, 32], sizes = [2, 32], strides = [1, 1]} : vector<2x128xf32> to vector<2x32xf32>
    %397 = arith.negf %396 : vector<2x32xf32>
    %398 = math.exp %397 : vector<2x32xf32>
    %cst_99 = arith.constant 1.000000e+00 : f32
    %399 = vector.broadcast %cst_99 : f32 to vector<2x32xf32>
    %400 = arith.addf %399, %398 : vector<2x32xf32>
    %401 = arith.divf %399, %400 : vector<2x32xf32>
    %402 = vector.extract_strided_slice %389 {offsets = [0, 64], sizes = [2, 32], strides = [1, 1]} : vector<2x128xf32> to vector<2x32xf32>
    %403 = math.tanh %402 : vector<2x32xf32>
    %404 = vector.extract_strided_slice %389 {offsets = [0, 96], sizes = [2, 32], strides = [1, 1]} : vector<2x128xf32> to vector<2x32xf32>
    %405 = arith.negf %404 : vector<2x32xf32>
    %406 = math.exp %405 : vector<2x32xf32>
    %cst_100 = arith.constant 1.000000e+00 : f32
    %407 = vector.broadcast %cst_100 : f32 to vector<2x32xf32>
    %408 = arith.addf %407, %406 : vector<2x32xf32>
    %409 = arith.divf %407, %408 : vector<2x32xf32>
    %410 = arith.mulf %401, %346 : vector<2x32xf32>
    %411 = arith.mulf %395, %403 : vector<2x32xf32>
    %412 = arith.addf %410, %411 : vector<2x32xf32>
    %413 = math.tanh %412 : vector<2x32xf32>
    %414 = arith.mulf %409, %413 : vector<2x32xf32>
    %415 = arith.truncf %414 : vector<2x32xf32> to vector<2x32xbf16>
    %c2_101 = arith.constant 2 : index
    %c0_102 = arith.constant 0 : index
    %c0_103 = arith.constant 0 : index
    %416 = vector.load %arg10[%c2_101, %c0_102, %c0_103] : memref<8x2x32xbf16, #tpu.memory_space<vmem>>, vector<1x2x32xbf16>
    %417 = vector.shape_cast %416 : vector<1x2x32xbf16> to vector<2x32xbf16>
    %418 = vector.shape_cast %415 : vector<2x32xbf16> to vector<1x2x32xbf16>
    tpu.vector_store %arg10[%c2_101, %c0_102, %c0_103], %418 {strides = array<i32>} : memref<8x2x32xbf16, #tpu.memory_space<vmem>>, vector<1x2x32xbf16>,
    %419 = vector.extract_strided_slice %9 {offsets = [12, 0], sizes = [2, 128], strides = [1, 1]} : vector<16x128xf32> to vector<2x128xf32>
    %420 = arith.truncf %381 : vector<2x32xf32> to vector<2x32xbf16>
    %cst_104 = arith.constant dense<0.000000e+00> : vector<2x128xf32>
    %421 = tpu.matmul %420, %17, %cst_104 {dimension_numbers = #tpu.dot_dimension_numbers<[1], [0], [0], [1], [0, 0, 1, 1], [], []>} : vector<2x32xbf16>, vector<32x128xbf16>, vector<2x128xf32> -> vector<2x128xf32>
    %422 = arith.addf %419, %421 : vector<2x128xf32>
    %423 = vector.extract_strided_slice %422 {offsets = [0, 0], sizes = [2, 32], strides = [1, 1]} : vector<2x128xf32> to vector<2x32xf32>
    %424 = arith.negf %423 : vector<2x32xf32>
    %425 = math.exp %424 : vector<2x32xf32>
    %cst_105 = arith.constant 1.000000e+00 : f32
    %426 = vector.broadcast %cst_105 : f32 to vector<2x32xf32>
    %427 = arith.addf %426, %425 : vector<2x32xf32>
    %428 = arith.divf %426, %427 : vector<2x32xf32>
    %429 = vector.extract_strided_slice %422 {offsets = [0, 32], sizes = [2, 32], strides = [1, 1]} : vector<2x128xf32> to vector<2x32xf32>
    %430 = arith.negf %429 : vector<2x32xf32>
    %431 = math.exp %430 : vector<2x32xf32>
    %cst_106 = arith.constant 1.000000e+00 : f32
    %432 = vector.broadcast %cst_106 : f32 to vector<2x32xf32>
    %433 = arith.addf %432, %431 : vector<2x32xf32>
    %434 = arith.divf %432, %433 : vector<2x32xf32>
    %435 = vector.extract_strided_slice %422 {offsets = [0, 64], sizes = [2, 32], strides = [1, 1]} : vector<2x128xf32> to vector<2x32xf32>
    %436 = math.tanh %435 : vector<2x32xf32>
    %437 = vector.extract_strided_slice %422 {offsets = [0, 96], sizes = [2, 32], strides = [1, 1]} : vector<2x128xf32> to vector<2x32xf32>
    %438 = arith.negf %437 : vector<2x32xf32>
    %439 = math.exp %438 : vector<2x32xf32>
    %cst_107 = arith.constant 1.000000e+00 : f32
    %440 = vector.broadcast %cst_107 : f32 to vector<2x32xf32>
    %441 = arith.addf %440, %439 : vector<2x32xf32>
    %442 = arith.divf %440, %441 : vector<2x32xf32>
    %443 = arith.mulf %434, %379 : vector<2x32xf32>
    %444 = arith.mulf %428, %436 : vector<2x32xf32>
    %445 = arith.addf %443, %444 : vector<2x32xf32>
    %446 = math.tanh %445 : vector<2x32xf32>
    %447 = arith.mulf %442, %446 : vector<2x32xf32>
    %448 = arith.truncf %447 : vector<2x32xf32> to vector<2x32xbf16>
    %c6_108 = arith.constant 6 : index
    %c0_109 = arith.constant 0 : index
    %c0_110 = arith.constant 0 : index
    %449 = vector.load %arg9[%c6_108, %c0_109, %c0_110] : memref<8x2x32xbf16, #tpu.memory_space<vmem>>, vector<1x2x32xbf16>
    %450 = vector.shape_cast %449 : vector<1x2x32xbf16> to vector<2x32xbf16>
    %451 = vector.shape_cast %448 : vector<2x32xbf16> to vector<1x2x32xbf16>
    tpu.vector_store %arg9[%c6_108, %c0_109, %c0_110], %451 {strides = array<i32>} : memref<8x2x32xbf16, #tpu.memory_space<vmem>>, vector<1x2x32xbf16>,
    %452 = vector.extract_strided_slice %16 {offsets = [2, 0], sizes = [2, 128], strides = [1, 1]} : vector<16x128xf32> to vector<2x128xf32>
    %453 = arith.truncf %414 : vector<2x32xf32> to vector<2x32xbf16>
    %cst_111 = arith.constant dense<0.000000e+00> : vector<2x128xf32>
    %454 = tpu.matmul %453, %18, %cst_111 {dimension_numbers = #tpu.dot_dimension_numbers<[1], [0], [0], [1], [0, 0, 1, 1], [], []>} : vector<2x32xbf16>, vector<32x128xbf16>, vector<2x128xf32> -> vector<2x128xf32>
    %455 = arith.addf %452, %454 : vector<2x128xf32>
    %456 = vector.extract_strided_slice %455 {offsets = [0, 0], sizes = [2, 32], strides = [1, 1]} : vector<2x128xf32> to vector<2x32xf32>
    %457 = arith.negf %456 : vector<2x32xf32>
    %458 = math.exp %457 : vector<2x32xf32>
    %cst_112 = arith.constant 1.000000e+00 : f32
    %459 = vector.broadcast %cst_112 : f32 to vector<2x32xf32>
    %460 = arith.addf %459, %458 : vector<2x32xf32>
    %461 = arith.divf %459, %460 : vector<2x32xf32>
    %462 = vector.extract_strided_slice %455 {offsets = [0, 32], sizes = [2, 32], strides = [1, 1]} : vector<2x128xf32> to vector<2x32xf32>
    %463 = arith.negf %462 : vector<2x32xf32>
    %464 = math.exp %463 : vector<2x32xf32>
    %cst_113 = arith.constant 1.000000e+00 : f32
    %465 = vector.broadcast %cst_113 : f32 to vector<2x32xf32>
    %466 = arith.addf %465, %464 : vector<2x32xf32>
    %467 = arith.divf %465, %466 : vector<2x32xf32>
    %468 = vector.extract_strided_slice %455 {offsets = [0, 64], sizes = [2, 32], strides = [1, 1]} : vector<2x128xf32> to vector<2x32xf32>
    %469 = math.tanh %468 : vector<2x32xf32>
    %470 = vector.extract_strided_slice %455 {offsets = [0, 96], sizes = [2, 32], strides = [1, 1]} : vector<2x128xf32> to vector<2x32xf32>
    %471 = arith.negf %470 : vector<2x32xf32>
    %472 = math.exp %471 : vector<2x32xf32>
    %cst_114 = arith.constant 1.000000e+00 : f32
    %473 = vector.broadcast %cst_114 : f32 to vector<2x32xf32>
    %474 = arith.addf %473, %472 : vector<2x32xf32>
    %475 = arith.divf %473, %474 : vector<2x32xf32>
    %476 = arith.mulf %467, %412 : vector<2x32xf32>
    %477 = arith.mulf %461, %469 : vector<2x32xf32>
    %478 = arith.addf %476, %477 : vector<2x32xf32>
    %479 = math.tanh %478 : vector<2x32xf32>
    %480 = arith.mulf %475, %479 : vector<2x32xf32>
    %481 = arith.truncf %480 : vector<2x32xf32> to vector<2x32xbf16>
    %c1_115 = arith.constant 1 : index
    %c0_116 = arith.constant 0 : index
    %c0_117 = arith.constant 0 : index
    %482 = vector.load %arg10[%c1_115, %c0_116, %c0_117] : memref<8x2x32xbf16, #tpu.memory_space<vmem>>, vector<1x2x32xbf16>
    %483 = vector.shape_cast %482 : vector<1x2x32xbf16> to vector<2x32xbf16>
    %484 = vector.shape_cast %481 : vector<2x32xbf16> to vector<1x2x32xbf16>
    tpu.vector_store %arg10[%c1_115, %c0_116, %c0_117], %484 {strides = array<i32>} : memref<8x2x32xbf16, #tpu.memory_space<vmem>>, vector<1x2x32xbf16>,
    %485 = vector.extract_strided_slice %9 {offsets = [14, 0], sizes = [2, 128], strides = [1, 1]} : vector<16x128xf32> to vector<2x128xf32>
    %486 = arith.truncf %447 : vector<2x32xf32> to vector<2x32xbf16>
    %cst_118 = arith.constant dense<0.000000e+00> : vector<2x128xf32>
    %487 = tpu.matmul %486, %17, %cst_118 {dimension_numbers = #tpu.dot_dimension_numbers<[1], [0], [0], [1], [0, 0, 1, 1], [], []>} : vector<2x32xbf16>, vector<32x128xbf16>, vector<2x128xf32> -> vector<2x128xf32>
    %488 = arith.addf %485, %487 : vector<2x128xf32>
    %489 = vector.extract_strided_slice %488 {offsets = [0, 0], sizes = [2, 32], strides = [1, 1]} : vector<2x128xf32> to vector<2x32xf32>
    %490 = arith.negf %489 : vector<2x32xf32>
    %491 = math.exp %490 : vector<2x32xf32>
    %cst_119 = arith.constant 1.000000e+00 : f32
    %492 = vector.broadcast %cst_119 : f32 to vector<2x32xf32>
    %493 = arith.addf %492, %491 : vector<2x32xf32>
    %494 = arith.divf %492, %493 : vector<2x32xf32>
    %495 = vector.extract_strided_slice %488 {offsets = [0, 32], sizes = [2, 32], strides = [1, 1]} : vector<2x128xf32> to vector<2x32xf32>
    %496 = arith.negf %495 : vector<2x32xf32>
    %497 = math.exp %496 : vector<2x32xf32>
    %cst_120 = arith.constant 1.000000e+00 : f32
    %498 = vector.broadcast %cst_120 : f32 to vector<2x32xf32>
    %499 = arith.addf %498, %497 : vector<2x32xf32>
    %500 = arith.divf %498, %499 : vector<2x32xf32>
    %501 = vector.extract_strided_slice %488 {offsets = [0, 64], sizes = [2, 32], strides = [1, 1]} : vector<2x128xf32> to vector<2x32xf32>
    %502 = math.tanh %501 : vector<2x32xf32>
    %503 = vector.extract_strided_slice %488 {offsets = [0, 96], sizes = [2, 32], strides = [1, 1]} : vector<2x128xf32> to vector<2x32xf32>
    %504 = arith.negf %503 : vector<2x32xf32>
    %505 = math.exp %504 : vector<2x32xf32>
    %cst_121 = arith.constant 1.000000e+00 : f32
    %506 = vector.broadcast %cst_121 : f32 to vector<2x32xf32>
    %507 = arith.addf %506, %505 : vector<2x32xf32>
    %508 = arith.divf %506, %507 : vector<2x32xf32>
    %509 = arith.mulf %500, %445 : vector<2x32xf32>
    %510 = arith.mulf %494, %502 : vector<2x32xf32>
    %511 = arith.addf %509, %510 : vector<2x32xf32>
    %512 = math.tanh %511 : vector<2x32xf32>
    %513 = arith.mulf %508, %512 : vector<2x32xf32>
    %514 = arith.truncf %513 : vector<2x32xf32> to vector<2x32xbf16>
    %c7_122 = arith.constant 7 : index
    %c0_123 = arith.constant 0 : index
    %c0_124 = arith.constant 0 : index
    %515 = vector.load %arg9[%c7_122, %c0_123, %c0_124] : memref<8x2x32xbf16, #tpu.memory_space<vmem>>, vector<1x2x32xbf16>
    %516 = vector.shape_cast %515 : vector<1x2x32xbf16> to vector<2x32xbf16>
    %517 = vector.shape_cast %514 : vector<2x32xbf16> to vector<1x2x32xbf16>
    tpu.vector_store %arg9[%c7_122, %c0_123, %c0_124], %517 {strides = array<i32>} : memref<8x2x32xbf16, #tpu.memory_space<vmem>>, vector<1x2x32xbf16>,
    %518 = vector.extract_strided_slice %16 {offsets = [0, 0], sizes = [2, 128], strides = [1, 1]} : vector<16x128xf32> to vector<2x128xf32>
    %519 = arith.truncf %480 : vector<2x32xf32> to vector<2x32xbf16>
    %cst_125 = arith.constant dense<0.000000e+00> : vector<2x128xf32>
    %520 = tpu.matmul %519, %18, %cst_125 {dimension_numbers = #tpu.dot_dimension_numbers<[1], [0], [0], [1], [0, 0, 1, 1], [], []>} : vector<2x32xbf16>, vector<32x128xbf16>, vector<2x128xf32> -> vector<2x128xf32>
    %521 = arith.addf %518, %520 : vector<2x128xf32>
    %522 = vector.extract_strided_slice %521 {offsets = [0, 0], sizes = [2, 32], strides = [1, 1]} : vector<2x128xf32> to vector<2x32xf32>
    %523 = arith.negf %522 : vector<2x32xf32>
    %524 = math.exp %523 : vector<2x32xf32>
    %cst_126 = arith.constant 1.000000e+00 : f32
    %525 = vector.broadcast %cst_126 : f32 to vector<2x32xf32>
    %526 = arith.addf %525, %524 : vector<2x32xf32>
    %527 = arith.divf %525, %526 : vector<2x32xf32>
    %528 = vector.extract_strided_slice %521 {offsets = [0, 32], sizes = [2, 32], strides = [1, 1]} : vector<2x128xf32> to vector<2x32xf32>
    %529 = arith.negf %528 : vector<2x32xf32>
    %530 = math.exp %529 : vector<2x32xf32>
    %cst_127 = arith.constant 1.000000e+00 : f32
    %531 = vector.broadcast %cst_127 : f32 to vector<2x32xf32>
    %532 = arith.addf %531, %530 : vector<2x32xf32>
    %533 = arith.divf %531, %532 : vector<2x32xf32>
    %534 = vector.extract_strided_slice %521 {offsets = [0, 64], sizes = [2, 32], strides = [1, 1]} : vector<2x128xf32> to vector<2x32xf32>
    %535 = math.tanh %534 : vector<2x32xf32>
    %536 = vector.extract_strided_slice %521 {offsets = [0, 96], sizes = [2, 32], strides = [1, 1]} : vector<2x128xf32> to vector<2x32xf32>
    %537 = arith.negf %536 : vector<2x32xf32>
    %538 = math.exp %537 : vector<2x32xf32>
    %cst_128 = arith.constant 1.000000e+00 : f32
    %539 = vector.broadcast %cst_128 : f32 to vector<2x32xf32>
    %540 = arith.addf %539, %538 : vector<2x32xf32>
    %541 = arith.divf %539, %540 : vector<2x32xf32>
    %542 = arith.mulf %533, %478 : vector<2x32xf32>
    %543 = arith.mulf %527, %535 : vector<2x32xf32>
    %544 = arith.addf %542, %543 : vector<2x32xf32>
    %545 = math.tanh %544 : vector<2x32xf32>
    %546 = arith.mulf %541, %545 : vector<2x32xf32>
    %547 = arith.truncf %546 : vector<2x32xf32> to vector<2x32xbf16>
    %c0_129 = arith.constant 0 : index
    %c0_130 = arith.constant 0 : index
    %c0_131 = arith.constant 0 : index
    %548 = vector.load %arg10[%c0_129, %c0_130, %c0_131] : memref<8x2x32xbf16, #tpu.memory_space<vmem>>, vector<1x2x32xbf16>
    %549 = vector.shape_cast %548 : vector<1x2x32xbf16> to vector<2x32xbf16>
    %550 = vector.shape_cast %547 : vector<2x32xbf16> to vector<1x2x32xbf16>
    tpu.vector_store %arg10[%c0_129, %c0_130, %c0_131], %550 {strides = array<i32>} : memref<8x2x32xbf16, #tpu.memory_space<vmem>>, vector<1x2x32xbf16>,
    %c0_132 = arith.constant 0 : index
    %c0_133 = arith.constant 0 : index
    %551 = vector.load %arg11[%c0_132, %c0_133] : memref<2x32xf32, #tpu.memory_space<vmem>>, vector<2x32xf32>
    tpu.vector_store %arg11[%c0_132, %c0_133], %513 {strides = array<i32>} : memref<2x32xf32, #tpu.memory_space<vmem>>, vector<2x32xf32>,
    %c0_134 = arith.constant 0 : index
    %c0_135 = arith.constant 0 : index
    %552 = vector.load %arg12[%c0_134, %c0_135] : memref<2x32xf32, #tpu.memory_space<vmem>>, vector<2x32xf32>
    tpu.vector_store %arg12[%c0_134, %c0_135], %511 {strides = array<i32>} : memref<2x32xf32, #tpu.memory_space<vmem>>, vector<2x32xf32>,
    %c0_136 = arith.constant 0 : index
    %c0_137 = arith.constant 0 : index
    %553 = vector.load %arg13[%c0_136, %c0_137] : memref<2x32xf32, #tpu.memory_space<vmem>>, vector<2x32xf32>
    tpu.vector_store %arg13[%c0_136, %c0_137], %546 {strides = array<i32>} : memref<2x32xf32, #tpu.memory_space<vmem>>, vector<2x32xf32>,
    %c0_138 = arith.constant 0 : index
    %c0_139 = arith.constant 0 : index
    %554 = vector.load %arg14[%c0_138, %c0_139] : memref<2x32xf32, #tpu.memory_space<vmem>>, vector<2x32xf32>
    tpu.vector_store %arg14[%c0_138, %c0_139], %544 {strides = array<i32>} : memref<2x32xf32, #tpu.memory_space<vmem>>, vector<2x32xf32>,
    return
  }
  func.func @transform_0(%arg0: i32) -> (i32, i32, i32) {
    %c0_i32 = arith.constant 0 : i32
    %c0_i32_0 = arith.constant 0 : i32
    %c0_i32_1 = arith.constant 0 : i32
    return %arg0, %c0_i32, %c0_i32_0 : i32, i32, i32
  }
  func.func @transform_1(%arg0: i32) -> (i32, i32, i32) {
    %c0_i32 = arith.constant 0 : i32
    %0 = arith.subi %c0_i32, %arg0 : i32
    %c0_i32_0 = arith.constant 0 : i32
    %c0_i32_1 = arith.constant 0 : i32
    %c0_i32_2 = arith.constant 0 : i32
    return %0, %c0_i32_0, %c0_i32_1 : i32, i32, i32
  }
  func.func @transform_2(%arg0: i32) -> (i32, i32) {
    %c0_i32 = arith.constant 0 : i32
    %c0_i32_0 = arith.constant 0 : i32
    %c0_i32_1 = arith.constant 0 : i32
    return %c0_i32, %c0_i32_0 : i32, i32
  }
  func.func @transform_3(%arg0: i32) -> (i32, i32) {
    %c0_i32 = arith.constant 0 : i32
    %c0_i32_0 = arith.constant 0 : i32
    %c0_i32_1 = arith.constant 0 : i32
    return %c0_i32, %c0_i32_0 : i32, i32
  }
  func.func @transform_4(%arg0: i32) -> (i32, i32) {
    %c0_i32 = arith.constant 0 : i32
    %c0_i32_0 = arith.constant 0 : i32
    %c0_i32_1 = arith.constant 0 : i32
    return %c0_i32, %c0_i32_0 : i32, i32
  }
  func.func @transform_5(%arg0: i32) -> (i32, i32) {
    %c0_i32 = arith.constant 0 : i32
    %c0_i32_0 = arith.constant 0 : i32
    %c0_i32_1 = arith.constant 0 : i32
    return %c0_i32, %c0_i32_0 : i32, i32
  }
  func.func @transform_6(%arg0: i32) -> (i32, i32) {
    %c0_i32 = arith.constant 0 : i32
    %c0_i32_0 = arith.constant 0 : i32
    %c0_i32_1 = arith.constant 0 : i32
    return %c0_i32, %c0_i32_0 : i32, i32
  }
  func.func @transform_7(%arg0: i32) -> (i32, i32) {
    %c0_i32 = arith.constant 0 : i32
    %c0_i32_0 = arith.constant 0 : i32
    %c0_i32_1 = arith.constant 0 : i32
    return %c0_i32, %c0_i32_0 : i32, i32
  }
  func.func @transform_8(%arg0: i32) -> (i32, i32, i32) {
    %c0_i32 = arith.constant 0 : i32
    %c0_i32_0 = arith.constant 0 : i32
    %c0_i32_1 = arith.constant 0 : i32
    return %arg0, %c0_i32, %c0_i32_0 : i32, i32, i32
  }
  func.func @transform_9(%arg0: i32) -> (i32, i32, i32) {
    %c0_i32 = arith.constant 0 : i32
    %0 = arith.subi %c0_i32, %arg0 : i32
    %c0_i32_0 = arith.constant 0 : i32
    %c0_i32_1 = arith.constant 0 : i32
    %c0_i32_2 = arith.constant 0 : i32
    return %0, %c0_i32_0, %c0_i32_1 : i32, i32, i32
  }
}

module attributes {stable_mosaic.version = 11 : i64} {
  func.func @bilstm_fused_kernel(%arg0: i32, %arg1: memref<1x32x16xbf16, #tpu.memory_space<vmem>>, %arg2: memref<1x32x16xbf16, #tpu.memory_space<vmem>>, %arg3: memref<16x128xbf16, #tpu.memory_space<vmem>>, %arg4: memref<16x128xbf16, #tpu.memory_space<vmem>>, %arg5: memref<1x128xf32, #tpu.memory_space<vmem>>, %arg6: memref<1x128xf32, #tpu.memory_space<vmem>>, %arg7: memref<32x128xbf16, #tpu.memory_space<vmem>>, %arg8: memref<32x128xbf16, #tpu.memory_space<vmem>>, %arg9: memref<16x2x32xbf16, #tpu.memory_space<vmem>>, %arg10: memref<16x2x32xbf16, #tpu.memory_space<vmem>>, %arg11: memref<2x32xf32, #tpu.memory_space<vmem>>, %arg12: memref<2x32xf32, #tpu.memory_space<vmem>>, %arg13: memref<2x32xf32, #tpu.memory_space<vmem>>, %arg14: memref<2x32xf32, #tpu.memory_space<vmem>>) attributes {dimension_semantics = [#tpu.dimension_semantics<arbitrary>], iteration_bounds = array<i64: 1>, scalar_prefetch = 0 : i64, scratch_operands = 4 : i64, tpu.core_type = #tpu.core_type<tc>, window_params = [{transform_indices = @transform_0, window_bounds = array<i64: 1, 32, 16>}, {transform_indices = @transform_1, window_bounds = array<i64: 1, 32, 16>}, {pipeline_mode = #tpu.pipeline_mode<synchronous>, transform_indices = @transform_2, window_bounds = array<i64: 16, 128>}, {pipeline_mode = #tpu.pipeline_mode<synchronous>, transform_indices = @transform_3, window_bounds = array<i64: 16, 128>}, {pipeline_mode = #tpu.pipeline_mode<synchronous>, transform_indices = @transform_4, window_bounds = array<i64: 1, 128>}, {pipeline_mode = #tpu.pipeline_mode<synchronous>, transform_indices = @transform_5, window_bounds = array<i64: 1, 128>}, {pipeline_mode = #tpu.pipeline_mode<synchronous>, transform_indices = @transform_6, window_bounds = array<i64: 32, 128>}, {pipeline_mode = #tpu.pipeline_mode<synchronous>, transform_indices = @transform_7, window_bounds = array<i64: 32, 128>}, {transform_indices = @transform_8, window_bounds = array<i64: 16, 2, 32>}, {transform_indices = @transform_9, window_bounds = array<i64: 16, 2, 32>}]} {
    %c0_i32 = arith.constant 0 : i32
    %0 = arith.cmpi eq, %arg0, %c0_i32 : i32
    %1 = arith.extui %0 : i1 to i32
    %c0_i32_0 = arith.constant 0 : i32
    %2 = arith.cmpi ne, %1, %c0_i32_0 : i32
    scf.if %2 {
      %cst_244 = arith.constant 0.000000e+00 : f32
      %1083 = vector.broadcast %cst_244 : f32 to vector<2x32xf32>
      %c0_245 = arith.constant 0 : index
      %c0_246 = arith.constant 0 : index
      %1084 = vector.load %arg11[%c0_245, %c0_246] : memref<2x32xf32, #tpu.memory_space<vmem>>, vector<2x32xf32>
      tpu.vector_store %arg11[%c0_245, %c0_246], %1083 {strides = array<i32>} : memref<2x32xf32, #tpu.memory_space<vmem>>, vector<2x32xf32>,
      %cst_247 = arith.constant 0.000000e+00 : f32
      %1085 = vector.broadcast %cst_247 : f32 to vector<2x32xf32>
      %c0_248 = arith.constant 0 : index
      %c0_249 = arith.constant 0 : index
      %1086 = vector.load %arg12[%c0_248, %c0_249] : memref<2x32xf32, #tpu.memory_space<vmem>>, vector<2x32xf32>
      tpu.vector_store %arg12[%c0_248, %c0_249], %1085 {strides = array<i32>} : memref<2x32xf32, #tpu.memory_space<vmem>>, vector<2x32xf32>,
      %cst_250 = arith.constant 0.000000e+00 : f32
      %1087 = vector.broadcast %cst_250 : f32 to vector<2x32xf32>
      %c0_251 = arith.constant 0 : index
      %c0_252 = arith.constant 0 : index
      %1088 = vector.load %arg13[%c0_251, %c0_252] : memref<2x32xf32, #tpu.memory_space<vmem>>, vector<2x32xf32>
      tpu.vector_store %arg13[%c0_251, %c0_252], %1087 {strides = array<i32>} : memref<2x32xf32, #tpu.memory_space<vmem>>, vector<2x32xf32>,
      %cst_253 = arith.constant 0.000000e+00 : f32
      %1089 = vector.broadcast %cst_253 : f32 to vector<2x32xf32>
      %c0_254 = arith.constant 0 : index
      %c0_255 = arith.constant 0 : index
      %1090 = vector.load %arg14[%c0_254, %c0_255] : memref<2x32xf32, #tpu.memory_space<vmem>>, vector<2x32xf32>
      tpu.vector_store %arg14[%c0_254, %c0_255], %1089 {strides = array<i32>} : memref<2x32xf32, #tpu.memory_space<vmem>>, vector<2x32xf32>,
    } else {
    }
    %c0 = arith.constant 0 : index
    %c0_1 = arith.constant 0 : index
    %c0_2 = arith.constant 0 : index
    %3 = vector.load %arg1[%c0, %c0_1, %c0_2] : memref<1x32x16xbf16, #tpu.memory_space<vmem>>, vector<1x32x16xbf16>
    %4 = vector.shape_cast %3 : vector<1x32x16xbf16> to vector<32x16xbf16>
    %c0_3 = arith.constant 0 : index
    %c0_4 = arith.constant 0 : index
    %5 = vector.load %arg3[%c0_3, %c0_4] : memref<16x128xbf16, #tpu.memory_space<vmem>>, vector<16x128xbf16>
    %cst = arith.constant dense<0.000000e+00> : vector<32x128xf32>
    %6 = tpu.matmul %4, %5, %cst {dimension_numbers = #tpu.dot_dimension_numbers<[1], [0], [0], [1], [0, 0, 1, 1], [], []>} : vector<32x16xbf16>, vector<16x128xbf16>, vector<32x128xf32> -> vector<32x128xf32>
    %c0_5 = arith.constant 0 : index
    %c0_6 = arith.constant 0 : index
    %7 = vector.load %arg5[%c0_5, %c0_6] : memref<1x128xf32, #tpu.memory_space<vmem>>, vector<1x128xf32>
    %8 = vector.broadcast %7 : vector<1x128xf32> to vector<32x128xf32>
    %9 = arith.addf %6, %8 : vector<32x128xf32>
    %c0_7 = arith.constant 0 : index
    %c0_8 = arith.constant 0 : index
    %c0_9 = arith.constant 0 : index
    %10 = vector.load %arg2[%c0_7, %c0_8, %c0_9] : memref<1x32x16xbf16, #tpu.memory_space<vmem>>, vector<1x32x16xbf16>
    %11 = vector.shape_cast %10 : vector<1x32x16xbf16> to vector<32x16xbf16>
    %c0_10 = arith.constant 0 : index
    %c0_11 = arith.constant 0 : index
    %12 = vector.load %arg4[%c0_10, %c0_11] : memref<16x128xbf16, #tpu.memory_space<vmem>>, vector<16x128xbf16>
    %cst_12 = arith.constant dense<0.000000e+00> : vector<32x128xf32>
    %13 = tpu.matmul %11, %12, %cst_12 {dimension_numbers = #tpu.dot_dimension_numbers<[1], [0], [0], [1], [0, 0, 1, 1], [], []>} : vector<32x16xbf16>, vector<16x128xbf16>, vector<32x128xf32> -> vector<32x128xf32>
    %c0_13 = arith.constant 0 : index
    %c0_14 = arith.constant 0 : index
    %14 = vector.load %arg6[%c0_13, %c0_14] : memref<1x128xf32, #tpu.memory_space<vmem>>, vector<1x128xf32>
    %15 = vector.broadcast %14 : vector<1x128xf32> to vector<32x128xf32>
    %16 = arith.addf %13, %15 : vector<32x128xf32>
    %c0_15 = arith.constant 0 : index
    %c0_16 = arith.constant 0 : index
    %17 = vector.load %arg7[%c0_15, %c0_16] : memref<32x128xbf16, #tpu.memory_space<vmem>>, vector<32x128xbf16>
    %c0_17 = arith.constant 0 : index
    %c0_18 = arith.constant 0 : index
    %18 = vector.load %arg8[%c0_17, %c0_18] : memref<32x128xbf16, #tpu.memory_space<vmem>>, vector<32x128xbf16>
    %c0_19 = arith.constant 0 : index
    %c0_20 = arith.constant 0 : index
    %19 = vector.load %arg11[%c0_19, %c0_20] : memref<2x32xf32, #tpu.memory_space<vmem>>, vector<2x32xf32>
    %c0_21 = arith.constant 0 : index
    %c0_22 = arith.constant 0 : index
    %20 = vector.load %arg12[%c0_21, %c0_22] : memref<2x32xf32, #tpu.memory_space<vmem>>, vector<2x32xf32>
    %c0_23 = arith.constant 0 : index
    %c0_24 = arith.constant 0 : index
    %21 = vector.load %arg13[%c0_23, %c0_24] : memref<2x32xf32, #tpu.memory_space<vmem>>, vector<2x32xf32>
    %c0_25 = arith.constant 0 : index
    %c0_26 = arith.constant 0 : index
    %22 = vector.load %arg14[%c0_25, %c0_26] : memref<2x32xf32, #tpu.memory_space<vmem>>, vector<2x32xf32>
    %23 = vector.extract_strided_slice %9 {offsets = [0, 0], sizes = [2, 128], strides = [1, 1]} : vector<32x128xf32> to vector<2x128xf32>
    %24 = arith.truncf %19 : vector<2x32xf32> to vector<2x32xbf16>
    %cst_27 = arith.constant dense<0.000000e+00> : vector<2x128xf32>
    %25 = tpu.matmul %24, %17, %cst_27 {dimension_numbers = #tpu.dot_dimension_numbers<[1], [0], [0], [1], [0, 0, 1, 1], [], []>} : vector<2x32xbf16>, vector<32x128xbf16>, vector<2x128xf32> -> vector<2x128xf32>
    %26 = arith.addf %23, %25 : vector<2x128xf32>
    %27 = vector.extract_strided_slice %26 {offsets = [0, 0], sizes = [2, 32], strides = [1, 1]} : vector<2x128xf32> to vector<2x32xf32>
    %28 = arith.negf %27 : vector<2x32xf32>
    %29 = math.exp %28 : vector<2x32xf32>
    %cst_28 = arith.constant 1.000000e+00 : f32
    %30 = vector.broadcast %cst_28 : f32 to vector<2x32xf32>
    %31 = arith.addf %30, %29 : vector<2x32xf32>
    %32 = arith.divf %30, %31 : vector<2x32xf32>
    %33 = vector.extract_strided_slice %26 {offsets = [0, 32], sizes = [2, 32], strides = [1, 1]} : vector<2x128xf32> to vector<2x32xf32>
    %34 = arith.negf %33 : vector<2x32xf32>
    %35 = math.exp %34 : vector<2x32xf32>
    %cst_29 = arith.constant 1.000000e+00 : f32
    %36 = vector.broadcast %cst_29 : f32 to vector<2x32xf32>
    %37 = arith.addf %36, %35 : vector<2x32xf32>
    %38 = arith.divf %36, %37 : vector<2x32xf32>
    %39 = vector.extract_strided_slice %26 {offsets = [0, 64], sizes = [2, 32], strides = [1, 1]} : vector<2x128xf32> to vector<2x32xf32>
    %40 = math.tanh %39 : vector<2x32xf32>
    %41 = vector.extract_strided_slice %26 {offsets = [0, 96], sizes = [2, 32], strides = [1, 1]} : vector<2x128xf32> to vector<2x32xf32>
    %42 = arith.negf %41 : vector<2x32xf32>
    %43 = math.exp %42 : vector<2x32xf32>
    %cst_30 = arith.constant 1.000000e+00 : f32
    %44 = vector.broadcast %cst_30 : f32 to vector<2x32xf32>
    %45 = arith.addf %44, %43 : vector<2x32xf32>
    %46 = arith.divf %44, %45 : vector<2x32xf32>
    %47 = arith.mulf %38, %20 : vector<2x32xf32>
    %48 = arith.mulf %32, %40 : vector<2x32xf32>
    %49 = arith.addf %47, %48 : vector<2x32xf32>
    %50 = math.tanh %49 : vector<2x32xf32>
    %51 = arith.mulf %46, %50 : vector<2x32xf32>
    %52 = arith.truncf %51 : vector<2x32xf32> to vector<2x32xbf16>
    %c0_31 = arith.constant 0 : index
    %c0_32 = arith.constant 0 : index
    %c0_33 = arith.constant 0 : index
    %53 = vector.load %arg9[%c0_31, %c0_32, %c0_33] : memref<16x2x32xbf16, #tpu.memory_space<vmem>>, vector<1x2x32xbf16>
    %54 = vector.shape_cast %53 : vector<1x2x32xbf16> to vector<2x32xbf16>
    %55 = vector.shape_cast %52 : vector<2x32xbf16> to vector<1x2x32xbf16>
    tpu.vector_store %arg9[%c0_31, %c0_32, %c0_33], %55 {strides = array<i32>} : memref<16x2x32xbf16, #tpu.memory_space<vmem>>, vector<1x2x32xbf16>,
    %56 = vector.extract_strided_slice %16 {offsets = [30, 0], sizes = [2, 128], strides = [1, 1]} : vector<32x128xf32> to vector<2x128xf32>
    %57 = arith.truncf %21 : vector<2x32xf32> to vector<2x32xbf16>
    %cst_34 = arith.constant dense<0.000000e+00> : vector<2x128xf32>
    %58 = tpu.matmul %57, %18, %cst_34 {dimension_numbers = #tpu.dot_dimension_numbers<[1], [0], [0], [1], [0, 0, 1, 1], [], []>} : vector<2x32xbf16>, vector<32x128xbf16>, vector<2x128xf32> -> vector<2x128xf32>
    %59 = arith.addf %56, %58 : vector<2x128xf32>
    %60 = vector.extract_strided_slice %59 {offsets = [0, 0], sizes = [2, 32], strides = [1, 1]} : vector<2x128xf32> to vector<2x32xf32>
    %61 = arith.negf %60 : vector<2x32xf32>
    %62 = math.exp %61 : vector<2x32xf32>
    %cst_35 = arith.constant 1.000000e+00 : f32
    %63 = vector.broadcast %cst_35 : f32 to vector<2x32xf32>
    %64 = arith.addf %63, %62 : vector<2x32xf32>
    %65 = arith.divf %63, %64 : vector<2x32xf32>
    %66 = vector.extract_strided_slice %59 {offsets = [0, 32], sizes = [2, 32], strides = [1, 1]} : vector<2x128xf32> to vector<2x32xf32>
    %67 = arith.negf %66 : vector<2x32xf32>
    %68 = math.exp %67 : vector<2x32xf32>
    %cst_36 = arith.constant 1.000000e+00 : f32
    %69 = vector.broadcast %cst_36 : f32 to vector<2x32xf32>
    %70 = arith.addf %69, %68 : vector<2x32xf32>
    %71 = arith.divf %69, %70 : vector<2x32xf32>
    %72 = vector.extract_strided_slice %59 {offsets = [0, 64], sizes = [2, 32], strides = [1, 1]} : vector<2x128xf32> to vector<2x32xf32>
    %73 = math.tanh %72 : vector<2x32xf32>
    %74 = vector.extract_strided_slice %59 {offsets = [0, 96], sizes = [2, 32], strides = [1, 1]} : vector<2x128xf32> to vector<2x32xf32>
    %75 = arith.negf %74 : vector<2x32xf32>
    %76 = math.exp %75 : vector<2x32xf32>
    %cst_37 = arith.constant 1.000000e+00 : f32
    %77 = vector.broadcast %cst_37 : f32 to vector<2x32xf32>
    %78 = arith.addf %77, %76 : vector<2x32xf32>
    %79 = arith.divf %77, %78 : vector<2x32xf32>
    %80 = arith.mulf %71, %22 : vector<2x32xf32>
    %81 = arith.mulf %65, %73 : vector<2x32xf32>
    %82 = arith.addf %80, %81 : vector<2x32xf32>
    %83 = math.tanh %82 : vector<2x32xf32>
    %84 = arith.mulf %79, %83 : vector<2x32xf32>
    %85 = arith.truncf %84 : vector<2x32xf32> to vector<2x32xbf16>
    %c15 = arith.constant 15 : index
    %c0_38 = arith.constant 0 : index
    %c0_39 = arith.constant 0 : index
    %86 = vector.load %arg10[%c15, %c0_38, %c0_39] : memref<16x2x32xbf16, #tpu.memory_space<vmem>>, vector<1x2x32xbf16>
    %87 = vector.shape_cast %86 : vector<1x2x32xbf16> to vector<2x32xbf16>
    %88 = vector.shape_cast %85 : vector<2x32xbf16> to vector<1x2x32xbf16>
    tpu.vector_store %arg10[%c15, %c0_38, %c0_39], %88 {strides = array<i32>} : memref<16x2x32xbf16, #tpu.memory_space<vmem>>, vector<1x2x32xbf16>,
    %89 = vector.extract_strided_slice %9 {offsets = [2, 0], sizes = [2, 128], strides = [1, 1]} : vector<32x128xf32> to vector<2x128xf32>
    %90 = arith.truncf %51 : vector<2x32xf32> to vector<2x32xbf16>
    %cst_40 = arith.constant dense<0.000000e+00> : vector<2x128xf32>
    %91 = tpu.matmul %90, %17, %cst_40 {dimension_numbers = #tpu.dot_dimension_numbers<[1], [0], [0], [1], [0, 0, 1, 1], [], []>} : vector<2x32xbf16>, vector<32x128xbf16>, vector<2x128xf32> -> vector<2x128xf32>
    %92 = arith.addf %89, %91 : vector<2x128xf32>
    %93 = vector.extract_strided_slice %92 {offsets = [0, 0], sizes = [2, 32], strides = [1, 1]} : vector<2x128xf32> to vector<2x32xf32>
    %94 = arith.negf %93 : vector<2x32xf32>
    %95 = math.exp %94 : vector<2x32xf32>
    %cst_41 = arith.constant 1.000000e+00 : f32
    %96 = vector.broadcast %cst_41 : f32 to vector<2x32xf32>
    %97 = arith.addf %96, %95 : vector<2x32xf32>
    %98 = arith.divf %96, %97 : vector<2x32xf32>
    %99 = vector.extract_strided_slice %92 {offsets = [0, 32], sizes = [2, 32], strides = [1, 1]} : vector<2x128xf32> to vector<2x32xf32>
    %100 = arith.negf %99 : vector<2x32xf32>
    %101 = math.exp %100 : vector<2x32xf32>
    %cst_42 = arith.constant 1.000000e+00 : f32
    %102 = vector.broadcast %cst_42 : f32 to vector<2x32xf32>
    %103 = arith.addf %102, %101 : vector<2x32xf32>
    %104 = arith.divf %102, %103 : vector<2x32xf32>
    %105 = vector.extract_strided_slice %92 {offsets = [0, 64], sizes = [2, 32], strides = [1, 1]} : vector<2x128xf32> to vector<2x32xf32>
    %106 = math.tanh %105 : vector<2x32xf32>
    %107 = vector.extract_strided_slice %92 {offsets = [0, 96], sizes = [2, 32], strides = [1, 1]} : vector<2x128xf32> to vector<2x32xf32>
    %108 = arith.negf %107 : vector<2x32xf32>
    %109 = math.exp %108 : vector<2x32xf32>
    %cst_43 = arith.constant 1.000000e+00 : f32
    %110 = vector.broadcast %cst_43 : f32 to vector<2x32xf32>
    %111 = arith.addf %110, %109 : vector<2x32xf32>
    %112 = arith.divf %110, %111 : vector<2x32xf32>
    %113 = arith.mulf %104, %49 : vector<2x32xf32>
    %114 = arith.mulf %98, %106 : vector<2x32xf32>
    %115 = arith.addf %113, %114 : vector<2x32xf32>
    %116 = math.tanh %115 : vector<2x32xf32>
    %117 = arith.mulf %112, %116 : vector<2x32xf32>
    %118 = arith.truncf %117 : vector<2x32xf32> to vector<2x32xbf16>
    %c1 = arith.constant 1 : index
    %c0_44 = arith.constant 0 : index
    %c0_45 = arith.constant 0 : index
    %119 = vector.load %arg9[%c1, %c0_44, %c0_45] : memref<16x2x32xbf16, #tpu.memory_space<vmem>>, vector<1x2x32xbf16>
    %120 = vector.shape_cast %119 : vector<1x2x32xbf16> to vector<2x32xbf16>
    %121 = vector.shape_cast %118 : vector<2x32xbf16> to vector<1x2x32xbf16>
    tpu.vector_store %arg9[%c1, %c0_44, %c0_45], %121 {strides = array<i32>} : memref<16x2x32xbf16, #tpu.memory_space<vmem>>, vector<1x2x32xbf16>,
    %122 = vector.extract_strided_slice %16 {offsets = [28, 0], sizes = [2, 128], strides = [1, 1]} : vector<32x128xf32> to vector<2x128xf32>
    %123 = arith.truncf %84 : vector<2x32xf32> to vector<2x32xbf16>
    %cst_46 = arith.constant dense<0.000000e+00> : vector<2x128xf32>
    %124 = tpu.matmul %123, %18, %cst_46 {dimension_numbers = #tpu.dot_dimension_numbers<[1], [0], [0], [1], [0, 0, 1, 1], [], []>} : vector<2x32xbf16>, vector<32x128xbf16>, vector<2x128xf32> -> vector<2x128xf32>
    %125 = arith.addf %122, %124 : vector<2x128xf32>
    %126 = vector.extract_strided_slice %125 {offsets = [0, 0], sizes = [2, 32], strides = [1, 1]} : vector<2x128xf32> to vector<2x32xf32>
    %127 = arith.negf %126 : vector<2x32xf32>
    %128 = math.exp %127 : vector<2x32xf32>
    %cst_47 = arith.constant 1.000000e+00 : f32
    %129 = vector.broadcast %cst_47 : f32 to vector<2x32xf32>
    %130 = arith.addf %129, %128 : vector<2x32xf32>
    %131 = arith.divf %129, %130 : vector<2x32xf32>
    %132 = vector.extract_strided_slice %125 {offsets = [0, 32], sizes = [2, 32], strides = [1, 1]} : vector<2x128xf32> to vector<2x32xf32>
    %133 = arith.negf %132 : vector<2x32xf32>
    %134 = math.exp %133 : vector<2x32xf32>
    %cst_48 = arith.constant 1.000000e+00 : f32
    %135 = vector.broadcast %cst_48 : f32 to vector<2x32xf32>
    %136 = arith.addf %135, %134 : vector<2x32xf32>
    %137 = arith.divf %135, %136 : vector<2x32xf32>
    %138 = vector.extract_strided_slice %125 {offsets = [0, 64], sizes = [2, 32], strides = [1, 1]} : vector<2x128xf32> to vector<2x32xf32>
    %139 = math.tanh %138 : vector<2x32xf32>
    %140 = vector.extract_strided_slice %125 {offsets = [0, 96], sizes = [2, 32], strides = [1, 1]} : vector<2x128xf32> to vector<2x32xf32>
    %141 = arith.negf %140 : vector<2x32xf32>
    %142 = math.exp %141 : vector<2x32xf32>
    %cst_49 = arith.constant 1.000000e+00 : f32
    %143 = vector.broadcast %cst_49 : f32 to vector<2x32xf32>
    %144 = arith.addf %143, %142 : vector<2x32xf32>
    %145 = arith.divf %143, %144 : vector<2x32xf32>
    %146 = arith.mulf %137, %82 : vector<2x32xf32>
    %147 = arith.mulf %131, %139 : vector<2x32xf32>
    %148 = arith.addf %146, %147 : vector<2x32xf32>
    %149 = math.tanh %148 : vector<2x32xf32>
    %150 = arith.mulf %145, %149 : vector<2x32xf32>
    %151 = arith.truncf %150 : vector<2x32xf32> to vector<2x32xbf16>
    %c14 = arith.constant 14 : index
    %c0_50 = arith.constant 0 : index
    %c0_51 = arith.constant 0 : index
    %152 = vector.load %arg10[%c14, %c0_50, %c0_51] : memref<16x2x32xbf16, #tpu.memory_space<vmem>>, vector<1x2x32xbf16>
    %153 = vector.shape_cast %152 : vector<1x2x32xbf16> to vector<2x32xbf16>
    %154 = vector.shape_cast %151 : vector<2x32xbf16> to vector<1x2x32xbf16>
    tpu.vector_store %arg10[%c14, %c0_50, %c0_51], %154 {strides = array<i32>} : memref<16x2x32xbf16, #tpu.memory_space<vmem>>, vector<1x2x32xbf16>,
    %155 = vector.extract_strided_slice %9 {offsets = [4, 0], sizes = [2, 128], strides = [1, 1]} : vector<32x128xf32> to vector<2x128xf32>
    %156 = arith.truncf %117 : vector<2x32xf32> to vector<2x32xbf16>
    %cst_52 = arith.constant dense<0.000000e+00> : vector<2x128xf32>
    %157 = tpu.matmul %156, %17, %cst_52 {dimension_numbers = #tpu.dot_dimension_numbers<[1], [0], [0], [1], [0, 0, 1, 1], [], []>} : vector<2x32xbf16>, vector<32x128xbf16>, vector<2x128xf32> -> vector<2x128xf32>
    %158 = arith.addf %155, %157 : vector<2x128xf32>
    %159 = vector.extract_strided_slice %158 {offsets = [0, 0], sizes = [2, 32], strides = [1, 1]} : vector<2x128xf32> to vector<2x32xf32>
    %160 = arith.negf %159 : vector<2x32xf32>
    %161 = math.exp %160 : vector<2x32xf32>
    %cst_53 = arith.constant 1.000000e+00 : f32
    %162 = vector.broadcast %cst_53 : f32 to vector<2x32xf32>
    %163 = arith.addf %162, %161 : vector<2x32xf32>
    %164 = arith.divf %162, %163 : vector<2x32xf32>
    %165 = vector.extract_strided_slice %158 {offsets = [0, 32], sizes = [2, 32], strides = [1, 1]} : vector<2x128xf32> to vector<2x32xf32>
    %166 = arith.negf %165 : vector<2x32xf32>
    %167 = math.exp %166 : vector<2x32xf32>
    %cst_54 = arith.constant 1.000000e+00 : f32
    %168 = vector.broadcast %cst_54 : f32 to vector<2x32xf32>
    %169 = arith.addf %168, %167 : vector<2x32xf32>
    %170 = arith.divf %168, %169 : vector<2x32xf32>
    %171 = vector.extract_strided_slice %158 {offsets = [0, 64], sizes = [2, 32], strides = [1, 1]} : vector<2x128xf32> to vector<2x32xf32>
    %172 = math.tanh %171 : vector<2x32xf32>
    %173 = vector.extract_strided_slice %158 {offsets = [0, 96], sizes = [2, 32], strides = [1, 1]} : vector<2x128xf32> to vector<2x32xf32>
    %174 = arith.negf %173 : vector<2x32xf32>
    %175 = math.exp %174 : vector<2x32xf32>
    %cst_55 = arith.constant 1.000000e+00 : f32
    %176 = vector.broadcast %cst_55 : f32 to vector<2x32xf32>
    %177 = arith.addf %176, %175 : vector<2x32xf32>
    %178 = arith.divf %176, %177 : vector<2x32xf32>
    %179 = arith.mulf %170, %115 : vector<2x32xf32>
    %180 = arith.mulf %164, %172 : vector<2x32xf32>
    %181 = arith.addf %179, %180 : vector<2x32xf32>
    %182 = math.tanh %181 : vector<2x32xf32>
    %183 = arith.mulf %178, %182 : vector<2x32xf32>
    %184 = arith.truncf %183 : vector<2x32xf32> to vector<2x32xbf16>
    %c2 = arith.constant 2 : index
    %c0_56 = arith.constant 0 : index
    %c0_57 = arith.constant 0 : index
    %185 = vector.load %arg9[%c2, %c0_56, %c0_57] : memref<16x2x32xbf16, #tpu.memory_space<vmem>>, vector<1x2x32xbf16>
    %186 = vector.shape_cast %185 : vector<1x2x32xbf16> to vector<2x32xbf16>
    %187 = vector.shape_cast %184 : vector<2x32xbf16> to vector<1x2x32xbf16>
    tpu.vector_store %arg9[%c2, %c0_56, %c0_57], %187 {strides = array<i32>} : memref<16x2x32xbf16, #tpu.memory_space<vmem>>, vector<1x2x32xbf16>,
    %188 = vector.extract_strided_slice %16 {offsets = [26, 0], sizes = [2, 128], strides = [1, 1]} : vector<32x128xf32> to vector<2x128xf32>
    %189 = arith.truncf %150 : vector<2x32xf32> to vector<2x32xbf16>
    %cst_58 = arith.constant dense<0.000000e+00> : vector<2x128xf32>
    %190 = tpu.matmul %189, %18, %cst_58 {dimension_numbers = #tpu.dot_dimension_numbers<[1], [0], [0], [1], [0, 0, 1, 1], [], []>} : vector<2x32xbf16>, vector<32x128xbf16>, vector<2x128xf32> -> vector<2x128xf32>
    %191 = arith.addf %188, %190 : vector<2x128xf32>
    %192 = vector.extract_strided_slice %191 {offsets = [0, 0], sizes = [2, 32], strides = [1, 1]} : vector<2x128xf32> to vector<2x32xf32>
    %193 = arith.negf %192 : vector<2x32xf32>
    %194 = math.exp %193 : vector<2x32xf32>
    %cst_59 = arith.constant 1.000000e+00 : f32
    %195 = vector.broadcast %cst_59 : f32 to vector<2x32xf32>
    %196 = arith.addf %195, %194 : vector<2x32xf32>
    %197 = arith.divf %195, %196 : vector<2x32xf32>
    %198 = vector.extract_strided_slice %191 {offsets = [0, 32], sizes = [2, 32], strides = [1, 1]} : vector<2x128xf32> to vector<2x32xf32>
    %199 = arith.negf %198 : vector<2x32xf32>
    %200 = math.exp %199 : vector<2x32xf32>
    %cst_60 = arith.constant 1.000000e+00 : f32
    %201 = vector.broadcast %cst_60 : f32 to vector<2x32xf32>
    %202 = arith.addf %201, %200 : vector<2x32xf32>
    %203 = arith.divf %201, %202 : vector<2x32xf32>
    %204 = vector.extract_strided_slice %191 {offsets = [0, 64], sizes = [2, 32], strides = [1, 1]} : vector<2x128xf32> to vector<2x32xf32>
    %205 = math.tanh %204 : vector<2x32xf32>
    %206 = vector.extract_strided_slice %191 {offsets = [0, 96], sizes = [2, 32], strides = [1, 1]} : vector<2x128xf32> to vector<2x32xf32>
    %207 = arith.negf %206 : vector<2x32xf32>
    %208 = math.exp %207 : vector<2x32xf32>
    %cst_61 = arith.constant 1.000000e+00 : f32
    %209 = vector.broadcast %cst_61 : f32 to vector<2x32xf32>
    %210 = arith.addf %209, %208 : vector<2x32xf32>
    %211 = arith.divf %209, %210 : vector<2x32xf32>
    %212 = arith.mulf %203, %148 : vector<2x32xf32>
    %213 = arith.mulf %197, %205 : vector<2x32xf32>
    %214 = arith.addf %212, %213 : vector<2x32xf32>
    %215 = math.tanh %214 : vector<2x32xf32>
    %216 = arith.mulf %211, %215 : vector<2x32xf32>
    %217 = arith.truncf %216 : vector<2x32xf32> to vector<2x32xbf16>
    %c13 = arith.constant 13 : index
    %c0_62 = arith.constant 0 : index
    %c0_63 = arith.constant 0 : index
    %218 = vector.load %arg10[%c13, %c0_62, %c0_63] : memref<16x2x32xbf16, #tpu.memory_space<vmem>>, vector<1x2x32xbf16>
    %219 = vector.shape_cast %218 : vector<1x2x32xbf16> to vector<2x32xbf16>
    %220 = vector.shape_cast %217 : vector<2x32xbf16> to vector<1x2x32xbf16>
    tpu.vector_store %arg10[%c13, %c0_62, %c0_63], %220 {strides = array<i32>} : memref<16x2x32xbf16, #tpu.memory_space<vmem>>, vector<1x2x32xbf16>,
    %221 = vector.extract_strided_slice %9 {offsets = [6, 0], sizes = [2, 128], strides = [1, 1]} : vector<32x128xf32> to vector<2x128xf32>
    %222 = arith.truncf %183 : vector<2x32xf32> to vector<2x32xbf16>
    %cst_64 = arith.constant dense<0.000000e+00> : vector<2x128xf32>
    %223 = tpu.matmul %222, %17, %cst_64 {dimension_numbers = #tpu.dot_dimension_numbers<[1], [0], [0], [1], [0, 0, 1, 1], [], []>} : vector<2x32xbf16>, vector<32x128xbf16>, vector<2x128xf32> -> vector<2x128xf32>
    %224 = arith.addf %221, %223 : vector<2x128xf32>
    %225 = vector.extract_strided_slice %224 {offsets = [0, 0], sizes = [2, 32], strides = [1, 1]} : vector<2x128xf32> to vector<2x32xf32>
    %226 = arith.negf %225 : vector<2x32xf32>
    %227 = math.exp %226 : vector<2x32xf32>
    %cst_65 = arith.constant 1.000000e+00 : f32
    %228 = vector.broadcast %cst_65 : f32 to vector<2x32xf32>
    %229 = arith.addf %228, %227 : vector<2x32xf32>
    %230 = arith.divf %228, %229 : vector<2x32xf32>
    %231 = vector.extract_strided_slice %224 {offsets = [0, 32], sizes = [2, 32], strides = [1, 1]} : vector<2x128xf32> to vector<2x32xf32>
    %232 = arith.negf %231 : vector<2x32xf32>
    %233 = math.exp %232 : vector<2x32xf32>
    %cst_66 = arith.constant 1.000000e+00 : f32
    %234 = vector.broadcast %cst_66 : f32 to vector<2x32xf32>
    %235 = arith.addf %234, %233 : vector<2x32xf32>
    %236 = arith.divf %234, %235 : vector<2x32xf32>
    %237 = vector.extract_strided_slice %224 {offsets = [0, 64], sizes = [2, 32], strides = [1, 1]} : vector<2x128xf32> to vector<2x32xf32>
    %238 = math.tanh %237 : vector<2x32xf32>
    %239 = vector.extract_strided_slice %224 {offsets = [0, 96], sizes = [2, 32], strides = [1, 1]} : vector<2x128xf32> to vector<2x32xf32>
    %240 = arith.negf %239 : vector<2x32xf32>
    %241 = math.exp %240 : vector<2x32xf32>
    %cst_67 = arith.constant 1.000000e+00 : f32
    %242 = vector.broadcast %cst_67 : f32 to vector<2x32xf32>
    %243 = arith.addf %242, %241 : vector<2x32xf32>
    %244 = arith.divf %242, %243 : vector<2x32xf32>
    %245 = arith.mulf %236, %181 : vector<2x32xf32>
    %246 = arith.mulf %230, %238 : vector<2x32xf32>
    %247 = arith.addf %245, %246 : vector<2x32xf32>
    %248 = math.tanh %247 : vector<2x32xf32>
    %249 = arith.mulf %244, %248 : vector<2x32xf32>
    %250 = arith.truncf %249 : vector<2x32xf32> to vector<2x32xbf16>
    %c3 = arith.constant 3 : index
    %c0_68 = arith.constant 0 : index
    %c0_69 = arith.constant 0 : index
    %251 = vector.load %arg9[%c3, %c0_68, %c0_69] : memref<16x2x32xbf16, #tpu.memory_space<vmem>>, vector<1x2x32xbf16>
    %252 = vector.shape_cast %251 : vector<1x2x32xbf16> to vector<2x32xbf16>
    %253 = vector.shape_cast %250 : vector<2x32xbf16> to vector<1x2x32xbf16>
    tpu.vector_store %arg9[%c3, %c0_68, %c0_69], %253 {strides = array<i32>} : memref<16x2x32xbf16, #tpu.memory_space<vmem>>, vector<1x2x32xbf16>,
    %254 = vector.extract_strided_slice %16 {offsets = [24, 0], sizes = [2, 128], strides = [1, 1]} : vector<32x128xf32> to vector<2x128xf32>
    %255 = arith.truncf %216 : vector<2x32xf32> to vector<2x32xbf16>
    %cst_70 = arith.constant dense<0.000000e+00> : vector<2x128xf32>
    %256 = tpu.matmul %255, %18, %cst_70 {dimension_numbers = #tpu.dot_dimension_numbers<[1], [0], [0], [1], [0, 0, 1, 1], [], []>} : vector<2x32xbf16>, vector<32x128xbf16>, vector<2x128xf32> -> vector<2x128xf32>
    %257 = arith.addf %254, %256 : vector<2x128xf32>
    %258 = vector.extract_strided_slice %257 {offsets = [0, 0], sizes = [2, 32], strides = [1, 1]} : vector<2x128xf32> to vector<2x32xf32>
    %259 = arith.negf %258 : vector<2x32xf32>
    %260 = math.exp %259 : vector<2x32xf32>
    %cst_71 = arith.constant 1.000000e+00 : f32
    %261 = vector.broadcast %cst_71 : f32 to vector<2x32xf32>
    %262 = arith.addf %261, %260 : vector<2x32xf32>
    %263 = arith.divf %261, %262 : vector<2x32xf32>
    %264 = vector.extract_strided_slice %257 {offsets = [0, 32], sizes = [2, 32], strides = [1, 1]} : vector<2x128xf32> to vector<2x32xf32>
    %265 = arith.negf %264 : vector<2x32xf32>
    %266 = math.exp %265 : vector<2x32xf32>
    %cst_72 = arith.constant 1.000000e+00 : f32
    %267 = vector.broadcast %cst_72 : f32 to vector<2x32xf32>
    %268 = arith.addf %267, %266 : vector<2x32xf32>
    %269 = arith.divf %267, %268 : vector<2x32xf32>
    %270 = vector.extract_strided_slice %257 {offsets = [0, 64], sizes = [2, 32], strides = [1, 1]} : vector<2x128xf32> to vector<2x32xf32>
    %271 = math.tanh %270 : vector<2x32xf32>
    %272 = vector.extract_strided_slice %257 {offsets = [0, 96], sizes = [2, 32], strides = [1, 1]} : vector<2x128xf32> to vector<2x32xf32>
    %273 = arith.negf %272 : vector<2x32xf32>
    %274 = math.exp %273 : vector<2x32xf32>
    %cst_73 = arith.constant 1.000000e+00 : f32
    %275 = vector.broadcast %cst_73 : f32 to vector<2x32xf32>
    %276 = arith.addf %275, %274 : vector<2x32xf32>
    %277 = arith.divf %275, %276 : vector<2x32xf32>
    %278 = arith.mulf %269, %214 : vector<2x32xf32>
    %279 = arith.mulf %263, %271 : vector<2x32xf32>
    %280 = arith.addf %278, %279 : vector<2x32xf32>
    %281 = math.tanh %280 : vector<2x32xf32>
    %282 = arith.mulf %277, %281 : vector<2x32xf32>
    %283 = arith.truncf %282 : vector<2x32xf32> to vector<2x32xbf16>
    %c12 = arith.constant 12 : index
    %c0_74 = arith.constant 0 : index
    %c0_75 = arith.constant 0 : index
    %284 = vector.load %arg10[%c12, %c0_74, %c0_75] : memref<16x2x32xbf16, #tpu.memory_space<vmem>>, vector<1x2x32xbf16>
    %285 = vector.shape_cast %284 : vector<1x2x32xbf16> to vector<2x32xbf16>
    %286 = vector.shape_cast %283 : vector<2x32xbf16> to vector<1x2x32xbf16>
    tpu.vector_store %arg10[%c12, %c0_74, %c0_75], %286 {strides = array<i32>} : memref<16x2x32xbf16, #tpu.memory_space<vmem>>, vector<1x2x32xbf16>,
    %287 = vector.extract_strided_slice %9 {offsets = [8, 0], sizes = [2, 128], strides = [1, 1]} : vector<32x128xf32> to vector<2x128xf32>
    %288 = arith.truncf %249 : vector<2x32xf32> to vector<2x32xbf16>
    %cst_76 = arith.constant dense<0.000000e+00> : vector<2x128xf32>
    %289 = tpu.matmul %288, %17, %cst_76 {dimension_numbers = #tpu.dot_dimension_numbers<[1], [0], [0], [1], [0, 0, 1, 1], [], []>} : vector<2x32xbf16>, vector<32x128xbf16>, vector<2x128xf32> -> vector<2x128xf32>
    %290 = arith.addf %287, %289 : vector<2x128xf32>
    %291 = vector.extract_strided_slice %290 {offsets = [0, 0], sizes = [2, 32], strides = [1, 1]} : vector<2x128xf32> to vector<2x32xf32>
    %292 = arith.negf %291 : vector<2x32xf32>
    %293 = math.exp %292 : vector<2x32xf32>
    %cst_77 = arith.constant 1.000000e+00 : f32
    %294 = vector.broadcast %cst_77 : f32 to vector<2x32xf32>
    %295 = arith.addf %294, %293 : vector<2x32xf32>
    %296 = arith.divf %294, %295 : vector<2x32xf32>
    %297 = vector.extract_strided_slice %290 {offsets = [0, 32], sizes = [2, 32], strides = [1, 1]} : vector<2x128xf32> to vector<2x32xf32>
    %298 = arith.negf %297 : vector<2x32xf32>
    %299 = math.exp %298 : vector<2x32xf32>
    %cst_78 = arith.constant 1.000000e+00 : f32
    %300 = vector.broadcast %cst_78 : f32 to vector<2x32xf32>
    %301 = arith.addf %300, %299 : vector<2x32xf32>
    %302 = arith.divf %300, %301 : vector<2x32xf32>
    %303 = vector.extract_strided_slice %290 {offsets = [0, 64], sizes = [2, 32], strides = [1, 1]} : vector<2x128xf32> to vector<2x32xf32>
    %304 = math.tanh %303 : vector<2x32xf32>
    %305 = vector.extract_strided_slice %290 {offsets = [0, 96], sizes = [2, 32], strides = [1, 1]} : vector<2x128xf32> to vector<2x32xf32>
    %306 = arith.negf %305 : vector<2x32xf32>
    %307 = math.exp %306 : vector<2x32xf32>
    %cst_79 = arith.constant 1.000000e+00 : f32
    %308 = vector.broadcast %cst_79 : f32 to vector<2x32xf32>
    %309 = arith.addf %308, %307 : vector<2x32xf32>
    %310 = arith.divf %308, %309 : vector<2x32xf32>
    %311 = arith.mulf %302, %247 : vector<2x32xf32>
    %312 = arith.mulf %296, %304 : vector<2x32xf32>
    %313 = arith.addf %311, %312 : vector<2x32xf32>
    %314 = math.tanh %313 : vector<2x32xf32>
    %315 = arith.mulf %310, %314 : vector<2x32xf32>
    %316 = arith.truncf %315 : vector<2x32xf32> to vector<2x32xbf16>
    %c4 = arith.constant 4 : index
    %c0_80 = arith.constant 0 : index
    %c0_81 = arith.constant 0 : index
    %317 = vector.load %arg9[%c4, %c0_80, %c0_81] : memref<16x2x32xbf16, #tpu.memory_space<vmem>>, vector<1x2x32xbf16>
    %318 = vector.shape_cast %317 : vector<1x2x32xbf16> to vector<2x32xbf16>
    %319 = vector.shape_cast %316 : vector<2x32xbf16> to vector<1x2x32xbf16>
    tpu.vector_store %arg9[%c4, %c0_80, %c0_81], %319 {strides = array<i32>} : memref<16x2x32xbf16, #tpu.memory_space<vmem>>, vector<1x2x32xbf16>,
    %320 = vector.extract_strided_slice %16 {offsets = [22, 0], sizes = [2, 128], strides = [1, 1]} : vector<32x128xf32> to vector<2x128xf32>
    %321 = arith.truncf %282 : vector<2x32xf32> to vector<2x32xbf16>
    %cst_82 = arith.constant dense<0.000000e+00> : vector<2x128xf32>
    %322 = tpu.matmul %321, %18, %cst_82 {dimension_numbers = #tpu.dot_dimension_numbers<[1], [0], [0], [1], [0, 0, 1, 1], [], []>} : vector<2x32xbf16>, vector<32x128xbf16>, vector<2x128xf32> -> vector<2x128xf32>
    %323 = arith.addf %320, %322 : vector<2x128xf32>
    %324 = vector.extract_strided_slice %323 {offsets = [0, 0], sizes = [2, 32], strides = [1, 1]} : vector<2x128xf32> to vector<2x32xf32>
    %325 = arith.negf %324 : vector<2x32xf32>
    %326 = math.exp %325 : vector<2x32xf32>
    %cst_83 = arith.constant 1.000000e+00 : f32
    %327 = vector.broadcast %cst_83 : f32 to vector<2x32xf32>
    %328 = arith.addf %327, %326 : vector<2x32xf32>
    %329 = arith.divf %327, %328 : vector<2x32xf32>
    %330 = vector.extract_strided_slice %323 {offsets = [0, 32], sizes = [2, 32], strides = [1, 1]} : vector<2x128xf32> to vector<2x32xf32>
    %331 = arith.negf %330 : vector<2x32xf32>
    %332 = math.exp %331 : vector<2x32xf32>
    %cst_84 = arith.constant 1.000000e+00 : f32
    %333 = vector.broadcast %cst_84 : f32 to vector<2x32xf32>
    %334 = arith.addf %333, %332 : vector<2x32xf32>
    %335 = arith.divf %333, %334 : vector<2x32xf32>
    %336 = vector.extract_strided_slice %323 {offsets = [0, 64], sizes = [2, 32], strides = [1, 1]} : vector<2x128xf32> to vector<2x32xf32>
    %337 = math.tanh %336 : vector<2x32xf32>
    %338 = vector.extract_strided_slice %323 {offsets = [0, 96], sizes = [2, 32], strides = [1, 1]} : vector<2x128xf32> to vector<2x32xf32>
    %339 = arith.negf %338 : vector<2x32xf32>
    %340 = math.exp %339 : vector<2x32xf32>
    %cst_85 = arith.constant 1.000000e+00 : f32
    %341 = vector.broadcast %cst_85 : f32 to vector<2x32xf32>
    %342 = arith.addf %341, %340 : vector<2x32xf32>
    %343 = arith.divf %341, %342 : vector<2x32xf32>
    %344 = arith.mulf %335, %280 : vector<2x32xf32>
    %345 = arith.mulf %329, %337 : vector<2x32xf32>
    %346 = arith.addf %344, %345 : vector<2x32xf32>
    %347 = math.tanh %346 : vector<2x32xf32>
    %348 = arith.mulf %343, %347 : vector<2x32xf32>
    %349 = arith.truncf %348 : vector<2x32xf32> to vector<2x32xbf16>
    %c11 = arith.constant 11 : index
    %c0_86 = arith.constant 0 : index
    %c0_87 = arith.constant 0 : index
    %350 = vector.load %arg10[%c11, %c0_86, %c0_87] : memref<16x2x32xbf16, #tpu.memory_space<vmem>>, vector<1x2x32xbf16>
    %351 = vector.shape_cast %350 : vector<1x2x32xbf16> to vector<2x32xbf16>
    %352 = vector.shape_cast %349 : vector<2x32xbf16> to vector<1x2x32xbf16>
    tpu.vector_store %arg10[%c11, %c0_86, %c0_87], %352 {strides = array<i32>} : memref<16x2x32xbf16, #tpu.memory_space<vmem>>, vector<1x2x32xbf16>,
    %353 = vector.extract_strided_slice %9 {offsets = [10, 0], sizes = [2, 128], strides = [1, 1]} : vector<32x128xf32> to vector<2x128xf32>
    %354 = arith.truncf %315 : vector<2x32xf32> to vector<2x32xbf16>
    %cst_88 = arith.constant dense<0.000000e+00> : vector<2x128xf32>
    %355 = tpu.matmul %354, %17, %cst_88 {dimension_numbers = #tpu.dot_dimension_numbers<[1], [0], [0], [1], [0, 0, 1, 1], [], []>} : vector<2x32xbf16>, vector<32x128xbf16>, vector<2x128xf32> -> vector<2x128xf32>
    %356 = arith.addf %353, %355 : vector<2x128xf32>
    %357 = vector.extract_strided_slice %356 {offsets = [0, 0], sizes = [2, 32], strides = [1, 1]} : vector<2x128xf32> to vector<2x32xf32>
    %358 = arith.negf %357 : vector<2x32xf32>
    %359 = math.exp %358 : vector<2x32xf32>
    %cst_89 = arith.constant 1.000000e+00 : f32
    %360 = vector.broadcast %cst_89 : f32 to vector<2x32xf32>
    %361 = arith.addf %360, %359 : vector<2x32xf32>
    %362 = arith.divf %360, %361 : vector<2x32xf32>
    %363 = vector.extract_strided_slice %356 {offsets = [0, 32], sizes = [2, 32], strides = [1, 1]} : vector<2x128xf32> to vector<2x32xf32>
    %364 = arith.negf %363 : vector<2x32xf32>
    %365 = math.exp %364 : vector<2x32xf32>
    %cst_90 = arith.constant 1.000000e+00 : f32
    %366 = vector.broadcast %cst_90 : f32 to vector<2x32xf32>
    %367 = arith.addf %366, %365 : vector<2x32xf32>
    %368 = arith.divf %366, %367 : vector<2x32xf32>
    %369 = vector.extract_strided_slice %356 {offsets = [0, 64], sizes = [2, 32], strides = [1, 1]} : vector<2x128xf32> to vector<2x32xf32>
    %370 = math.tanh %369 : vector<2x32xf32>
    %371 = vector.extract_strided_slice %356 {offsets = [0, 96], sizes = [2, 32], strides = [1, 1]} : vector<2x128xf32> to vector<2x32xf32>
    %372 = arith.negf %371 : vector<2x32xf32>
    %373 = math.exp %372 : vector<2x32xf32>
    %cst_91 = arith.constant 1.000000e+00 : f32
    %374 = vector.broadcast %cst_91 : f32 to vector<2x32xf32>
    %375 = arith.addf %374, %373 : vector<2x32xf32>
    %376 = arith.divf %374, %375 : vector<2x32xf32>
    %377 = arith.mulf %368, %313 : vector<2x32xf32>
    %378 = arith.mulf %362, %370 : vector<2x32xf32>
    %379 = arith.addf %377, %378 : vector<2x32xf32>
    %380 = math.tanh %379 : vector<2x32xf32>
    %381 = arith.mulf %376, %380 : vector<2x32xf32>
    %382 = arith.truncf %381 : vector<2x32xf32> to vector<2x32xbf16>
    %c5 = arith.constant 5 : index
    %c0_92 = arith.constant 0 : index
    %c0_93 = arith.constant 0 : index
    %383 = vector.load %arg9[%c5, %c0_92, %c0_93] : memref<16x2x32xbf16, #tpu.memory_space<vmem>>, vector<1x2x32xbf16>
    %384 = vector.shape_cast %383 : vector<1x2x32xbf16> to vector<2x32xbf16>
    %385 = vector.shape_cast %382 : vector<2x32xbf16> to vector<1x2x32xbf16>
    tpu.vector_store %arg9[%c5, %c0_92, %c0_93], %385 {strides = array<i32>} : memref<16x2x32xbf16, #tpu.memory_space<vmem>>, vector<1x2x32xbf16>,
    %386 = vector.extract_strided_slice %16 {offsets = [20, 0], sizes = [2, 128], strides = [1, 1]} : vector<32x128xf32> to vector<2x128xf32>
    %387 = arith.truncf %348 : vector<2x32xf32> to vector<2x32xbf16>
    %cst_94 = arith.constant dense<0.000000e+00> : vector<2x128xf32>
    %388 = tpu.matmul %387, %18, %cst_94 {dimension_numbers = #tpu.dot_dimension_numbers<[1], [0], [0], [1], [0, 0, 1, 1], [], []>} : vector<2x32xbf16>, vector<32x128xbf16>, vector<2x128xf32> -> vector<2x128xf32>
    %389 = arith.addf %386, %388 : vector<2x128xf32>
    %390 = vector.extract_strided_slice %389 {offsets = [0, 0], sizes = [2, 32], strides = [1, 1]} : vector<2x128xf32> to vector<2x32xf32>
    %391 = arith.negf %390 : vector<2x32xf32>
    %392 = math.exp %391 : vector<2x32xf32>
    %cst_95 = arith.constant 1.000000e+00 : f32
    %393 = vector.broadcast %cst_95 : f32 to vector<2x32xf32>
    %394 = arith.addf %393, %392 : vector<2x32xf32>
    %395 = arith.divf %393, %394 : vector<2x32xf32>
    %396 = vector.extract_strided_slice %389 {offsets = [0, 32], sizes = [2, 32], strides = [1, 1]} : vector<2x128xf32> to vector<2x32xf32>
    %397 = arith.negf %396 : vector<2x32xf32>
    %398 = math.exp %397 : vector<2x32xf32>
    %cst_96 = arith.constant 1.000000e+00 : f32
    %399 = vector.broadcast %cst_96 : f32 to vector<2x32xf32>
    %400 = arith.addf %399, %398 : vector<2x32xf32>
    %401 = arith.divf %399, %400 : vector<2x32xf32>
    %402 = vector.extract_strided_slice %389 {offsets = [0, 64], sizes = [2, 32], strides = [1, 1]} : vector<2x128xf32> to vector<2x32xf32>
    %403 = math.tanh %402 : vector<2x32xf32>
    %404 = vector.extract_strided_slice %389 {offsets = [0, 96], sizes = [2, 32], strides = [1, 1]} : vector<2x128xf32> to vector<2x32xf32>
    %405 = arith.negf %404 : vector<2x32xf32>
    %406 = math.exp %405 : vector<2x32xf32>
    %cst_97 = arith.constant 1.000000e+00 : f32
    %407 = vector.broadcast %cst_97 : f32 to vector<2x32xf32>
    %408 = arith.addf %407, %406 : vector<2x32xf32>
    %409 = arith.divf %407, %408 : vector<2x32xf32>
    %410 = arith.mulf %401, %346 : vector<2x32xf32>
    %411 = arith.mulf %395, %403 : vector<2x32xf32>
    %412 = arith.addf %410, %411 : vector<2x32xf32>
    %413 = math.tanh %412 : vector<2x32xf32>
    %414 = arith.mulf %409, %413 : vector<2x32xf32>
    %415 = arith.truncf %414 : vector<2x32xf32> to vector<2x32xbf16>
    %c10 = arith.constant 10 : index
    %c0_98 = arith.constant 0 : index
    %c0_99 = arith.constant 0 : index
    %416 = vector.load %arg10[%c10, %c0_98, %c0_99] : memref<16x2x32xbf16, #tpu.memory_space<vmem>>, vector<1x2x32xbf16>
    %417 = vector.shape_cast %416 : vector<1x2x32xbf16> to vector<2x32xbf16>
    %418 = vector.shape_cast %415 : vector<2x32xbf16> to vector<1x2x32xbf16>
    tpu.vector_store %arg10[%c10, %c0_98, %c0_99], %418 {strides = array<i32>} : memref<16x2x32xbf16, #tpu.memory_space<vmem>>, vector<1x2x32xbf16>,
    %419 = vector.extract_strided_slice %9 {offsets = [12, 0], sizes = [2, 128], strides = [1, 1]} : vector<32x128xf32> to vector<2x128xf32>
    %420 = arith.truncf %381 : vector<2x32xf32> to vector<2x32xbf16>
    %cst_100 = arith.constant dense<0.000000e+00> : vector<2x128xf32>
    %421 = tpu.matmul %420, %17, %cst_100 {dimension_numbers = #tpu.dot_dimension_numbers<[1], [0], [0], [1], [0, 0, 1, 1], [], []>} : vector<2x32xbf16>, vector<32x128xbf16>, vector<2x128xf32> -> vector<2x128xf32>
    %422 = arith.addf %419, %421 : vector<2x128xf32>
    %423 = vector.extract_strided_slice %422 {offsets = [0, 0], sizes = [2, 32], strides = [1, 1]} : vector<2x128xf32> to vector<2x32xf32>
    %424 = arith.negf %423 : vector<2x32xf32>
    %425 = math.exp %424 : vector<2x32xf32>
    %cst_101 = arith.constant 1.000000e+00 : f32
    %426 = vector.broadcast %cst_101 : f32 to vector<2x32xf32>
    %427 = arith.addf %426, %425 : vector<2x32xf32>
    %428 = arith.divf %426, %427 : vector<2x32xf32>
    %429 = vector.extract_strided_slice %422 {offsets = [0, 32], sizes = [2, 32], strides = [1, 1]} : vector<2x128xf32> to vector<2x32xf32>
    %430 = arith.negf %429 : vector<2x32xf32>
    %431 = math.exp %430 : vector<2x32xf32>
    %cst_102 = arith.constant 1.000000e+00 : f32
    %432 = vector.broadcast %cst_102 : f32 to vector<2x32xf32>
    %433 = arith.addf %432, %431 : vector<2x32xf32>
    %434 = arith.divf %432, %433 : vector<2x32xf32>
    %435 = vector.extract_strided_slice %422 {offsets = [0, 64], sizes = [2, 32], strides = [1, 1]} : vector<2x128xf32> to vector<2x32xf32>
    %436 = math.tanh %435 : vector<2x32xf32>
    %437 = vector.extract_strided_slice %422 {offsets = [0, 96], sizes = [2, 32], strides = [1, 1]} : vector<2x128xf32> to vector<2x32xf32>
    %438 = arith.negf %437 : vector<2x32xf32>
    %439 = math.exp %438 : vector<2x32xf32>
    %cst_103 = arith.constant 1.000000e+00 : f32
    %440 = vector.broadcast %cst_103 : f32 to vector<2x32xf32>
    %441 = arith.addf %440, %439 : vector<2x32xf32>
    %442 = arith.divf %440, %441 : vector<2x32xf32>
    %443 = arith.mulf %434, %379 : vector<2x32xf32>
    %444 = arith.mulf %428, %436 : vector<2x32xf32>
    %445 = arith.addf %443, %444 : vector<2x32xf32>
    %446 = math.tanh %445 : vector<2x32xf32>
    %447 = arith.mulf %442, %446 : vector<2x32xf32>
    %448 = arith.truncf %447 : vector<2x32xf32> to vector<2x32xbf16>
    %c6 = arith.constant 6 : index
    %c0_104 = arith.constant 0 : index
    %c0_105 = arith.constant 0 : index
    %449 = vector.load %arg9[%c6, %c0_104, %c0_105] : memref<16x2x32xbf16, #tpu.memory_space<vmem>>, vector<1x2x32xbf16>
    %450 = vector.shape_cast %449 : vector<1x2x32xbf16> to vector<2x32xbf16>
    %451 = vector.shape_cast %448 : vector<2x32xbf16> to vector<1x2x32xbf16>
    tpu.vector_store %arg9[%c6, %c0_104, %c0_105], %451 {strides = array<i32>} : memref<16x2x32xbf16, #tpu.memory_space<vmem>>, vector<1x2x32xbf16>,
    %452 = vector.extract_strided_slice %16 {offsets = [18, 0], sizes = [2, 128], strides = [1, 1]} : vector<32x128xf32> to vector<2x128xf32>
    %453 = arith.truncf %414 : vector<2x32xf32> to vector<2x32xbf16>
    %cst_106 = arith.constant dense<0.000000e+00> : vector<2x128xf32>
    %454 = tpu.matmul %453, %18, %cst_106 {dimension_numbers = #tpu.dot_dimension_numbers<[1], [0], [0], [1], [0, 0, 1, 1], [], []>} : vector<2x32xbf16>, vector<32x128xbf16>, vector<2x128xf32> -> vector<2x128xf32>
    %455 = arith.addf %452, %454 : vector<2x128xf32>
    %456 = vector.extract_strided_slice %455 {offsets = [0, 0], sizes = [2, 32], strides = [1, 1]} : vector<2x128xf32> to vector<2x32xf32>
    %457 = arith.negf %456 : vector<2x32xf32>
    %458 = math.exp %457 : vector<2x32xf32>
    %cst_107 = arith.constant 1.000000e+00 : f32
    %459 = vector.broadcast %cst_107 : f32 to vector<2x32xf32>
    %460 = arith.addf %459, %458 : vector<2x32xf32>
    %461 = arith.divf %459, %460 : vector<2x32xf32>
    %462 = vector.extract_strided_slice %455 {offsets = [0, 32], sizes = [2, 32], strides = [1, 1]} : vector<2x128xf32> to vector<2x32xf32>
    %463 = arith.negf %462 : vector<2x32xf32>
    %464 = math.exp %463 : vector<2x32xf32>
    %cst_108 = arith.constant 1.000000e+00 : f32
    %465 = vector.broadcast %cst_108 : f32 to vector<2x32xf32>
    %466 = arith.addf %465, %464 : vector<2x32xf32>
    %467 = arith.divf %465, %466 : vector<2x32xf32>
    %468 = vector.extract_strided_slice %455 {offsets = [0, 64], sizes = [2, 32], strides = [1, 1]} : vector<2x128xf32> to vector<2x32xf32>
    %469 = math.tanh %468 : vector<2x32xf32>
    %470 = vector.extract_strided_slice %455 {offsets = [0, 96], sizes = [2, 32], strides = [1, 1]} : vector<2x128xf32> to vector<2x32xf32>
    %471 = arith.negf %470 : vector<2x32xf32>
    %472 = math.exp %471 : vector<2x32xf32>
    %cst_109 = arith.constant 1.000000e+00 : f32
    %473 = vector.broadcast %cst_109 : f32 to vector<2x32xf32>
    %474 = arith.addf %473, %472 : vector<2x32xf32>
    %475 = arith.divf %473, %474 : vector<2x32xf32>
    %476 = arith.mulf %467, %412 : vector<2x32xf32>
    %477 = arith.mulf %461, %469 : vector<2x32xf32>
    %478 = arith.addf %476, %477 : vector<2x32xf32>
    %479 = math.tanh %478 : vector<2x32xf32>
    %480 = arith.mulf %475, %479 : vector<2x32xf32>
    %481 = arith.truncf %480 : vector<2x32xf32> to vector<2x32xbf16>
    %c9 = arith.constant 9 : index
    %c0_110 = arith.constant 0 : index
    %c0_111 = arith.constant 0 : index
    %482 = vector.load %arg10[%c9, %c0_110, %c0_111] : memref<16x2x32xbf16, #tpu.memory_space<vmem>>, vector<1x2x32xbf16>
    %483 = vector.shape_cast %482 : vector<1x2x32xbf16> to vector<2x32xbf16>
    %484 = vector.shape_cast %481 : vector<2x32xbf16> to vector<1x2x32xbf16>
    tpu.vector_store %arg10[%c9, %c0_110, %c0_111], %484 {strides = array<i32>} : memref<16x2x32xbf16, #tpu.memory_space<vmem>>, vector<1x2x32xbf16>,
    %485 = vector.extract_strided_slice %9 {offsets = [14, 0], sizes = [2, 128], strides = [1, 1]} : vector<32x128xf32> to vector<2x128xf32>
    %486 = arith.truncf %447 : vector<2x32xf32> to vector<2x32xbf16>
    %cst_112 = arith.constant dense<0.000000e+00> : vector<2x128xf32>
    %487 = tpu.matmul %486, %17, %cst_112 {dimension_numbers = #tpu.dot_dimension_numbers<[1], [0], [0], [1], [0, 0, 1, 1], [], []>} : vector<2x32xbf16>, vector<32x128xbf16>, vector<2x128xf32> -> vector<2x128xf32>
    %488 = arith.addf %485, %487 : vector<2x128xf32>
    %489 = vector.extract_strided_slice %488 {offsets = [0, 0], sizes = [2, 32], strides = [1, 1]} : vector<2x128xf32> to vector<2x32xf32>
    %490 = arith.negf %489 : vector<2x32xf32>
    %491 = math.exp %490 : vector<2x32xf32>
    %cst_113 = arith.constant 1.000000e+00 : f32
    %492 = vector.broadcast %cst_113 : f32 to vector<2x32xf32>
    %493 = arith.addf %492, %491 : vector<2x32xf32>
    %494 = arith.divf %492, %493 : vector<2x32xf32>
    %495 = vector.extract_strided_slice %488 {offsets = [0, 32], sizes = [2, 32], strides = [1, 1]} : vector<2x128xf32> to vector<2x32xf32>
    %496 = arith.negf %495 : vector<2x32xf32>
    %497 = math.exp %496 : vector<2x32xf32>
    %cst_114 = arith.constant 1.000000e+00 : f32
    %498 = vector.broadcast %cst_114 : f32 to vector<2x32xf32>
    %499 = arith.addf %498, %497 : vector<2x32xf32>
    %500 = arith.divf %498, %499 : vector<2x32xf32>
    %501 = vector.extract_strided_slice %488 {offsets = [0, 64], sizes = [2, 32], strides = [1, 1]} : vector<2x128xf32> to vector<2x32xf32>
    %502 = math.tanh %501 : vector<2x32xf32>
    %503 = vector.extract_strided_slice %488 {offsets = [0, 96], sizes = [2, 32], strides = [1, 1]} : vector<2x128xf32> to vector<2x32xf32>
    %504 = arith.negf %503 : vector<2x32xf32>
    %505 = math.exp %504 : vector<2x32xf32>
    %cst_115 = arith.constant 1.000000e+00 : f32
    %506 = vector.broadcast %cst_115 : f32 to vector<2x32xf32>
    %507 = arith.addf %506, %505 : vector<2x32xf32>
    %508 = arith.divf %506, %507 : vector<2x32xf32>
    %509 = arith.mulf %500, %445 : vector<2x32xf32>
    %510 = arith.mulf %494, %502 : vector<2x32xf32>
    %511 = arith.addf %509, %510 : vector<2x32xf32>
    %512 = math.tanh %511 : vector<2x32xf32>
    %513 = arith.mulf %508, %512 : vector<2x32xf32>
    %514 = arith.truncf %513 : vector<2x32xf32> to vector<2x32xbf16>
    %c7 = arith.constant 7 : index
    %c0_116 = arith.constant 0 : index
    %c0_117 = arith.constant 0 : index
    %515 = vector.load %arg9[%c7, %c0_116, %c0_117] : memref<16x2x32xbf16, #tpu.memory_space<vmem>>, vector<1x2x32xbf16>
    %516 = vector.shape_cast %515 : vector<1x2x32xbf16> to vector<2x32xbf16>
    %517 = vector.shape_cast %514 : vector<2x32xbf16> to vector<1x2x32xbf16>
    tpu.vector_store %arg9[%c7, %c0_116, %c0_117], %517 {strides = array<i32>} : memref<16x2x32xbf16, #tpu.memory_space<vmem>>, vector<1x2x32xbf16>,
    %518 = vector.extract_strided_slice %16 {offsets = [16, 0], sizes = [2, 128], strides = [1, 1]} : vector<32x128xf32> to vector<2x128xf32>
    %519 = arith.truncf %480 : vector<2x32xf32> to vector<2x32xbf16>
    %cst_118 = arith.constant dense<0.000000e+00> : vector<2x128xf32>
    %520 = tpu.matmul %519, %18, %cst_118 {dimension_numbers = #tpu.dot_dimension_numbers<[1], [0], [0], [1], [0, 0, 1, 1], [], []>} : vector<2x32xbf16>, vector<32x128xbf16>, vector<2x128xf32> -> vector<2x128xf32>
    %521 = arith.addf %518, %520 : vector<2x128xf32>
    %522 = vector.extract_strided_slice %521 {offsets = [0, 0], sizes = [2, 32], strides = [1, 1]} : vector<2x128xf32> to vector<2x32xf32>
    %523 = arith.negf %522 : vector<2x32xf32>
    %524 = math.exp %523 : vector<2x32xf32>
    %cst_119 = arith.constant 1.000000e+00 : f32
    %525 = vector.broadcast %cst_119 : f32 to vector<2x32xf32>
    %526 = arith.addf %525, %524 : vector<2x32xf32>
    %527 = arith.divf %525, %526 : vector<2x32xf32>
    %528 = vector.extract_strided_slice %521 {offsets = [0, 32], sizes = [2, 32], strides = [1, 1]} : vector<2x128xf32> to vector<2x32xf32>
    %529 = arith.negf %528 : vector<2x32xf32>
    %530 = math.exp %529 : vector<2x32xf32>
    %cst_120 = arith.constant 1.000000e+00 : f32
    %531 = vector.broadcast %cst_120 : f32 to vector<2x32xf32>
    %532 = arith.addf %531, %530 : vector<2x32xf32>
    %533 = arith.divf %531, %532 : vector<2x32xf32>
    %534 = vector.extract_strided_slice %521 {offsets = [0, 64], sizes = [2, 32], strides = [1, 1]} : vector<2x128xf32> to vector<2x32xf32>
    %535 = math.tanh %534 : vector<2x32xf32>
    %536 = vector.extract_strided_slice %521 {offsets = [0, 96], sizes = [2, 32], strides = [1, 1]} : vector<2x128xf32> to vector<2x32xf32>
    %537 = arith.negf %536 : vector<2x32xf32>
    %538 = math.exp %537 : vector<2x32xf32>
    %cst_121 = arith.constant 1.000000e+00 : f32
    %539 = vector.broadcast %cst_121 : f32 to vector<2x32xf32>
    %540 = arith.addf %539, %538 : vector<2x32xf32>
    %541 = arith.divf %539, %540 : vector<2x32xf32>
    %542 = arith.mulf %533, %478 : vector<2x32xf32>
    %543 = arith.mulf %527, %535 : vector<2x32xf32>
    %544 = arith.addf %542, %543 : vector<2x32xf32>
    %545 = math.tanh %544 : vector<2x32xf32>
    %546 = arith.mulf %541, %545 : vector<2x32xf32>
    %547 = arith.truncf %546 : vector<2x32xf32> to vector<2x32xbf16>
    %c8 = arith.constant 8 : index
    %c0_122 = arith.constant 0 : index
    %c0_123 = arith.constant 0 : index
    %548 = vector.load %arg10[%c8, %c0_122, %c0_123] : memref<16x2x32xbf16, #tpu.memory_space<vmem>>, vector<1x2x32xbf16>
    %549 = vector.shape_cast %548 : vector<1x2x32xbf16> to vector<2x32xbf16>
    %550 = vector.shape_cast %547 : vector<2x32xbf16> to vector<1x2x32xbf16>
    tpu.vector_store %arg10[%c8, %c0_122, %c0_123], %550 {strides = array<i32>} : memref<16x2x32xbf16, #tpu.memory_space<vmem>>, vector<1x2x32xbf16>,
    %551 = vector.extract_strided_slice %9 {offsets = [16, 0], sizes = [2, 128], strides = [1, 1]} : vector<32x128xf32> to vector<2x128xf32>
    %552 = arith.truncf %513 : vector<2x32xf32> to vector<2x32xbf16>
    %cst_124 = arith.constant dense<0.000000e+00> : vector<2x128xf32>
    %553 = tpu.matmul %552, %17, %cst_124 {dimension_numbers = #tpu.dot_dimension_numbers<[1], [0], [0], [1], [0, 0, 1, 1], [], []>} : vector<2x32xbf16>, vector<32x128xbf16>, vector<2x128xf32> -> vector<2x128xf32>
    %554 = arith.addf %551, %553 : vector<2x128xf32>
    %555 = vector.extract_strided_slice %554 {offsets = [0, 0], sizes = [2, 32], strides = [1, 1]} : vector<2x128xf32> to vector<2x32xf32>
    %556 = arith.negf %555 : vector<2x32xf32>
    %557 = math.exp %556 : vector<2x32xf32>
    %cst_125 = arith.constant 1.000000e+00 : f32
    %558 = vector.broadcast %cst_125 : f32 to vector<2x32xf32>
    %559 = arith.addf %558, %557 : vector<2x32xf32>
    %560 = arith.divf %558, %559 : vector<2x32xf32>
    %561 = vector.extract_strided_slice %554 {offsets = [0, 32], sizes = [2, 32], strides = [1, 1]} : vector<2x128xf32> to vector<2x32xf32>
    %562 = arith.negf %561 : vector<2x32xf32>
    %563 = math.exp %562 : vector<2x32xf32>
    %cst_126 = arith.constant 1.000000e+00 : f32
    %564 = vector.broadcast %cst_126 : f32 to vector<2x32xf32>
    %565 = arith.addf %564, %563 : vector<2x32xf32>
    %566 = arith.divf %564, %565 : vector<2x32xf32>
    %567 = vector.extract_strided_slice %554 {offsets = [0, 64], sizes = [2, 32], strides = [1, 1]} : vector<2x128xf32> to vector<2x32xf32>
    %568 = math.tanh %567 : vector<2x32xf32>
    %569 = vector.extract_strided_slice %554 {offsets = [0, 96], sizes = [2, 32], strides = [1, 1]} : vector<2x128xf32> to vector<2x32xf32>
    %570 = arith.negf %569 : vector<2x32xf32>
    %571 = math.exp %570 : vector<2x32xf32>
    %cst_127 = arith.constant 1.000000e+00 : f32
    %572 = vector.broadcast %cst_127 : f32 to vector<2x32xf32>
    %573 = arith.addf %572, %571 : vector<2x32xf32>
    %574 = arith.divf %572, %573 : vector<2x32xf32>
    %575 = arith.mulf %566, %511 : vector<2x32xf32>
    %576 = arith.mulf %560, %568 : vector<2x32xf32>
    %577 = arith.addf %575, %576 : vector<2x32xf32>
    %578 = math.tanh %577 : vector<2x32xf32>
    %579 = arith.mulf %574, %578 : vector<2x32xf32>
    %580 = arith.truncf %579 : vector<2x32xf32> to vector<2x32xbf16>
    %c8_128 = arith.constant 8 : index
    %c0_129 = arith.constant 0 : index
    %c0_130 = arith.constant 0 : index
    %581 = vector.load %arg9[%c8_128, %c0_129, %c0_130] : memref<16x2x32xbf16, #tpu.memory_space<vmem>>, vector<1x2x32xbf16>
    %582 = vector.shape_cast %581 : vector<1x2x32xbf16> to vector<2x32xbf16>
    %583 = vector.shape_cast %580 : vector<2x32xbf16> to vector<1x2x32xbf16>
    tpu.vector_store %arg9[%c8_128, %c0_129, %c0_130], %583 {strides = array<i32>} : memref<16x2x32xbf16, #tpu.memory_space<vmem>>, vector<1x2x32xbf16>,
    %584 = vector.extract_strided_slice %16 {offsets = [14, 0], sizes = [2, 128], strides = [1, 1]} : vector<32x128xf32> to vector<2x128xf32>
    %585 = arith.truncf %546 : vector<2x32xf32> to vector<2x32xbf16>
    %cst_131 = arith.constant dense<0.000000e+00> : vector<2x128xf32>
    %586 = tpu.matmul %585, %18, %cst_131 {dimension_numbers = #tpu.dot_dimension_numbers<[1], [0], [0], [1], [0, 0, 1, 1], [], []>} : vector<2x32xbf16>, vector<32x128xbf16>, vector<2x128xf32> -> vector<2x128xf32>
    %587 = arith.addf %584, %586 : vector<2x128xf32>
    %588 = vector.extract_strided_slice %587 {offsets = [0, 0], sizes = [2, 32], strides = [1, 1]} : vector<2x128xf32> to vector<2x32xf32>
    %589 = arith.negf %588 : vector<2x32xf32>
    %590 = math.exp %589 : vector<2x32xf32>
    %cst_132 = arith.constant 1.000000e+00 : f32
    %591 = vector.broadcast %cst_132 : f32 to vector<2x32xf32>
    %592 = arith.addf %591, %590 : vector<2x32xf32>
    %593 = arith.divf %591, %592 : vector<2x32xf32>
    %594 = vector.extract_strided_slice %587 {offsets = [0, 32], sizes = [2, 32], strides = [1, 1]} : vector<2x128xf32> to vector<2x32xf32>
    %595 = arith.negf %594 : vector<2x32xf32>
    %596 = math.exp %595 : vector<2x32xf32>
    %cst_133 = arith.constant 1.000000e+00 : f32
    %597 = vector.broadcast %cst_133 : f32 to vector<2x32xf32>
    %598 = arith.addf %597, %596 : vector<2x32xf32>
    %599 = arith.divf %597, %598 : vector<2x32xf32>
    %600 = vector.extract_strided_slice %587 {offsets = [0, 64], sizes = [2, 32], strides = [1, 1]} : vector<2x128xf32> to vector<2x32xf32>
    %601 = math.tanh %600 : vector<2x32xf32>
    %602 = vector.extract_strided_slice %587 {offsets = [0, 96], sizes = [2, 32], strides = [1, 1]} : vector<2x128xf32> to vector<2x32xf32>
    %603 = arith.negf %602 : vector<2x32xf32>
    %604 = math.exp %603 : vector<2x32xf32>
    %cst_134 = arith.constant 1.000000e+00 : f32
    %605 = vector.broadcast %cst_134 : f32 to vector<2x32xf32>
    %606 = arith.addf %605, %604 : vector<2x32xf32>
    %607 = arith.divf %605, %606 : vector<2x32xf32>
    %608 = arith.mulf %599, %544 : vector<2x32xf32>
    %609 = arith.mulf %593, %601 : vector<2x32xf32>
    %610 = arith.addf %608, %609 : vector<2x32xf32>
    %611 = math.tanh %610 : vector<2x32xf32>
    %612 = arith.mulf %607, %611 : vector<2x32xf32>
    %613 = arith.truncf %612 : vector<2x32xf32> to vector<2x32xbf16>
    %c7_135 = arith.constant 7 : index
    %c0_136 = arith.constant 0 : index
    %c0_137 = arith.constant 0 : index
    %614 = vector.load %arg10[%c7_135, %c0_136, %c0_137] : memref<16x2x32xbf16, #tpu.memory_space<vmem>>, vector<1x2x32xbf16>
    %615 = vector.shape_cast %614 : vector<1x2x32xbf16> to vector<2x32xbf16>
    %616 = vector.shape_cast %613 : vector<2x32xbf16> to vector<1x2x32xbf16>
    tpu.vector_store %arg10[%c7_135, %c0_136, %c0_137], %616 {strides = array<i32>} : memref<16x2x32xbf16, #tpu.memory_space<vmem>>, vector<1x2x32xbf16>,
    %617 = vector.extract_strided_slice %9 {offsets = [18, 0], sizes = [2, 128], strides = [1, 1]} : vector<32x128xf32> to vector<2x128xf32>
    %618 = arith.truncf %579 : vector<2x32xf32> to vector<2x32xbf16>
    %cst_138 = arith.constant dense<0.000000e+00> : vector<2x128xf32>
    %619 = tpu.matmul %618, %17, %cst_138 {dimension_numbers = #tpu.dot_dimension_numbers<[1], [0], [0], [1], [0, 0, 1, 1], [], []>} : vector<2x32xbf16>, vector<32x128xbf16>, vector<2x128xf32> -> vector<2x128xf32>
    %620 = arith.addf %617, %619 : vector<2x128xf32>
    %621 = vector.extract_strided_slice %620 {offsets = [0, 0], sizes = [2, 32], strides = [1, 1]} : vector<2x128xf32> to vector<2x32xf32>
    %622 = arith.negf %621 : vector<2x32xf32>
    %623 = math.exp %622 : vector<2x32xf32>
    %cst_139 = arith.constant 1.000000e+00 : f32
    %624 = vector.broadcast %cst_139 : f32 to vector<2x32xf32>
    %625 = arith.addf %624, %623 : vector<2x32xf32>
    %626 = arith.divf %624, %625 : vector<2x32xf32>
    %627 = vector.extract_strided_slice %620 {offsets = [0, 32], sizes = [2, 32], strides = [1, 1]} : vector<2x128xf32> to vector<2x32xf32>
    %628 = arith.negf %627 : vector<2x32xf32>
    %629 = math.exp %628 : vector<2x32xf32>
    %cst_140 = arith.constant 1.000000e+00 : f32
    %630 = vector.broadcast %cst_140 : f32 to vector<2x32xf32>
    %631 = arith.addf %630, %629 : vector<2x32xf32>
    %632 = arith.divf %630, %631 : vector<2x32xf32>
    %633 = vector.extract_strided_slice %620 {offsets = [0, 64], sizes = [2, 32], strides = [1, 1]} : vector<2x128xf32> to vector<2x32xf32>
    %634 = math.tanh %633 : vector<2x32xf32>
    %635 = vector.extract_strided_slice %620 {offsets = [0, 96], sizes = [2, 32], strides = [1, 1]} : vector<2x128xf32> to vector<2x32xf32>
    %636 = arith.negf %635 : vector<2x32xf32>
    %637 = math.exp %636 : vector<2x32xf32>
    %cst_141 = arith.constant 1.000000e+00 : f32
    %638 = vector.broadcast %cst_141 : f32 to vector<2x32xf32>
    %639 = arith.addf %638, %637 : vector<2x32xf32>
    %640 = arith.divf %638, %639 : vector<2x32xf32>
    %641 = arith.mulf %632, %577 : vector<2x32xf32>
    %642 = arith.mulf %626, %634 : vector<2x32xf32>
    %643 = arith.addf %641, %642 : vector<2x32xf32>
    %644 = math.tanh %643 : vector<2x32xf32>
    %645 = arith.mulf %640, %644 : vector<2x32xf32>
    %646 = arith.truncf %645 : vector<2x32xf32> to vector<2x32xbf16>
    %c9_142 = arith.constant 9 : index
    %c0_143 = arith.constant 0 : index
    %c0_144 = arith.constant 0 : index
    %647 = vector.load %arg9[%c9_142, %c0_143, %c0_144] : memref<16x2x32xbf16, #tpu.memory_space<vmem>>, vector<1x2x32xbf16>
    %648 = vector.shape_cast %647 : vector<1x2x32xbf16> to vector<2x32xbf16>
    %649 = vector.shape_cast %646 : vector<2x32xbf16> to vector<1x2x32xbf16>
    tpu.vector_store %arg9[%c9_142, %c0_143, %c0_144], %649 {strides = array<i32>} : memref<16x2x32xbf16, #tpu.memory_space<vmem>>, vector<1x2x32xbf16>,
    %650 = vector.extract_strided_slice %16 {offsets = [12, 0], sizes = [2, 128], strides = [1, 1]} : vector<32x128xf32> to vector<2x128xf32>
    %651 = arith.truncf %612 : vector<2x32xf32> to vector<2x32xbf16>
    %cst_145 = arith.constant dense<0.000000e+00> : vector<2x128xf32>
    %652 = tpu.matmul %651, %18, %cst_145 {dimension_numbers = #tpu.dot_dimension_numbers<[1], [0], [0], [1], [0, 0, 1, 1], [], []>} : vector<2x32xbf16>, vector<32x128xbf16>, vector<2x128xf32> -> vector<2x128xf32>
    %653 = arith.addf %650, %652 : vector<2x128xf32>
    %654 = vector.extract_strided_slice %653 {offsets = [0, 0], sizes = [2, 32], strides = [1, 1]} : vector<2x128xf32> to vector<2x32xf32>
    %655 = arith.negf %654 : vector<2x32xf32>
    %656 = math.exp %655 : vector<2x32xf32>
    %cst_146 = arith.constant 1.000000e+00 : f32
    %657 = vector.broadcast %cst_146 : f32 to vector<2x32xf32>
    %658 = arith.addf %657, %656 : vector<2x32xf32>
    %659 = arith.divf %657, %658 : vector<2x32xf32>
    %660 = vector.extract_strided_slice %653 {offsets = [0, 32], sizes = [2, 32], strides = [1, 1]} : vector<2x128xf32> to vector<2x32xf32>
    %661 = arith.negf %660 : vector<2x32xf32>
    %662 = math.exp %661 : vector<2x32xf32>
    %cst_147 = arith.constant 1.000000e+00 : f32
    %663 = vector.broadcast %cst_147 : f32 to vector<2x32xf32>
    %664 = arith.addf %663, %662 : vector<2x32xf32>
    %665 = arith.divf %663, %664 : vector<2x32xf32>
    %666 = vector.extract_strided_slice %653 {offsets = [0, 64], sizes = [2, 32], strides = [1, 1]} : vector<2x128xf32> to vector<2x32xf32>
    %667 = math.tanh %666 : vector<2x32xf32>
    %668 = vector.extract_strided_slice %653 {offsets = [0, 96], sizes = [2, 32], strides = [1, 1]} : vector<2x128xf32> to vector<2x32xf32>
    %669 = arith.negf %668 : vector<2x32xf32>
    %670 = math.exp %669 : vector<2x32xf32>
    %cst_148 = arith.constant 1.000000e+00 : f32
    %671 = vector.broadcast %cst_148 : f32 to vector<2x32xf32>
    %672 = arith.addf %671, %670 : vector<2x32xf32>
    %673 = arith.divf %671, %672 : vector<2x32xf32>
    %674 = arith.mulf %665, %610 : vector<2x32xf32>
    %675 = arith.mulf %659, %667 : vector<2x32xf32>
    %676 = arith.addf %674, %675 : vector<2x32xf32>
    %677 = math.tanh %676 : vector<2x32xf32>
    %678 = arith.mulf %673, %677 : vector<2x32xf32>
    %679 = arith.truncf %678 : vector<2x32xf32> to vector<2x32xbf16>
    %c6_149 = arith.constant 6 : index
    %c0_150 = arith.constant 0 : index
    %c0_151 = arith.constant 0 : index
    %680 = vector.load %arg10[%c6_149, %c0_150, %c0_151] : memref<16x2x32xbf16, #tpu.memory_space<vmem>>, vector<1x2x32xbf16>
    %681 = vector.shape_cast %680 : vector<1x2x32xbf16> to vector<2x32xbf16>
    %682 = vector.shape_cast %679 : vector<2x32xbf16> to vector<1x2x32xbf16>
    tpu.vector_store %arg10[%c6_149, %c0_150, %c0_151], %682 {strides = array<i32>} : memref<16x2x32xbf16, #tpu.memory_space<vmem>>, vector<1x2x32xbf16>,
    %683 = vector.extract_strided_slice %9 {offsets = [20, 0], sizes = [2, 128], strides = [1, 1]} : vector<32x128xf32> to vector<2x128xf32>
    %684 = arith.truncf %645 : vector<2x32xf32> to vector<2x32xbf16>
    %cst_152 = arith.constant dense<0.000000e+00> : vector<2x128xf32>
    %685 = tpu.matmul %684, %17, %cst_152 {dimension_numbers = #tpu.dot_dimension_numbers<[1], [0], [0], [1], [0, 0, 1, 1], [], []>} : vector<2x32xbf16>, vector<32x128xbf16>, vector<2x128xf32> -> vector<2x128xf32>
    %686 = arith.addf %683, %685 : vector<2x128xf32>
    %687 = vector.extract_strided_slice %686 {offsets = [0, 0], sizes = [2, 32], strides = [1, 1]} : vector<2x128xf32> to vector<2x32xf32>
    %688 = arith.negf %687 : vector<2x32xf32>
    %689 = math.exp %688 : vector<2x32xf32>
    %cst_153 = arith.constant 1.000000e+00 : f32
    %690 = vector.broadcast %cst_153 : f32 to vector<2x32xf32>
    %691 = arith.addf %690, %689 : vector<2x32xf32>
    %692 = arith.divf %690, %691 : vector<2x32xf32>
    %693 = vector.extract_strided_slice %686 {offsets = [0, 32], sizes = [2, 32], strides = [1, 1]} : vector<2x128xf32> to vector<2x32xf32>
    %694 = arith.negf %693 : vector<2x32xf32>
    %695 = math.exp %694 : vector<2x32xf32>
    %cst_154 = arith.constant 1.000000e+00 : f32
    %696 = vector.broadcast %cst_154 : f32 to vector<2x32xf32>
    %697 = arith.addf %696, %695 : vector<2x32xf32>
    %698 = arith.divf %696, %697 : vector<2x32xf32>
    %699 = vector.extract_strided_slice %686 {offsets = [0, 64], sizes = [2, 32], strides = [1, 1]} : vector<2x128xf32> to vector<2x32xf32>
    %700 = math.tanh %699 : vector<2x32xf32>
    %701 = vector.extract_strided_slice %686 {offsets = [0, 96], sizes = [2, 32], strides = [1, 1]} : vector<2x128xf32> to vector<2x32xf32>
    %702 = arith.negf %701 : vector<2x32xf32>
    %703 = math.exp %702 : vector<2x32xf32>
    %cst_155 = arith.constant 1.000000e+00 : f32
    %704 = vector.broadcast %cst_155 : f32 to vector<2x32xf32>
    %705 = arith.addf %704, %703 : vector<2x32xf32>
    %706 = arith.divf %704, %705 : vector<2x32xf32>
    %707 = arith.mulf %698, %643 : vector<2x32xf32>
    %708 = arith.mulf %692, %700 : vector<2x32xf32>
    %709 = arith.addf %707, %708 : vector<2x32xf32>
    %710 = math.tanh %709 : vector<2x32xf32>
    %711 = arith.mulf %706, %710 : vector<2x32xf32>
    %712 = arith.truncf %711 : vector<2x32xf32> to vector<2x32xbf16>
    %c10_156 = arith.constant 10 : index
    %c0_157 = arith.constant 0 : index
    %c0_158 = arith.constant 0 : index
    %713 = vector.load %arg9[%c10_156, %c0_157, %c0_158] : memref<16x2x32xbf16, #tpu.memory_space<vmem>>, vector<1x2x32xbf16>
    %714 = vector.shape_cast %713 : vector<1x2x32xbf16> to vector<2x32xbf16>
    %715 = vector.shape_cast %712 : vector<2x32xbf16> to vector<1x2x32xbf16>
    tpu.vector_store %arg9[%c10_156, %c0_157, %c0_158], %715 {strides = array<i32>} : memref<16x2x32xbf16, #tpu.memory_space<vmem>>, vector<1x2x32xbf16>,
    %716 = vector.extract_strided_slice %16 {offsets = [10, 0], sizes = [2, 128], strides = [1, 1]} : vector<32x128xf32> to vector<2x128xf32>
    %717 = arith.truncf %678 : vector<2x32xf32> to vector<2x32xbf16>
    %cst_159 = arith.constant dense<0.000000e+00> : vector<2x128xf32>
    %718 = tpu.matmul %717, %18, %cst_159 {dimension_numbers = #tpu.dot_dimension_numbers<[1], [0], [0], [1], [0, 0, 1, 1], [], []>} : vector<2x32xbf16>, vector<32x128xbf16>, vector<2x128xf32> -> vector<2x128xf32>
    %719 = arith.addf %716, %718 : vector<2x128xf32>
    %720 = vector.extract_strided_slice %719 {offsets = [0, 0], sizes = [2, 32], strides = [1, 1]} : vector<2x128xf32> to vector<2x32xf32>
    %721 = arith.negf %720 : vector<2x32xf32>
    %722 = math.exp %721 : vector<2x32xf32>
    %cst_160 = arith.constant 1.000000e+00 : f32
    %723 = vector.broadcast %cst_160 : f32 to vector<2x32xf32>
    %724 = arith.addf %723, %722 : vector<2x32xf32>
    %725 = arith.divf %723, %724 : vector<2x32xf32>
    %726 = vector.extract_strided_slice %719 {offsets = [0, 32], sizes = [2, 32], strides = [1, 1]} : vector<2x128xf32> to vector<2x32xf32>
    %727 = arith.negf %726 : vector<2x32xf32>
    %728 = math.exp %727 : vector<2x32xf32>
    %cst_161 = arith.constant 1.000000e+00 : f32
    %729 = vector.broadcast %cst_161 : f32 to vector<2x32xf32>
    %730 = arith.addf %729, %728 : vector<2x32xf32>
    %731 = arith.divf %729, %730 : vector<2x32xf32>
    %732 = vector.extract_strided_slice %719 {offsets = [0, 64], sizes = [2, 32], strides = [1, 1]} : vector<2x128xf32> to vector<2x32xf32>
    %733 = math.tanh %732 : vector<2x32xf32>
    %734 = vector.extract_strided_slice %719 {offsets = [0, 96], sizes = [2, 32], strides = [1, 1]} : vector<2x128xf32> to vector<2x32xf32>
    %735 = arith.negf %734 : vector<2x32xf32>
    %736 = math.exp %735 : vector<2x32xf32>
    %cst_162 = arith.constant 1.000000e+00 : f32
    %737 = vector.broadcast %cst_162 : f32 to vector<2x32xf32>
    %738 = arith.addf %737, %736 : vector<2x32xf32>
    %739 = arith.divf %737, %738 : vector<2x32xf32>
    %740 = arith.mulf %731, %676 : vector<2x32xf32>
    %741 = arith.mulf %725, %733 : vector<2x32xf32>
    %742 = arith.addf %740, %741 : vector<2x32xf32>
    %743 = math.tanh %742 : vector<2x32xf32>
    %744 = arith.mulf %739, %743 : vector<2x32xf32>
    %745 = arith.truncf %744 : vector<2x32xf32> to vector<2x32xbf16>
    %c5_163 = arith.constant 5 : index
    %c0_164 = arith.constant 0 : index
    %c0_165 = arith.constant 0 : index
    %746 = vector.load %arg10[%c5_163, %c0_164, %c0_165] : memref<16x2x32xbf16, #tpu.memory_space<vmem>>, vector<1x2x32xbf16>
    %747 = vector.shape_cast %746 : vector<1x2x32xbf16> to vector<2x32xbf16>
    %748 = vector.shape_cast %745 : vector<2x32xbf16> to vector<1x2x32xbf16>
    tpu.vector_store %arg10[%c5_163, %c0_164, %c0_165], %748 {strides = array<i32>} : memref<16x2x32xbf16, #tpu.memory_space<vmem>>, vector<1x2x32xbf16>,
    %749 = vector.extract_strided_slice %9 {offsets = [22, 0], sizes = [2, 128], strides = [1, 1]} : vector<32x128xf32> to vector<2x128xf32>
    %750 = arith.truncf %711 : vector<2x32xf32> to vector<2x32xbf16>
    %cst_166 = arith.constant dense<0.000000e+00> : vector<2x128xf32>
    %751 = tpu.matmul %750, %17, %cst_166 {dimension_numbers = #tpu.dot_dimension_numbers<[1], [0], [0], [1], [0, 0, 1, 1], [], []>} : vector<2x32xbf16>, vector<32x128xbf16>, vector<2x128xf32> -> vector<2x128xf32>
    %752 = arith.addf %749, %751 : vector<2x128xf32>
    %753 = vector.extract_strided_slice %752 {offsets = [0, 0], sizes = [2, 32], strides = [1, 1]} : vector<2x128xf32> to vector<2x32xf32>
    %754 = arith.negf %753 : vector<2x32xf32>
    %755 = math.exp %754 : vector<2x32xf32>
    %cst_167 = arith.constant 1.000000e+00 : f32
    %756 = vector.broadcast %cst_167 : f32 to vector<2x32xf32>
    %757 = arith.addf %756, %755 : vector<2x32xf32>
    %758 = arith.divf %756, %757 : vector<2x32xf32>
    %759 = vector.extract_strided_slice %752 {offsets = [0, 32], sizes = [2, 32], strides = [1, 1]} : vector<2x128xf32> to vector<2x32xf32>
    %760 = arith.negf %759 : vector<2x32xf32>
    %761 = math.exp %760 : vector<2x32xf32>
    %cst_168 = arith.constant 1.000000e+00 : f32
    %762 = vector.broadcast %cst_168 : f32 to vector<2x32xf32>
    %763 = arith.addf %762, %761 : vector<2x32xf32>
    %764 = arith.divf %762, %763 : vector<2x32xf32>
    %765 = vector.extract_strided_slice %752 {offsets = [0, 64], sizes = [2, 32], strides = [1, 1]} : vector<2x128xf32> to vector<2x32xf32>
    %766 = math.tanh %765 : vector<2x32xf32>
    %767 = vector.extract_strided_slice %752 {offsets = [0, 96], sizes = [2, 32], strides = [1, 1]} : vector<2x128xf32> to vector<2x32xf32>
    %768 = arith.negf %767 : vector<2x32xf32>
    %769 = math.exp %768 : vector<2x32xf32>
    %cst_169 = arith.constant 1.000000e+00 : f32
    %770 = vector.broadcast %cst_169 : f32 to vector<2x32xf32>
    %771 = arith.addf %770, %769 : vector<2x32xf32>
    %772 = arith.divf %770, %771 : vector<2x32xf32>
    %773 = arith.mulf %764, %709 : vector<2x32xf32>
    %774 = arith.mulf %758, %766 : vector<2x32xf32>
    %775 = arith.addf %773, %774 : vector<2x32xf32>
    %776 = math.tanh %775 : vector<2x32xf32>
    %777 = arith.mulf %772, %776 : vector<2x32xf32>
    %778 = arith.truncf %777 : vector<2x32xf32> to vector<2x32xbf16>
    %c11_170 = arith.constant 11 : index
    %c0_171 = arith.constant 0 : index
    %c0_172 = arith.constant 0 : index
    %779 = vector.load %arg9[%c11_170, %c0_171, %c0_172] : memref<16x2x32xbf16, #tpu.memory_space<vmem>>, vector<1x2x32xbf16>
    %780 = vector.shape_cast %779 : vector<1x2x32xbf16> to vector<2x32xbf16>
    %781 = vector.shape_cast %778 : vector<2x32xbf16> to vector<1x2x32xbf16>
    tpu.vector_store %arg9[%c11_170, %c0_171, %c0_172], %781 {strides = array<i32>} : memref<16x2x32xbf16, #tpu.memory_space<vmem>>, vector<1x2x32xbf16>,
    %782 = vector.extract_strided_slice %16 {offsets = [8, 0], sizes = [2, 128], strides = [1, 1]} : vector<32x128xf32> to vector<2x128xf32>
    %783 = arith.truncf %744 : vector<2x32xf32> to vector<2x32xbf16>
    %cst_173 = arith.constant dense<0.000000e+00> : vector<2x128xf32>
    %784 = tpu.matmul %783, %18, %cst_173 {dimension_numbers = #tpu.dot_dimension_numbers<[1], [0], [0], [1], [0, 0, 1, 1], [], []>} : vector<2x32xbf16>, vector<32x128xbf16>, vector<2x128xf32> -> vector<2x128xf32>
    %785 = arith.addf %782, %784 : vector<2x128xf32>
    %786 = vector.extract_strided_slice %785 {offsets = [0, 0], sizes = [2, 32], strides = [1, 1]} : vector<2x128xf32> to vector<2x32xf32>
    %787 = arith.negf %786 : vector<2x32xf32>
    %788 = math.exp %787 : vector<2x32xf32>
    %cst_174 = arith.constant 1.000000e+00 : f32
    %789 = vector.broadcast %cst_174 : f32 to vector<2x32xf32>
    %790 = arith.addf %789, %788 : vector<2x32xf32>
    %791 = arith.divf %789, %790 : vector<2x32xf32>
    %792 = vector.extract_strided_slice %785 {offsets = [0, 32], sizes = [2, 32], strides = [1, 1]} : vector<2x128xf32> to vector<2x32xf32>
    %793 = arith.negf %792 : vector<2x32xf32>
    %794 = math.exp %793 : vector<2x32xf32>
    %cst_175 = arith.constant 1.000000e+00 : f32
    %795 = vector.broadcast %cst_175 : f32 to vector<2x32xf32>
    %796 = arith.addf %795, %794 : vector<2x32xf32>
    %797 = arith.divf %795, %796 : vector<2x32xf32>
    %798 = vector.extract_strided_slice %785 {offsets = [0, 64], sizes = [2, 32], strides = [1, 1]} : vector<2x128xf32> to vector<2x32xf32>
    %799 = math.tanh %798 : vector<2x32xf32>
    %800 = vector.extract_strided_slice %785 {offsets = [0, 96], sizes = [2, 32], strides = [1, 1]} : vector<2x128xf32> to vector<2x32xf32>
    %801 = arith.negf %800 : vector<2x32xf32>
    %802 = math.exp %801 : vector<2x32xf32>
    %cst_176 = arith.constant 1.000000e+00 : f32
    %803 = vector.broadcast %cst_176 : f32 to vector<2x32xf32>
    %804 = arith.addf %803, %802 : vector<2x32xf32>
    %805 = arith.divf %803, %804 : vector<2x32xf32>
    %806 = arith.mulf %797, %742 : vector<2x32xf32>
    %807 = arith.mulf %791, %799 : vector<2x32xf32>
    %808 = arith.addf %806, %807 : vector<2x32xf32>
    %809 = math.tanh %808 : vector<2x32xf32>
    %810 = arith.mulf %805, %809 : vector<2x32xf32>
    %811 = arith.truncf %810 : vector<2x32xf32> to vector<2x32xbf16>
    %c4_177 = arith.constant 4 : index
    %c0_178 = arith.constant 0 : index
    %c0_179 = arith.constant 0 : index
    %812 = vector.load %arg10[%c4_177, %c0_178, %c0_179] : memref<16x2x32xbf16, #tpu.memory_space<vmem>>, vector<1x2x32xbf16>
    %813 = vector.shape_cast %812 : vector<1x2x32xbf16> to vector<2x32xbf16>
    %814 = vector.shape_cast %811 : vector<2x32xbf16> to vector<1x2x32xbf16>
    tpu.vector_store %arg10[%c4_177, %c0_178, %c0_179], %814 {strides = array<i32>} : memref<16x2x32xbf16, #tpu.memory_space<vmem>>, vector<1x2x32xbf16>,
    %815 = vector.extract_strided_slice %9 {offsets = [24, 0], sizes = [2, 128], strides = [1, 1]} : vector<32x128xf32> to vector<2x128xf32>
    %816 = arith.truncf %777 : vector<2x32xf32> to vector<2x32xbf16>
    %cst_180 = arith.constant dense<0.000000e+00> : vector<2x128xf32>
    %817 = tpu.matmul %816, %17, %cst_180 {dimension_numbers = #tpu.dot_dimension_numbers<[1], [0], [0], [1], [0, 0, 1, 1], [], []>} : vector<2x32xbf16>, vector<32x128xbf16>, vector<2x128xf32> -> vector<2x128xf32>
    %818 = arith.addf %815, %817 : vector<2x128xf32>
    %819 = vector.extract_strided_slice %818 {offsets = [0, 0], sizes = [2, 32], strides = [1, 1]} : vector<2x128xf32> to vector<2x32xf32>
    %820 = arith.negf %819 : vector<2x32xf32>
    %821 = math.exp %820 : vector<2x32xf32>
    %cst_181 = arith.constant 1.000000e+00 : f32
    %822 = vector.broadcast %cst_181 : f32 to vector<2x32xf32>
    %823 = arith.addf %822, %821 : vector<2x32xf32>
    %824 = arith.divf %822, %823 : vector<2x32xf32>
    %825 = vector.extract_strided_slice %818 {offsets = [0, 32], sizes = [2, 32], strides = [1, 1]} : vector<2x128xf32> to vector<2x32xf32>
    %826 = arith.negf %825 : vector<2x32xf32>
    %827 = math.exp %826 : vector<2x32xf32>
    %cst_182 = arith.constant 1.000000e+00 : f32
    %828 = vector.broadcast %cst_182 : f32 to vector<2x32xf32>
    %829 = arith.addf %828, %827 : vector<2x32xf32>
    %830 = arith.divf %828, %829 : vector<2x32xf32>
    %831 = vector.extract_strided_slice %818 {offsets = [0, 64], sizes = [2, 32], strides = [1, 1]} : vector<2x128xf32> to vector<2x32xf32>
    %832 = math.tanh %831 : vector<2x32xf32>
    %833 = vector.extract_strided_slice %818 {offsets = [0, 96], sizes = [2, 32], strides = [1, 1]} : vector<2x128xf32> to vector<2x32xf32>
    %834 = arith.negf %833 : vector<2x32xf32>
    %835 = math.exp %834 : vector<2x32xf32>
    %cst_183 = arith.constant 1.000000e+00 : f32
    %836 = vector.broadcast %cst_183 : f32 to vector<2x32xf32>
    %837 = arith.addf %836, %835 : vector<2x32xf32>
    %838 = arith.divf %836, %837 : vector<2x32xf32>
    %839 = arith.mulf %830, %775 : vector<2x32xf32>
    %840 = arith.mulf %824, %832 : vector<2x32xf32>
    %841 = arith.addf %839, %840 : vector<2x32xf32>
    %842 = math.tanh %841 : vector<2x32xf32>
    %843 = arith.mulf %838, %842 : vector<2x32xf32>
    %844 = arith.truncf %843 : vector<2x32xf32> to vector<2x32xbf16>
    %c12_184 = arith.constant 12 : index
    %c0_185 = arith.constant 0 : index
    %c0_186 = arith.constant 0 : index
    %845 = vector.load %arg9[%c12_184, %c0_185, %c0_186] : memref<16x2x32xbf16, #tpu.memory_space<vmem>>, vector<1x2x32xbf16>
    %846 = vector.shape_cast %845 : vector<1x2x32xbf16> to vector<2x32xbf16>
    %847 = vector.shape_cast %844 : vector<2x32xbf16> to vector<1x2x32xbf16>
    tpu.vector_store %arg9[%c12_184, %c0_185, %c0_186], %847 {strides = array<i32>} : memref<16x2x32xbf16, #tpu.memory_space<vmem>>, vector<1x2x32xbf16>,
    %848 = vector.extract_strided_slice %16 {offsets = [6, 0], sizes = [2, 128], strides = [1, 1]} : vector<32x128xf32> to vector<2x128xf32>
    %849 = arith.truncf %810 : vector<2x32xf32> to vector<2x32xbf16>
    %cst_187 = arith.constant dense<0.000000e+00> : vector<2x128xf32>
    %850 = tpu.matmul %849, %18, %cst_187 {dimension_numbers = #tpu.dot_dimension_numbers<[1], [0], [0], [1], [0, 0, 1, 1], [], []>} : vector<2x32xbf16>, vector<32x128xbf16>, vector<2x128xf32> -> vector<2x128xf32>
    %851 = arith.addf %848, %850 : vector<2x128xf32>
    %852 = vector.extract_strided_slice %851 {offsets = [0, 0], sizes = [2, 32], strides = [1, 1]} : vector<2x128xf32> to vector<2x32xf32>
    %853 = arith.negf %852 : vector<2x32xf32>
    %854 = math.exp %853 : vector<2x32xf32>
    %cst_188 = arith.constant 1.000000e+00 : f32
    %855 = vector.broadcast %cst_188 : f32 to vector<2x32xf32>
    %856 = arith.addf %855, %854 : vector<2x32xf32>
    %857 = arith.divf %855, %856 : vector<2x32xf32>
    %858 = vector.extract_strided_slice %851 {offsets = [0, 32], sizes = [2, 32], strides = [1, 1]} : vector<2x128xf32> to vector<2x32xf32>
    %859 = arith.negf %858 : vector<2x32xf32>
    %860 = math.exp %859 : vector<2x32xf32>
    %cst_189 = arith.constant 1.000000e+00 : f32
    %861 = vector.broadcast %cst_189 : f32 to vector<2x32xf32>
    %862 = arith.addf %861, %860 : vector<2x32xf32>
    %863 = arith.divf %861, %862 : vector<2x32xf32>
    %864 = vector.extract_strided_slice %851 {offsets = [0, 64], sizes = [2, 32], strides = [1, 1]} : vector<2x128xf32> to vector<2x32xf32>
    %865 = math.tanh %864 : vector<2x32xf32>
    %866 = vector.extract_strided_slice %851 {offsets = [0, 96], sizes = [2, 32], strides = [1, 1]} : vector<2x128xf32> to vector<2x32xf32>
    %867 = arith.negf %866 : vector<2x32xf32>
    %868 = math.exp %867 : vector<2x32xf32>
    %cst_190 = arith.constant 1.000000e+00 : f32
    %869 = vector.broadcast %cst_190 : f32 to vector<2x32xf32>
    %870 = arith.addf %869, %868 : vector<2x32xf32>
    %871 = arith.divf %869, %870 : vector<2x32xf32>
    %872 = arith.mulf %863, %808 : vector<2x32xf32>
    %873 = arith.mulf %857, %865 : vector<2x32xf32>
    %874 = arith.addf %872, %873 : vector<2x32xf32>
    %875 = math.tanh %874 : vector<2x32xf32>
    %876 = arith.mulf %871, %875 : vector<2x32xf32>
    %877 = arith.truncf %876 : vector<2x32xf32> to vector<2x32xbf16>
    %c3_191 = arith.constant 3 : index
    %c0_192 = arith.constant 0 : index
    %c0_193 = arith.constant 0 : index
    %878 = vector.load %arg10[%c3_191, %c0_192, %c0_193] : memref<16x2x32xbf16, #tpu.memory_space<vmem>>, vector<1x2x32xbf16>
    %879 = vector.shape_cast %878 : vector<1x2x32xbf16> to vector<2x32xbf16>
    %880 = vector.shape_cast %877 : vector<2x32xbf16> to vector<1x2x32xbf16>
    tpu.vector_store %arg10[%c3_191, %c0_192, %c0_193], %880 {strides = array<i32>} : memref<16x2x32xbf16, #tpu.memory_space<vmem>>, vector<1x2x32xbf16>,
    %881 = vector.extract_strided_slice %9 {offsets = [26, 0], sizes = [2, 128], strides = [1, 1]} : vector<32x128xf32> to vector<2x128xf32>
    %882 = arith.truncf %843 : vector<2x32xf32> to vector<2x32xbf16>
    %cst_194 = arith.constant dense<0.000000e+00> : vector<2x128xf32>
    %883 = tpu.matmul %882, %17, %cst_194 {dimension_numbers = #tpu.dot_dimension_numbers<[1], [0], [0], [1], [0, 0, 1, 1], [], []>} : vector<2x32xbf16>, vector<32x128xbf16>, vector<2x128xf32> -> vector<2x128xf32>
    %884 = arith.addf %881, %883 : vector<2x128xf32>
    %885 = vector.extract_strided_slice %884 {offsets = [0, 0], sizes = [2, 32], strides = [1, 1]} : vector<2x128xf32> to vector<2x32xf32>
    %886 = arith.negf %885 : vector<2x32xf32>
    %887 = math.exp %886 : vector<2x32xf32>
    %cst_195 = arith.constant 1.000000e+00 : f32
    %888 = vector.broadcast %cst_195 : f32 to vector<2x32xf32>
    %889 = arith.addf %888, %887 : vector<2x32xf32>
    %890 = arith.divf %888, %889 : vector<2x32xf32>
    %891 = vector.extract_strided_slice %884 {offsets = [0, 32], sizes = [2, 32], strides = [1, 1]} : vector<2x128xf32> to vector<2x32xf32>
    %892 = arith.negf %891 : vector<2x32xf32>
    %893 = math.exp %892 : vector<2x32xf32>
    %cst_196 = arith.constant 1.000000e+00 : f32
    %894 = vector.broadcast %cst_196 : f32 to vector<2x32xf32>
    %895 = arith.addf %894, %893 : vector<2x32xf32>
    %896 = arith.divf %894, %895 : vector<2x32xf32>
    %897 = vector.extract_strided_slice %884 {offsets = [0, 64], sizes = [2, 32], strides = [1, 1]} : vector<2x128xf32> to vector<2x32xf32>
    %898 = math.tanh %897 : vector<2x32xf32>
    %899 = vector.extract_strided_slice %884 {offsets = [0, 96], sizes = [2, 32], strides = [1, 1]} : vector<2x128xf32> to vector<2x32xf32>
    %900 = arith.negf %899 : vector<2x32xf32>
    %901 = math.exp %900 : vector<2x32xf32>
    %cst_197 = arith.constant 1.000000e+00 : f32
    %902 = vector.broadcast %cst_197 : f32 to vector<2x32xf32>
    %903 = arith.addf %902, %901 : vector<2x32xf32>
    %904 = arith.divf %902, %903 : vector<2x32xf32>
    %905 = arith.mulf %896, %841 : vector<2x32xf32>
    %906 = arith.mulf %890, %898 : vector<2x32xf32>
    %907 = arith.addf %905, %906 : vector<2x32xf32>
    %908 = math.tanh %907 : vector<2x32xf32>
    %909 = arith.mulf %904, %908 : vector<2x32xf32>
    %910 = arith.truncf %909 : vector<2x32xf32> to vector<2x32xbf16>
    %c13_198 = arith.constant 13 : index
    %c0_199 = arith.constant 0 : index
    %c0_200 = arith.constant 0 : index
    %911 = vector.load %arg9[%c13_198, %c0_199, %c0_200] : memref<16x2x32xbf16, #tpu.memory_space<vmem>>, vector<1x2x32xbf16>
    %912 = vector.shape_cast %911 : vector<1x2x32xbf16> to vector<2x32xbf16>
    %913 = vector.shape_cast %910 : vector<2x32xbf16> to vector<1x2x32xbf16>
    tpu.vector_store %arg9[%c13_198, %c0_199, %c0_200], %913 {strides = array<i32>} : memref<16x2x32xbf16, #tpu.memory_space<vmem>>, vector<1x2x32xbf16>,
    %914 = vector.extract_strided_slice %16 {offsets = [4, 0], sizes = [2, 128], strides = [1, 1]} : vector<32x128xf32> to vector<2x128xf32>
    %915 = arith.truncf %876 : vector<2x32xf32> to vector<2x32xbf16>
    %cst_201 = arith.constant dense<0.000000e+00> : vector<2x128xf32>
    %916 = tpu.matmul %915, %18, %cst_201 {dimension_numbers = #tpu.dot_dimension_numbers<[1], [0], [0], [1], [0, 0, 1, 1], [], []>} : vector<2x32xbf16>, vector<32x128xbf16>, vector<2x128xf32> -> vector<2x128xf32>
    %917 = arith.addf %914, %916 : vector<2x128xf32>
    %918 = vector.extract_strided_slice %917 {offsets = [0, 0], sizes = [2, 32], strides = [1, 1]} : vector<2x128xf32> to vector<2x32xf32>
    %919 = arith.negf %918 : vector<2x32xf32>
    %920 = math.exp %919 : vector<2x32xf32>
    %cst_202 = arith.constant 1.000000e+00 : f32
    %921 = vector.broadcast %cst_202 : f32 to vector<2x32xf32>
    %922 = arith.addf %921, %920 : vector<2x32xf32>
    %923 = arith.divf %921, %922 : vector<2x32xf32>
    %924 = vector.extract_strided_slice %917 {offsets = [0, 32], sizes = [2, 32], strides = [1, 1]} : vector<2x128xf32> to vector<2x32xf32>
    %925 = arith.negf %924 : vector<2x32xf32>
    %926 = math.exp %925 : vector<2x32xf32>
    %cst_203 = arith.constant 1.000000e+00 : f32
    %927 = vector.broadcast %cst_203 : f32 to vector<2x32xf32>
    %928 = arith.addf %927, %926 : vector<2x32xf32>
    %929 = arith.divf %927, %928 : vector<2x32xf32>
    %930 = vector.extract_strided_slice %917 {offsets = [0, 64], sizes = [2, 32], strides = [1, 1]} : vector<2x128xf32> to vector<2x32xf32>
    %931 = math.tanh %930 : vector<2x32xf32>
    %932 = vector.extract_strided_slice %917 {offsets = [0, 96], sizes = [2, 32], strides = [1, 1]} : vector<2x128xf32> to vector<2x32xf32>
    %933 = arith.negf %932 : vector<2x32xf32>
    %934 = math.exp %933 : vector<2x32xf32>
    %cst_204 = arith.constant 1.000000e+00 : f32
    %935 = vector.broadcast %cst_204 : f32 to vector<2x32xf32>
    %936 = arith.addf %935, %934 : vector<2x32xf32>
    %937 = arith.divf %935, %936 : vector<2x32xf32>
    %938 = arith.mulf %929, %874 : vector<2x32xf32>
    %939 = arith.mulf %923, %931 : vector<2x32xf32>
    %940 = arith.addf %938, %939 : vector<2x32xf32>
    %941 = math.tanh %940 : vector<2x32xf32>
    %942 = arith.mulf %937, %941 : vector<2x32xf32>
    %943 = arith.truncf %942 : vector<2x32xf32> to vector<2x32xbf16>
    %c2_205 = arith.constant 2 : index
    %c0_206 = arith.constant 0 : index
    %c0_207 = arith.constant 0 : index
    %944 = vector.load %arg10[%c2_205, %c0_206, %c0_207] : memref<16x2x32xbf16, #tpu.memory_space<vmem>>, vector<1x2x32xbf16>
    %945 = vector.shape_cast %944 : vector<1x2x32xbf16> to vector<2x32xbf16>
    %946 = vector.shape_cast %943 : vector<2x32xbf16> to vector<1x2x32xbf16>
    tpu.vector_store %arg10[%c2_205, %c0_206, %c0_207], %946 {strides = array<i32>} : memref<16x2x32xbf16, #tpu.memory_space<vmem>>, vector<1x2x32xbf16>,
    %947 = vector.extract_strided_slice %9 {offsets = [28, 0], sizes = [2, 128], strides = [1, 1]} : vector<32x128xf32> to vector<2x128xf32>
    %948 = arith.truncf %909 : vector<2x32xf32> to vector<2x32xbf16>
    %cst_208 = arith.constant dense<0.000000e+00> : vector<2x128xf32>
    %949 = tpu.matmul %948, %17, %cst_208 {dimension_numbers = #tpu.dot_dimension_numbers<[1], [0], [0], [1], [0, 0, 1, 1], [], []>} : vector<2x32xbf16>, vector<32x128xbf16>, vector<2x128xf32> -> vector<2x128xf32>
    %950 = arith.addf %947, %949 : vector<2x128xf32>
    %951 = vector.extract_strided_slice %950 {offsets = [0, 0], sizes = [2, 32], strides = [1, 1]} : vector<2x128xf32> to vector<2x32xf32>
    %952 = arith.negf %951 : vector<2x32xf32>
    %953 = math.exp %952 : vector<2x32xf32>
    %cst_209 = arith.constant 1.000000e+00 : f32
    %954 = vector.broadcast %cst_209 : f32 to vector<2x32xf32>
    %955 = arith.addf %954, %953 : vector<2x32xf32>
    %956 = arith.divf %954, %955 : vector<2x32xf32>
    %957 = vector.extract_strided_slice %950 {offsets = [0, 32], sizes = [2, 32], strides = [1, 1]} : vector<2x128xf32> to vector<2x32xf32>
    %958 = arith.negf %957 : vector<2x32xf32>
    %959 = math.exp %958 : vector<2x32xf32>
    %cst_210 = arith.constant 1.000000e+00 : f32
    %960 = vector.broadcast %cst_210 : f32 to vector<2x32xf32>
    %961 = arith.addf %960, %959 : vector<2x32xf32>
    %962 = arith.divf %960, %961 : vector<2x32xf32>
    %963 = vector.extract_strided_slice %950 {offsets = [0, 64], sizes = [2, 32], strides = [1, 1]} : vector<2x128xf32> to vector<2x32xf32>
    %964 = math.tanh %963 : vector<2x32xf32>
    %965 = vector.extract_strided_slice %950 {offsets = [0, 96], sizes = [2, 32], strides = [1, 1]} : vector<2x128xf32> to vector<2x32xf32>
    %966 = arith.negf %965 : vector<2x32xf32>
    %967 = math.exp %966 : vector<2x32xf32>
    %cst_211 = arith.constant 1.000000e+00 : f32
    %968 = vector.broadcast %cst_211 : f32 to vector<2x32xf32>
    %969 = arith.addf %968, %967 : vector<2x32xf32>
    %970 = arith.divf %968, %969 : vector<2x32xf32>
    %971 = arith.mulf %962, %907 : vector<2x32xf32>
    %972 = arith.mulf %956, %964 : vector<2x32xf32>
    %973 = arith.addf %971, %972 : vector<2x32xf32>
    %974 = math.tanh %973 : vector<2x32xf32>
    %975 = arith.mulf %970, %974 : vector<2x32xf32>
    %976 = arith.truncf %975 : vector<2x32xf32> to vector<2x32xbf16>
    %c14_212 = arith.constant 14 : index
    %c0_213 = arith.constant 0 : index
    %c0_214 = arith.constant 0 : index
    %977 = vector.load %arg9[%c14_212, %c0_213, %c0_214] : memref<16x2x32xbf16, #tpu.memory_space<vmem>>, vector<1x2x32xbf16>
    %978 = vector.shape_cast %977 : vector<1x2x32xbf16> to vector<2x32xbf16>
    %979 = vector.shape_cast %976 : vector<2x32xbf16> to vector<1x2x32xbf16>
    tpu.vector_store %arg9[%c14_212, %c0_213, %c0_214], %979 {strides = array<i32>} : memref<16x2x32xbf16, #tpu.memory_space<vmem>>, vector<1x2x32xbf16>,
    %980 = vector.extract_strided_slice %16 {offsets = [2, 0], sizes = [2, 128], strides = [1, 1]} : vector<32x128xf32> to vector<2x128xf32>
    %981 = arith.truncf %942 : vector<2x32xf32> to vector<2x32xbf16>
    %cst_215 = arith.constant dense<0.000000e+00> : vector<2x128xf32>
    %982 = tpu.matmul %981, %18, %cst_215 {dimension_numbers = #tpu.dot_dimension_numbers<[1], [0], [0], [1], [0, 0, 1, 1], [], []>} : vector<2x32xbf16>, vector<32x128xbf16>, vector<2x128xf32> -> vector<2x128xf32>
    %983 = arith.addf %980, %982 : vector<2x128xf32>
    %984 = vector.extract_strided_slice %983 {offsets = [0, 0], sizes = [2, 32], strides = [1, 1]} : vector<2x128xf32> to vector<2x32xf32>
    %985 = arith.negf %984 : vector<2x32xf32>
    %986 = math.exp %985 : vector<2x32xf32>
    %cst_216 = arith.constant 1.000000e+00 : f32
    %987 = vector.broadcast %cst_216 : f32 to vector<2x32xf32>
    %988 = arith.addf %987, %986 : vector<2x32xf32>
    %989 = arith.divf %987, %988 : vector<2x32xf32>
    %990 = vector.extract_strided_slice %983 {offsets = [0, 32], sizes = [2, 32], strides = [1, 1]} : vector<2x128xf32> to vector<2x32xf32>
    %991 = arith.negf %990 : vector<2x32xf32>
    %992 = math.exp %991 : vector<2x32xf32>
    %cst_217 = arith.constant 1.000000e+00 : f32
    %993 = vector.broadcast %cst_217 : f32 to vector<2x32xf32>
    %994 = arith.addf %993, %992 : vector<2x32xf32>
    %995 = arith.divf %993, %994 : vector<2x32xf32>
    %996 = vector.extract_strided_slice %983 {offsets = [0, 64], sizes = [2, 32], strides = [1, 1]} : vector<2x128xf32> to vector<2x32xf32>
    %997 = math.tanh %996 : vector<2x32xf32>
    %998 = vector.extract_strided_slice %983 {offsets = [0, 96], sizes = [2, 32], strides = [1, 1]} : vector<2x128xf32> to vector<2x32xf32>
    %999 = arith.negf %998 : vector<2x32xf32>
    %1000 = math.exp %999 : vector<2x32xf32>
    %cst_218 = arith.constant 1.000000e+00 : f32
    %1001 = vector.broadcast %cst_218 : f32 to vector<2x32xf32>
    %1002 = arith.addf %1001, %1000 : vector<2x32xf32>
    %1003 = arith.divf %1001, %1002 : vector<2x32xf32>
    %1004 = arith.mulf %995, %940 : vector<2x32xf32>
    %1005 = arith.mulf %989, %997 : vector<2x32xf32>
    %1006 = arith.addf %1004, %1005 : vector<2x32xf32>
    %1007 = math.tanh %1006 : vector<2x32xf32>
    %1008 = arith.mulf %1003, %1007 : vector<2x32xf32>
    %1009 = arith.truncf %1008 : vector<2x32xf32> to vector<2x32xbf16>
    %c1_219 = arith.constant 1 : index
    %c0_220 = arith.constant 0 : index
    %c0_221 = arith.constant 0 : index
    %1010 = vector.load %arg10[%c1_219, %c0_220, %c0_221] : memref<16x2x32xbf16, #tpu.memory_space<vmem>>, vector<1x2x32xbf16>
    %1011 = vector.shape_cast %1010 : vector<1x2x32xbf16> to vector<2x32xbf16>
    %1012 = vector.shape_cast %1009 : vector<2x32xbf16> to vector<1x2x32xbf16>
    tpu.vector_store %arg10[%c1_219, %c0_220, %c0_221], %1012 {strides = array<i32>} : memref<16x2x32xbf16, #tpu.memory_space<vmem>>, vector<1x2x32xbf16>,
    %1013 = vector.extract_strided_slice %9 {offsets = [30, 0], sizes = [2, 128], strides = [1, 1]} : vector<32x128xf32> to vector<2x128xf32>
    %1014 = arith.truncf %975 : vector<2x32xf32> to vector<2x32xbf16>
    %cst_222 = arith.constant dense<0.000000e+00> : vector<2x128xf32>
    %1015 = tpu.matmul %1014, %17, %cst_222 {dimension_numbers = #tpu.dot_dimension_numbers<[1], [0], [0], [1], [0, 0, 1, 1], [], []>} : vector<2x32xbf16>, vector<32x128xbf16>, vector<2x128xf32> -> vector<2x128xf32>
    %1016 = arith.addf %1013, %1015 : vector<2x128xf32>
    %1017 = vector.extract_strided_slice %1016 {offsets = [0, 0], sizes = [2, 32], strides = [1, 1]} : vector<2x128xf32> to vector<2x32xf32>
    %1018 = arith.negf %1017 : vector<2x32xf32>
    %1019 = math.exp %1018 : vector<2x32xf32>
    %cst_223 = arith.constant 1.000000e+00 : f32
    %1020 = vector.broadcast %cst_223 : f32 to vector<2x32xf32>
    %1021 = arith.addf %1020, %1019 : vector<2x32xf32>
    %1022 = arith.divf %1020, %1021 : vector<2x32xf32>
    %1023 = vector.extract_strided_slice %1016 {offsets = [0, 32], sizes = [2, 32], strides = [1, 1]} : vector<2x128xf32> to vector<2x32xf32>
    %1024 = arith.negf %1023 : vector<2x32xf32>
    %1025 = math.exp %1024 : vector<2x32xf32>
    %cst_224 = arith.constant 1.000000e+00 : f32
    %1026 = vector.broadcast %cst_224 : f32 to vector<2x32xf32>
    %1027 = arith.addf %1026, %1025 : vector<2x32xf32>
    %1028 = arith.divf %1026, %1027 : vector<2x32xf32>
    %1029 = vector.extract_strided_slice %1016 {offsets = [0, 64], sizes = [2, 32], strides = [1, 1]} : vector<2x128xf32> to vector<2x32xf32>
    %1030 = math.tanh %1029 : vector<2x32xf32>
    %1031 = vector.extract_strided_slice %1016 {offsets = [0, 96], sizes = [2, 32], strides = [1, 1]} : vector<2x128xf32> to vector<2x32xf32>
    %1032 = arith.negf %1031 : vector<2x32xf32>
    %1033 = math.exp %1032 : vector<2x32xf32>
    %cst_225 = arith.constant 1.000000e+00 : f32
    %1034 = vector.broadcast %cst_225 : f32 to vector<2x32xf32>
    %1035 = arith.addf %1034, %1033 : vector<2x32xf32>
    %1036 = arith.divf %1034, %1035 : vector<2x32xf32>
    %1037 = arith.mulf %1028, %973 : vector<2x32xf32>
    %1038 = arith.mulf %1022, %1030 : vector<2x32xf32>
    %1039 = arith.addf %1037, %1038 : vector<2x32xf32>
    %1040 = math.tanh %1039 : vector<2x32xf32>
    %1041 = arith.mulf %1036, %1040 : vector<2x32xf32>
    %1042 = arith.truncf %1041 : vector<2x32xf32> to vector<2x32xbf16>
    %c15_226 = arith.constant 15 : index
    %c0_227 = arith.constant 0 : index
    %c0_228 = arith.constant 0 : index
    %1043 = vector.load %arg9[%c15_226, %c0_227, %c0_228] : memref<16x2x32xbf16, #tpu.memory_space<vmem>>, vector<1x2x32xbf16>
    %1044 = vector.shape_cast %1043 : vector<1x2x32xbf16> to vector<2x32xbf16>
    %1045 = vector.shape_cast %1042 : vector<2x32xbf16> to vector<1x2x32xbf16>
    tpu.vector_store %arg9[%c15_226, %c0_227, %c0_228], %1045 {strides = array<i32>} : memref<16x2x32xbf16, #tpu.memory_space<vmem>>, vector<1x2x32xbf16>,
    %1046 = vector.extract_strided_slice %16 {offsets = [0, 0], sizes = [2, 128], strides = [1, 1]} : vector<32x128xf32> to vector<2x128xf32>
    %1047 = arith.truncf %1008 : vector<2x32xf32> to vector<2x32xbf16>
    %cst_229 = arith.constant dense<0.000000e+00> : vector<2x128xf32>
    %1048 = tpu.matmul %1047, %18, %cst_229 {dimension_numbers = #tpu.dot_dimension_numbers<[1], [0], [0], [1], [0, 0, 1, 1], [], []>} : vector<2x32xbf16>, vector<32x128xbf16>, vector<2x128xf32> -> vector<2x128xf32>
    %1049 = arith.addf %1046, %1048 : vector<2x128xf32>
    %1050 = vector.extract_strided_slice %1049 {offsets = [0, 0], sizes = [2, 32], strides = [1, 1]} : vector<2x128xf32> to vector<2x32xf32>
    %1051 = arith.negf %1050 : vector<2x32xf32>
    %1052 = math.exp %1051 : vector<2x32xf32>
    %cst_230 = arith.constant 1.000000e+00 : f32
    %1053 = vector.broadcast %cst_230 : f32 to vector<2x32xf32>
    %1054 = arith.addf %1053, %1052 : vector<2x32xf32>
    %1055 = arith.divf %1053, %1054 : vector<2x32xf32>
    %1056 = vector.extract_strided_slice %1049 {offsets = [0, 32], sizes = [2, 32], strides = [1, 1]} : vector<2x128xf32> to vector<2x32xf32>
    %1057 = arith.negf %1056 : vector<2x32xf32>
    %1058 = math.exp %1057 : vector<2x32xf32>
    %cst_231 = arith.constant 1.000000e+00 : f32
    %1059 = vector.broadcast %cst_231 : f32 to vector<2x32xf32>
    %1060 = arith.addf %1059, %1058 : vector<2x32xf32>
    %1061 = arith.divf %1059, %1060 : vector<2x32xf32>
    %1062 = vector.extract_strided_slice %1049 {offsets = [0, 64], sizes = [2, 32], strides = [1, 1]} : vector<2x128xf32> to vector<2x32xf32>
    %1063 = math.tanh %1062 : vector<2x32xf32>
    %1064 = vector.extract_strided_slice %1049 {offsets = [0, 96], sizes = [2, 32], strides = [1, 1]} : vector<2x128xf32> to vector<2x32xf32>
    %1065 = arith.negf %1064 : vector<2x32xf32>
    %1066 = math.exp %1065 : vector<2x32xf32>
    %cst_232 = arith.constant 1.000000e+00 : f32
    %1067 = vector.broadcast %cst_232 : f32 to vector<2x32xf32>
    %1068 = arith.addf %1067, %1066 : vector<2x32xf32>
    %1069 = arith.divf %1067, %1068 : vector<2x32xf32>
    %1070 = arith.mulf %1061, %1006 : vector<2x32xf32>
    %1071 = arith.mulf %1055, %1063 : vector<2x32xf32>
    %1072 = arith.addf %1070, %1071 : vector<2x32xf32>
    %1073 = math.tanh %1072 : vector<2x32xf32>
    %1074 = arith.mulf %1069, %1073 : vector<2x32xf32>
    %1075 = arith.truncf %1074 : vector<2x32xf32> to vector<2x32xbf16>
    %c0_233 = arith.constant 0 : index
    %c0_234 = arith.constant 0 : index
    %c0_235 = arith.constant 0 : index
    %1076 = vector.load %arg10[%c0_233, %c0_234, %c0_235] : memref<16x2x32xbf16, #tpu.memory_space<vmem>>, vector<1x2x32xbf16>
    %1077 = vector.shape_cast %1076 : vector<1x2x32xbf16> to vector<2x32xbf16>
    %1078 = vector.shape_cast %1075 : vector<2x32xbf16> to vector<1x2x32xbf16>
    tpu.vector_store %arg10[%c0_233, %c0_234, %c0_235], %1078 {strides = array<i32>} : memref<16x2x32xbf16, #tpu.memory_space<vmem>>, vector<1x2x32xbf16>,
    %c0_236 = arith.constant 0 : index
    %c0_237 = arith.constant 0 : index
    %1079 = vector.load %arg11[%c0_236, %c0_237] : memref<2x32xf32, #tpu.memory_space<vmem>>, vector<2x32xf32>
    tpu.vector_store %arg11[%c0_236, %c0_237], %1041 {strides = array<i32>} : memref<2x32xf32, #tpu.memory_space<vmem>>, vector<2x32xf32>,
    %c0_238 = arith.constant 0 : index
    %c0_239 = arith.constant 0 : index
    %1080 = vector.load %arg12[%c0_238, %c0_239] : memref<2x32xf32, #tpu.memory_space<vmem>>, vector<2x32xf32>
    tpu.vector_store %arg12[%c0_238, %c0_239], %1039 {strides = array<i32>} : memref<2x32xf32, #tpu.memory_space<vmem>>, vector<2x32xf32>,
    %c0_240 = arith.constant 0 : index
    %c0_241 = arith.constant 0 : index
    %1081 = vector.load %arg13[%c0_240, %c0_241] : memref<2x32xf32, #tpu.memory_space<vmem>>, vector<2x32xf32>
    tpu.vector_store %arg13[%c0_240, %c0_241], %1074 {strides = array<i32>} : memref<2x32xf32, #tpu.memory_space<vmem>>, vector<2x32xf32>,
    %c0_242 = arith.constant 0 : index
    %c0_243 = arith.constant 0 : index
    %1082 = vector.load %arg14[%c0_242, %c0_243] : memref<2x32xf32, #tpu.memory_space<vmem>>, vector<2x32xf32>
    tpu.vector_store %arg14[%c0_242, %c0_243], %1072 {strides = array<i32>} : memref<2x32xf32, #tpu.memory_space<vmem>>, vector<2x32xf32>,
    return
  }
  func.func @transform_0(%arg0: i32) -> (i32, i32, i32) {
    %c0_i32 = arith.constant 0 : i32
    %c0_i32_0 = arith.constant 0 : i32
    %c0_i32_1 = arith.constant 0 : i32
    return %arg0, %c0_i32, %c0_i32_0 : i32, i32, i32
  }
  func.func @transform_1(%arg0: i32) -> (i32, i32, i32) {
    %c0_i32 = arith.constant 0 : i32
    %0 = arith.subi %c0_i32, %arg0 : i32
    %c0_i32_0 = arith.constant 0 : i32
    %c0_i32_1 = arith.constant 0 : i32
    %c0_i32_2 = arith.constant 0 : i32
    return %0, %c0_i32_0, %c0_i32_1 : i32, i32, i32
  }
  func.func @transform_2(%arg0: i32) -> (i32, i32) {
    %c0_i32 = arith.constant 0 : i32
    %c0_i32_0 = arith.constant 0 : i32
    %c0_i32_1 = arith.constant 0 : i32
    return %c0_i32, %c0_i32_0 : i32, i32
  }
  func.func @transform_3(%arg0: i32) -> (i32, i32) {
    %c0_i32 = arith.constant 0 : i32
    %c0_i32_0 = arith.constant 0 : i32
    %c0_i32_1 = arith.constant 0 : i32
    return %c0_i32, %c0_i32_0 : i32, i32
  }
  func.func @transform_4(%arg0: i32) -> (i32, i32) {
    %c0_i32 = arith.constant 0 : i32
    %c0_i32_0 = arith.constant 0 : i32
    %c0_i32_1 = arith.constant 0 : i32
    return %c0_i32, %c0_i32_0 : i32, i32
  }
  func.func @transform_5(%arg0: i32) -> (i32, i32) {
    %c0_i32 = arith.constant 0 : i32
    %c0_i32_0 = arith.constant 0 : i32
    %c0_i32_1 = arith.constant 0 : i32
    return %c0_i32, %c0_i32_0 : i32, i32
  }
  func.func @transform_6(%arg0: i32) -> (i32, i32) {
    %c0_i32 = arith.constant 0 : i32
    %c0_i32_0 = arith.constant 0 : i32
    %c0_i32_1 = arith.constant 0 : i32
    return %c0_i32, %c0_i32_0 : i32, i32
  }
  func.func @transform_7(%arg0: i32) -> (i32, i32) {
    %c0_i32 = arith.constant 0 : i32
    %c0_i32_0 = arith.constant 0 : i32
    %c0_i32_1 = arith.constant 0 : i32
    return %c0_i32, %c0_i32_0 : i32, i32
  }
  func.func @transform_8(%arg0: i32) -> (i32, i32, i32) {
    %c0_i32 = arith.constant 0 : i32
    %c0_i32_0 = arith.constant 0 : i32
    %c0_i32_1 = arith.constant 0 : i32
    return %arg0, %c0_i32, %c0_i32_0 : i32, i32, i32
  }
  func.func @transform_9(%arg0: i32) -> (i32, i32, i32) {
    %c0_i32 = arith.constant 0 : i32
    %0 = arith.subi %c0_i32, %arg0 : i32
    %c0_i32_0 = arith.constant 0 : i32
    %c0_i32_1 = arith.constant 0 : i32
    %c0_i32_2 = arith.constant 0 : i32
    return %0, %c0_i32_0, %c0_i32_1 : i32, i32, i32
  }
}

module attributes {stable_mosaic.version = 11 : i64} {
  func.func @bilstm_fused_kernel(%arg0: i32, %arg1: memref<1x8x128xbf16, #tpu.memory_space<vmem>>, %arg2: memref<1x8x128xbf16, #tpu.memory_space<vmem>>, %arg3: memref<128x128xbf16, #tpu.memory_space<vmem>>, %arg4: memref<128x128xbf16, #tpu.memory_space<vmem>>, %arg5: memref<1x128xf32, #tpu.memory_space<vmem>>, %arg6: memref<1x128xf32, #tpu.memory_space<vmem>>, %arg7: memref<32x128xbf16, #tpu.memory_space<vmem>>, %arg8: memref<32x128xbf16, #tpu.memory_space<vmem>>, %arg9: memref<4x2x32xbf16, #tpu.memory_space<vmem>>, %arg10: memref<4x2x32xbf16, #tpu.memory_space<vmem>>, %arg11: memref<2x32xf32, #tpu.memory_space<vmem>>, %arg12: memref<2x32xf32, #tpu.memory_space<vmem>>, %arg13: memref<2x32xf32, #tpu.memory_space<vmem>>, %arg14: memref<2x32xf32, #tpu.memory_space<vmem>>) attributes {dimension_semantics = [#tpu.dimension_semantics<arbitrary>], iteration_bounds = array<i64: 1>, scalar_prefetch = 0 : i64, scratch_operands = 4 : i64, tpu.core_type = #tpu.core_type<tc>, window_params = [{transform_indices = @transform_0, window_bounds = array<i64: 1, 8, 128>}, {transform_indices = @transform_1, window_bounds = array<i64: 1, 8, 128>}, {pipeline_mode = #tpu.pipeline_mode<synchronous>, transform_indices = @transform_2, window_bounds = array<i64: 128, 128>}, {pipeline_mode = #tpu.pipeline_mode<synchronous>, transform_indices = @transform_3, window_bounds = array<i64: 128, 128>}, {pipeline_mode = #tpu.pipeline_mode<synchronous>, transform_indices = @transform_4, window_bounds = array<i64: 1, 128>}, {pipeline_mode = #tpu.pipeline_mode<synchronous>, transform_indices = @transform_5, window_bounds = array<i64: 1, 128>}, {pipeline_mode = #tpu.pipeline_mode<synchronous>, transform_indices = @transform_6, window_bounds = array<i64: 32, 128>}, {pipeline_mode = #tpu.pipeline_mode<synchronous>, transform_indices = @transform_7, window_bounds = array<i64: 32, 128>}, {transform_indices = @transform_8, window_bounds = array<i64: 4, 2, 32>}, {transform_indices = @transform_9, window_bounds = array<i64: 4, 2, 32>}]} {
    %c0_i32 = arith.constant 0 : i32
    %0 = arith.cmpi eq, %arg0, %c0_i32 : i32
    %1 = arith.extui %0 : i1 to i32
    %c0_i32_0 = arith.constant 0 : i32
    %2 = arith.cmpi ne, %1, %c0_i32_0 : i32
    scf.if %2 {
      %cst_88 = arith.constant 0.000000e+00 : f32
      %291 = vector.broadcast %cst_88 : f32 to vector<2x32xf32>
      %c0_89 = arith.constant 0 : index
      %c0_90 = arith.constant 0 : index
      %292 = vector.load %arg11[%c0_89, %c0_90] : memref<2x32xf32, #tpu.memory_space<vmem>>, vector<2x32xf32>
      tpu.vector_store %arg11[%c0_89, %c0_90], %291 {strides = array<i32>} : memref<2x32xf32, #tpu.memory_space<vmem>>, vector<2x32xf32>,
      %cst_91 = arith.constant 0.000000e+00 : f32
      %293 = vector.broadcast %cst_91 : f32 to vector<2x32xf32>
      %c0_92 = arith.constant 0 : index
      %c0_93 = arith.constant 0 : index
      %294 = vector.load %arg12[%c0_92, %c0_93] : memref<2x32xf32, #tpu.memory_space<vmem>>, vector<2x32xf32>
      tpu.vector_store %arg12[%c0_92, %c0_93], %293 {strides = array<i32>} : memref<2x32xf32, #tpu.memory_space<vmem>>, vector<2x32xf32>,
      %cst_94 = arith.constant 0.000000e+00 : f32
      %295 = vector.broadcast %cst_94 : f32 to vector<2x32xf32>
      %c0_95 = arith.constant 0 : index
      %c0_96 = arith.constant 0 : index
      %296 = vector.load %arg13[%c0_95, %c0_96] : memref<2x32xf32, #tpu.memory_space<vmem>>, vector<2x32xf32>
      tpu.vector_store %arg13[%c0_95, %c0_96], %295 {strides = array<i32>} : memref<2x32xf32, #tpu.memory_space<vmem>>, vector<2x32xf32>,
      %cst_97 = arith.constant 0.000000e+00 : f32
      %297 = vector.broadcast %cst_97 : f32 to vector<2x32xf32>
      %c0_98 = arith.constant 0 : index
      %c0_99 = arith.constant 0 : index
      %298 = vector.load %arg14[%c0_98, %c0_99] : memref<2x32xf32, #tpu.memory_space<vmem>>, vector<2x32xf32>
      tpu.vector_store %arg14[%c0_98, %c0_99], %297 {strides = array<i32>} : memref<2x32xf32, #tpu.memory_space<vmem>>, vector<2x32xf32>,
    } else {
    }
    %c0 = arith.constant 0 : index
    %c0_1 = arith.constant 0 : index
    %c0_2 = arith.constant 0 : index
    %3 = vector.load %arg1[%c0, %c0_1, %c0_2] : memref<1x8x128xbf16, #tpu.memory_space<vmem>>, vector<1x8x128xbf16>
    %4 = vector.shape_cast %3 : vector<1x8x128xbf16> to vector<8x128xbf16>
    %c0_3 = arith.constant 0 : index
    %c0_4 = arith.constant 0 : index
    %5 = vector.load %arg3[%c0_3, %c0_4] : memref<128x128xbf16, #tpu.memory_space<vmem>>, vector<128x128xbf16>
    %cst = arith.constant dense<0.000000e+00> : vector<8x128xf32>
    %6 = tpu.matmul %4, %5, %cst {dimension_numbers = #tpu.dot_dimension_numbers<[1], [0], [0], [1], [0, 0, 1, 1], [], []>} : vector<8x128xbf16>, vector<128x128xbf16>, vector<8x128xf32> -> vector<8x128xf32>
    %c0_5 = arith.constant 0 : index
    %c0_6 = arith.constant 0 : index
    %7 = vector.load %arg5[%c0_5, %c0_6] : memref<1x128xf32, #tpu.memory_space<vmem>>, vector<1x128xf32>
    %8 = vector.broadcast %7 : vector<1x128xf32> to vector<8x128xf32>
    %9 = arith.addf %6, %8 : vector<8x128xf32>
    %c0_7 = arith.constant 0 : index
    %c0_8 = arith.constant 0 : index
    %c0_9 = arith.constant 0 : index
    %10 = vector.load %arg2[%c0_7, %c0_8, %c0_9] : memref<1x8x128xbf16, #tpu.memory_space<vmem>>, vector<1x8x128xbf16>
    %11 = vector.shape_cast %10 : vector<1x8x128xbf16> to vector<8x128xbf16>
    %c0_10 = arith.constant 0 : index
    %c0_11 = arith.constant 0 : index
    %12 = vector.load %arg4[%c0_10, %c0_11] : memref<128x128xbf16, #tpu.memory_space<vmem>>, vector<128x128xbf16>
    %cst_12 = arith.constant dense<0.000000e+00> : vector<8x128xf32>
    %13 = tpu.matmul %11, %12, %cst_12 {dimension_numbers = #tpu.dot_dimension_numbers<[1], [0], [0], [1], [0, 0, 1, 1], [], []>} : vector<8x128xbf16>, vector<128x128xbf16>, vector<8x128xf32> -> vector<8x128xf32>
    %c0_13 = arith.constant 0 : index
    %c0_14 = arith.constant 0 : index
    %14 = vector.load %arg6[%c0_13, %c0_14] : memref<1x128xf32, #tpu.memory_space<vmem>>, vector<1x128xf32>
    %15 = vector.broadcast %14 : vector<1x128xf32> to vector<8x128xf32>
    %16 = arith.addf %13, %15 : vector<8x128xf32>
    %c0_15 = arith.constant 0 : index
    %c0_16 = arith.constant 0 : index
    %17 = vector.load %arg7[%c0_15, %c0_16] : memref<32x128xbf16, #tpu.memory_space<vmem>>, vector<32x128xbf16>
    %c0_17 = arith.constant 0 : index
    %c0_18 = arith.constant 0 : index
    %18 = vector.load %arg8[%c0_17, %c0_18] : memref<32x128xbf16, #tpu.memory_space<vmem>>, vector<32x128xbf16>
    %c0_19 = arith.constant 0 : index
    %c0_20 = arith.constant 0 : index
    %19 = vector.load %arg11[%c0_19, %c0_20] : memref<2x32xf32, #tpu.memory_space<vmem>>, vector<2x32xf32>
    %c0_21 = arith.constant 0 : index
    %c0_22 = arith.constant 0 : index
    %20 = vector.load %arg12[%c0_21, %c0_22] : memref<2x32xf32, #tpu.memory_space<vmem>>, vector<2x32xf32>
    %c0_23 = arith.constant 0 : index
    %c0_24 = arith.constant 0 : index
    %21 = vector.load %arg13[%c0_23, %c0_24] : memref<2x32xf32, #tpu.memory_space<vmem>>, vector<2x32xf32>
    %c0_25 = arith.constant 0 : index
    %c0_26 = arith.constant 0 : index
    %22 = vector.load %arg14[%c0_25, %c0_26] : memref<2x32xf32, #tpu.memory_space<vmem>>, vector<2x32xf32>
    %23 = vector.extract_strided_slice %9 {offsets = [0, 0], sizes = [2, 128], strides = [1, 1]} : vector<8x128xf32> to vector<2x128xf32>
    %24 = arith.truncf %19 : vector<2x32xf32> to vector<2x32xbf16>
    %cst_27 = arith.constant dense<0.000000e+00> : vector<2x128xf32>
    %25 = tpu.matmul %24, %17, %cst_27 {dimension_numbers = #tpu.dot_dimension_numbers<[1], [0], [0], [1], [0, 0, 1, 1], [], []>} : vector<2x32xbf16>, vector<32x128xbf16>, vector<2x128xf32> -> vector<2x128xf32>
    %26 = arith.addf %23, %25 : vector<2x128xf32>
    %27 = vector.extract_strided_slice %26 {offsets = [0, 0], sizes = [2, 32], strides = [1, 1]} : vector<2x128xf32> to vector<2x32xf32>
    %28 = arith.negf %27 : vector<2x32xf32>
    %29 = math.exp %28 : vector<2x32xf32>
    %cst_28 = arith.constant 1.000000e+00 : f32
    %30 = vector.broadcast %cst_28 : f32 to vector<2x32xf32>
    %31 = arith.addf %30, %29 : vector<2x32xf32>
    %32 = arith.divf %30, %31 : vector<2x32xf32>
    %33 = vector.extract_strided_slice %26 {offsets = [0, 32], sizes = [2, 32], strides = [1, 1]} : vector<2x128xf32> to vector<2x32xf32>
    %34 = arith.negf %33 : vector<2x32xf32>
    %35 = math.exp %34 : vector<2x32xf32>
    %cst_29 = arith.constant 1.000000e+00 : f32
    %36 = vector.broadcast %cst_29 : f32 to vector<2x32xf32>
    %37 = arith.addf %36, %35 : vector<2x32xf32>
    %38 = arith.divf %36, %37 : vector<2x32xf32>
    %39 = vector.extract_strided_slice %26 {offsets = [0, 64], sizes = [2, 32], strides = [1, 1]} : vector<2x128xf32> to vector<2x32xf32>
    %40 = math.tanh %39 : vector<2x32xf32>
    %41 = vector.extract_strided_slice %26 {offsets = [0, 96], sizes = [2, 32], strides = [1, 1]} : vector<2x128xf32> to vector<2x32xf32>
    %42 = arith.negf %41 : vector<2x32xf32>
    %43 = math.exp %42 : vector<2x32xf32>
    %cst_30 = arith.constant 1.000000e+00 : f32
    %44 = vector.broadcast %cst_30 : f32 to vector<2x32xf32>
    %45 = arith.addf %44, %43 : vector<2x32xf32>
    %46 = arith.divf %44, %45 : vector<2x32xf32>
    %47 = arith.mulf %38, %20 : vector<2x32xf32>
    %48 = arith.mulf %32, %40 : vector<2x32xf32>
    %49 = arith.addf %47, %48 : vector<2x32xf32>
    %50 = math.tanh %49 : vector<2x32xf32>
    %51 = arith.mulf %46, %50 : vector<2x32xf32>
    %52 = arith.truncf %51 : vector<2x32xf32> to vector<2x32xbf16>
    %c0_31 = arith.constant 0 : index
    %c0_32 = arith.constant 0 : index
    %c0_33 = arith.constant 0 : index
    %53 = vector.load %arg9[%c0_31, %c0_32, %c0_33] : memref<4x2x32xbf16, #tpu.memory_space<vmem>>, vector<1x2x32xbf16>
    %54 = vector.shape_cast %53 : vector<1x2x32xbf16> to vector<2x32xbf16>
    %55 = vector.shape_cast %52 : vector<2x32xbf16> to vector<1x2x32xbf16>
    tpu.vector_store %arg9[%c0_31, %c0_32, %c0_33], %55 {strides = array<i32>} : memref<4x2x32xbf16, #tpu.memory_space<vmem>>, vector<1x2x32xbf16>,
    %56 = vector.extract_strided_slice %16 {offsets = [6, 0], sizes = [2, 128], strides = [1, 1]} : vector<8x128xf32> to vector<2x128xf32>
    %57 = arith.truncf %21 : vector<2x32xf32> to vector<2x32xbf16>
    %cst_34 = arith.constant dense<0.000000e+00> : vector<2x128xf32>
    %58 = tpu.matmul %57, %18, %cst_34 {dimension_numbers = #tpu.dot_dimension_numbers<[1], [0], [0], [1], [0, 0, 1, 1], [], []>} : vector<2x32xbf16>, vector<32x128xbf16>, vector<2x128xf32> -> vector<2x128xf32>
    %59 = arith.addf %56, %58 : vector<2x128xf32>
    %60 = vector.extract_strided_slice %59 {offsets = [0, 0], sizes = [2, 32], strides = [1, 1]} : vector<2x128xf32> to vector<2x32xf32>
    %61 = arith.negf %60 : vector<2x32xf32>
    %62 = math.exp %61 : vector<2x32xf32>
    %cst_35 = arith.constant 1.000000e+00 : f32
    %63 = vector.broadcast %cst_35 : f32 to vector<2x32xf32>
    %64 = arith.addf %63, %62 : vector<2x32xf32>
    %65 = arith.divf %63, %64 : vector<2x32xf32>
    %66 = vector.extract_strided_slice %59 {offsets = [0, 32], sizes = [2, 32], strides = [1, 1]} : vector<2x128xf32> to vector<2x32xf32>
    %67 = arith.negf %66 : vector<2x32xf32>
    %68 = math.exp %67 : vector<2x32xf32>
    %cst_36 = arith.constant 1.000000e+00 : f32
    %69 = vector.broadcast %cst_36 : f32 to vector<2x32xf32>
    %70 = arith.addf %69, %68 : vector<2x32xf32>
    %71 = arith.divf %69, %70 : vector<2x32xf32>
    %72 = vector.extract_strided_slice %59 {offsets = [0, 64], sizes = [2, 32], strides = [1, 1]} : vector<2x128xf32> to vector<2x32xf32>
    %73 = math.tanh %72 : vector<2x32xf32>
    %74 = vector.extract_strided_slice %59 {offsets = [0, 96], sizes = [2, 32], strides = [1, 1]} : vector<2x128xf32> to vector<2x32xf32>
    %75 = arith.negf %74 : vector<2x32xf32>
    %76 = math.exp %75 : vector<2x32xf32>
    %cst_37 = arith.constant 1.000000e+00 : f32
    %77 = vector.broadcast %cst_37 : f32 to vector<2x32xf32>
    %78 = arith.addf %77, %76 : vector<2x32xf32>
    %79 = arith.divf %77, %78 : vector<2x32xf32>
    %80 = arith.mulf %71, %22 : vector<2x32xf32>
    %81 = arith.mulf %65, %73 : vector<2x32xf32>
    %82 = arith.addf %80, %81 : vector<2x32xf32>
    %83 = math.tanh %82 : vector<2x32xf32>
    %84 = arith.mulf %79, %83 : vector<2x32xf32>
    %85 = arith.truncf %84 : vector<2x32xf32> to vector<2x32xbf16>
    %c3 = arith.constant 3 : index
    %c0_38 = arith.constant 0 : index
    %c0_39 = arith.constant 0 : index
    %86 = vector.load %arg10[%c3, %c0_38, %c0_39] : memref<4x2x32xbf16, #tpu.memory_space<vmem>>, vector<1x2x32xbf16>
    %87 = vector.shape_cast %86 : vector<1x2x32xbf16> to vector<2x32xbf16>
    %88 = vector.shape_cast %85 : vector<2x32xbf16> to vector<1x2x32xbf16>
    tpu.vector_store %arg10[%c3, %c0_38, %c0_39], %88 {strides = array<i32>} : memref<4x2x32xbf16, #tpu.memory_space<vmem>>, vector<1x2x32xbf16>,
    %89 = vector.extract_strided_slice %9 {offsets = [2, 0], sizes = [2, 128], strides = [1, 1]} : vector<8x128xf32> to vector<2x128xf32>
    %90 = arith.truncf %51 : vector<2x32xf32> to vector<2x32xbf16>
    %cst_40 = arith.constant dense<0.000000e+00> : vector<2x128xf32>
    %91 = tpu.matmul %90, %17, %cst_40 {dimension_numbers = #tpu.dot_dimension_numbers<[1], [0], [0], [1], [0, 0, 1, 1], [], []>} : vector<2x32xbf16>, vector<32x128xbf16>, vector<2x128xf32> -> vector<2x128xf32>
    %92 = arith.addf %89, %91 : vector<2x128xf32>
    %93 = vector.extract_strided_slice %92 {offsets = [0, 0], sizes = [2, 32], strides = [1, 1]} : vector<2x128xf32> to vector<2x32xf32>
    %94 = arith.negf %93 : vector<2x32xf32>
    %95 = math.exp %94 : vector<2x32xf32>
    %cst_41 = arith.constant 1.000000e+00 : f32
    %96 = vector.broadcast %cst_41 : f32 to vector<2x32xf32>
    %97 = arith.addf %96, %95 : vector<2x32xf32>
    %98 = arith.divf %96, %97 : vector<2x32xf32>
    %99 = vector.extract_strided_slice %92 {offsets = [0, 32], sizes = [2, 32], strides = [1, 1]} : vector<2x128xf32> to vector<2x32xf32>
    %100 = arith.negf %99 : vector<2x32xf32>
    %101 = math.exp %100 : vector<2x32xf32>
    %cst_42 = arith.constant 1.000000e+00 : f32
    %102 = vector.broadcast %cst_42 : f32 to vector<2x32xf32>
    %103 = arith.addf %102, %101 : vector<2x32xf32>
    %104 = arith.divf %102, %103 : vector<2x32xf32>
    %105 = vector.extract_strided_slice %92 {offsets = [0, 64], sizes = [2, 32], strides = [1, 1]} : vector<2x128xf32> to vector<2x32xf32>
    %106 = math.tanh %105 : vector<2x32xf32>
    %107 = vector.extract_strided_slice %92 {offsets = [0, 96], sizes = [2, 32], strides = [1, 1]} : vector<2x128xf32> to vector<2x32xf32>
    %108 = arith.negf %107 : vector<2x32xf32>
    %109 = math.exp %108 : vector<2x32xf32>
    %cst_43 = arith.constant 1.000000e+00 : f32
    %110 = vector.broadcast %cst_43 : f32 to vector<2x32xf32>
    %111 = arith.addf %110, %109 : vector<2x32xf32>
    %112 = arith.divf %110, %111 : vector<2x32xf32>
    %113 = arith.mulf %104, %49 : vector<2x32xf32>
    %114 = arith.mulf %98, %106 : vector<2x32xf32>
    %115 = arith.addf %113, %114 : vector<2x32xf32>
    %116 = math.tanh %115 : vector<2x32xf32>
    %117 = arith.mulf %112, %116 : vector<2x32xf32>
    %118 = arith.truncf %117 : vector<2x32xf32> to vector<2x32xbf16>
    %c1 = arith.constant 1 : index
    %c0_44 = arith.constant 0 : index
    %c0_45 = arith.constant 0 : index
    %119 = vector.load %arg9[%c1, %c0_44, %c0_45] : memref<4x2x32xbf16, #tpu.memory_space<vmem>>, vector<1x2x32xbf16>
    %120 = vector.shape_cast %119 : vector<1x2x32xbf16> to vector<2x32xbf16>
    %121 = vector.shape_cast %118 : vector<2x32xbf16> to vector<1x2x32xbf16>
    tpu.vector_store %arg9[%c1, %c0_44, %c0_45], %121 {strides = array<i32>} : memref<4x2x32xbf16, #tpu.memory_space<vmem>>, vector<1x2x32xbf16>,
    %122 = vector.extract_strided_slice %16 {offsets = [4, 0], sizes = [2, 128], strides = [1, 1]} : vector<8x128xf32> to vector<2x128xf32>
    %123 = arith.truncf %84 : vector<2x32xf32> to vector<2x32xbf16>
    %cst_46 = arith.constant dense<0.000000e+00> : vector<2x128xf32>
    %124 = tpu.matmul %123, %18, %cst_46 {dimension_numbers = #tpu.dot_dimension_numbers<[1], [0], [0], [1], [0, 0, 1, 1], [], []>} : vector<2x32xbf16>, vector<32x128xbf16>, vector<2x128xf32> -> vector<2x128xf32>
    %125 = arith.addf %122, %124 : vector<2x128xf32>
    %126 = vector.extract_strided_slice %125 {offsets = [0, 0], sizes = [2, 32], strides = [1, 1]} : vector<2x128xf32> to vector<2x32xf32>
    %127 = arith.negf %126 : vector<2x32xf32>
    %128 = math.exp %127 : vector<2x32xf32>
    %cst_47 = arith.constant 1.000000e+00 : f32
    %129 = vector.broadcast %cst_47 : f32 to vector<2x32xf32>
    %130 = arith.addf %129, %128 : vector<2x32xf32>
    %131 = arith.divf %129, %130 : vector<2x32xf32>
    %132 = vector.extract_strided_slice %125 {offsets = [0, 32], sizes = [2, 32], strides = [1, 1]} : vector<2x128xf32> to vector<2x32xf32>
    %133 = arith.negf %132 : vector<2x32xf32>
    %134 = math.exp %133 : vector<2x32xf32>
    %cst_48 = arith.constant 1.000000e+00 : f32
    %135 = vector.broadcast %cst_48 : f32 to vector<2x32xf32>
    %136 = arith.addf %135, %134 : vector<2x32xf32>
    %137 = arith.divf %135, %136 : vector<2x32xf32>
    %138 = vector.extract_strided_slice %125 {offsets = [0, 64], sizes = [2, 32], strides = [1, 1]} : vector<2x128xf32> to vector<2x32xf32>
    %139 = math.tanh %138 : vector<2x32xf32>
    %140 = vector.extract_strided_slice %125 {offsets = [0, 96], sizes = [2, 32], strides = [1, 1]} : vector<2x128xf32> to vector<2x32xf32>
    %141 = arith.negf %140 : vector<2x32xf32>
    %142 = math.exp %141 : vector<2x32xf32>
    %cst_49 = arith.constant 1.000000e+00 : f32
    %143 = vector.broadcast %cst_49 : f32 to vector<2x32xf32>
    %144 = arith.addf %143, %142 : vector<2x32xf32>
    %145 = arith.divf %143, %144 : vector<2x32xf32>
    %146 = arith.mulf %137, %82 : vector<2x32xf32>
    %147 = arith.mulf %131, %139 : vector<2x32xf32>
    %148 = arith.addf %146, %147 : vector<2x32xf32>
    %149 = math.tanh %148 : vector<2x32xf32>
    %150 = arith.mulf %145, %149 : vector<2x32xf32>
    %151 = arith.truncf %150 : vector<2x32xf32> to vector<2x32xbf16>
    %c2 = arith.constant 2 : index
    %c0_50 = arith.constant 0 : index
    %c0_51 = arith.constant 0 : index
    %152 = vector.load %arg10[%c2, %c0_50, %c0_51] : memref<4x2x32xbf16, #tpu.memory_space<vmem>>, vector<1x2x32xbf16>
    %153 = vector.shape_cast %152 : vector<1x2x32xbf16> to vector<2x32xbf16>
    %154 = vector.shape_cast %151 : vector<2x32xbf16> to vector<1x2x32xbf16>
    tpu.vector_store %arg10[%c2, %c0_50, %c0_51], %154 {strides = array<i32>} : memref<4x2x32xbf16, #tpu.memory_space<vmem>>, vector<1x2x32xbf16>,
    %155 = vector.extract_strided_slice %9 {offsets = [4, 0], sizes = [2, 128], strides = [1, 1]} : vector<8x128xf32> to vector<2x128xf32>
    %156 = arith.truncf %117 : vector<2x32xf32> to vector<2x32xbf16>
    %cst_52 = arith.constant dense<0.000000e+00> : vector<2x128xf32>
    %157 = tpu.matmul %156, %17, %cst_52 {dimension_numbers = #tpu.dot_dimension_numbers<[1], [0], [0], [1], [0, 0, 1, 1], [], []>} : vector<2x32xbf16>, vector<32x128xbf16>, vector<2x128xf32> -> vector<2x128xf32>
    %158 = arith.addf %155, %157 : vector<2x128xf32>
    %159 = vector.extract_strided_slice %158 {offsets = [0, 0], sizes = [2, 32], strides = [1, 1]} : vector<2x128xf32> to vector<2x32xf32>
    %160 = arith.negf %159 : vector<2x32xf32>
    %161 = math.exp %160 : vector<2x32xf32>
    %cst_53 = arith.constant 1.000000e+00 : f32
    %162 = vector.broadcast %cst_53 : f32 to vector<2x32xf32>
    %163 = arith.addf %162, %161 : vector<2x32xf32>
    %164 = arith.divf %162, %163 : vector<2x32xf32>
    %165 = vector.extract_strided_slice %158 {offsets = [0, 32], sizes = [2, 32], strides = [1, 1]} : vector<2x128xf32> to vector<2x32xf32>
    %166 = arith.negf %165 : vector<2x32xf32>
    %167 = math.exp %166 : vector<2x32xf32>
    %cst_54 = arith.constant 1.000000e+00 : f32
    %168 = vector.broadcast %cst_54 : f32 to vector<2x32xf32>
    %169 = arith.addf %168, %167 : vector<2x32xf32>
    %170 = arith.divf %168, %169 : vector<2x32xf32>
    %171 = vector.extract_strided_slice %158 {offsets = [0, 64], sizes = [2, 32], strides = [1, 1]} : vector<2x128xf32> to vector<2x32xf32>
    %172 = math.tanh %171 : vector<2x32xf32>
    %173 = vector.extract_strided_slice %158 {offsets = [0, 96], sizes = [2, 32], strides = [1, 1]} : vector<2x128xf32> to vector<2x32xf32>
    %174 = arith.negf %173 : vector<2x32xf32>
    %175 = math.exp %174 : vector<2x32xf32>
    %cst_55 = arith.constant 1.000000e+00 : f32
    %176 = vector.broadcast %cst_55 : f32 to vector<2x32xf32>
    %177 = arith.addf %176, %175 : vector<2x32xf32>
    %178 = arith.divf %176, %177 : vector<2x32xf32>
    %179 = arith.mulf %170, %115 : vector<2x32xf32>
    %180 = arith.mulf %164, %172 : vector<2x32xf32>
    %181 = arith.addf %179, %180 : vector<2x32xf32>
    %182 = math.tanh %181 : vector<2x32xf32>
    %183 = arith.mulf %178, %182 : vector<2x32xf32>
    %184 = arith.truncf %183 : vector<2x32xf32> to vector<2x32xbf16>
    %c2_56 = arith.constant 2 : index
    %c0_57 = arith.constant 0 : index
    %c0_58 = arith.constant 0 : index
    %185 = vector.load %arg9[%c2_56, %c0_57, %c0_58] : memref<4x2x32xbf16, #tpu.memory_space<vmem>>, vector<1x2x32xbf16>
    %186 = vector.shape_cast %185 : vector<1x2x32xbf16> to vector<2x32xbf16>
    %187 = vector.shape_cast %184 : vector<2x32xbf16> to vector<1x2x32xbf16>
    tpu.vector_store %arg9[%c2_56, %c0_57, %c0_58], %187 {strides = array<i32>} : memref<4x2x32xbf16, #tpu.memory_space<vmem>>, vector<1x2x32xbf16>,
    %188 = vector.extract_strided_slice %16 {offsets = [2, 0], sizes = [2, 128], strides = [1, 1]} : vector<8x128xf32> to vector<2x128xf32>
    %189 = arith.truncf %150 : vector<2x32xf32> to vector<2x32xbf16>
    %cst_59 = arith.constant dense<0.000000e+00> : vector<2x128xf32>
    %190 = tpu.matmul %189, %18, %cst_59 {dimension_numbers = #tpu.dot_dimension_numbers<[1], [0], [0], [1], [0, 0, 1, 1], [], []>} : vector<2x32xbf16>, vector<32x128xbf16>, vector<2x128xf32> -> vector<2x128xf32>
    %191 = arith.addf %188, %190 : vector<2x128xf32>
    %192 = vector.extract_strided_slice %191 {offsets = [0, 0], sizes = [2, 32], strides = [1, 1]} : vector<2x128xf32> to vector<2x32xf32>
    %193 = arith.negf %192 : vector<2x32xf32>
    %194 = math.exp %193 : vector<2x32xf32>
    %cst_60 = arith.constant 1.000000e+00 : f32
    %195 = vector.broadcast %cst_60 : f32 to vector<2x32xf32>
    %196 = arith.addf %195, %194 : vector<2x32xf32>
    %197 = arith.divf %195, %196 : vector<2x32xf32>
    %198 = vector.extract_strided_slice %191 {offsets = [0, 32], sizes = [2, 32], strides = [1, 1]} : vector<2x128xf32> to vector<2x32xf32>
    %199 = arith.negf %198 : vector<2x32xf32>
    %200 = math.exp %199 : vector<2x32xf32>
    %cst_61 = arith.constant 1.000000e+00 : f32
    %201 = vector.broadcast %cst_61 : f32 to vector<2x32xf32>
    %202 = arith.addf %201, %200 : vector<2x32xf32>
    %203 = arith.divf %201, %202 : vector<2x32xf32>
    %204 = vector.extract_strided_slice %191 {offsets = [0, 64], sizes = [2, 32], strides = [1, 1]} : vector<2x128xf32> to vector<2x32xf32>
    %205 = math.tanh %204 : vector<2x32xf32>
    %206 = vector.extract_strided_slice %191 {offsets = [0, 96], sizes = [2, 32], strides = [1, 1]} : vector<2x128xf32> to vector<2x32xf32>
    %207 = arith.negf %206 : vector<2x32xf32>
    %208 = math.exp %207 : vector<2x32xf32>
    %cst_62 = arith.constant 1.000000e+00 : f32
    %209 = vector.broadcast %cst_62 : f32 to vector<2x32xf32>
    %210 = arith.addf %209, %208 : vector<2x32xf32>
    %211 = arith.divf %209, %210 : vector<2x32xf32>
    %212 = arith.mulf %203, %148 : vector<2x32xf32>
    %213 = arith.mulf %197, %205 : vector<2x32xf32>
    %214 = arith.addf %212, %213 : vector<2x32xf32>
    %215 = math.tanh %214 : vector<2x32xf32>
    %216 = arith.mulf %211, %215 : vector<2x32xf32>
    %217 = arith.truncf %216 : vector<2x32xf32> to vector<2x32xbf16>
    %c1_63 = arith.constant 1 : index
    %c0_64 = arith.constant 0 : index
    %c0_65 = arith.constant 0 : index
    %218 = vector.load %arg10[%c1_63, %c0_64, %c0_65] : memref<4x2x32xbf16, #tpu.memory_space<vmem>>, vector<1x2x32xbf16>
    %219 = vector.shape_cast %218 : vector<1x2x32xbf16> to vector<2x32xbf16>
    %220 = vector.shape_cast %217 : vector<2x32xbf16> to vector<1x2x32xbf16>
    tpu.vector_store %arg10[%c1_63, %c0_64, %c0_65], %220 {strides = array<i32>} : memref<4x2x32xbf16, #tpu.memory_space<vmem>>, vector<1x2x32xbf16>,
    %221 = vector.extract_strided_slice %9 {offsets = [6, 0], sizes = [2, 128], strides = [1, 1]} : vector<8x128xf32> to vector<2x128xf32>
    %222 = arith.truncf %183 : vector<2x32xf32> to vector<2x32xbf16>
    %cst_66 = arith.constant dense<0.000000e+00> : vector<2x128xf32>
    %223 = tpu.matmul %222, %17, %cst_66 {dimension_numbers = #tpu.dot_dimension_numbers<[1], [0], [0], [1], [0, 0, 1, 1], [], []>} : vector<2x32xbf16>, vector<32x128xbf16>, vector<2x128xf32> -> vector<2x128xf32>
    %224 = arith.addf %221, %223 : vector<2x128xf32>
    %225 = vector.extract_strided_slice %224 {offsets = [0, 0], sizes = [2, 32], strides = [1, 1]} : vector<2x128xf32> to vector<2x32xf32>
    %226 = arith.negf %225 : vector<2x32xf32>
    %227 = math.exp %226 : vector<2x32xf32>
    %cst_67 = arith.constant 1.000000e+00 : f32
    %228 = vector.broadcast %cst_67 : f32 to vector<2x32xf32>
    %229 = arith.addf %228, %227 : vector<2x32xf32>
    %230 = arith.divf %228, %229 : vector<2x32xf32>
    %231 = vector.extract_strided_slice %224 {offsets = [0, 32], sizes = [2, 32], strides = [1, 1]} : vector<2x128xf32> to vector<2x32xf32>
    %232 = arith.negf %231 : vector<2x32xf32>
    %233 = math.exp %232 : vector<2x32xf32>
    %cst_68 = arith.constant 1.000000e+00 : f32
    %234 = vector.broadcast %cst_68 : f32 to vector<2x32xf32>
    %235 = arith.addf %234, %233 : vector<2x32xf32>
    %236 = arith.divf %234, %235 : vector<2x32xf32>
    %237 = vector.extract_strided_slice %224 {offsets = [0, 64], sizes = [2, 32], strides = [1, 1]} : vector<2x128xf32> to vector<2x32xf32>
    %238 = math.tanh %237 : vector<2x32xf32>
    %239 = vector.extract_strided_slice %224 {offsets = [0, 96], sizes = [2, 32], strides = [1, 1]} : vector<2x128xf32> to vector<2x32xf32>
    %240 = arith.negf %239 : vector<2x32xf32>
    %241 = math.exp %240 : vector<2x32xf32>
    %cst_69 = arith.constant 1.000000e+00 : f32
    %242 = vector.broadcast %cst_69 : f32 to vector<2x32xf32>
    %243 = arith.addf %242, %241 : vector<2x32xf32>
    %244 = arith.divf %242, %243 : vector<2x32xf32>
    %245 = arith.mulf %236, %181 : vector<2x32xf32>
    %246 = arith.mulf %230, %238 : vector<2x32xf32>
    %247 = arith.addf %245, %246 : vector<2x32xf32>
    %248 = math.tanh %247 : vector<2x32xf32>
    %249 = arith.mulf %244, %248 : vector<2x32xf32>
    %250 = arith.truncf %249 : vector<2x32xf32> to vector<2x32xbf16>
    %c3_70 = arith.constant 3 : index
    %c0_71 = arith.constant 0 : index
    %c0_72 = arith.constant 0 : index
    %251 = vector.load %arg9[%c3_70, %c0_71, %c0_72] : memref<4x2x32xbf16, #tpu.memory_space<vmem>>, vector<1x2x32xbf16>
    %252 = vector.shape_cast %251 : vector<1x2x32xbf16> to vector<2x32xbf16>
    %253 = vector.shape_cast %250 : vector<2x32xbf16> to vector<1x2x32xbf16>
    tpu.vector_store %arg9[%c3_70, %c0_71, %c0_72], %253 {strides = array<i32>} : memref<4x2x32xbf16, #tpu.memory_space<vmem>>, vector<1x2x32xbf16>,
    %254 = vector.extract_strided_slice %16 {offsets = [0, 0], sizes = [2, 128], strides = [1, 1]} : vector<8x128xf32> to vector<2x128xf32>
    %255 = arith.truncf %216 : vector<2x32xf32> to vector<2x32xbf16>
    %cst_73 = arith.constant dense<0.000000e+00> : vector<2x128xf32>
    %256 = tpu.matmul %255, %18, %cst_73 {dimension_numbers = #tpu.dot_dimension_numbers<[1], [0], [0], [1], [0, 0, 1, 1], [], []>} : vector<2x32xbf16>, vector<32x128xbf16>, vector<2x128xf32> -> vector<2x128xf32>
    %257 = arith.addf %254, %256 : vector<2x128xf32>
    %258 = vector.extract_strided_slice %257 {offsets = [0, 0], sizes = [2, 32], strides = [1, 1]} : vector<2x128xf32> to vector<2x32xf32>
    %259 = arith.negf %258 : vector<2x32xf32>
    %260 = math.exp %259 : vector<2x32xf32>
    %cst_74 = arith.constant 1.000000e+00 : f32
    %261 = vector.broadcast %cst_74 : f32 to vector<2x32xf32>
    %262 = arith.addf %261, %260 : vector<2x32xf32>
    %263 = arith.divf %261, %262 : vector<2x32xf32>
    %264 = vector.extract_strided_slice %257 {offsets = [0, 32], sizes = [2, 32], strides = [1, 1]} : vector<2x128xf32> to vector<2x32xf32>
    %265 = arith.negf %264 : vector<2x32xf32>
    %266 = math.exp %265 : vector<2x32xf32>
    %cst_75 = arith.constant 1.000000e+00 : f32
    %267 = vector.broadcast %cst_75 : f32 to vector<2x32xf32>
    %268 = arith.addf %267, %266 : vector<2x32xf32>
    %269 = arith.divf %267, %268 : vector<2x32xf32>
    %270 = vector.extract_strided_slice %257 {offsets = [0, 64], sizes = [2, 32], strides = [1, 1]} : vector<2x128xf32> to vector<2x32xf32>
    %271 = math.tanh %270 : vector<2x32xf32>
    %272 = vector.extract_strided_slice %257 {offsets = [0, 96], sizes = [2, 32], strides = [1, 1]} : vector<2x128xf32> to vector<2x32xf32>
    %273 = arith.negf %272 : vector<2x32xf32>
    %274 = math.exp %273 : vector<2x32xf32>
    %cst_76 = arith.constant 1.000000e+00 : f32
    %275 = vector.broadcast %cst_76 : f32 to vector<2x32xf32>
    %276 = arith.addf %275, %274 : vector<2x32xf32>
    %277 = arith.divf %275, %276 : vector<2x32xf32>
    %278 = arith.mulf %269, %214 : vector<2x32xf32>
    %279 = arith.mulf %263, %271 : vector<2x32xf32>
    %280 = arith.addf %278, %279 : vector<2x32xf32>
    %281 = math.tanh %280 : vector<2x32xf32>
    %282 = arith.mulf %277, %281 : vector<2x32xf32>
    %283 = arith.truncf %282 : vector<2x32xf32> to vector<2x32xbf16>
    %c0_77 = arith.constant 0 : index
    %c0_78 = arith.constant 0 : index
    %c0_79 = arith.constant 0 : index
    %284 = vector.load %arg10[%c0_77, %c0_78, %c0_79] : memref<4x2x32xbf16, #tpu.memory_space<vmem>>, vector<1x2x32xbf16>
    %285 = vector.shape_cast %284 : vector<1x2x32xbf16> to vector<2x32xbf16>
    %286 = vector.shape_cast %283 : vector<2x32xbf16> to vector<1x2x32xbf16>
    tpu.vector_store %arg10[%c0_77, %c0_78, %c0_79], %286 {strides = array<i32>} : memref<4x2x32xbf16, #tpu.memory_space<vmem>>, vector<1x2x32xbf16>,
    %c0_80 = arith.constant 0 : index
    %c0_81 = arith.constant 0 : index
    %287 = vector.load %arg11[%c0_80, %c0_81] : memref<2x32xf32, #tpu.memory_space<vmem>>, vector<2x32xf32>
    tpu.vector_store %arg11[%c0_80, %c0_81], %249 {strides = array<i32>} : memref<2x32xf32, #tpu.memory_space<vmem>>, vector<2x32xf32>,
    %c0_82 = arith.constant 0 : index
    %c0_83 = arith.constant 0 : index
    %288 = vector.load %arg12[%c0_82, %c0_83] : memref<2x32xf32, #tpu.memory_space<vmem>>, vector<2x32xf32>
    tpu.vector_store %arg12[%c0_82, %c0_83], %247 {strides = array<i32>} : memref<2x32xf32, #tpu.memory_space<vmem>>, vector<2x32xf32>,
    %c0_84 = arith.constant 0 : index
    %c0_85 = arith.constant 0 : index
    %289 = vector.load %arg13[%c0_84, %c0_85] : memref<2x32xf32, #tpu.memory_space<vmem>>, vector<2x32xf32>
    tpu.vector_store %arg13[%c0_84, %c0_85], %282 {strides = array<i32>} : memref<2x32xf32, #tpu.memory_space<vmem>>, vector<2x32xf32>,
    %c0_86 = arith.constant 0 : index
    %c0_87 = arith.constant 0 : index
    %290 = vector.load %arg14[%c0_86, %c0_87] : memref<2x32xf32, #tpu.memory_space<vmem>>, vector<2x32xf32>
    tpu.vector_store %arg14[%c0_86, %c0_87], %280 {strides = array<i32>} : memref<2x32xf32, #tpu.memory_space<vmem>>, vector<2x32xf32>,
    return
  }
  func.func @transform_0(%arg0: i32) -> (i32, i32, i32) {
    %c0_i32 = arith.constant 0 : i32
    %c0_i32_0 = arith.constant 0 : i32
    %c0_i32_1 = arith.constant 0 : i32
    return %arg0, %c0_i32, %c0_i32_0 : i32, i32, i32
  }
  func.func @transform_1(%arg0: i32) -> (i32, i32, i32) {
    %c0_i32 = arith.constant 0 : i32
    %0 = arith.subi %c0_i32, %arg0 : i32
    %c0_i32_0 = arith.constant 0 : i32
    %c0_i32_1 = arith.constant 0 : i32
    %c0_i32_2 = arith.constant 0 : i32
    return %0, %c0_i32_0, %c0_i32_1 : i32, i32, i32
  }
  func.func @transform_2(%arg0: i32) -> (i32, i32) {
    %c0_i32 = arith.constant 0 : i32
    %c0_i32_0 = arith.constant 0 : i32
    %c0_i32_1 = arith.constant 0 : i32
    return %c0_i32, %c0_i32_0 : i32, i32
  }
  func.func @transform_3(%arg0: i32) -> (i32, i32) {
    %c0_i32 = arith.constant 0 : i32
    %c0_i32_0 = arith.constant 0 : i32
    %c0_i32_1 = arith.constant 0 : i32
    return %c0_i32, %c0_i32_0 : i32, i32
  }
  func.func @transform_4(%arg0: i32) -> (i32, i32) {
    %c0_i32 = arith.constant 0 : i32
    %c0_i32_0 = arith.constant 0 : i32
    %c0_i32_1 = arith.constant 0 : i32
    return %c0_i32, %c0_i32_0 : i32, i32
  }
  func.func @transform_5(%arg0: i32) -> (i32, i32) {
    %c0_i32 = arith.constant 0 : i32
    %c0_i32_0 = arith.constant 0 : i32
    %c0_i32_1 = arith.constant 0 : i32
    return %c0_i32, %c0_i32_0 : i32, i32
  }
  func.func @transform_6(%arg0: i32) -> (i32, i32) {
    %c0_i32 = arith.constant 0 : i32
    %c0_i32_0 = arith.constant 0 : i32
    %c0_i32_1 = arith.constant 0 : i32
    return %c0_i32, %c0_i32_0 : i32, i32
  }
  func.func @transform_7(%arg0: i32) -> (i32, i32) {
    %c0_i32 = arith.constant 0 : i32
    %c0_i32_0 = arith.constant 0 : i32
    %c0_i32_1 = arith.constant 0 : i32
    return %c0_i32, %c0_i32_0 : i32, i32
  }
  func.func @transform_8(%arg0: i32) -> (i32, i32, i32) {
    %c0_i32 = arith.constant 0 : i32
    %c0_i32_0 = arith.constant 0 : i32
    %c0_i32_1 = arith.constant 0 : i32
    return %arg0, %c0_i32, %c0_i32_0 : i32, i32, i32
  }
  func.func @transform_9(%arg0: i32) -> (i32, i32, i32) {
    %c0_i32 = arith.constant 0 : i32
    %0 = arith.subi %c0_i32, %arg0 : i32
    %c0_i32_0 = arith.constant 0 : i32
    %c0_i32_1 = arith.constant 0 : i32
    %c0_i32_2 = arith.constant 0 : i32
    return %0, %c0_i32_0, %c0_i32_1 : i32, i32, i32
  }
}

module attributes {stable_mosaic.version = 11 : i64} {
  func.func @bilstm_fused_kernel(%arg0: i32, %arg1: memref<1x4x128xbf16, #tpu.memory_space<vmem>>, %arg2: memref<1x4x128xbf16, #tpu.memory_space<vmem>>, %arg3: memref<128x128xbf16, #tpu.memory_space<vmem>>, %arg4: memref<128x128xbf16, #tpu.memory_space<vmem>>, %arg5: memref<1x128xf32, #tpu.memory_space<vmem>>, %arg6: memref<1x128xf32, #tpu.memory_space<vmem>>, %arg7: memref<32x128xbf16, #tpu.memory_space<vmem>>, %arg8: memref<32x128xbf16, #tpu.memory_space<vmem>>, %arg9: memref<2x2x32xbf16, #tpu.memory_space<vmem>>, %arg10: memref<2x2x32xbf16, #tpu.memory_space<vmem>>, %arg11: memref<2x32xf32, #tpu.memory_space<vmem>>, %arg12: memref<2x32xf32, #tpu.memory_space<vmem>>, %arg13: memref<2x32xf32, #tpu.memory_space<vmem>>, %arg14: memref<2x32xf32, #tpu.memory_space<vmem>>) attributes {dimension_semantics = [#tpu.dimension_semantics<arbitrary>], iteration_bounds = array<i64: 1>, scalar_prefetch = 0 : i64, scratch_operands = 4 : i64, tpu.core_type = #tpu.core_type<tc>, window_params = [{transform_indices = @transform_0, window_bounds = array<i64: 1, 4, 128>}, {transform_indices = @transform_1, window_bounds = array<i64: 1, 4, 128>}, {pipeline_mode = #tpu.pipeline_mode<synchronous>, transform_indices = @transform_2, window_bounds = array<i64: 128, 128>}, {pipeline_mode = #tpu.pipeline_mode<synchronous>, transform_indices = @transform_3, window_bounds = array<i64: 128, 128>}, {pipeline_mode = #tpu.pipeline_mode<synchronous>, transform_indices = @transform_4, window_bounds = array<i64: 1, 128>}, {pipeline_mode = #tpu.pipeline_mode<synchronous>, transform_indices = @transform_5, window_bounds = array<i64: 1, 128>}, {pipeline_mode = #tpu.pipeline_mode<synchronous>, transform_indices = @transform_6, window_bounds = array<i64: 32, 128>}, {pipeline_mode = #tpu.pipeline_mode<synchronous>, transform_indices = @transform_7, window_bounds = array<i64: 32, 128>}, {transform_indices = @transform_8, window_bounds = array<i64: 2, 2, 32>}, {transform_indices = @transform_9, window_bounds = array<i64: 2, 2, 32>}]} {
    %c0_i32 = arith.constant 0 : i32
    %0 = arith.cmpi eq, %arg0, %c0_i32 : i32
    %1 = arith.extui %0 : i1 to i32
    %c0_i32_0 = arith.constant 0 : i32
    %2 = arith.cmpi ne, %1, %c0_i32_0 : i32
    scf.if %2 {
      %cst_62 = arith.constant 0.000000e+00 : f32
      %159 = vector.broadcast %cst_62 : f32 to vector<2x32xf32>
      %c0_63 = arith.constant 0 : index
      %c0_64 = arith.constant 0 : index
      %160 = vector.load %arg11[%c0_63, %c0_64] : memref<2x32xf32, #tpu.memory_space<vmem>>, vector<2x32xf32>
      tpu.vector_store %arg11[%c0_63, %c0_64], %159 {strides = array<i32>} : memref<2x32xf32, #tpu.memory_space<vmem>>, vector<2x32xf32>,
      %cst_65 = arith.constant 0.000000e+00 : f32
      %161 = vector.broadcast %cst_65 : f32 to vector<2x32xf32>
      %c0_66 = arith.constant 0 : index
      %c0_67 = arith.constant 0 : index
      %162 = vector.load %arg12[%c0_66, %c0_67] : memref<2x32xf32, #tpu.memory_space<vmem>>, vector<2x32xf32>
      tpu.vector_store %arg12[%c0_66, %c0_67], %161 {strides = array<i32>} : memref<2x32xf32, #tpu.memory_space<vmem>>, vector<2x32xf32>,
      %cst_68 = arith.constant 0.000000e+00 : f32
      %163 = vector.broadcast %cst_68 : f32 to vector<2x32xf32>
      %c0_69 = arith.constant 0 : index
      %c0_70 = arith.constant 0 : index
      %164 = vector.load %arg13[%c0_69, %c0_70] : memref<2x32xf32, #tpu.memory_space<vmem>>, vector<2x32xf32>
      tpu.vector_store %arg13[%c0_69, %c0_70], %163 {strides = array<i32>} : memref<2x32xf32, #tpu.memory_space<vmem>>, vector<2x32xf32>,
      %cst_71 = arith.constant 0.000000e+00 : f32
      %165 = vector.broadcast %cst_71 : f32 to vector<2x32xf32>
      %c0_72 = arith.constant 0 : index
      %c0_73 = arith.constant 0 : index
      %166 = vector.load %arg14[%c0_72, %c0_73] : memref<2x32xf32, #tpu.memory_space<vmem>>, vector<2x32xf32>
      tpu.vector_store %arg14[%c0_72, %c0_73], %165 {strides = array<i32>} : memref<2x32xf32, #tpu.memory_space<vmem>>, vector<2x32xf32>,
    } else {
    }
    %c0 = arith.constant 0 : index
    %c0_1 = arith.constant 0 : index
    %c0_2 = arith.constant 0 : index
    %3 = vector.load %arg1[%c0, %c0_1, %c0_2] : memref<1x4x128xbf16, #tpu.memory_space<vmem>>, vector<1x4x128xbf16>
    %4 = vector.shape_cast %3 : vector<1x4x128xbf16> to vector<4x128xbf16>
    %c0_3 = arith.constant 0 : index
    %c0_4 = arith.constant 0 : index
    %5 = vector.load %arg3[%c0_3, %c0_4] : memref<128x128xbf16, #tpu.memory_space<vmem>>, vector<128x128xbf16>
    %cst = arith.constant dense<0.000000e+00> : vector<4x128xf32>
    %6 = tpu.matmul %4, %5, %cst {dimension_numbers = #tpu.dot_dimension_numbers<[1], [0], [0], [1], [0, 0, 1, 1], [], []>} : vector<4x128xbf16>, vector<128x128xbf16>, vector<4x128xf32> -> vector<4x128xf32>
    %c0_5 = arith.constant 0 : index
    %c0_6 = arith.constant 0 : index
    %7 = vector.load %arg5[%c0_5, %c0_6] : memref<1x128xf32, #tpu.memory_space<vmem>>, vector<1x128xf32>
    %8 = vector.broadcast %7 : vector<1x128xf32> to vector<4x128xf32>
    %9 = arith.addf %6, %8 : vector<4x128xf32>
    %c0_7 = arith.constant 0 : index
    %c0_8 = arith.constant 0 : index
    %c0_9 = arith.constant 0 : index
    %10 = vector.load %arg2[%c0_7, %c0_8, %c0_9] : memref<1x4x128xbf16, #tpu.memory_space<vmem>>, vector<1x4x128xbf16>
    %11 = vector.shape_cast %10 : vector<1x4x128xbf16> to vector<4x128xbf16>
    %c0_10 = arith.constant 0 : index
    %c0_11 = arith.constant 0 : index
    %12 = vector.load %arg4[%c0_10, %c0_11] : memref<128x128xbf16, #tpu.memory_space<vmem>>, vector<128x128xbf16>
    %cst_12 = arith.constant dense<0.000000e+00> : vector<4x128xf32>
    %13 = tpu.matmul %11, %12, %cst_12 {dimension_numbers = #tpu.dot_dimension_numbers<[1], [0], [0], [1], [0, 0, 1, 1], [], []>} : vector<4x128xbf16>, vector<128x128xbf16>, vector<4x128xf32> -> vector<4x128xf32>
    %c0_13 = arith.constant 0 : index
    %c0_14 = arith.constant 0 : index
    %14 = vector.load %arg6[%c0_13, %c0_14] : memref<1x128xf32, #tpu.memory_space<vmem>>, vector<1x128xf32>
    %15 = vector.broadcast %14 : vector<1x128xf32> to vector<4x128xf32>
    %16 = arith.addf %13, %15 : vector<4x128xf32>
    %c0_15 = arith.constant 0 : index
    %c0_16 = arith.constant 0 : index
    %17 = vector.load %arg7[%c0_15, %c0_16] : memref<32x128xbf16, #tpu.memory_space<vmem>>, vector<32x128xbf16>
    %c0_17 = arith.constant 0 : index
    %c0_18 = arith.constant 0 : index
    %18 = vector.load %arg8[%c0_17, %c0_18] : memref<32x128xbf16, #tpu.memory_space<vmem>>, vector<32x128xbf16>
    %c0_19 = arith.constant 0 : index
    %c0_20 = arith.constant 0 : index
    %19 = vector.load %arg11[%c0_19, %c0_20] : memref<2x32xf32, #tpu.memory_space<vmem>>, vector<2x32xf32>
    %c0_21 = arith.constant 0 : index
    %c0_22 = arith.constant 0 : index
    %20 = vector.load %arg12[%c0_21, %c0_22] : memref<2x32xf32, #tpu.memory_space<vmem>>, vector<2x32xf32>
    %c0_23 = arith.constant 0 : index
    %c0_24 = arith.constant 0 : index
    %21 = vector.load %arg13[%c0_23, %c0_24] : memref<2x32xf32, #tpu.memory_space<vmem>>, vector<2x32xf32>
    %c0_25 = arith.constant 0 : index
    %c0_26 = arith.constant 0 : index
    %22 = vector.load %arg14[%c0_25, %c0_26] : memref<2x32xf32, #tpu.memory_space<vmem>>, vector<2x32xf32>
    %23 = vector.extract_strided_slice %9 {offsets = [0, 0], sizes = [2, 128], strides = [1, 1]} : vector<4x128xf32> to vector<2x128xf32>
    %24 = arith.truncf %19 : vector<2x32xf32> to vector<2x32xbf16>
    %cst_27 = arith.constant dense<0.000000e+00> : vector<2x128xf32>
    %25 = tpu.matmul %24, %17, %cst_27 {dimension_numbers = #tpu.dot_dimension_numbers<[1], [0], [0], [1], [0, 0, 1, 1], [], []>} : vector<2x32xbf16>, vector<32x128xbf16>, vector<2x128xf32> -> vector<2x128xf32>
    %26 = arith.addf %23, %25 : vector<2x128xf32>
    %27 = vector.extract_strided_slice %26 {offsets = [0, 0], sizes = [2, 32], strides = [1, 1]} : vector<2x128xf32> to vector<2x32xf32>
    %28 = arith.negf %27 : vector<2x32xf32>
    %29 = math.exp %28 : vector<2x32xf32>
    %cst_28 = arith.constant 1.000000e+00 : f32
    %30 = vector.broadcast %cst_28 : f32 to vector<2x32xf32>
    %31 = arith.addf %30, %29 : vector<2x32xf32>
    %32 = arith.divf %30, %31 : vector<2x32xf32>
    %33 = vector.extract_strided_slice %26 {offsets = [0, 32], sizes = [2, 32], strides = [1, 1]} : vector<2x128xf32> to vector<2x32xf32>
    %34 = arith.negf %33 : vector<2x32xf32>
    %35 = math.exp %34 : vector<2x32xf32>
    %cst_29 = arith.constant 1.000000e+00 : f32
    %36 = vector.broadcast %cst_29 : f32 to vector<2x32xf32>
    %37 = arith.addf %36, %35 : vector<2x32xf32>
    %38 = arith.divf %36, %37 : vector<2x32xf32>
    %39 = vector.extract_strided_slice %26 {offsets = [0, 64], sizes = [2, 32], strides = [1, 1]} : vector<2x128xf32> to vector<2x32xf32>
    %40 = math.tanh %39 : vector<2x32xf32>
    %41 = vector.extract_strided_slice %26 {offsets = [0, 96], sizes = [2, 32], strides = [1, 1]} : vector<2x128xf32> to vector<2x32xf32>
    %42 = arith.negf %41 : vector<2x32xf32>
    %43 = math.exp %42 : vector<2x32xf32>
    %cst_30 = arith.constant 1.000000e+00 : f32
    %44 = vector.broadcast %cst_30 : f32 to vector<2x32xf32>
    %45 = arith.addf %44, %43 : vector<2x32xf32>
    %46 = arith.divf %44, %45 : vector<2x32xf32>
    %47 = arith.mulf %38, %20 : vector<2x32xf32>
    %48 = arith.mulf %32, %40 : vector<2x32xf32>
    %49 = arith.addf %47, %48 : vector<2x32xf32>
    %50 = math.tanh %49 : vector<2x32xf32>
    %51 = arith.mulf %46, %50 : vector<2x32xf32>
    %52 = arith.truncf %51 : vector<2x32xf32> to vector<2x32xbf16>
    %c0_31 = arith.constant 0 : index
    %c0_32 = arith.constant 0 : index
    %c0_33 = arith.constant 0 : index
    %53 = vector.load %arg9[%c0_31, %c0_32, %c0_33] : memref<2x2x32xbf16, #tpu.memory_space<vmem>>, vector<1x2x32xbf16>
    %54 = vector.shape_cast %53 : vector<1x2x32xbf16> to vector<2x32xbf16>
    %55 = vector.shape_cast %52 : vector<2x32xbf16> to vector<1x2x32xbf16>
    tpu.vector_store %arg9[%c0_31, %c0_32, %c0_33], %55 {strides = array<i32>} : memref<2x2x32xbf16, #tpu.memory_space<vmem>>, vector<1x2x32xbf16>,
    %56 = vector.extract_strided_slice %16 {offsets = [2, 0], sizes = [2, 128], strides = [1, 1]} : vector<4x128xf32> to vector<2x128xf32>
    %57 = arith.truncf %21 : vector<2x32xf32> to vector<2x32xbf16>
    %cst_34 = arith.constant dense<0.000000e+00> : vector<2x128xf32>
    %58 = tpu.matmul %57, %18, %cst_34 {dimension_numbers = #tpu.dot_dimension_numbers<[1], [0], [0], [1], [0, 0, 1, 1], [], []>} : vector<2x32xbf16>, vector<32x128xbf16>, vector<2x128xf32> -> vector<2x128xf32>
    %59 = arith.addf %56, %58 : vector<2x128xf32>
    %60 = vector.extract_strided_slice %59 {offsets = [0, 0], sizes = [2, 32], strides = [1, 1]} : vector<2x128xf32> to vector<2x32xf32>
    %61 = arith.negf %60 : vector<2x32xf32>
    %62 = math.exp %61 : vector<2x32xf32>
    %cst_35 = arith.constant 1.000000e+00 : f32
    %63 = vector.broadcast %cst_35 : f32 to vector<2x32xf32>
    %64 = arith.addf %63, %62 : vector<2x32xf32>
    %65 = arith.divf %63, %64 : vector<2x32xf32>
    %66 = vector.extract_strided_slice %59 {offsets = [0, 32], sizes = [2, 32], strides = [1, 1]} : vector<2x128xf32> to vector<2x32xf32>
    %67 = arith.negf %66 : vector<2x32xf32>
    %68 = math.exp %67 : vector<2x32xf32>
    %cst_36 = arith.constant 1.000000e+00 : f32
    %69 = vector.broadcast %cst_36 : f32 to vector<2x32xf32>
    %70 = arith.addf %69, %68 : vector<2x32xf32>
    %71 = arith.divf %69, %70 : vector<2x32xf32>
    %72 = vector.extract_strided_slice %59 {offsets = [0, 64], sizes = [2, 32], strides = [1, 1]} : vector<2x128xf32> to vector<2x32xf32>
    %73 = math.tanh %72 : vector<2x32xf32>
    %74 = vector.extract_strided_slice %59 {offsets = [0, 96], sizes = [2, 32], strides = [1, 1]} : vector<2x128xf32> to vector<2x32xf32>
    %75 = arith.negf %74 : vector<2x32xf32>
    %76 = math.exp %75 : vector<2x32xf32>
    %cst_37 = arith.constant 1.000000e+00 : f32
    %77 = vector.broadcast %cst_37 : f32 to vector<2x32xf32>
    %78 = arith.addf %77, %76 : vector<2x32xf32>
    %79 = arith.divf %77, %78 : vector<2x32xf32>
    %80 = arith.mulf %71, %22 : vector<2x32xf32>
    %81 = arith.mulf %65, %73 : vector<2x32xf32>
    %82 = arith.addf %80, %81 : vector<2x32xf32>
    %83 = math.tanh %82 : vector<2x32xf32>
    %84 = arith.mulf %79, %83 : vector<2x32xf32>
    %85 = arith.truncf %84 : vector<2x32xf32> to vector<2x32xbf16>
    %c1 = arith.constant 1 : index
    %c0_38 = arith.constant 0 : index
    %c0_39 = arith.constant 0 : index
    %86 = vector.load %arg10[%c1, %c0_38, %c0_39] : memref<2x2x32xbf16, #tpu.memory_space<vmem>>, vector<1x2x32xbf16>
    %87 = vector.shape_cast %86 : vector<1x2x32xbf16> to vector<2x32xbf16>
    %88 = vector.shape_cast %85 : vector<2x32xbf16> to vector<1x2x32xbf16>
    tpu.vector_store %arg10[%c1, %c0_38, %c0_39], %88 {strides = array<i32>} : memref<2x2x32xbf16, #tpu.memory_space<vmem>>, vector<1x2x32xbf16>,
    %89 = vector.extract_strided_slice %9 {offsets = [2, 0], sizes = [2, 128], strides = [1, 1]} : vector<4x128xf32> to vector<2x128xf32>
    %90 = arith.truncf %51 : vector<2x32xf32> to vector<2x32xbf16>
    %cst_40 = arith.constant dense<0.000000e+00> : vector<2x128xf32>
    %91 = tpu.matmul %90, %17, %cst_40 {dimension_numbers = #tpu.dot_dimension_numbers<[1], [0], [0], [1], [0, 0, 1, 1], [], []>} : vector<2x32xbf16>, vector<32x128xbf16>, vector<2x128xf32> -> vector<2x128xf32>
    %92 = arith.addf %89, %91 : vector<2x128xf32>
    %93 = vector.extract_strided_slice %92 {offsets = [0, 0], sizes = [2, 32], strides = [1, 1]} : vector<2x128xf32> to vector<2x32xf32>
    %94 = arith.negf %93 : vector<2x32xf32>
    %95 = math.exp %94 : vector<2x32xf32>
    %cst_41 = arith.constant 1.000000e+00 : f32
    %96 = vector.broadcast %cst_41 : f32 to vector<2x32xf32>
    %97 = arith.addf %96, %95 : vector<2x32xf32>
    %98 = arith.divf %96, %97 : vector<2x32xf32>
    %99 = vector.extract_strided_slice %92 {offsets = [0, 32], sizes = [2, 32], strides = [1, 1]} : vector<2x128xf32> to vector<2x32xf32>
    %100 = arith.negf %99 : vector<2x32xf32>
    %101 = math.exp %100 : vector<2x32xf32>
    %cst_42 = arith.constant 1.000000e+00 : f32
    %102 = vector.broadcast %cst_42 : f32 to vector<2x32xf32>
    %103 = arith.addf %102, %101 : vector<2x32xf32>
    %104 = arith.divf %102, %103 : vector<2x32xf32>
    %105 = vector.extract_strided_slice %92 {offsets = [0, 64], sizes = [2, 32], strides = [1, 1]} : vector<2x128xf32> to vector<2x32xf32>
    %106 = math.tanh %105 : vector<2x32xf32>
    %107 = vector.extract_strided_slice %92 {offsets = [0, 96], sizes = [2, 32], strides = [1, 1]} : vector<2x128xf32> to vector<2x32xf32>
    %108 = arith.negf %107 : vector<2x32xf32>
    %109 = math.exp %108 : vector<2x32xf32>
    %cst_43 = arith.constant 1.000000e+00 : f32
    %110 = vector.broadcast %cst_43 : f32 to vector<2x32xf32>
    %111 = arith.addf %110, %109 : vector<2x32xf32>
    %112 = arith.divf %110, %111 : vector<2x32xf32>
    %113 = arith.mulf %104, %49 : vector<2x32xf32>
    %114 = arith.mulf %98, %106 : vector<2x32xf32>
    %115 = arith.addf %113, %114 : vector<2x32xf32>
    %116 = math.tanh %115 : vector<2x32xf32>
    %117 = arith.mulf %112, %116 : vector<2x32xf32>
    %118 = arith.truncf %117 : vector<2x32xf32> to vector<2x32xbf16>
    %c1_44 = arith.constant 1 : index
    %c0_45 = arith.constant 0 : index
    %c0_46 = arith.constant 0 : index
    %119 = vector.load %arg9[%c1_44, %c0_45, %c0_46] : memref<2x2x32xbf16, #tpu.memory_space<vmem>>, vector<1x2x32xbf16>
    %120 = vector.shape_cast %119 : vector<1x2x32xbf16> to vector<2x32xbf16>
    %121 = vector.shape_cast %118 : vector<2x32xbf16> to vector<1x2x32xbf16>
    tpu.vector_store %arg9[%c1_44, %c0_45, %c0_46], %121 {strides = array<i32>} : memref<2x2x32xbf16, #tpu.memory_space<vmem>>, vector<1x2x32xbf16>,
    %122 = vector.extract_strided_slice %16 {offsets = [0, 0], sizes = [2, 128], strides = [1, 1]} : vector<4x128xf32> to vector<2x128xf32>
    %123 = arith.truncf %84 : vector<2x32xf32> to vector<2x32xbf16>
    %cst_47 = arith.constant dense<0.000000e+00> : vector<2x128xf32>
    %124 = tpu.matmul %123, %18, %cst_47 {dimension_numbers = #tpu.dot_dimension_numbers<[1], [0], [0], [1], [0, 0, 1, 1], [], []>} : vector<2x32xbf16>, vector<32x128xbf16>, vector<2x128xf32> -> vector<2x128xf32>
    %125 = arith.addf %122, %124 : vector<2x128xf32>
    %126 = vector.extract_strided_slice %125 {offsets = [0, 0], sizes = [2, 32], strides = [1, 1]} : vector<2x128xf32> to vector<2x32xf32>
    %127 = arith.negf %126 : vector<2x32xf32>
    %128 = math.exp %127 : vector<2x32xf32>
    %cst_48 = arith.constant 1.000000e+00 : f32
    %129 = vector.broadcast %cst_48 : f32 to vector<2x32xf32>
    %130 = arith.addf %129, %128 : vector<2x32xf32>
    %131 = arith.divf %129, %130 : vector<2x32xf32>
    %132 = vector.extract_strided_slice %125 {offsets = [0, 32], sizes = [2, 32], strides = [1, 1]} : vector<2x128xf32> to vector<2x32xf32>
    %133 = arith.negf %132 : vector<2x32xf32>
    %134 = math.exp %133 : vector<2x32xf32>
    %cst_49 = arith.constant 1.000000e+00 : f32
    %135 = vector.broadcast %cst_49 : f32 to vector<2x32xf32>
    %136 = arith.addf %135, %134 : vector<2x32xf32>
    %137 = arith.divf %135, %136 : vector<2x32xf32>
    %138 = vector.extract_strided_slice %125 {offsets = [0, 64], sizes = [2, 32], strides = [1, 1]} : vector<2x128xf32> to vector<2x32xf32>
    %139 = math.tanh %138 : vector<2x32xf32>
    %140 = vector.extract_strided_slice %125 {offsets = [0, 96], sizes = [2, 32], strides = [1, 1]} : vector<2x128xf32> to vector<2x32xf32>
    %141 = arith.negf %140 : vector<2x32xf32>
    %142 = math.exp %141 : vector<2x32xf32>
    %cst_50 = arith.constant 1.000000e+00 : f32
    %143 = vector.broadcast %cst_50 : f32 to vector<2x32xf32>
    %144 = arith.addf %143, %142 : vector<2x32xf32>
    %145 = arith.divf %143, %144 : vector<2x32xf32>
    %146 = arith.mulf %137, %82 : vector<2x32xf32>
    %147 = arith.mulf %131, %139 : vector<2x32xf32>
    %148 = arith.addf %146, %147 : vector<2x32xf32>
    %149 = math.tanh %148 : vector<2x32xf32>
    %150 = arith.mulf %145, %149 : vector<2x32xf32>
    %151 = arith.truncf %150 : vector<2x32xf32> to vector<2x32xbf16>
    %c0_51 = arith.constant 0 : index
    %c0_52 = arith.constant 0 : index
    %c0_53 = arith.constant 0 : index
    %152 = vector.load %arg10[%c0_51, %c0_52, %c0_53] : memref<2x2x32xbf16, #tpu.memory_space<vmem>>, vector<1x2x32xbf16>
    %153 = vector.shape_cast %152 : vector<1x2x32xbf16> to vector<2x32xbf16>
    %154 = vector.shape_cast %151 : vector<2x32xbf16> to vector<1x2x32xbf16>
    tpu.vector_store %arg10[%c0_51, %c0_52, %c0_53], %154 {strides = array<i32>} : memref<2x2x32xbf16, #tpu.memory_space<vmem>>, vector<1x2x32xbf16>,
    %c0_54 = arith.constant 0 : index
    %c0_55 = arith.constant 0 : index
    %155 = vector.load %arg11[%c0_54, %c0_55] : memref<2x32xf32, #tpu.memory_space<vmem>>, vector<2x32xf32>
    tpu.vector_store %arg11[%c0_54, %c0_55], %117 {strides = array<i32>} : memref<2x32xf32, #tpu.memory_space<vmem>>, vector<2x32xf32>,
    %c0_56 = arith.constant 0 : index
    %c0_57 = arith.constant 0 : index
    %156 = vector.load %arg12[%c0_56, %c0_57] : memref<2x32xf32, #tpu.memory_space<vmem>>, vector<2x32xf32>
    tpu.vector_store %arg12[%c0_56, %c0_57], %115 {strides = array<i32>} : memref<2x32xf32, #tpu.memory_space<vmem>>, vector<2x32xf32>,
    %c0_58 = arith.constant 0 : index
    %c0_59 = arith.constant 0 : index
    %157 = vector.load %arg13[%c0_58, %c0_59] : memref<2x32xf32, #tpu.memory_space<vmem>>, vector<2x32xf32>
    tpu.vector_store %arg13[%c0_58, %c0_59], %150 {strides = array<i32>} : memref<2x32xf32, #tpu.memory_space<vmem>>, vector<2x32xf32>,
    %c0_60 = arith.constant 0 : index
    %c0_61 = arith.constant 0 : index
    %158 = vector.load %arg14[%c0_60, %c0_61] : memref<2x32xf32, #tpu.memory_space<vmem>>, vector<2x32xf32>
    tpu.vector_store %arg14[%c0_60, %c0_61], %148 {strides = array<i32>} : memref<2x32xf32, #tpu.memory_space<vmem>>, vector<2x32xf32>,
    return
  }
  func.func @transform_0(%arg0: i32) -> (i32, i32, i32) {
    %c0_i32 = arith.constant 0 : i32
    %c0_i32_0 = arith.constant 0 : i32
    %c0_i32_1 = arith.constant 0 : i32
    return %arg0, %c0_i32, %c0_i32_0 : i32, i32, i32
  }
  func.func @transform_1(%arg0: i32) -> (i32, i32, i32) {
    %c0_i32 = arith.constant 0 : i32
    %0 = arith.subi %c0_i32, %arg0 : i32
    %c0_i32_0 = arith.constant 0 : i32
    %c0_i32_1 = arith.constant 0 : i32
    %c0_i32_2 = arith.constant 0 : i32
    return %0, %c0_i32_0, %c0_i32_1 : i32, i32, i32
  }
  func.func @transform_2(%arg0: i32) -> (i32, i32) {
    %c0_i32 = arith.constant 0 : i32
    %c0_i32_0 = arith.constant 0 : i32
    %c0_i32_1 = arith.constant 0 : i32
    return %c0_i32, %c0_i32_0 : i32, i32
  }
  func.func @transform_3(%arg0: i32) -> (i32, i32) {
    %c0_i32 = arith.constant 0 : i32
    %c0_i32_0 = arith.constant 0 : i32
    %c0_i32_1 = arith.constant 0 : i32
    return %c0_i32, %c0_i32_0 : i32, i32
  }
  func.func @transform_4(%arg0: i32) -> (i32, i32) {
    %c0_i32 = arith.constant 0 : i32
    %c0_i32_0 = arith.constant 0 : i32
    %c0_i32_1 = arith.constant 0 : i32
    return %c0_i32, %c0_i32_0 : i32, i32
  }
  func.func @transform_5(%arg0: i32) -> (i32, i32) {
    %c0_i32 = arith.constant 0 : i32
    %c0_i32_0 = arith.constant 0 : i32
    %c0_i32_1 = arith.constant 0 : i32
    return %c0_i32, %c0_i32_0 : i32, i32
  }
  func.func @transform_6(%arg0: i32) -> (i32, i32) {
    %c0_i32 = arith.constant 0 : i32
    %c0_i32_0 = arith.constant 0 : i32
    %c0_i32_1 = arith.constant 0 : i32
    return %c0_i32, %c0_i32_0 : i32, i32
  }
  func.func @transform_7(%arg0: i32) -> (i32, i32) {
    %c0_i32 = arith.constant 0 : i32
    %c0_i32_0 = arith.constant 0 : i32
    %c0_i32_1 = arith.constant 0 : i32
    return %c0_i32, %c0_i32_0 : i32, i32
  }
  func.func @transform_8(%arg0: i32) -> (i32, i32, i32) {
    %c0_i32 = arith.constant 0 : i32
    %c0_i32_0 = arith.constant 0 : i32
    %c0_i32_1 = arith.constant 0 : i32
    return %arg0, %c0_i32, %c0_i32_0 : i32, i32, i32
  }
  func.func @transform_9(%arg0: i32) -> (i32, i32, i32) {
    %c0_i32 = arith.constant 0 : i32
    %0 = arith.subi %c0_i32, %arg0 : i32
    %c0_i32_0 = arith.constant 0 : i32
    %c0_i32_1 = arith.constant 0 : i32
    %c0_i32_2 = arith.constant 0 : i32
    return %0, %c0_i32_0, %c0_i32_1 : i32, i32, i32
  }
}

module attributes {stable_mosaic.version = 11 : i64} {
  func.func @rows_matmul_bias_kernel(%arg0: i32, %arg1: i32, %arg2: memref<4x64xbf16, #tpu.memory_space<vmem>>, %arg3: memref<64x128xbf16, #tpu.memory_space<vmem>>, %arg4: memref<1x128xf32, #tpu.memory_space<vmem>>, %arg5: memref<4x128xbf16, #tpu.memory_space<vmem>>) attributes {dimension_semantics = [#tpu.dimension_semantics<parallel>, #tpu.dimension_semantics<parallel>], iteration_bounds = array<i64: 1, 1>, scalar_prefetch = 0 : i64, scratch_operands = 0 : i64, tpu.core_type = #tpu.core_type<tc>, window_params = [{transform_indices = @transform_0, window_bounds = array<i64: 4, 64>}, {transform_indices = @transform_1, window_bounds = array<i64: 64, 128>}, {transform_indices = @transform_2, window_bounds = array<i64: 1, 128>}, {transform_indices = @transform_3, window_bounds = array<i64: 4, 128>}]} {
    %c0 = arith.constant 0 : index
    %c0_0 = arith.constant 0 : index
    %0 = vector.load %arg2[%c0, %c0_0] : memref<4x64xbf16, #tpu.memory_space<vmem>>, vector<4x64xbf16>
    %c0_1 = arith.constant 0 : index
    %c0_2 = arith.constant 0 : index
    %1 = vector.load %arg3[%c0_1, %c0_2] : memref<64x128xbf16, #tpu.memory_space<vmem>>, vector<64x128xbf16>
    %cst = arith.constant dense<0.000000e+00> : vector<4x128xf32>
    %2 = tpu.matmul %0, %1, %cst {dimension_numbers = #tpu.dot_dimension_numbers<[1], [0], [0], [1], [0, 0, 1, 1], [], []>} : vector<4x64xbf16>, vector<64x128xbf16>, vector<4x128xf32> -> vector<4x128xf32>
    %c0_3 = arith.constant 0 : index
    %c0_4 = arith.constant 0 : index
    %3 = vector.load %arg4[%c0_3, %c0_4] : memref<1x128xf32, #tpu.memory_space<vmem>>, vector<1x128xf32>
    %4 = vector.broadcast %3 : vector<1x128xf32> to vector<4x128xf32>
    %5 = arith.addf %2, %4 : vector<4x128xf32>
    %6 = arith.truncf %5 : vector<4x128xf32> to vector<4x128xbf16>
    %c0_5 = arith.constant 0 : index
    %c0_6 = arith.constant 0 : index
    %7 = vector.load %arg5[%c0_5, %c0_6] : memref<4x128xbf16, #tpu.memory_space<vmem>>, vector<4x128xbf16>
    tpu.vector_store %arg5[%c0_5, %c0_6], %6 {strides = array<i32>} : memref<4x128xbf16, #tpu.memory_space<vmem>>, vector<4x128xbf16>,
    return
  }
  func.func @transform_0(%arg0: i32, %arg1: i32) -> (i32, i32) {
    %c0_i32 = arith.constant 0 : i32
    %c0_i32_0 = arith.constant 0 : i32
    return %arg0, %c0_i32 : i32, i32
  }
  func.func @transform_1(%arg0: i32, %arg1: i32) -> (i32, i32) {
    %c0_i32 = arith.constant 0 : i32
    %c0_i32_0 = arith.constant 0 : i32
    return %c0_i32, %arg1 : i32, i32
  }
  func.func @transform_2(%arg0: i32, %arg1: i32) -> (i32, i32) {
    %c0_i32 = arith.constant 0 : i32
    %c0_i32_0 = arith.constant 0 : i32
    return %c0_i32, %arg1 : i32, i32
  }
  func.func @transform_3(%arg0: i32, %arg1: i32) -> (i32, i32) {
    %c0_i32 = arith.constant 0 : i32
    return %arg0, %arg1 : i32, i32
  }
}

module attributes {stable_mosaic.version = 11 : i64} {
  func.func @rows_matmul_bias_kernel(%arg0: i32, %arg1: i32, %arg2: memref<8x64xbf16, #tpu.memory_space<vmem>>, %arg3: memref<64x64xbf16, #tpu.memory_space<vmem>>, %arg4: memref<1x64xf32, #tpu.memory_space<vmem>>, %arg5: memref<8x64xbf16, #tpu.memory_space<vmem>>) attributes {dimension_semantics = [#tpu.dimension_semantics<parallel>, #tpu.dimension_semantics<parallel>], iteration_bounds = array<i64: 1, 1>, scalar_prefetch = 0 : i64, scratch_operands = 0 : i64, tpu.core_type = #tpu.core_type<tc>, window_params = [{transform_indices = @transform_0, window_bounds = array<i64: 8, 64>}, {transform_indices = @transform_1, window_bounds = array<i64: 64, 64>}, {transform_indices = @transform_2, window_bounds = array<i64: 1, 64>}, {transform_indices = @transform_3, window_bounds = array<i64: 8, 64>}]} {
    %c0 = arith.constant 0 : index
    %c0_0 = arith.constant 0 : index
    %0 = vector.load %arg2[%c0, %c0_0] : memref<8x64xbf16, #tpu.memory_space<vmem>>, vector<8x64xbf16>
    %c0_1 = arith.constant 0 : index
    %c0_2 = arith.constant 0 : index
    %1 = vector.load %arg3[%c0_1, %c0_2] : memref<64x64xbf16, #tpu.memory_space<vmem>>, vector<64x64xbf16>
    %cst = arith.constant dense<0.000000e+00> : vector<8x64xf32>
    %2 = tpu.matmul %0, %1, %cst {dimension_numbers = #tpu.dot_dimension_numbers<[1], [0], [0], [1], [0, 0, 1, 1], [], []>} : vector<8x64xbf16>, vector<64x64xbf16>, vector<8x64xf32> -> vector<8x64xf32>
    %c0_3 = arith.constant 0 : index
    %c0_4 = arith.constant 0 : index
    %3 = vector.load %arg4[%c0_3, %c0_4] : memref<1x64xf32, #tpu.memory_space<vmem>>, vector<1x64xf32>
    %4 = vector.broadcast %3 : vector<1x64xf32> to vector<8x64xf32>
    %5 = arith.addf %2, %4 : vector<8x64xf32>
    %6 = arith.truncf %5 : vector<8x64xf32> to vector<8x64xbf16>
    %c0_5 = arith.constant 0 : index
    %c0_6 = arith.constant 0 : index
    %7 = vector.load %arg5[%c0_5, %c0_6] : memref<8x64xbf16, #tpu.memory_space<vmem>>, vector<8x64xbf16>
    tpu.vector_store %arg5[%c0_5, %c0_6], %6 {strides = array<i32>} : memref<8x64xbf16, #tpu.memory_space<vmem>>, vector<8x64xbf16>,
    return
  }
  func.func @transform_0(%arg0: i32, %arg1: i32) -> (i32, i32) {
    %c0_i32 = arith.constant 0 : i32
    %c0_i32_0 = arith.constant 0 : i32
    return %arg0, %c0_i32 : i32, i32
  }
  func.func @transform_1(%arg0: i32, %arg1: i32) -> (i32, i32) {
    %c0_i32 = arith.constant 0 : i32
    %c0_i32_0 = arith.constant 0 : i32
    return %c0_i32, %arg1 : i32, i32
  }
  func.func @transform_2(%arg0: i32, %arg1: i32) -> (i32, i32) {
    %c0_i32 = arith.constant 0 : i32
    %c0_i32_0 = arith.constant 0 : i32
    return %c0_i32, %arg1 : i32, i32
  }
  func.func @transform_3(%arg0: i32, %arg1: i32) -> (i32, i32) {
    %c0_i32 = arith.constant 0 : i32
    return %arg0, %arg1 : i32, i32
  }
}

module attributes {stable_mosaic.version = 11 : i64} {
  func.func @rows_matmul_bias_kernel(%arg0: i32, %arg1: i32, %arg2: memref<16x32xbf16, #tpu.memory_space<vmem>>, %arg3: memref<32x32xbf16, #tpu.memory_space<vmem>>, %arg4: memref<1x32xf32, #tpu.memory_space<vmem>>, %arg5: memref<16x32xf32, #tpu.memory_space<vmem>>) attributes {dimension_semantics = [#tpu.dimension_semantics<parallel>, #tpu.dimension_semantics<parallel>], iteration_bounds = array<i64: 1, 1>, scalar_prefetch = 0 : i64, scratch_operands = 0 : i64, tpu.core_type = #tpu.core_type<tc>, window_params = [{transform_indices = @transform_0, window_bounds = array<i64: 16, 32>}, {transform_indices = @transform_1, window_bounds = array<i64: 32, 32>}, {transform_indices = @transform_2, window_bounds = array<i64: 1, 32>}, {transform_indices = @transform_3, window_bounds = array<i64: 16, 32>}]} {
    %c0 = arith.constant 0 : index
    %c0_0 = arith.constant 0 : index
    %0 = vector.load %arg2[%c0, %c0_0] : memref<16x32xbf16, #tpu.memory_space<vmem>>, vector<16x32xbf16>
    %c0_1 = arith.constant 0 : index
    %c0_2 = arith.constant 0 : index
    %1 = vector.load %arg3[%c0_1, %c0_2] : memref<32x32xbf16, #tpu.memory_space<vmem>>, vector<32x32xbf16>
    %cst = arith.constant dense<0.000000e+00> : vector<16x32xf32>
    %2 = tpu.matmul %0, %1, %cst {dimension_numbers = #tpu.dot_dimension_numbers<[1], [0], [0], [1], [0, 0, 1, 1], [], []>} : vector<16x32xbf16>, vector<32x32xbf16>, vector<16x32xf32> -> vector<16x32xf32>
    %c0_3 = arith.constant 0 : index
    %c0_4 = arith.constant 0 : index
    %3 = vector.load %arg4[%c0_3, %c0_4] : memref<1x32xf32, #tpu.memory_space<vmem>>, vector<1x32xf32>
    %4 = vector.broadcast %3 : vector<1x32xf32> to vector<16x32xf32>
    %5 = arith.addf %2, %4 : vector<16x32xf32>
    %c0_5 = arith.constant 0 : index
    %c0_6 = arith.constant 0 : index
    %6 = vector.load %arg5[%c0_5, %c0_6] : memref<16x32xf32, #tpu.memory_space<vmem>>, vector<16x32xf32>
    tpu.vector_store %arg5[%c0_5, %c0_6], %5 {strides = array<i32>} : memref<16x32xf32, #tpu.memory_space<vmem>>, vector<16x32xf32>,
    return
  }
  func.func @transform_0(%arg0: i32, %arg1: i32) -> (i32, i32) {
    %c0_i32 = arith.constant 0 : i32
    %c0_i32_0 = arith.constant 0 : i32
    return %arg0, %c0_i32 : i32, i32
  }
  func.func @transform_1(%arg0: i32, %arg1: i32) -> (i32, i32) {
    %c0_i32 = arith.constant 0 : i32
    %c0_i32_0 = arith.constant 0 : i32
    return %c0_i32, %arg1 : i32, i32
  }
  func.func @transform_2(%arg0: i32, %arg1: i32) -> (i32, i32) {
    %c0_i32 = arith.constant 0 : i32
    %c0_i32_0 = arith.constant 0 : i32
    return %c0_i32, %arg1 : i32, i32
  }
  func.func @transform_3(%arg0: i32, %arg1: i32) -> (i32, i32) {
    %c0_i32 = arith.constant 0 : i32
    return %arg0, %arg1 : i32, i32
  }
}

</mosaic_0001>

<bundles_post_ra>
// kernel: listener_pre_trainer_forward.10
= control target key start
LH: loop header
LB: loop body
LE: loop exit
PB: predicated region body
PF: predicated region fallthrough
CT: control target
= control target key end

     0   :  { %vm65_vm0 = vcmask 254976   ;;  %v960_v0 = vmov 0.0   ;;  %vm961_vm1 = vmmov 0   ;;  %s962_s14 = smov 32   ;;  %vm319_vm2 = vcmask 261120   ;;  %s1192_s2 = inlined_call_operand.vmem [shape: bf16[128,128], index: 2, kind: input, shape index: {}]   ;;  %s1193_s3 = inlined_call_operand.vmem [shape: bf16[128,128], index: 3, kind: input, shape index: {}]   ;;  %s1194_s6 = inlined_call_operand.vmem [shape: bf16[32,128], index: 6, kind: input, shape index: {}]   ;;  %s1195_s7 = inlined_call_operand.vmem [shape: bf16[32,128], index: 7, kind: input, shape index: {}]   ;;  %s1196_s0 = inlined_call_operand.vmem [shape: bf16[1,4,128], index: 0, kind: input, shape index: {}, may-alias: {0,1}]   ;;  %s1197_s1 = inlined_call_operand.vmem [shape: bf16[1,4,128], index: 1, kind: input, shape index: {}, may-alias: {0,1}]   ;;  %s1198_s4 = inlined_call_operand.vmem [shape: f32[1,128], index: 4, kind: input, shape index: {}]   ;;  %s1199_s5 = inlined_call_operand.vmem [shape: f32[1,128], index: 5, kind: input, shape index: {}]   ;;  %s1200_s8 = inlined_call_operand.vmem [shape: bf16[2,2,32], index: 8, kind: output, shape index: {0}]   ;;  %s1201_s9 = inlined_call_operand.vmem [shape: bf16[2,2,32], index: 9, kind: output, shape index: {1}]  }
   0x1   :  { %830 = vmatprep.subr.bf16.mxu0 %v960_v0  ;;  %850 = vmatprep.subr.bf16.mxu1 %v960_v0  ;;  %v908_v1 = vld [vmem:[%s1192_s2 + $0x38] sm:$0xff]   ;;  %66 = vst.msk [vmem:[#allocation2] sm:$0x3] %vm65_vm0, %v960_v0  ;;  %67 = vst.msk [vmem:[#allocation3] sm:$0x3] %vm65_vm0, %v960_v0  ;;  %v910_v3 = vld [vmem:[%s1192_s2 + $0x30] sm:$0xff]  }
   0x2   :  { %68 = vst.msk [vmem:[#allocation4] sm:$0x3] %vm65_vm0, %v960_v0  ;;  %69 = vst.msk [vmem:[#allocation5] sm:$0x3] %vm65_vm0, %v960_v0  ;;  %v909_v2 = vld [vmem:[%s1193_s3 + $0x38] sm:$0xff]   ;;  %846 = vmatprep.mubr.msk.bf16.mxu0 %vm961_vm1, %v960_v0  ;;  %866 = vmatprep.mubr.msk.bf16.mxu1 %vm961_vm1, %v960_v0  ;;  %v911_v4 = vld [vmem:[%s1193_s3 + $0x30] sm:$0xff]  }
   0x3   :  { %831 = vmatpush3.bf16.msra.mxu0 %v908_v1  ;;  %851 = vmatpush3.bf16.msra.mxu1 %v909_v2  ;;  %v912_v5 = vld [vmem:[%s1192_s2 + $0x28] sm:$0xff]   ;;  %v914_v7 = vld [vmem:[%s1192_s2 + $0x20] sm:$0xff]   ;;  %v916_v9 = vld [vmem:[%s1192_s2 + $0x18] sm:$0xff]   ;;  %vm411_vm3 = vcmask 253952   ;;  %vm720_vm4 = vcmask 257026  }
   0x4   :  { %832 = vmatprep.subr.bf16.mxu0 %v960_v0  ;;  %852 = vmatprep.subr.bf16.mxu1 %v960_v0  ;;  %v913_v6 = vld [vmem:[%s1193_s3 + $0x28] sm:$0xff]   ;;  %v915_v8 = vld [vmem:[%s1193_s3 + $0x20] sm:$0xff]   ;;  %v917_v10 = vld [vmem:[%s1193_s3 + $0x18] sm:$0xff]  }
   0x5   :  { %v918_v11 = vld [vmem:[%s1192_s2 + $0x10] sm:$0xff]   ;;  %v920_v14 = vld [vmem:[%s1192_s2 + $0x8] sm:$0xff]   ;;  %v922_v16 = vld [vmem:[%s1192_s2] sm:$0xff]  }
   0x6   :  { %v919_v12 = vld [vmem:[%s1193_s3 + $0x10] sm:$0xff]   ;;  %v921_v15 = vld [vmem:[%s1193_s3 + $0x8] sm:$0xff]   ;;  %v923_v17 = vld [vmem:[%s1193_s3] sm:$0xff]  }
   0x7   :  { %833 = vmatpush3.bf16.msra.mxu0 %v910_v3  ;;  %853 = vmatpush3.bf16.msra.mxu1 %v911_v4  ;;  %v70_v18 = vld [vmem:[%s1196_s0] sm:$0x3]  ;;  %v924_v19 = vld [vmem:[%s1194_s6 + $0x8] sm:$0xff]  }
   0x8   :  { %834 = vmatprep.subr.bf16.mxu0 %v960_v0  ;;  %854 = vmatprep.subr.bf16.mxu1 %v960_v0  ;;  %v303_v13 = vld [vmem:[#allocation3] sm:$0x3]  ;;  %v182_v20 = vld [vmem:[%s1197_s1] sm:$0x3]  ;;  %v925_v21 = vld [vmem:[%s1195_s7 + $0x8] sm:$0xff]  }
   0x9   :  { %372 = vrot.lane.b32.xlu1 %v303_v13, %s962_s14  ;;  %v926_v22 = vld [vmem:[%s1194_s6] sm:$0xff]  }
   0xa   :  { %v302_v23 = vld [vmem:[#allocation2] sm:$0x3]  ;;  %v304_v25 = vld [vmem:[#allocation4] sm:$0x3]  ;;  %v305_v52 = vld [vmem:[#allocation5] sm:$0x3] }
   0xb   :  { %835 = vmatpush3.bf16.msra.mxu0 %v912_v5  ;;  %855 = vmatpush3.bf16.msra.mxu1 %v913_v6  ;;  %v927_v24 = vld [vmem:[%s1195_s7] sm:$0xff]   ;;  %v306_v26 = vpack.c.bf16 %v302_v23, %v302_v23  ;;  %v413_v27 = vpack.c.bf16 %v304_v25, %v304_v25  ;;  %v481_v54 = vrot.slane %v305_v52, 6  ;;  %v964_v52 = vmov 1966171168  }
   0xc   :  { %836 = vmatprep.subr.bf16.mxu0 %v960_v0  ;;  %856 = vmatprep.subr.bf16.mxu1 %v960_v0  ;;  %v768_v32 = vld [vmem:[%s1198_s4] ss:$0 sm:$0xff]  ;;  %s963_s4 = smov 64  }
   0xd   :  { %v777_v37 = vld [vmem:[%s1199_s5] ss:$0 sm:$0xff]  ;;  %s965_s5 = smov 96  }
   0xf   :  { %837 = vmatpush3.bf16.msra.mxu0 %v914_v7  ;;  %857 = vmatpush3.bf16.msra.mxu1 %v915_v8 }
  0x10   :  { %838 = vmatprep.subr.bf16.mxu0 %v960_v0  ;;  %858 = vmatprep.subr.bf16.mxu1 %v960_v0 }
  0x13   :  { %839 = vmatpush3.bf16.msra.mxu0 %v916_v9  ;;  %859 = vmatpush3.bf16.msra.mxu1 %v917_v10 }
  0x14   :  { %840 = vmatprep.subr.bf16.mxu0 %v960_v0  ;;  %860 = vmatprep.subr.bf16.mxu1 %v960_v0 }
  0x17   :  { %841 = vmatpush3.bf16.msra.mxu0 %v918_v11  ;;  %861 = vmatpush3.bf16.msra.mxu1 %v919_v12 }
  0x18   :  { %842 = vmatprep.subr.bf16.mxu0 %v960_v0  ;;  %862 = vmatprep.subr.bf16.mxu1 %v960_v0 }
  0x1b   :  { %843 = vmatpush3.bf16.msra.mxu0 %v920_v14  ;;  %863 = vmatpush3.bf16.msra.mxu1 %v921_v15 }
  0x1c   :  { %844 = vmatprep.subr.bf16.mxu0 %v960_v0  ;;  %864 = vmatprep.subr.bf16.mxu1 %v960_v0 }
  0x1f   :  { %845 = vmatpush3.bf16.msra.mxu0 %v922_v16  ;;  %865 = vmatpush3.bf16.msra.mxu1 %v923_v17 }
  0x20   :  { %870 = vmatprep.subr.bf16.mxu0 %v960_v0  ;;  %878 = vmatprep.subr.bf16.mxu1 %v960_v0 }
  0x22   :  { %847 = vmatmul.mubr.bf16.vlgmr.msra.gmra.mxu0 %v70_v18  ;;  %867 = vmatmul.mubr.bf16.vlgmr.msra.gmra.mxu1 %v182_v20 }
  0x23   :  { %871 = vmatpush3.bf16.msra.mxu0 %v924_v19  ;;  %879 = vmatpush3.bf16.msra.mxu1 %v925_v21 }
  0x24   :  { %872 = vmatprep.subr.bf16.mxu0 %v960_v0  ;;  %880 = vmatprep.subr.bf16.mxu1 %v960_v0 }
  0x25   :  { %874 = vmatprep.mubr.msk.bf16.mxu0 %vm961_vm1, %v960_v0  ;;  %882 = vmatprep.mubr.msk.bf16.mxu1 %vm961_vm1, %v960_v0 }
  0x27   :  { %873 = vmatpush3.bf16.msra.mxu0 %v926_v22  ;;  %881 = vmatpush3.bf16.msra.mxu1 %v927_v24 }
  0x28   :  { %886 = vmatprep.subr.bf16.mxu0 %v960_v0  ;;  %894 = vmatprep.subr.bf16.mxu1 %v960_v0 }
  0x2a   :  { %875 = vmatmul.mubr.msk.bf16.vlgmr.msra.gmra.mxu0 %vm319_vm2, %v306_v26  ;;  %883 = vmatmul.mubr.msk.bf16.vlgmr.msra.gmra.mxu1 %vm319_vm2, %v413_v27 }
  0x2b   :  { %887 = vmatpush3.bf16.msra.mxu0 %v924_v19  ;;  %890 = vmatprep.mubr.msk.bf16.mxu0 %vm961_vm1, %v960_v0 }
  0x2c   :  { %888 = vmatprep.subr.bf16.mxu0 %v960_v0  ;;  %895 = vmatpush3.bf16.msra.mxu1 %v925_v21 }
  0x2d   :  { %898 = vmatprep.mubr.msk.bf16.mxu1 %vm961_vm1, %v960_v0  ;;  %896 = vmatprep.subr.bf16.mxu1 %v960_v0 }
  0x2f   :  { %889 = vmatpush3.bf16.msra.mxu0 %v926_v22 }
  0x30   :  { %897 = vmatpush3.bf16.msra.mxu1 %v927_v24 }
  0x7b   :  { %v373_v3 = vpop.permute.xlu1 %372 }
  0xe2   :  { %v176_v28 = vpop.f32.mrf.mxu0  ;;  %v288_v29 = vpop.f32.mrf.mxu1 }
  0xe3   :  { %v1132_v36 = vadd.f32 %v768_v32, %v176_v28  ;;  %v1138_v42 = vadd.f32 %v777_v37, %v288_v29 }
  0xe4   :  { %v848_v30 = vpop.f32.mrf.mxu0  ;;  %v868_v31 = vpop.f32.mrf.mxu1 }
  0xe6   :  { %v179_v33 = vpop.f32.mrf.mxu0  ;;  %v291_v34 = vpop.f32.mrf.mxu1 }
  0xe8   :  { %v849_v35 = vpop.f32.mrf.mxu0  ;;  %v869_v38 = vpop.f32.mrf.mxu1 }
  0xea   :  { %v357_v39 = vpop.f32.mrf.mxu0  ;;  %v463_v41 = vpop.f32.mrf.mxu1 }
  0xeb   :  { %v363_v40 = vadd.f32 %v357_v39, %v1132_v36  ;;  %v470_v43 = vrot.slane %v463_v41, 6 }
  0xec   :  { %v876_v44 = vpop.f32.mrf.mxu0  ;;  %v884_v45 = vpop.f32.mrf.mxu1 }
  0xed   :  { %928 = vtanh.f32 %v363_v40  ;;  %v472_v46 = vadd.f32 %v470_v43, %v1138_v42  ;;  %v789_v55 = vmul.f32 -1.442695, %v363_v40 }
  0xee   :  { %v360_v47 = vpop.f32.mrf.mxu0  ;;  %v466_v48 = vpop.f32.mrf.mxu1 }
  0xef   :  { %930 = vtanh.f32 %v472_v46  ;;  %v793_v56 = vmul.f32 -1.442695, %v472_v46 }
  0xf0   :  { %v877_v49 = vpop.f32.mrf.mxu0  ;;  %v885_v50 = vpop.f32.mrf.mxu1  ;;  %932 = vpow2.f32 %v789_v55 }
  0xf1   :  { %934 = vpow2.f32 %v793_v56 }
  0xfa   :  { %v929_v51 = vpop.eup %928 }
  0xfb   :  { %377 = vrot.lane.b32.xlu0 %v929_v51, %s963_s4 }
  0xfc   :  { %v931_v53 = vpop.eup %930 }
  0xfd   :  { %v933_v57 = vpop.eup %932 }
  0xfe   :  { %v367_v58 = vadd.f32 1.0, %v933_v57  ;;  %v935_v59 = vpop.eup %934 }
  0xff   :  { %487 = vrot.lane.b32.xlu0 %v931_v53, %s963_s4  ;;  %v476_v60 = vadd.f32 1.0, %v935_v59  ;;  %v395_v53 = vunpack.c.l.s4 %v964_v52 }
 0x100   :  { %936 = vrcp.f32 %v367_v58 }
 0x101   :  { %938 = vrcp.f32 %v476_v60  ;;  %v396_v58 = vunpack.c.0.s8 %v395_v53 }
 0x103   :  { %482 = vrot.lane.b32.xlu0 %v481_v54, %s962_s14  ;;  %v397_v54 = vlaneseq }
 0x105   :  { %v398_v59 = vshrl.u32 %v397_v54, 7 }
 0x107   :  { %v399_v60 = vsub.s32 %v396_v58, %v398_v59 }
 0x10d   :  { %v937_v61 = vpop.eup %936 }
 0x10e   :  { %v939_v0 = vpop.eup %938  ;;  %v375_v4 = vmul.f32 %v937_v61, %v373_v3 }
 0x16d   :  { %v378_v62 = vpop.permute.xlu0 %377 }
 0x16e   :  { %v380_v63 = vmul.f32 %v937_v61, %v378_v62 }
 0x170   :  { %382 = vrot.lane.b32.xlu1 %v380_v63, %s962_s14 }
 0x171   :  { %v488_v1 = vpop.permute.xlu0 %487 }
 0x172   :  { %v490_v2 = vmul.f32 %v939_v0, %v488_v1 }
 0x174   :  { %492 = vrot.lane.b32.xlu1 %v490_v2, %s962_s14 }
 0x175   :  { %v483_v5 = vpop.permute.xlu0 %482 }
 0x176   :  { %v485_v8 = vmul.f32 %v939_v0, %v483_v5 }
 0x1e2   :  { %v383_v6 = vpop.permute.xlu1 %382 }
 0x1e3   :  { %v385_v7 = vadd.f32 %v383_v6, %v375_v4 }
 0x1e5   :  { %940 = vtanh.f32 %v385_v7  ;;  %v581_v47 = vrot.slane %v385_v7, 6 }
 0x1e6   :  { %v493_v9 = vpop.permute.xlu1 %492 }
 0x1e7   :  { %v1146_v10 = vadd.f32 %v493_v9, %v485_v8 }
 0x1e9   :  { %942 = vtanh.f32 %v1146_v10  ;;  %v677_v50 = vrot.slane %v1146_v10, 2 }
 0x1f2   :  { %v941_v11 = vpop.eup %940 }
 0x1f3   :  { %388 = vrot.lane.b32.xlu0 %v941_v11, %s963_s4 }
 0x1f6   :  { %v943_v12 = vpop.eup %942 }
 0x1f7   :  { %498 = vrot.lane.b32.xlu1 %v943_v12, %s963_s4 }
 0x265   :  { %v389_v13 = vpop.permute.xlu0 %388 }
 0x266   :  { %v391_v14 = vmul.f32 %v937_v61, %v389_v13 }
 0x268   :  { %v1151_v15 = vpack.c.bf16 %v391_v14, %v391_v14 }
 0x269   :  { %v499_v16 = vpop.permute.xlu1 %498 }
 0x26a   :  { %v501_v17 = vmul.f32 %v939_v0, %v499_v16  ;;  %524 = vrot.lane.b32.xlu0 %v1151_v15, %s962_s14  ;;  %v400_v61 = vrot.slane %v1151_v15, %v399_v60 }
 0x26c   :  { %v502_v18 = vpack.c.bf16 %v501_v17, %v501_v17  ;;  %v407_v1 = vrot.slane %v400_v61, %v399_v60 }
 0x26e   :  { %v622_v19 = vrot.slane %v502_v18, 1  ;;  %v510_v62 = vrot.slane %v502_v18, %v399_v60 }
 0x270   :  { %623 = vrot.lane.b32.xlu1 %v622_v19, %s962_s14  ;;  %v511_v0 = vcombine.high %v510_v62, %v510_v62 }
 0x272   :  { %v518_v3 = vrot.slane %v511_v0, %v399_v60 }
 0x2dc   :  { %v525_v20 = vpop.permute.xlu0 %524 }
 0x2dd   :  { %891 = vmatmul.mubr.msk.bf16.vlgmr.msra.gmra.mxu0 %vm319_vm2, %v525_v20 }
 0x2e2   :  { %v624_v21 = vpop.permute.xlu1 %623 }
 0x2e3   :  { %899 = vmatmul.mubr.msk.bf16.vlgmr.msra.gmra.mxu1 %vm319_vm2, %v624_v21 }
 0x39d   :  { %v563_v22 = vpop.f32.mrf.mxu0 }
 0x39e   :  { %v570_v23 = vrot.slane %v563_v22, 6 }
 0x39f   :  { %v892_v24 = vpop.f32.mrf.mxu0 }
 0x3a0   :  { %v572_v25 = vadd.f32 %v570_v23, %v1132_v36 }
 0x3a1   :  { %v566_v26 = vpop.f32.mrf.mxu0 }
 0x3a2   :  { %944 = vtanh.f32 %v572_v25  ;;  %v796_v35 = vmul.f32 -1.442695, %v572_v25 }
 0x3a3   :  { %v893_v27 = vpop.f32.mrf.mxu0  ;;  %v662_v28 = vpop.f32.mrf.mxu1 }
 0x3a4   :  { %v668_v29 = vadd.f32 %v662_v28, %v1138_v42 }
 0x3a5   :  { %v900_v30 = vpop.f32.mrf.mxu1 }
 0x3a6   :  { %946 = vtanh.f32 %v668_v29  ;;  %v799_v37 = vmul.f32 -1.442695, %v668_v29 }
 0x3a7   :  { %v665_v31 = vpop.f32.mrf.mxu1  ;;  %948 = vpow2.f32 %v796_v35 }
 0x3a8   :  { %950 = vpow2.f32 %v799_v37 }
 0x3a9   :  { %v901_v32 = vpop.f32.mrf.mxu1 }
 0x3af   :  { %v945_v33 = vpop.eup %944 }
 0x3b0   :  { %585 = vrot.lane.b32.xlu0 %v945_v33, %s963_s4 }
 0x3b3   :  { %v947_v34 = vpop.eup %946 }
 0x3b4   :  { %681 = vrot.lane.b32.xlu1 %v947_v34, %s963_s4  ;;  %v949_v36 = vpop.eup %948 }
 0x3b5   :  { %v576_v38 = vadd.f32 1.0, %v949_v36  ;;  %v951_v39 = vpop.eup %950 }
 0x3b6   :  { %v672_v40 = vadd.f32 1.0, %v951_v39 }
 0x3b7   :  { %952 = vrcp.f32 %v576_v38 }
 0x3b8   :  { %954 = vrcp.f32 %v672_v40 }
 0x3c4   :  { %v953_v41 = vpop.eup %952 }
 0x3c5   :  { %v955_v44 = vpop.eup %954  ;;  %v583_v48 = vmul.f32 %v953_v41, %v581_v47 }
 0x3c6   :  { %v679_v55 = vmul.f32 %v955_v44, %v677_v50 }
 0x422   :  { %v586_v42 = vpop.permute.xlu0 %585 }
 0x423   :  { %v588_v43 = vmul.f32 %v953_v41, %v586_v42 }
 0x425   :  { %590 = vrot.lane.b32.xlu0 %v588_v43, %s962_s14 }
 0x426   :  { %v682_v45 = vpop.permute.xlu1 %681 }
 0x427   :  { %v684_v46 = vmul.f32 %v955_v44, %v682_v45 }
 0x429   :  { %686 = vrot.lane.b32.xlu1 %v684_v46, %s962_s14 }
 0x497   :  { %v591_v49 = vpop.permute.xlu0 %590 }
 0x498   :  { %v593_v51 = vadd.f32 %v591_v49, %v583_v48 }
 0x49a   :  { %956 = vtanh.f32 %v593_v51 }
 0x49b   :  { %v687_v56 = vpop.permute.xlu1 %686 }
 0x49c   :  { %v689_v57 = vadd.f32 %v687_v56, %v679_v55 }
 0x49e   :  { %958 = vtanh.f32 %v689_v57 }
 0x4a7   :  { %v957_v63 = vpop.eup %956 }
 0x4a8   :  { %596 = vrot.lane.b32.xlu0 %v957_v63, %s963_s4 }
 0x4ab   :  { %v959_v2 = vpop.eup %958 }
 0x4ac   :  { %692 = vrot.lane.b32.xlu1 %v959_v2, %s963_s4  ;;  %408 = vrot.lane.b32.xlu0 %v407_v1, %s962_s14 }
 0x4b0   :  { %519 = vrot.lane.b32.xlu1 %v518_v3, %s962_s14 }
 0x4b4   :  { %723 = vrot.lane.b32.xlu1 %v593_v51, %s965_s5 }
 0x51a   :  { %v597_v4 = vpop.permute.xlu0 %596 }
 0x51b   :  { %v599_v5 = vmul.f32 %v953_v41, %v597_v4 }
 0x51d   :  { %v600_v6 = vpack.c.bf16 %v599_v5, %v599_v5  ;;  %717 = vrot.lane.b32.xlu0 %v599_v5, %s962_s14 }
 0x51e   :  { %v693_v7 = vpop.permute.xlu1 %692  ;;  %v409_v8 = vpop.permute.xlu0 %408 }
 0x51f   :  { %v608_v9 = vrot.slane %v600_v6, %v399_v60  ;;  %v695_v10 = vmul.f32 %v955_v44, %v693_v7  ;;  %412 = vst.msk [vmem:[%s1200_s8] sm:$0x1] %vm411_vm3, %v409_v8 }
 0x521   :  { %v609_v11 = vcombine.high %v608_v9, %v608_v9  ;;  %v696_v12 = vpack.c.bf16 %v695_v10, %v695_v10 }
 0x522   :  { %v520_v13 = vpop.permute.xlu1 %519 }
 0x523   :  { %v704_v14 = vrot.slane %v696_v12, %v399_v60  ;;  %794 = vst.msk [vmem:[%s1201_s9 + $0x1] sm:$0x1] %vm411_vm3, %v520_v13  ;;  %v616_v15 = vrot.slane %v609_v11, %v399_v60 }
 0x525   :  { %617 = vrot.lane.b32.xlu0 %v616_v15, %s962_s14  ;;  %v711_v16 = vrot.slane %v704_v14, %v399_v60 }
 0x526   :  { %v724_v17 = vpop.permute.xlu1 %723 }
 0x527   :  { %726 = vst.msk [vmem:[#allocation3 - $0x2] sm:$0xc] %vm720_vm4, %v724_v17  ;;  %712 = vrot.lane.b32.xlu1 %v711_v16, %s962_s14 }
 0x529   :  { %728 = vrot.lane.b32.xlu0 %v695_v10, %s962_s14 }
 0x52b   :  { %734 = vrot.lane.b32.xlu1 %v689_v57, %s965_s5 }
 0x58f   :  { %v718_v18 = vpop.permute.xlu0 %717 }
 0x590   :  { %721 = vst.msk [vmem:[#allocation2 - $0x2] sm:$0xc] %vm720_vm4, %v718_v18 }
 0x597   :  { %v618_v19 = vpop.permute.xlu0 %617 }
 0x598   :  { %797 = vst.msk [vmem:[%s1200_s8 + $0x1] sm:$0x1] %vm411_vm3, %v618_v19 }
 0x599   :  { %v713_v20 = vpop.permute.xlu1 %712 }
 0x59a   :  { %715 = vst.msk [vmem:[%s1201_s9] sm:$0x1] %vm411_vm3, %v713_v20 }
 0x59b   :  { %v729_v21 = vpop.permute.xlu0 %728 }
 0x59c   :  { %732 = vst.msk [vmem:[#allocation4] sm:$0x3] %vm65_vm0, %v729_v21 }
 0x59d   :  { %v735_v22 = vpop.permute.xlu1 %734 }
 0x59e   :  { %737 = vst.msk [vmem:[#allocation5] sm:$0x3] %vm65_vm0, %v735_v22 }

// kernel: listener_pre_trainer_forward.9
= control target key start
LH: loop header
LB: loop body
LE: loop exit
PB: predicated region body
PF: predicated region fallthrough
CT: control target
= control target key end

     0   :  { %vm65_vm0 = vcmask 254976   ;;  %v1446_v0 = vmov 0.0   ;;  %vm1447_vm1 = vmmov 0   ;;  %s1448_s14 = smov 32   ;;  %vm319_vm2 = vcmask 261120   ;;  %s1804_s2 = inlined_call_operand.vmem [shape: bf16[128,128], index: 2, kind: input, shape index: {}]   ;;  %s1805_s3 = inlined_call_operand.vmem [shape: bf16[128,128], index: 3, kind: input, shape index: {}]   ;;  %s1806_s6 = inlined_call_operand.vmem [shape: bf16[32,128], index: 6, kind: input, shape index: {}]   ;;  %s1807_s7 = inlined_call_operand.vmem [shape: bf16[32,128], index: 7, kind: input, shape index: {}]   ;;  %s1808_s0 = inlined_call_operand.vmem [shape: bf16[1,8,128], index: 0, kind: input, shape index: {}, may-alias: {0,1}]   ;;  %s1809_s1 = inlined_call_operand.vmem [shape: bf16[1,8,128], index: 1, kind: input, shape index: {}, may-alias: {0,1}]   ;;  %s1810_s4 = inlined_call_operand.vmem [shape: f32[1,128], index: 4, kind: input, shape index: {}]   ;;  %s1811_s5 = inlined_call_operand.vmem [shape: f32[1,128], index: 5, kind: input, shape index: {}]   ;;  %s1812_s8 = inlined_call_operand.vmem [shape: bf16[4,2,32], index: 8, kind: output, shape index: {0}]   ;;  %s1813_s9 = inlined_call_operand.vmem [shape: bf16[4,2,32], index: 9, kind: output, shape index: {1}]  }
   0x1   :  { %1252 = vmatprep.subr.bf16.mxu0 %v1446_v0  ;;  %1272 = vmatprep.subr.bf16.mxu1 %v1446_v0  ;;  %v1362_v1 = vld [vmem:[%s1804_s2 + $0x38] sm:$0xff]   ;;  %66 = vst.msk [vmem:[#allocation2] sm:$0x3] %vm65_vm0, %v1446_v0  ;;  %67 = vst.msk [vmem:[#allocation3] sm:$0x3] %vm65_vm0, %v1446_v0  ;;  %v1364_v3 = vld [vmem:[%s1804_s2 + $0x30] sm:$0xff]  }
   0x2   :  { %68 = vst.msk [vmem:[#allocation4] sm:$0x3] %vm65_vm0, %v1446_v0  ;;  %69 = vst.msk [vmem:[#allocation5] sm:$0x3] %vm65_vm0, %v1446_v0  ;;  %v1363_v2 = vld [vmem:[%s1805_s3 + $0x38] sm:$0xff]   ;;  %1268 = vmatprep.mubr.msk.bf16.mxu0 %vm1447_vm1, %v1446_v0  ;;  %1288 = vmatprep.mubr.msk.bf16.mxu1 %vm1447_vm1, %v1446_v0  ;;  %v1365_v4 = vld [vmem:[%s1805_s3 + $0x30] sm:$0xff]  }
   0x3   :  { %1253 = vmatpush3.bf16.msra.mxu0 %v1362_v1  ;;  %1273 = vmatpush3.bf16.msra.mxu1 %v1363_v2  ;;  %v1366_v5 = vld [vmem:[%s1804_s2 + $0x28] sm:$0xff]   ;;  %v1368_v7 = vld [vmem:[%s1804_s2 + $0x20] sm:$0xff]   ;;  %v1370_v9 = vld [vmem:[%s1804_s2 + $0x18] sm:$0xff]   ;;  %vm411_vm3 = vcmask 253952   ;;  %vm1118_vm4 = vcmask 261126  }
   0x4   :  { %1254 = vmatprep.subr.bf16.mxu0 %v1446_v0  ;;  %1274 = vmatprep.subr.bf16.mxu1 %v1446_v0  ;;  %v1367_v6 = vld [vmem:[%s1805_s3 + $0x28] sm:$0xff]   ;;  %v1369_v8 = vld [vmem:[%s1805_s3 + $0x20] sm:$0xff]   ;;  %v1371_v10 = vld [vmem:[%s1805_s3 + $0x18] sm:$0xff]  }
   0x5   :  { %v1372_v11 = vld [vmem:[%s1804_s2 + $0x10] sm:$0xff]   ;;  %v1374_v14 = vld [vmem:[%s1804_s2 + $0x8] sm:$0xff]   ;;  %v1376_v16 = vld [vmem:[%s1804_s2] sm:$0xff]  }
   0x6   :  { %v1373_v12 = vld [vmem:[%s1805_s3 + $0x10] sm:$0xff]   ;;  %v1375_v15 = vld [vmem:[%s1805_s3 + $0x8] sm:$0xff]   ;;  %v1377_v17 = vld [vmem:[%s1805_s3] sm:$0xff]  }
   0x7   :  { %1255 = vmatpush3.bf16.msra.mxu0 %v1364_v3  ;;  %1275 = vmatpush3.bf16.msra.mxu1 %v1365_v4  ;;  %v70_v18 = vld [vmem:[%s1808_s0] sm:$0xf]  ;;  %v1585_v19 = vld [vmem:[%s1806_s6 + $0x8] sm:$0xff]  }
   0x8   :  { %1256 = vmatprep.subr.bf16.mxu0 %v1446_v0  ;;  %1276 = vmatprep.subr.bf16.mxu1 %v1446_v0  ;;  %v303_v13 = vld [vmem:[#allocation3] sm:$0x3]  ;;  %v1594_v21 = vld [vmem:[%s1807_s7 + $0x8] sm:$0xff]   ;;  %v302_v23 = vld [vmem:[#allocation2] sm:$0x3] }
   0x9   :  { %372 = vrot.lane.b32.xlu1 %v303_v13, %s1448_s14  ;;  %v182_v20 = vld [vmem:[%s1809_s1] sm:$0xf]  ;;  %v304_v25 = vld [vmem:[#allocation4] sm:$0x3]  ;;  %v306_v26 = vpack.c.bf16 %v302_v23, %v302_v23  ;;  %v305_v52 = vld [vmem:[#allocation5] sm:$0x3] }
   0xa   :  { %v1601_v22 = vld [vmem:[%s1806_s6] sm:$0xff]   ;;  %v413_v27 = vpack.c.bf16 %v304_v25, %v304_v25  ;;  %v481_v54 = vrot.slane %v305_v52, 2 }
   0xb   :  { %1257 = vmatpush3.bf16.msra.mxu0 %v1366_v5  ;;  %1277 = vmatpush3.bf16.msra.mxu1 %v1367_v6  ;;  %v1608_v24 = vld [vmem:[%s1807_s7] sm:$0xff]  }
   0xc   :  { %1258 = vmatprep.subr.bf16.mxu0 %v1446_v0  ;;  %1278 = vmatprep.subr.bf16.mxu1 %v1446_v0  ;;  %v1166_v32 = vld [vmem:[%s1810_s4] ss:$0 sm:$0xff]  ;;  %s1449_s4 = smov 64  }
   0xd   :  { %v1175_v37 = vld [vmem:[%s1811_s5] ss:$0 sm:$0xff]  ;;  %s1451_s5 = smov 96  }
   0xf   :  { %1259 = vmatpush3.bf16.msra.mxu0 %v1368_v7  ;;  %1279 = vmatpush3.bf16.msra.mxu1 %v1369_v8 }
  0x10   :  { %1260 = vmatprep.subr.bf16.mxu0 %v1446_v0  ;;  %1280 = vmatprep.subr.bf16.mxu1 %v1446_v0 }
  0x13   :  { %1261 = vmatpush3.bf16.msra.mxu0 %v1370_v9  ;;  %1281 = vmatpush3.bf16.msra.mxu1 %v1371_v10 }
  0x14   :  { %1262 = vmatprep.subr.bf16.mxu0 %v1446_v0  ;;  %1282 = vmatprep.subr.bf16.mxu1 %v1446_v0 }
  0x17   :  { %1263 = vmatpush3.bf16.msra.mxu0 %v1372_v11  ;;  %1283 = vmatpush3.bf16.msra.mxu1 %v1373_v12 }
  0x18   :  { %1264 = vmatprep.subr.bf16.mxu0 %v1446_v0  ;;  %1284 = vmatprep.subr.bf16.mxu1 %v1446_v0 }
  0x1b   :  { %1265 = vmatpush3.bf16.msra.mxu0 %v1374_v14  ;;  %1285 = vmatpush3.bf16.msra.mxu1 %v1375_v15 }
  0x1c   :  { %1266 = vmatprep.subr.bf16.mxu0 %v1446_v0  ;;  %1286 = vmatprep.subr.bf16.mxu1 %v1446_v0 }
  0x1f   :  { %1267 = vmatpush3.bf16.msra.mxu0 %v1376_v16  ;;  %1287 = vmatpush3.bf16.msra.mxu1 %v1377_v17 }
  0x20   :  { %1292 = vmatprep.subr.bf16.mxu0 %v1446_v0  ;;  %1300 = vmatprep.subr.bf16.mxu1 %v1446_v0 }
  0x22   :  { %1269 = vmatmul.mubr.bf16.vlgmr.msra.gmra.mxu0 %v70_v18  ;;  %1289 = vmatmul.mubr.bf16.vlgmr.msra.gmra.mxu1 %v182_v20 }
  0x23   :  { %1293 = vmatpush3.bf16.msra.mxu0 %v1585_v19  ;;  %1301 = vmatpush3.bf16.msra.mxu1 %v1594_v21 }
  0x24   :  { %1294 = vmatprep.subr.bf16.mxu0 %v1446_v0  ;;  %1302 = vmatprep.subr.bf16.mxu1 %v1446_v0 }
  0x25   :  { %1296 = vmatprep.mubr.msk.bf16.mxu0 %vm1447_vm1, %v1446_v0  ;;  %1304 = vmatprep.mubr.msk.bf16.mxu1 %vm1447_vm1, %v1446_v0 }
  0x27   :  { %1295 = vmatpush3.bf16.msra.mxu0 %v1601_v22  ;;  %1303 = vmatpush3.bf16.msra.mxu1 %v1608_v24 }
  0x28   :  { %1308 = vmatprep.subr.bf16.mxu0 %v1446_v0  ;;  %1316 = vmatprep.subr.bf16.mxu1 %v1446_v0 }
  0x2a   :  { %1297 = vmatmul.mubr.msk.bf16.vlgmr.msra.gmra.mxu0 %vm319_vm2, %v306_v26  ;;  %1305 = vmatmul.mubr.msk.bf16.vlgmr.msra.gmra.mxu1 %vm319_vm2, %v413_v27 }
  0x2b   :  { %1309 = vmatpush3.bf16.msra.mxu0 %v1585_v19  ;;  %1312 = vmatprep.mubr.msk.bf16.mxu0 %vm1447_vm1, %v1446_v0 }
  0x2c   :  { %1310 = vmatprep.subr.bf16.mxu0 %v1446_v0  ;;  %1317 = vmatpush3.bf16.msra.mxu1 %v1594_v21 }
  0x2d   :  { %1320 = vmatprep.mubr.msk.bf16.mxu1 %vm1447_vm1, %v1446_v0  ;;  %1318 = vmatprep.subr.bf16.mxu1 %v1446_v0 }
  0x2f   :  { %1311 = vmatpush3.bf16.msra.mxu0 %v1601_v22 }
  0x30   :  { %1324 = vmatprep.subr.bf16.mxu0 %v1446_v0  ;;  %1319 = vmatpush3.bf16.msra.mxu1 %v1608_v24 }
  0x31   :  { %1332 = vmatprep.subr.bf16.mxu1 %v1446_v0 }
  0x7b   :  { %v373_v4 = vpop.permute.xlu1 %372 }
  0xe2   :  { %v176_v28 = vpop.f32.mrf.mxu0  ;;  %v288_v29 = vpop.f32.mrf.mxu1 }
  0xe3   :  { %v1636_v36 = vadd.f32 %v1166_v32, %v176_v28  ;;  %v1642_v42 = vadd.f32 %v1175_v37, %v288_v29 }
  0xe4   :  { %v1270_v30 = vpop.f32.mrf.mxu0  ;;  %v1290_v31 = vpop.f32.mrf.mxu1 }
  0xe6   :  { %v179_v33 = vpop.f32.mrf.mxu0  ;;  %v291_v34 = vpop.f32.mrf.mxu1 }
  0xe8   :  { %v1271_v35 = vpop.f32.mrf.mxu0  ;;  %v1291_v38 = vpop.f32.mrf.mxu1 }
  0xea   :  { %v357_v39 = vpop.f32.mrf.mxu0  ;;  %v463_v41 = vpop.f32.mrf.mxu1 }
  0xeb   :  { %v363_v40 = vadd.f32 %v357_v39, %v1636_v36  ;;  %v470_v43 = vrot.slane %v463_v41, 2 }
  0xec   :  { %v1298_v44 = vpop.f32.mrf.mxu0  ;;  %v1306_v45 = vpop.f32.mrf.mxu1 }
  0xed   :  { %1382 = vtanh.f32 %v363_v40  ;;  %v472_v46 = vadd.f32 %v470_v43, %v1642_v42  ;;  %v1187_v55 = vmul.f32 -1.442695, %v363_v40 }
  0xee   :  { %v360_v47 = vpop.f32.mrf.mxu0  ;;  %v466_v48 = vpop.f32.mrf.mxu1 }
  0xef   :  { %1384 = vtanh.f32 %v472_v46  ;;  %v1191_v56 = vmul.f32 -1.442695, %v472_v46 }
  0xf0   :  { %v1299_v49 = vpop.f32.mrf.mxu0  ;;  %v1307_v50 = vpop.f32.mrf.mxu1  ;;  %1386 = vpow2.f32 %v1187_v55 }
  0xf1   :  { %1388 = vpow2.f32 %v1191_v56 }
  0xfa   :  { %v1383_v51 = vpop.eup %1382 }
  0xfb   :  { %377 = vrot.lane.b32.xlu0 %v1383_v51, %s1449_s4 }
  0xfc   :  { %v1385_v53 = vpop.eup %1384 }
  0xfd   :  { %v1387_v57 = vpop.eup %1386 }
  0xfe   :  { %v367_v58 = vadd.f32 1.0, %v1387_v57  ;;  %v1389_v59 = vpop.eup %1388 }
  0xff   :  { %487 = vrot.lane.b32.xlu0 %v1385_v53, %s1449_s4  ;;  %v476_v60 = vadd.f32 1.0, %v1389_v59 }
 0x100   :  { %1390 = vrcp.f32 %v367_v58 }
 0x101   :  { %1392 = vrcp.f32 %v476_v60 }
 0x103   :  { %482 = vrot.lane.b32.xlu0 %v481_v54, %s1448_s14 }
 0x10d   :  { %v1391_v61 = vpop.eup %1390 }
 0x10e   :  { %v1393_v1 = vpop.eup %1392  ;;  %v375_v5 = vmul.f32 %v1391_v61, %v373_v4 }
 0x16d   :  { %v378_v62 = vpop.permute.xlu0 %377 }
 0x16e   :  { %v380_v63 = vmul.f32 %v1391_v61, %v378_v62 }
 0x170   :  { %382 = vrot.lane.b32.xlu1 %v380_v63, %s1448_s14 }
 0x171   :  { %v488_v2 = vpop.permute.xlu0 %487 }
 0x172   :  { %v490_v3 = vmul.f32 %v1393_v1, %v488_v2 }
 0x174   :  { %492 = vrot.lane.b32.xlu1 %v490_v3, %s1448_s14 }
 0x175   :  { %v483_v6 = vpop.permute.xlu0 %482 }
 0x176   :  { %v485_v9 = vmul.f32 %v1393_v1, %v483_v6 }
 0x1e2   :  { %v383_v7 = vpop.permute.xlu1 %382 }
 0x1e3   :  { %v1650_v8 = vadd.f32 %v383_v7, %v375_v5 }
 0x1e5   :  { %1394 = vtanh.f32 %v1650_v8  ;;  %v582_v55 = vrot.slane %v1650_v8, 6 }
 0x1e6   :  { %v493_v10 = vpop.permute.xlu1 %492 }
 0x1e7   :  { %v1653_v11 = vadd.f32 %v493_v10, %v485_v9 }
 0x1e9   :  { %1396 = vtanh.f32 %v1653_v11  ;;  %v681_v59 = vrot.slane %v1653_v11, 2 }
 0x1f2   :  { %v1395_v12 = vpop.eup %1394 }
 0x1f3   :  { %388 = vrot.lane.b32.xlu0 %v1395_v12, %s1449_s4 }
 0x1f6   :  { %v1397_v13 = vpop.eup %1396 }
 0x1f7   :  { %498 = vrot.lane.b32.xlu1 %v1397_v13, %s1449_s4 }
 0x265   :  { %v389_v14 = vpop.permute.xlu0 %388 }
 0x266   :  { %v391_v15 = vmul.f32 %v1391_v61, %v389_v14 }
 0x268   :  { %v1658_v16 = vpack.c.bf16 %v391_v15, %v391_v15 }
 0x269   :  { %v499_v17 = vpop.permute.xlu1 %498 }
 0x26a   :  { %v501_v18 = vmul.f32 %v1393_v1, %v499_v17  ;;  %525 = vrot.lane.b32.xlu0 %v1658_v16, %s1448_s14 }
 0x26c   :  { %v1662_v20 = vpack.c.bf16 %v501_v18, %v501_v18 }
 0x26e   :  { %v623_v23 = vrot.slane %v1662_v20, 3 }
 0x270   :  { %624 = vrot.lane.b32.xlu1 %v623_v23, %s1448_s14 }
 0x2dc   :  { %v526_v25 = vpop.permute.xlu0 %525 }
 0x2dd   :  { %1313 = vmatmul.mubr.msk.bf16.vlgmr.msra.gmra.mxu0 %vm319_vm2, %v526_v25 }
 0x2de   :  { %1325 = vmatpush3.bf16.msra.mxu0 %v1585_v19  ;;  %1328 = vmatprep.mubr.msk.bf16.mxu0 %vm1447_vm1, %v1446_v0 }
 0x2df   :  { %1326 = vmatprep.subr.bf16.mxu0 %v1446_v0 }
 0x2e2   :  { %v625_v26 = vpop.permute.xlu1 %624  ;;  %1327 = vmatpush3.bf16.msra.mxu0 %v1601_v22 }
 0x2e3   :  { %1321 = vmatmul.mubr.msk.bf16.vlgmr.msra.gmra.mxu1 %vm319_vm2, %v625_v26  ;;  %1340 = vmatprep.subr.bf16.mxu0 %v1446_v0 }
 0x2e4   :  { %1333 = vmatpush3.bf16.msra.mxu1 %v1594_v21  ;;  %1336 = vmatprep.mubr.msk.bf16.mxu1 %vm1447_vm1, %v1446_v0 }
 0x2e5   :  { %1334 = vmatprep.subr.bf16.mxu1 %v1446_v0 }
 0x2e8   :  { %1335 = vmatpush3.bf16.msra.mxu1 %v1608_v24 }
 0x2e9   :  { %1348 = vmatprep.subr.bf16.mxu1 %v1446_v0 }
 0x39d   :  { %v564_v27 = vpop.f32.mrf.mxu0 }
 0x39e   :  { %v571_v28 = vrot.slane %v564_v27, 6 }
 0x39f   :  { %v1314_v29 = vpop.f32.mrf.mxu0 }
 0x3a0   :  { %v573_v30 = vadd.f32 %v571_v28, %v1636_v36 }
 0x3a1   :  { %v567_v31 = vpop.f32.mrf.mxu0 }
 0x3a2   :  { %1398 = vtanh.f32 %v573_v30  ;;  %v1194_v43 = vmul.f32 -1.442695, %v573_v30 }
 0x3a3   :  { %v1315_v32 = vpop.f32.mrf.mxu0  ;;  %v663_v33 = vpop.f32.mrf.mxu1 }
 0x3a4   :  { %v670_v34 = vrot.slane %v663_v33, 4 }
 0x3a5   :  { %v1322_v35 = vpop.f32.mrf.mxu1 }
 0x3a6   :  { %v672_v37 = vadd.f32 %v670_v34, %v1642_v42 }
 0x3a7   :  { %v666_v38 = vpop.f32.mrf.mxu1 }
 0x3a8   :  { %1400 = vtanh.f32 %v672_v37  ;;  %v1197_v44 = vmul.f32 -1.442695, %v672_v37 }
 0x3a9   :  { %v1323_v39 = vpop.f32.mrf.mxu1  ;;  %1402 = vpow2.f32 %v1194_v43 }
 0x3aa   :  { %1404 = vpow2.f32 %v1197_v44 }
 0x3af   :  { %v1399_v40 = vpop.eup %1398 }
 0x3b0   :  { %586 = vrot.lane.b32.xlu0 %v1399_v40, %s1449_s4 }
 0x3b5   :  { %v1401_v41 = vpop.eup %1400 }
 0x3b6   :  { %685 = vrot.lane.b32.xlu1 %v1401_v41, %s1449_s4  ;;  %v1403_v45 = vpop.eup %1402 }
 0x3b7   :  { %v577_v46 = vadd.f32 1.0, %v1403_v45  ;;  %v1405_v47 = vpop.eup %1404 }
 0x3b8   :  { %v676_v48 = vadd.f32 1.0, %v1405_v47 }
 0x3b9   :  { %1406 = vrcp.f32 %v577_v46 }
 0x3ba   :  { %1408 = vrcp.f32 %v676_v48 }
 0x3c6   :  { %v1407_v49 = vpop.eup %1406 }
 0x3c7   :  { %v1409_v52 = vpop.eup %1408  ;;  %v584_v56 = vmul.f32 %v1407_v49, %v582_v55 }
 0x3c8   :  { %v683_v60 = vmul.f32 %v1409_v52, %v681_v59 }
 0x422   :  { %v587_v50 = vpop.permute.xlu0 %586 }
 0x423   :  { %v589_v51 = vmul.f32 %v1407_v49, %v587_v50 }
 0x425   :  { %591 = vrot.lane.b32.xlu0 %v589_v51, %s1448_s14 }
 0x428   :  { %v686_v53 = vpop.permute.xlu1 %685 }
 0x429   :  { %v688_v54 = vmul.f32 %v1409_v52, %v686_v53 }
 0x42b   :  { %690 = vrot.lane.b32.xlu1 %v688_v54, %s1448_s14 }
 0x497   :  { %v592_v57 = vpop.permute.xlu0 %591 }
 0x498   :  { %v1687_v58 = vadd.f32 %v592_v57, %v584_v56 }
 0x49a   :  { %1410 = vtanh.f32 %v1687_v58  ;;  %v780_v40 = vrot.slane %v1687_v58, 6 }
 0x49d   :  { %v691_v61 = vpop.permute.xlu1 %690 }
 0x49e   :  { %v1691_v62 = vadd.f32 %v691_v61, %v683_v60 }
 0x4a0   :  { %1412 = vtanh.f32 %v1691_v62  ;;  %v879_v45 = vrot.slane %v1691_v62, 2 }
 0x4a7   :  { %v1411_v63 = vpop.eup %1410 }
 0x4a8   :  { %597 = vrot.lane.b32.xlu0 %v1411_v63, %s1449_s4 }
 0x4ad   :  { %v1413_v1 = vpop.eup %1412 }
 0x4ae   :  { %696 = vrot.lane.b32.xlu1 %v1413_v1, %s1449_s4 }
 0x51a   :  { %v598_v2 = vpop.permute.xlu0 %597 }
 0x51b   :  { %v600_v3 = vmul.f32 %v1407_v49, %v598_v2 }
 0x51d   :  { %v1696_v4 = vpack.c.bf16 %v600_v3, %v600_v3 }
 0x51f   :  { %v722_v5 = vrot.slane %v1696_v4, 1 }
 0x520   :  { %v697_v6 = vpop.permute.xlu1 %696 }
 0x521   :  { %v699_v7 = vmul.f32 %v1409_v52, %v697_v6  ;;  %723 = vrot.lane.b32.xlu0 %v722_v5, %s1448_s14 }
 0x523   :  { %v1700_v8 = vpack.c.bf16 %v699_v7, %v699_v7 }
 0x525   :  { %v821_v9 = vrot.slane %v1700_v8, 2 }
 0x527   :  { %822 = vrot.lane.b32.xlu1 %v821_v9, %s1448_s14 }
 0x593   :  { %v724_v10 = vpop.permute.xlu0 %723 }
 0x594   :  { %1329 = vmatmul.mubr.msk.bf16.vlgmr.msra.gmra.mxu0 %vm319_vm2, %v724_v10 }
 0x595   :  { %1341 = vmatpush3.bf16.msra.mxu0 %v1585_v19  ;;  %1344 = vmatprep.mubr.msk.bf16.mxu0 %vm1447_vm1, %v1446_v0 }
 0x596   :  { %1342 = vmatprep.subr.bf16.mxu0 %v1446_v0 }
 0x599   :  { %v823_v11 = vpop.permute.xlu1 %822  ;;  %1343 = vmatpush3.bf16.msra.mxu0 %v1601_v22 }
 0x59a   :  { %1337 = vmatmul.mubr.msk.bf16.vlgmr.msra.gmra.mxu1 %vm319_vm2, %v823_v11 }
 0x59b   :  { %1349 = vmatpush3.bf16.msra.mxu1 %v1594_v21  ;;  %1352 = vmatprep.mubr.msk.bf16.mxu1 %vm1447_vm1, %v1446_v0 }
 0x59c   :  { %1350 = vmatprep.subr.bf16.mxu1 %v1446_v0 }
 0x59f   :  { %1351 = vmatpush3.bf16.msra.mxu1 %v1608_v24 }
 0x654   :  { %v762_v19 = vpop.f32.mrf.mxu0 }
 0x655   :  { %v769_v12 = vrot.slane %v762_v19, 4 }
 0x656   :  { %v1330_v13 = vpop.f32.mrf.mxu0 }
 0x657   :  { %v771_v14 = vadd.f32 %v769_v12, %v1636_v36 }
 0x658   :  { %v765_v15 = vpop.f32.mrf.mxu0 }
 0x659   :  { %1414 = vtanh.f32 %v771_v14  ;;  %v1200_v24 = vmul.f32 -1.442695, %v771_v14 }
 0x65a   :  { %v1331_v17 = vpop.f32.mrf.mxu0  ;;  %v861_v22 = vpop.f32.mrf.mxu1 }
 0x65b   :  { %v868_v18 = vrot.slane %v861_v22, 6 }
 0x65c   :  { %v1338_v23 = vpop.f32.mrf.mxu1 }
 0x65d   :  { %v870_v21 = vadd.f32 %v868_v18, %v1642_v42 }
 0x65e   :  { %v864_v25 = vpop.f32.mrf.mxu1 }
 0x65f   :  { %1416 = vtanh.f32 %v870_v21  ;;  %v1203_v28 = vmul.f32 -1.442695, %v870_v21 }
 0x660   :  { %v1339_v26 = vpop.f32.mrf.mxu1  ;;  %1418 = vpow2.f32 %v1200_v24 }
 0x661   :  { %1420 = vpow2.f32 %v1203_v28  ;;  %v397_v28 = vlaneseq }
 0x666   :  { %v1415_v27 = vpop.eup %1414 }
 0x667   :  { %784 = vrot.lane.b32.xlu0 %v1415_v27, %s1449_s4 }
 0x66c   :  { %v1417_v0 = vpop.eup %1416 }
 0x66d   :  { %883 = vrot.lane.b32.xlu1 %v1417_v0, %s1449_s4  ;;  %v1419_v29 = vpop.eup %1418  ;;  %v1450_v0 = vmov 1966171168  }
 0x66e   :  { %v775_v30 = vadd.f32 1.0, %v1419_v29  ;;  %v1421_v31 = vpop.eup %1420  ;;  %v395_v24 = vunpack.c.l.s4 %v1450_v0 }
 0x66f   :  { %v874_v32 = vadd.f32 1.0, %v1421_v31 }
 0x670   :  { %1422 = vrcp.f32 %v775_v30 }
 0x671   :  { %1424 = vrcp.f32 %v874_v32 }
 0x67d   :  { %v1423_v33 = vpop.eup %1422 }
 0x67e   :  { %v1425_v37 = vpop.eup %1424  ;;  %v782_v41 = vmul.f32 %v1423_v33, %v780_v40 }
 0x67f   :  { %v881_v46 = vmul.f32 %v1425_v37, %v879_v45 }
 0x6d9   :  { %v785_v34 = vpop.permute.xlu0 %784 }
 0x6da   :  { %v787_v35 = vmul.f32 %v1423_v33, %v785_v34  ;;  %v398_v34 = vshrl.u32 %v397_v28, 7 }
 0x6dc   :  { %789 = vrot.lane.b32.xlu0 %v787_v35, %s1448_s14 }
 0x6df   :  { %v884_v38 = vpop.permute.xlu1 %883 }
 0x6e0   :  { %v886_v39 = vmul.f32 %v1425_v37, %v884_v38 }
 0x6e2   :  { %888 = vrot.lane.b32.xlu1 %v886_v39, %s1448_s14 }
 0x74e   :  { %v790_v43 = vpop.permute.xlu0 %789 }
 0x74f   :  { %v792_v44 = vadd.f32 %v790_v43, %v782_v41 }
 0x751   :  { %1426 = vtanh.f32 %v792_v44  ;;  %v978_v26 = vrot.slane %v792_v44, 6 }
 0x754   :  { %v889_v47 = vpop.permute.xlu1 %888 }
 0x755   :  { %v1724_v48 = vadd.f32 %v889_v47, %v881_v46 }
 0x757   :  { %1428 = vtanh.f32 %v1724_v48  ;;  %v1075_v30 = vrot.slane %v1724_v48, 2 }
 0x75e   :  { %v1427_v49 = vpop.eup %1426 }
 0x75f   :  { %795 = vrot.lane.b32.xlu0 %v1427_v49, %s1449_s4 }
 0x764   :  { %v1429_v50 = vpop.eup %1428 }
 0x765   :  { %894 = vrot.lane.b32.xlu1 %v1429_v50, %s1449_s4 }
 0x7d1   :  { %v796_v51 = vpop.permute.xlu0 %795 }
 0x7d2   :  { %v798_v52 = vmul.f32 %v1423_v33, %v796_v51  ;;  %v396_v33 = vunpack.c.0.s8 %v395_v24 }
 0x7d4   :  { %v1729_v53 = vpack.c.bf16 %v798_v52, %v798_v52  ;;  %v399_v38 = vsub.s32 %v396_v33, %v398_v34 }
 0x7d6   :  { %v920_v54 = vrot.slane %v1729_v53, 2  ;;  %v510_v39 = vrot.slane %v1662_v20, %v399_v38  ;;  %v400_v41 = vrot.slane %v1658_v16, %v399_v38  ;;  %v609_v43 = vrot.slane %v1696_v4, %v399_v38 }
 0x7d7   :  { %v895_v55 = vpop.permute.xlu1 %894  ;;  %v708_v47 = vrot.slane %v1700_v8, %v399_v38  ;;  %v807_v48 = vrot.slane %v1729_v53, %v399_v38 }
 0x7d8   :  { %v897_v56 = vmul.f32 %v1425_v37, %v895_v55  ;;  %921 = vrot.lane.b32.xlu0 %v920_v54, %s1448_s14  ;;  %v511_v40 = vcombine.high %v510_v39, %v510_v39  ;;  %v610_v46 = vcombine.high %v609_v43, %v609_v43  ;;  %v407_v49 = vrot.slane %v400_v41, %v399_v38 }
 0x7d9   :  { %v715_v4 = vrot.slane %v708_v47, %v399_v38  ;;  %v814_v52 = vrot.slane %v807_v48, %v399_v38 }
 0x7da   :  { %v1733_v57 = vpack.c.bf16 %v897_v56, %v897_v56  ;;  %v518_v45 = vrot.slane %v511_v40, %v399_v38  ;;  %v617_v51 = vrot.slane %v610_v46, %v399_v38 }
 0x7db   :  { %v716_v8 = vcombine.high %v715_v4, %v715_v4  ;;  %v815_v55 = vcombine.high %v814_v52, %v814_v52 }
 0x7dc   :  { %v1020_v58 = vrot.slane %v1733_v57, 1  ;;  %v519_v20 = vcombine.high %v518_v45, %v518_v45  ;;  %v906_v16 = vrot.slane %v1733_v57, %v399_v38 }
 0x7de   :  { %1021 = vrot.lane.b32.xlu1 %v1020_v58, %s1448_s14  ;;  %v907_v54 = vcombine.high %v906_v16, %v906_v16 }
 0x7e0   :  { %v914_v53 = vrot.slane %v907_v54, %v399_v38 }
 0x84a   :  { %v922_v59 = vpop.permute.xlu0 %921 }
 0x84b   :  { %1345 = vmatmul.mubr.msk.bf16.vlgmr.msra.gmra.mxu0 %vm319_vm2, %v922_v59 }
 0x850   :  { %v1022_v60 = vpop.permute.xlu1 %1021 }
 0x851   :  { %1353 = vmatmul.mubr.msk.bf16.vlgmr.msra.gmra.mxu1 %vm319_vm2, %v1022_v60 }
 0x90b   :  { %v960_v61 = vpop.f32.mrf.mxu0 }
 0x90c   :  { %v967_v62 = vrot.slane %v960_v61, 2 }
 0x90d   :  { %v1346_v63 = vpop.f32.mrf.mxu0 }
 0x90e   :  { %v969_v1 = vadd.f32 %v967_v62, %v1636_v36 }
 0x90f   :  { %v963_v2 = vpop.f32.mrf.mxu0 }
 0x910   :  { %1430 = vtanh.f32 %v969_v1  ;;  %v1206_v12 = vmul.f32 -1.442695, %v969_v1 }
 0x911   :  { %v1347_v3 = vpop.f32.mrf.mxu0  ;;  %v1060_v5 = vpop.f32.mrf.mxu1 }
 0x912   :  { %v1066_v6 = vadd.f32 %v1060_v5, %v1642_v42 }
 0x913   :  { %v1354_v7 = vpop.f32.mrf.mxu1 }
 0x914   :  { %1432 = vtanh.f32 %v1066_v6  ;;  %v1209_v13 = vmul.f32 -1.442695, %v1066_v6 }
 0x915   :  { %v1063_v9 = vpop.f32.mrf.mxu1  ;;  %1434 = vpow2.f32 %v1206_v12 }
 0x916   :  { %1436 = vpow2.f32 %v1209_v13 }
 0x917   :  { %v1355_v10 = vpop.f32.mrf.mxu1 }
 0x91d   :  { %v1431_v11 = vpop.eup %1430 }
 0x91e   :  { %982 = vrot.lane.b32.xlu0 %v1431_v11, %s1449_s4 }
 0x921   :  { %v1433_v19 = vpop.eup %1432 }
 0x922   :  { %1079 = vrot.lane.b32.xlu1 %v1433_v19, %s1449_s4  ;;  %v1435_v36 = vpop.eup %1434 }
 0x923   :  { %v973_v14 = vadd.f32 1.0, %v1435_v36  ;;  %v1437_v15 = vpop.eup %1436 }
 0x924   :  { %v1070_v17 = vadd.f32 1.0, %v1437_v15 }
 0x925   :  { %1438 = vrcp.f32 %v973_v14 }
 0x926   :  { %1440 = vrcp.f32 %v1070_v17 }
 0x932   :  { %v1439_v42 = vpop.eup %1438 }
 0x933   :  { %v1441_v23 = vpop.eup %1440  ;;  %v980_v27 = vmul.f32 %v1439_v42, %v978_v26 }
 0x934   :  { %v1077_v32 = vmul.f32 %v1441_v23, %v1075_v30 }
 0x990   :  { %v983_v22 = vpop.permute.xlu0 %982 }
 0x991   :  { %v985_v18 = vmul.f32 %v1439_v42, %v983_v22 }
 0x993   :  { %987 = vrot.lane.b32.xlu0 %v985_v18, %s1448_s14 }
 0x994   :  { %v1080_v21 = vpop.permute.xlu1 %1079 }
 0x995   :  { %v1082_v25 = vmul.f32 %v1441_v23, %v1080_v21 }
 0x997   :  { %1084 = vrot.lane.b32.xlu1 %v1082_v25, %s1448_s14 }
 0xa05   :  { %v988_v29 = vpop.permute.xlu0 %987 }
 0xa06   :  { %v990_v31 = vadd.f32 %v988_v29, %v980_v27 }
 0xa08   :  { %1442 = vtanh.f32 %v990_v31 }
 0xa09   :  { %v1085_v35 = vpop.permute.xlu1 %1084 }
 0xa0a   :  { %v1746_v37 = vadd.f32 %v1085_v35, %v1077_v32 }
 0xa0c   :  { %1444 = vtanh.f32 %v1746_v37 }
 0xa15   :  { %v1443_v44 = vpop.eup %1442 }
 0xa16   :  { %993 = vrot.lane.b32.xlu0 %v1443_v44, %s1449_s4 }
 0xa19   :  { %v1445_v50 = vpop.eup %1444 }
 0xa1a   :  { %1090 = vrot.lane.b32.xlu1 %v1445_v50, %s1449_s4  ;;  %408 = vrot.lane.b32.xlu0 %v407_v49, %s1448_s14 }
 0xa1e   :  { %520 = vrot.lane.b32.xlu1 %v519_v20, %s1448_s14  ;;  %618 = vrot.lane.b32.xlu0 %v617_v51, %s1448_s14 }
 0xa22   :  { %717 = vrot.lane.b32.xlu1 %v716_v8, %s1448_s14  ;;  %816 = vrot.lane.b32.xlu0 %v815_v55, %s1448_s14 }
 0xa26   :  { %915 = vrot.lane.b32.xlu1 %v914_v53, %s1448_s14 }
 0xa2a   :  { %1121 = vrot.lane.b32.xlu1 %v990_v31, %s1451_s5 }
 0xa88   :  { %v994_v56 = vpop.permute.xlu0 %993 }
 0xa89   :  { %v996_v57 = vmul.f32 %v1439_v42, %v994_v56 }
 0xa8b   :  { %v997_v58 = vpack.c.bf16 %v996_v57, %v996_v57  ;;  %1115 = vrot.lane.b32.xlu0 %v996_v57, %s1448_s14 }
 0xa8c   :  { %v1091_v59 = vpop.permute.xlu1 %1090  ;;  %v409_v60 = vpop.permute.xlu0 %408 }
 0xa8d   :  { %v1005_v61 = vrot.slane %v997_v58, %v399_v38  ;;  %v1093_v62 = vmul.f32 %v1441_v23, %v1091_v59  ;;  %412 = vst.msk [vmem:[%s1812_s8] sm:$0x1] %vm411_vm3, %v409_v60 }
 0xa8f   :  { %v1006_v63 = vcombine.high %v1005_v61, %v1005_v61  ;;  %v1094_v1 = vpack.c.bf16 %v1093_v62, %v1093_v62 }
 0xa90   :  { %v521_v2 = vpop.permute.xlu1 %520  ;;  %v619_v3 = vpop.permute.xlu0 %618 }
 0xa91   :  { %v1102_v5 = vrot.slane %v1094_v1, %v399_v38  ;;  %1192 = vst.msk [vmem:[%s1813_s9 + $0x3] sm:$0x1] %vm411_vm3, %v521_v2  ;;  %1195 = vst.msk [vmem:[%s1812_s8 + $0x1] sm:$0x1] %vm411_vm3, %v619_v3  ;;  %v1013_v6 = vrot.slane %v1006_v63, %v399_v38 }
 0xa93   :  { %v1109_v7 = vrot.slane %v1102_v5, %v399_v38  ;;  %v1014_v9 = vcombine.high %v1013_v6, %v1013_v6 }
 0xa94   :  { %v718_v10 = vpop.permute.xlu1 %717  ;;  %v817_v11 = vpop.permute.xlu0 %816 }
 0xa95   :  { %1198 = vst.msk [vmem:[%s1813_s9 + $0x2] sm:$0x1] %vm411_vm3, %v718_v10  ;;  %1201 = vst.msk [vmem:[%s1812_s8 + $0x2] sm:$0x1] %vm411_vm3, %v817_v11  ;;  %1110 = vrot.lane.b32.xlu1 %v1109_v7, %s1448_s14  ;;  %1015 = vrot.lane.b32.xlu0 %v1014_v9, %s1448_s14 }
 0xa98   :  { %v916_v19 = vpop.permute.xlu1 %915 }
 0xa99   :  { %1204 = vst.msk [vmem:[%s1813_s9 + $0x1] sm:$0x1] %vm411_vm3, %v916_v19  ;;  %1132 = vrot.lane.b32.xlu1 %v1746_v37, %s1451_s5  ;;  %1126 = vrot.lane.b32.xlu0 %v1093_v62, %s1448_s14 }
 0xa9c   :  { %v1122_v12 = vpop.permute.xlu1 %1121 }
 0xa9d   :  { %1124 = vst.msk [vmem:[#allocation3 - $0x6] sm:$0xc0] %vm1118_vm4, %v1122_v12 }
 0xafd   :  { %v1116_v13 = vpop.permute.xlu0 %1115 }
 0xafe   :  { %1119 = vst.msk [vmem:[#allocation2 - $0x6] sm:$0xc0] %vm1118_vm4, %v1116_v13 }
 0xb07   :  { %v1111_v36 = vpop.permute.xlu1 %1110  ;;  %v1016_v14 = vpop.permute.xlu0 %1015 }
 0xb08   :  { %1113 = vst.msk [vmem:[%s1813_s9] sm:$0x1] %vm411_vm3, %v1111_v36  ;;  %1207 = vst.msk [vmem:[%s1812_s8 + $0x3] sm:$0x1] %vm411_vm3, %v1016_v14 }
 0xb0b   :  { %v1133_v15 = vpop.permute.xlu1 %1132  ;;  %v1127_v17 = vpop.permute.xlu0 %1126 }
 0xb0c   :  { %1135 = vst.msk [vmem:[#allocation5] sm:$0x3] %vm65_vm0, %v1133_v15  ;;  %1130 = vst.msk [vmem:[#allocation4] sm:$0x3] %vm65_vm0, %v1127_v17 }

// kernel: listener_pre_trainer_forward.8
= control target key start
LH: loop header
LB: loop body
LE: loop exit
PB: predicated region body
PF: predicated region fallthrough
CT: control target
= control target key end

     0   :  { %vm68_vm0 = vcmask 254976   ;;  %v2429_v0 = vmov 0.0   ;;  %vm2430_vm1 = vmmov 0   ;;  %s2431_s16 = smov 32   ;;  %vm338_vm2 = vcmask 261120   ;;  %s3039_s2 = inlined_call_operand.vmem [shape: bf16[128,128], index: 2, kind: input, shape index: {}]   ;;  %s3040_s3 = inlined_call_operand.vmem [shape: bf16[128,128], index: 3, kind: input, shape index: {}]   ;;  %s3041_s0 = inlined_call_operand.vmem [shape: bf16[1,16,128], index: 0, kind: input, shape index: {}, may-alias: {0,1}]   ;;  %s3042_s1 = inlined_call_operand.vmem [shape: bf16[1,16,128], index: 1, kind: input, shape index: {}, may-alias: {0,1}]   ;;  %s3043_s6 = inlined_call_operand.vmem [shape: bf16[32,128], index: 6, kind: input, shape index: {}]   ;;  %s3044_s7 = inlined_call_operand.vmem [shape: bf16[32,128], index: 7, kind: input, shape index: {}]   ;;  %s3045_s5 = inlined_call_operand.vmem [shape: f32[1,128], index: 5, kind: input, shape index: {}]   ;;  %s3046_s4 = inlined_call_operand.vmem [shape: f32[1,128], index: 4, kind: input, shape index: {}]   ;;  %s3047_s8 = inlined_call_operand.vmem [shape: bf16[8,2,32], index: 8, kind: output, shape index: {0}]   ;;  %s3048_s9 = inlined_call_operand.vmem [shape: bf16[8,2,32], index: 9, kind: output, shape index: {1}]  }
   0x1   :  { %2105 = vmatprep.subr.bf16.mxu0 %v2429_v0  ;;  %2125 = vmatprep.subr.bf16.mxu1 %v2429_v0  ;;  %v2279_v1 = vld [vmem:[%s3039_s2 + $0x38] sm:$0xff]   ;;  %69 = vst.msk [vmem:[#allocation2] sm:$0x3] %vm68_vm0, %v2429_v0  ;;  %70 = vst.msk [vmem:[#allocation3] sm:$0x3] %vm68_vm0, %v2429_v0  ;;  %v2281_v3 = vld [vmem:[%s3039_s2 + $0x30] sm:$0xff]  }
   0x2   :  { %71 = vst.msk [vmem:[#allocation4] sm:$0x3] %vm68_vm0, %v2429_v0  ;;  %72 = vst.msk [vmem:[#allocation5] sm:$0x3] %vm68_vm0, %v2429_v0  ;;  %v2280_v2 = vld [vmem:[%s3040_s3 + $0x38] sm:$0xff]   ;;  %2121 = vmatprep.mubr.msk.bf16.mxu0 %vm2430_vm1, %v2429_v0  ;;  %2141 = vmatprep.mubr.msk.bf16.mxu1 %vm2430_vm1, %v2429_v0  ;;  %v2282_v4 = vld [vmem:[%s3040_s3 + $0x30] sm:$0xff]  }
   0x3   :  { %2106 = vmatpush3.bf16.msra.mxu0 %v2279_v1  ;;  %2126 = vmatpush3.bf16.msra.mxu1 %v2280_v2  ;;  %v2283_v5 = vld [vmem:[%s3039_s2 + $0x28] sm:$0xff]   ;;  %v2285_v7 = vld [vmem:[%s3039_s2 + $0x20] sm:$0xff]   ;;  %v2287_v9 = vld [vmem:[%s3039_s2 + $0x18] sm:$0xff]   ;;  %vm430_vm3 = vcmask 253952   ;;  %vm1921_vm4 = vcmask 261126  }
   0x4   :  { %2107 = vmatprep.subr.bf16.mxu0 %v2429_v0  ;;  %2127 = vmatprep.subr.bf16.mxu1 %v2429_v0  ;;  %v2284_v6 = vld [vmem:[%s3040_s3 + $0x28] sm:$0xff]   ;;  %v2286_v8 = vld [vmem:[%s3040_s3 + $0x20] sm:$0xff]   ;;  %v2288_v10 = vld [vmem:[%s3040_s3 + $0x18] sm:$0xff]  }
   0x5   :  { %v2289_v11 = vld [vmem:[%s3039_s2 + $0x10] sm:$0xff]   ;;  %v2291_v13 = vld [vmem:[%s3039_s2 + $0x8] sm:$0xff]   ;;  %v2293_v16 = vld [vmem:[%s3039_s2] sm:$0xff]  }
   0x6   :  { %v2290_v12 = vld [vmem:[%s3040_s3 + $0x10] sm:$0xff]   ;;  %v2292_v15 = vld [vmem:[%s3040_s3 + $0x8] sm:$0xff]   ;;  %v2294_v17 = vld [vmem:[%s3040_s3] sm:$0xff]  }
   0x7   :  { %2108 = vmatpush3.bf16.msra.mxu0 %v2281_v3  ;;  %2128 = vmatpush3.bf16.msra.mxu1 %v2282_v4  ;;  %v2295_v18 = vld [vmem:[%s3041_s0] sm:$0xff]   ;;  %v2571_v20 = vld [vmem:[%s3043_s6 + $0x8] sm:$0xff]  }
   0x8   :  { %2109 = vmatprep.subr.bf16.mxu0 %v2429_v0  ;;  %2129 = vmatprep.subr.bf16.mxu1 %v2429_v0  ;;  %v322_v14 = vld [vmem:[#allocation3] sm:$0x3]  ;;  %v2577_v21 = vld [vmem:[%s3044_s7 + $0x8] sm:$0xff]   ;;  %v321_v23 = vld [vmem:[#allocation2] sm:$0x3] }
   0x9   :  { %391 = vrot.lane.b32.xlu1 %v322_v14, %s2431_s16  ;;  %v2296_v19 = vld [vmem:[%s3042_s1] sm:$0xff]   ;;  %v325_v26 = vpack.c.bf16 %v321_v23, %v321_v23 }
   0xa   :  { %v2584_v22 = vld [vmem:[%s3043_s6] sm:$0xff]  }
   0xb   :  { %2110 = vmatpush3.bf16.msra.mxu0 %v2283_v5  ;;  %2130 = vmatpush3.bf16.msra.mxu1 %v2284_v6  ;;  %v2591_v24 = vld [vmem:[%s3044_s7] sm:$0xff]  }
   0xc   :  { %2111 = vmatprep.subr.bf16.mxu0 %v2429_v0  ;;  %2131 = vmatprep.subr.bf16.mxu1 %v2429_v0  ;;  %v323_v25 = vld [vmem:[#allocation4] sm:$0x3]  ;;  %v1979_v28 = vld [vmem:[%s3045_s5] ss:$0 sm:$0xff]  ;;  %v324_v54 = vld [vmem:[#allocation5] sm:$0x3] }
   0xd   :  { %v432_v27 = vpack.c.bf16 %v323_v25, %v323_v25  ;;  %v1969_v34 = vld [vmem:[%s3046_s4] ss:$0 sm:$0xff]  ;;  %s2432_s4 = smov 64   ;;  %v500_v56 = vrot.slane %v324_v54, 2  ;;  %s2434_s5 = smov 96  }
   0xf   :  { %2112 = vmatpush3.bf16.msra.mxu0 %v2285_v7  ;;  %2132 = vmatpush3.bf16.msra.mxu1 %v2286_v8 }
  0x10   :  { %2113 = vmatprep.subr.bf16.mxu0 %v2429_v0  ;;  %2133 = vmatprep.subr.bf16.mxu1 %v2429_v0 }
  0x13   :  { %2114 = vmatpush3.bf16.msra.mxu0 %v2287_v9  ;;  %2134 = vmatpush3.bf16.msra.mxu1 %v2288_v10 }
  0x14   :  { %2115 = vmatprep.subr.bf16.mxu0 %v2429_v0  ;;  %2135 = vmatprep.subr.bf16.mxu1 %v2429_v0 }
  0x17   :  { %2116 = vmatpush3.bf16.msra.mxu0 %v2289_v11  ;;  %2136 = vmatpush3.bf16.msra.mxu1 %v2290_v12 }
  0x18   :  { %2117 = vmatprep.subr.bf16.mxu0 %v2429_v0  ;;  %2137 = vmatprep.subr.bf16.mxu1 %v2429_v0 }
  0x1b   :  { %2118 = vmatpush3.bf16.msra.mxu0 %v2291_v13  ;;  %2138 = vmatpush3.bf16.msra.mxu1 %v2292_v15 }
  0x1c   :  { %2119 = vmatprep.subr.bf16.mxu0 %v2429_v0  ;;  %2139 = vmatprep.subr.bf16.mxu1 %v2429_v0 }
  0x1f   :  { %2120 = vmatpush3.bf16.msra.mxu0 %v2293_v16  ;;  %2140 = vmatpush3.bf16.msra.mxu1 %v2294_v17 }
  0x20   :  { %2145 = vmatprep.subr.bf16.mxu0 %v2429_v0  ;;  %2153 = vmatprep.subr.bf16.mxu1 %v2429_v0 }
  0x22   :  { %2122 = vmatmul.mubr.bf16.vlgmr.msra.gmra.mxu0 %v2295_v18  ;;  %2142 = vmatmul.mubr.bf16.vlgmr.msra.gmra.mxu1 %v2296_v19 }
  0x23   :  { %2146 = vmatpush3.bf16.msra.mxu0 %v2571_v20  ;;  %2154 = vmatpush3.bf16.msra.mxu1 %v2577_v21 }
  0x24   :  { %2147 = vmatprep.subr.bf16.mxu0 %v2429_v0  ;;  %2155 = vmatprep.subr.bf16.mxu1 %v2429_v0 }
  0x25   :  { %2149 = vmatprep.mubr.msk.bf16.mxu0 %vm2430_vm1, %v2429_v0  ;;  %2157 = vmatprep.mubr.msk.bf16.mxu1 %vm2430_vm1, %v2429_v0 }
  0x27   :  { %2148 = vmatpush3.bf16.msra.mxu0 %v2584_v22  ;;  %2156 = vmatpush3.bf16.msra.mxu1 %v2591_v24 }
  0x28   :  { %2161 = vmatprep.subr.bf16.mxu0 %v2429_v0  ;;  %2169 = vmatprep.subr.bf16.mxu1 %v2429_v0 }
  0x2a   :  { %2150 = vmatmul.mubr.msk.bf16.vlgmr.msra.gmra.mxu0 %vm338_vm2, %v325_v26  ;;  %2158 = vmatmul.mubr.msk.bf16.vlgmr.msra.gmra.mxu1 %vm338_vm2, %v432_v27 }
  0x2b   :  { %2162 = vmatpush3.bf16.msra.mxu0 %v2571_v20  ;;  %2165 = vmatprep.mubr.msk.bf16.mxu0 %vm2430_vm1, %v2429_v0 }
  0x2c   :  { %2163 = vmatprep.subr.bf16.mxu0 %v2429_v0  ;;  %2170 = vmatpush3.bf16.msra.mxu1 %v2577_v21 }
  0x2d   :  { %2173 = vmatprep.mubr.msk.bf16.mxu1 %vm2430_vm1, %v2429_v0  ;;  %2171 = vmatprep.subr.bf16.mxu1 %v2429_v0 }
  0x2f   :  { %2164 = vmatpush3.bf16.msra.mxu0 %v2584_v22 }
  0x30   :  { %2177 = vmatprep.subr.bf16.mxu0 %v2429_v0  ;;  %2172 = vmatpush3.bf16.msra.mxu1 %v2591_v24 }
  0x31   :  { %2185 = vmatprep.subr.bf16.mxu1 %v2429_v0 }
  0x7b   :  { %v392_v6 = vpop.permute.xlu1 %391 }
  0xe2   :  { %v186_v29 = vpop.f32.mrf.mxu0  ;;  %v306_v30 = vpop.f32.mrf.mxu1 }
  0xe3   :  { %v2619_v31 = vadd.f32 %v1979_v28, %v306_v30  ;;  %v2626_v39 = vadd.f32 %v1969_v34, %v186_v29 }
  0xe4   :  { %v2123_v32 = vpop.f32.mrf.mxu0  ;;  %v2143_v33 = vpop.f32.mrf.mxu1 }
  0xe6   :  { %v189_v35 = vpop.f32.mrf.mxu0  ;;  %v309_v37 = vpop.f32.mrf.mxu1 }
  0xe7   :  { %v2624_v36 = vadd.f32 %v1969_v34, %v189_v35  ;;  %v2629_v44 = vadd.f32 %v1979_v28, %v309_v37 }
  0xe8   :  { %v2124_v38 = vpop.f32.mrf.mxu0  ;;  %v2144_v40 = vpop.f32.mrf.mxu1 }
  0xea   :  { %v376_v41 = vpop.f32.mrf.mxu0  ;;  %v482_v43 = vpop.f32.mrf.mxu1 }
  0xeb   :  { %v382_v42 = vadd.f32 %v376_v41, %v2626_v39  ;;  %v489_v45 = vrot.slane %v482_v43, 2 }
  0xec   :  { %v2151_v46 = vpop.f32.mrf.mxu0  ;;  %v2159_v47 = vpop.f32.mrf.mxu1 }
  0xed   :  { %2301 = vtanh.f32 %v382_v42  ;;  %v491_v48 = vadd.f32 %v489_v45, %v2629_v44  ;;  %v1992_v57 = vmul.f32 -1.442695, %v382_v42 }
  0xee   :  { %v379_v49 = vpop.f32.mrf.mxu0  ;;  %v485_v50 = vpop.f32.mrf.mxu1 }
  0xef   :  { %2303 = vtanh.f32 %v491_v48  ;;  %v1996_v58 = vmul.f32 -1.442695, %v491_v48 }
  0xf0   :  { %v2152_v51 = vpop.f32.mrf.mxu0  ;;  %v2160_v52 = vpop.f32.mrf.mxu1  ;;  %2305 = vpow2.f32 %v1992_v57 }
  0xf1   :  { %2307 = vpow2.f32 %v1996_v58 }
  0xfa   :  { %v2302_v53 = vpop.eup %2301 }
  0xfb   :  { %396 = vrot.lane.b32.xlu0 %v2302_v53, %s2432_s4 }
  0xfc   :  { %v2304_v55 = vpop.eup %2303 }
  0xfd   :  { %v2306_v59 = vpop.eup %2305 }
  0xfe   :  { %v386_v60 = vadd.f32 1.0, %v2306_v59  ;;  %v2308_v61 = vpop.eup %2307 }
  0xff   :  { %506 = vrot.lane.b32.xlu0 %v2304_v55, %s2432_s4  ;;  %v495_v62 = vadd.f32 1.0, %v2308_v61 }
 0x100   :  { %2309 = vrcp.f32 %v386_v60 }
 0x101   :  { %2311 = vrcp.f32 %v495_v62 }
 0x103   :  { %501 = vrot.lane.b32.xlu0 %v500_v56, %s2431_s16 }
 0x10d   :  { %v2310_v63 = vpop.eup %2309 }
 0x10e   :  { %v2312_v3 = vpop.eup %2311  ;;  %v394_v7 = vmul.f32 %v2310_v63, %v392_v6 }
 0x16d   :  { %v397_v1 = vpop.permute.xlu0 %396 }
 0x16e   :  { %v399_v2 = vmul.f32 %v2310_v63, %v397_v1 }
 0x170   :  { %401 = vrot.lane.b32.xlu1 %v399_v2, %s2431_s16 }
 0x171   :  { %v507_v4 = vpop.permute.xlu0 %506 }
 0x172   :  { %v509_v5 = vmul.f32 %v2312_v3, %v507_v4 }
 0x174   :  { %511 = vrot.lane.b32.xlu1 %v509_v5, %s2431_s16 }
 0x175   :  { %v502_v8 = vpop.permute.xlu0 %501 }
 0x176   :  { %v504_v11 = vmul.f32 %v2312_v3, %v502_v8 }
 0x1e2   :  { %v402_v9 = vpop.permute.xlu1 %401 }
 0x1e3   :  { %v2637_v10 = vadd.f32 %v402_v9, %v394_v7 }
 0x1e5   :  { %2313 = vtanh.f32 %v2637_v10  ;;  %v601_v59 = vrot.slane %v2637_v10, 6 }
 0x1e6   :  { %v512_v12 = vpop.permute.xlu1 %511 }
 0x1e7   :  { %v2640_v13 = vadd.f32 %v512_v12, %v504_v11 }
 0x1e9   :  { %2315 = vtanh.f32 %v2640_v13 }
 0x1f2   :  { %v2314_v14 = vpop.eup %2313 }
 0x1f3   :  { %407 = vrot.lane.b32.xlu0 %v2314_v14, %s2432_s4 }
 0x1f6   :  { %v2316_v15 = vpop.eup %2315 }
 0x1f7   :  { %517 = vrot.lane.b32.xlu1 %v2316_v15, %s2432_s4 }
 0x265   :  { %v408_v16 = vpop.permute.xlu0 %407 }
 0x266   :  { %v410_v17 = vmul.f32 %v2310_v63, %v408_v16  ;;  %v700_v63 = vrot.slane %v2640_v13, 2 }
 0x268   :  { %v2645_v18 = vpack.c.bf16 %v410_v17, %v410_v17 }
 0x269   :  { %v518_v19 = vpop.permute.xlu1 %517 }
 0x26a   :  { %v520_v23 = vmul.f32 %v2312_v3, %v518_v19  ;;  %544 = vrot.lane.b32.xlu0 %v2645_v18, %s2431_s16 }
 0x26c   :  { %v2649_v25 = vpack.c.bf16 %v520_v23, %v520_v23 }
 0x26e   :  { %v642_v26 = vrot.slane %v2649_v25, 3 }
 0x270   :  { %643 = vrot.lane.b32.xlu1 %v642_v26, %s2431_s16 }
 0x2dc   :  { %v545_v27 = vpop.permute.xlu0 %544 }
 0x2dd   :  { %2166 = vmatmul.mubr.msk.bf16.vlgmr.msra.gmra.mxu0 %vm338_vm2, %v545_v27 }
 0x2de   :  { %2178 = vmatpush3.bf16.msra.mxu0 %v2571_v20  ;;  %2181 = vmatprep.mubr.msk.bf16.mxu0 %vm2430_vm1, %v2429_v0 }
 0x2df   :  { %2179 = vmatprep.subr.bf16.mxu0 %v2429_v0 }
 0x2e2   :  { %v644_v28 = vpop.permute.xlu1 %643  ;;  %2180 = vmatpush3.bf16.msra.mxu0 %v2584_v22 }
 0x2e3   :  { %2174 = vmatmul.mubr.msk.bf16.vlgmr.msra.gmra.mxu1 %vm338_vm2, %v644_v28  ;;  %2193 = vmatprep.subr.bf16.mxu0 %v2429_v0 }
 0x2e4   :  { %2186 = vmatpush3.bf16.msra.mxu1 %v2577_v21  ;;  %2189 = vmatprep.mubr.msk.bf16.mxu1 %vm2430_vm1, %v2429_v0 }
 0x2e5   :  { %2187 = vmatprep.subr.bf16.mxu1 %v2429_v0 }
 0x2e8   :  { %2188 = vmatpush3.bf16.msra.mxu1 %v2591_v24 }
 0x2e9   :  { %2201 = vmatprep.subr.bf16.mxu1 %v2429_v0 }
 0x39d   :  { %v583_v29 = vpop.f32.mrf.mxu0 }
 0x39e   :  { %v590_v30 = vrot.slane %v583_v29, 6 }
 0x39f   :  { %v2167_v32 = vpop.f32.mrf.mxu0 }
 0x3a0   :  { %v592_v33 = vadd.f32 %v590_v30, %v2626_v39 }
 0x3a1   :  { %v586_v34 = vpop.f32.mrf.mxu0 }
 0x3a2   :  { %2317 = vtanh.f32 %v592_v33  ;;  %v1999_v47 = vmul.f32 -1.442695, %v592_v33 }
 0x3a3   :  { %v2168_v35 = vpop.f32.mrf.mxu0  ;;  %v682_v37 = vpop.f32.mrf.mxu1 }
 0x3a4   :  { %v689_v38 = vrot.slane %v682_v37, 4 }
 0x3a5   :  { %v2175_v40 = vpop.f32.mrf.mxu1 }
 0x3a6   :  { %v691_v41 = vadd.f32 %v689_v38, %v2629_v44 }
 0x3a7   :  { %v685_v42 = vpop.f32.mrf.mxu1 }
 0x3a8   :  { %2319 = vtanh.f32 %v691_v41  ;;  %v2002_v48 = vmul.f32 -1.442695, %v691_v41 }
 0x3a9   :  { %v2176_v43 = vpop.f32.mrf.mxu1  ;;  %2321 = vpow2.f32 %v1999_v47 }
 0x3aa   :  { %2323 = vpow2.f32 %v2002_v48 }
 0x3af   :  { %v2318_v45 = vpop.eup %2317 }
 0x3b0   :  { %605 = vrot.lane.b32.xlu0 %v2318_v45, %s2432_s4 }
 0x3b5   :  { %v2320_v46 = vpop.eup %2319 }
 0x3b6   :  { %704 = vrot.lane.b32.xlu1 %v2320_v46, %s2432_s4  ;;  %v2322_v49 = vpop.eup %2321 }
 0x3b7   :  { %v596_v50 = vadd.f32 1.0, %v2322_v49  ;;  %v2324_v51 = vpop.eup %2323 }
 0x3b8   :  { %v695_v52 = vadd.f32 1.0, %v2324_v51 }
 0x3b9   :  { %2325 = vrcp.f32 %v596_v50 }
 0x3ba   :  { %2327 = vrcp.f32 %v695_v52 }
 0x3c6   :  { %v2326_v53 = vpop.eup %2325 }
 0x3c7   :  { %v2328_v56 = vpop.eup %2327  ;;  %v603_v60 = vmul.f32 %v2326_v53, %v601_v59 }
 0x3c8   :  { %v702_v1 = vmul.f32 %v2328_v56, %v700_v63 }
 0x422   :  { %v606_v54 = vpop.permute.xlu0 %605 }
 0x423   :  { %v608_v55 = vmul.f32 %v2326_v53, %v606_v54 }
 0x425   :  { %610 = vrot.lane.b32.xlu0 %v608_v55, %s2431_s16 }
 0x428   :  { %v705_v57 = vpop.permute.xlu1 %704 }
 0x429   :  { %v707_v58 = vmul.f32 %v2328_v56, %v705_v57 }
 0x42b   :  { %709 = vrot.lane.b32.xlu1 %v707_v58, %s2431_s16 }
 0x497   :  { %v611_v61 = vpop.permute.xlu0 %610 }
 0x498   :  { %v2674_v62 = vadd.f32 %v611_v61, %v603_v60 }
 0x49a   :  { %2329 = vtanh.f32 %v2674_v62  ;;  %v799_v52 = vrot.slane %v2674_v62, 6 }
 0x49d   :  { %v710_v2 = vpop.permute.xlu1 %709 }
 0x49e   :  { %v2678_v3 = vadd.f32 %v710_v2, %v702_v1 }
 0x4a0   :  { %2331 = vtanh.f32 %v2678_v3 }
 0x4a7   :  { %v2330_v4 = vpop.eup %2329 }
 0x4a8   :  { %616 = vrot.lane.b32.xlu0 %v2330_v4, %s2432_s4 }
 0x4ad   :  { %v2332_v5 = vpop.eup %2331 }
 0x4ae   :  { %715 = vrot.lane.b32.xlu1 %v2332_v5, %s2432_s4 }
 0x51a   :  { %v617_v6 = vpop.permute.xlu0 %616 }
 0x51b   :  { %v619_v7 = vmul.f32 %v2326_v53, %v617_v6 }
 0x51d   :  { %v2683_v8 = vpack.c.bf16 %v619_v7, %v619_v7 }
 0x51f   :  { %v741_v9 = vrot.slane %v2683_v8, 1 }
 0x520   :  { %v716_v10 = vpop.permute.xlu1 %715 }
 0x521   :  { %v718_v11 = vmul.f32 %v2328_v56, %v716_v10  ;;  %742 = vrot.lane.b32.xlu0 %v741_v9, %s2431_s16  ;;  %v898_v56 = vrot.slane %v2678_v3, 2 }
 0x523   :  { %v2687_v12 = vpack.c.bf16 %v718_v11, %v718_v11 }
 0x525   :  { %v840_v13 = vrot.slane %v2687_v12, 2 }
 0x527   :  { %841 = vrot.lane.b32.xlu1 %v840_v13, %s2431_s16 }
 0x593   :  { %v743_v14 = vpop.permute.xlu0 %742 }
 0x594   :  { %2182 = vmatmul.mubr.msk.bf16.vlgmr.msra.gmra.mxu0 %vm338_vm2, %v743_v14 }
 0x595   :  { %2194 = vmatpush3.bf16.msra.mxu0 %v2571_v20  ;;  %2197 = vmatprep.mubr.msk.bf16.mxu0 %vm2430_vm1, %v2429_v0 }
 0x596   :  { %2195 = vmatprep.subr.bf16.mxu0 %v2429_v0 }
 0x599   :  { %v842_v15 = vpop.permute.xlu1 %841  ;;  %2196 = vmatpush3.bf16.msra.mxu0 %v2584_v22 }
 0x59a   :  { %2190 = vmatmul.mubr.msk.bf16.vlgmr.msra.gmra.mxu1 %vm338_vm2, %v842_v15  ;;  %2209 = vmatprep.subr.bf16.mxu0 %v2429_v0 }
 0x59b   :  { %2202 = vmatpush3.bf16.msra.mxu1 %v2577_v21  ;;  %2205 = vmatprep.mubr.msk.bf16.mxu1 %vm2430_vm1, %v2429_v0 }
 0x59c   :  { %2203 = vmatprep.subr.bf16.mxu1 %v2429_v0 }
 0x59f   :  { %2204 = vmatpush3.bf16.msra.mxu1 %v2591_v24 }
 0x5a0   :  { %2217 = vmatprep.subr.bf16.mxu1 %v2429_v0 }
 0x654   :  { %v781_v16 = vpop.f32.mrf.mxu0 }
 0x655   :  { %v788_v17 = vrot.slane %v781_v16, 4 }
 0x656   :  { %v2183_v19 = vpop.f32.mrf.mxu0 }
 0x657   :  { %v790_v23 = vadd.f32 %v788_v17, %v2626_v39 }
 0x658   :  { %v784_v26 = vpop.f32.mrf.mxu0 }
 0x659   :  { %2333 = vtanh.f32 %v790_v23  ;;  %v2005_v38 = vmul.f32 -1.442695, %v790_v23 }
 0x65a   :  { %v2184_v27 = vpop.f32.mrf.mxu0  ;;  %v880_v28 = vpop.f32.mrf.mxu1 }
 0x65b   :  { %v887_v29 = vrot.slane %v880_v28, 6 }
 0x65c   :  { %v2191_v30 = vpop.f32.mrf.mxu1 }
 0x65d   :  { %v889_v32 = vadd.f32 %v887_v29, %v2629_v44 }
 0x65e   :  { %v883_v33 = vpop.f32.mrf.mxu1 }
 0x65f   :  { %2335 = vtanh.f32 %v889_v32  ;;  %v2008_v40 = vmul.f32 -1.442695, %v889_v32 }
 0x660   :  { %v2192_v34 = vpop.f32.mrf.mxu1  ;;  %2337 = vpow2.f32 %v2005_v38 }
 0x661   :  { %2339 = vpow2.f32 %v2008_v40 }
 0x666   :  { %v2334_v35 = vpop.eup %2333 }
 0x667   :  { %803 = vrot.lane.b32.xlu0 %v2334_v35, %s2432_s4 }
 0x66c   :  { %v2336_v37 = vpop.eup %2335 }
 0x66d   :  { %902 = vrot.lane.b32.xlu1 %v2336_v37, %s2432_s4  ;;  %v2338_v41 = vpop.eup %2337 }
 0x66e   :  { %v794_v42 = vadd.f32 1.0, %v2338_v41  ;;  %v2340_v43 = vpop.eup %2339 }
 0x66f   :  { %v893_v45 = vadd.f32 1.0, %v2340_v43 }
 0x670   :  { %2341 = vrcp.f32 %v794_v42 }
 0x671   :  { %2343 = vrcp.f32 %v893_v45 }
 0x67d   :  { %v2342_v46 = vpop.eup %2341 }
 0x67e   :  { %v2344_v49 = vpop.eup %2343  ;;  %v801_v53 = vmul.f32 %v2342_v46, %v799_v52 }
 0x67f   :  { %v900_v57 = vmul.f32 %v2344_v49, %v898_v56 }
 0x6d9   :  { %v804_v47 = vpop.permute.xlu0 %803 }
 0x6da   :  { %v806_v48 = vmul.f32 %v2342_v46, %v804_v47 }
 0x6dc   :  { %808 = vrot.lane.b32.xlu0 %v806_v48, %s2431_s16 }
 0x6df   :  { %v903_v50 = vpop.permute.xlu1 %902 }
 0x6e0   :  { %v905_v51 = vmul.f32 %v2344_v49, %v903_v50 }
 0x6e2   :  { %907 = vrot.lane.b32.xlu1 %v905_v51, %s2431_s16 }
 0x74e   :  { %v809_v54 = vpop.permute.xlu0 %808 }
 0x74f   :  { %v2712_v55 = vadd.f32 %v809_v54, %v801_v53 }
 0x751   :  { %2345 = vtanh.f32 %v2712_v55  ;;  %v997_v43 = vrot.slane %v2712_v55, 6 }
 0x754   :  { %v908_v58 = vpop.permute.xlu1 %907 }
 0x755   :  { %v2716_v59 = vadd.f32 %v908_v58, %v900_v57 }
 0x757   :  { %2347 = vtanh.f32 %v2716_v59  ;;  %v1094_v47 = vrot.slane %v2716_v59, 2 }
 0x75e   :  { %v2346_v60 = vpop.eup %2345 }
 0x75f   :  { %814 = vrot.lane.b32.xlu0 %v2346_v60, %s2432_s4 }
 0x764   :  { %v2348_v61 = vpop.eup %2347 }
 0x765   :  { %913 = vrot.lane.b32.xlu1 %v2348_v61, %s2432_s4 }
 0x7d1   :  { %v815_v62 = vpop.permute.xlu0 %814 }
 0x7d2   :  { %v817_v63 = vmul.f32 %v2342_v46, %v815_v62 }
 0x7d4   :  { %v2721_v1 = vpack.c.bf16 %v817_v63, %v817_v63 }
 0x7d6   :  { %v939_v2 = vrot.slane %v2721_v1, 2 }
 0x7d7   :  { %v914_v3 = vpop.permute.xlu1 %913 }
 0x7d8   :  { %v916_v4 = vmul.f32 %v2344_v49, %v914_v3  ;;  %940 = vrot.lane.b32.xlu0 %v939_v2, %s2431_s16 }
 0x7da   :  { %v2725_v5 = vpack.c.bf16 %v916_v4, %v916_v4 }
 0x7dc   :  { %v1039_v6 = vrot.slane %v2725_v5, 1 }
 0x7de   :  { %1040 = vrot.lane.b32.xlu1 %v1039_v6, %s2431_s16 }
 0x84a   :  { %v941_v7 = vpop.permute.xlu0 %940 }
 0x84b   :  { %2198 = vmatmul.mubr.msk.bf16.vlgmr.msra.gmra.mxu0 %vm338_vm2, %v941_v7 }
 0x84c   :  { %2210 = vmatpush3.bf16.msra.mxu0 %v2571_v20  ;;  %2213 = vmatprep.mubr.msk.bf16.mxu0 %vm2430_vm1, %v2429_v0 }
 0x84d   :  { %2211 = vmatprep.subr.bf16.mxu0 %v2429_v0 }
 0x850   :  { %v1041_v9 = vpop.permute.xlu1 %1040  ;;  %2212 = vmatpush3.bf16.msra.mxu0 %v2584_v22 }
 0x851   :  { %2206 = vmatmul.mubr.msk.bf16.vlgmr.msra.gmra.mxu1 %vm338_vm2, %v1041_v9  ;;  %2225 = vmatprep.subr.bf16.mxu0 %v2429_v0 }
 0x852   :  { %2218 = vmatpush3.bf16.msra.mxu1 %v2577_v21  ;;  %2221 = vmatprep.mubr.msk.bf16.mxu1 %vm2430_vm1, %v2429_v0 }
 0x853   :  { %2219 = vmatprep.subr.bf16.mxu1 %v2429_v0 }
 0x856   :  { %2220 = vmatpush3.bf16.msra.mxu1 %v2591_v24 }
 0x857   :  { %2233 = vmatprep.subr.bf16.mxu1 %v2429_v0 }
 0x90b   :  { %v979_v10 = vpop.f32.mrf.mxu0 }
 0x90c   :  { %v986_v11 = vrot.slane %v979_v10, 2 }
 0x90d   :  { %v2199_v13 = vpop.f32.mrf.mxu0 }
 0x90e   :  { %v988_v14 = vadd.f32 %v986_v11, %v2626_v39 }
 0x90f   :  { %v982_v15 = vpop.f32.mrf.mxu0 }
 0x910   :  { %2349 = vtanh.f32 %v988_v14  ;;  %v2011_v30 = vmul.f32 -1.442695, %v988_v14 }
 0x911   :  { %v2200_v16 = vpop.f32.mrf.mxu0  ;;  %v1079_v17 = vpop.f32.mrf.mxu1 }
 0x912   :  { %v1085_v19 = vadd.f32 %v1079_v17, %v2629_v44 }
 0x913   :  { %v2207_v23 = vpop.f32.mrf.mxu1 }
 0x914   :  { %2351 = vtanh.f32 %v1085_v19  ;;  %v2014_v32 = vmul.f32 -1.442695, %v1085_v19 }
 0x915   :  { %v1082_v26 = vpop.f32.mrf.mxu1  ;;  %2353 = vpow2.f32 %v2011_v30 }
 0x916   :  { %2355 = vpow2.f32 %v2014_v32 }
 0x917   :  { %v2208_v27 = vpop.f32.mrf.mxu1 }
 0x91d   :  { %v2350_v28 = vpop.eup %2349 }
 0x91e   :  { %1001 = vrot.lane.b32.xlu0 %v2350_v28, %s2432_s4 }
 0x921   :  { %v2352_v29 = vpop.eup %2351 }
 0x922   :  { %1098 = vrot.lane.b32.xlu1 %v2352_v29, %s2432_s4  ;;  %v2354_v39 = vpop.eup %2353 }
 0x923   :  { %v992_v33 = vadd.f32 1.0, %v2354_v39  ;;  %v2356_v34 = vpop.eup %2355 }
 0x924   :  { %v1089_v35 = vadd.f32 1.0, %v2356_v34 }
 0x925   :  { %2357 = vrcp.f32 %v992_v33 }
 0x926   :  { %2359 = vrcp.f32 %v1089_v35 }
 0x932   :  { %v2358_v44 = vpop.eup %2357 }
 0x933   :  { %v2360_v40 = vpop.eup %2359  ;;  %v999_v45 = vmul.f32 %v2358_v44, %v997_v43 }
 0x934   :  { %v1096_v49 = vmul.f32 %v2360_v40, %v1094_v47 }
 0x990   :  { %v1002_v37 = vpop.permute.xlu0 %1001 }
 0x991   :  { %v1004_v38 = vmul.f32 %v2358_v44, %v1002_v37 }
 0x993   :  { %1006 = vrot.lane.b32.xlu0 %v1004_v38, %s2431_s16 }
 0x994   :  { %v1099_v41 = vpop.permute.xlu1 %1098 }
 0x995   :  { %v1101_v42 = vmul.f32 %v2360_v40, %v1099_v41 }
 0x997   :  { %1103 = vrot.lane.b32.xlu1 %v1101_v42, %s2431_s16 }
 0xa05   :  { %v1007_v46 = vpop.permute.xlu0 %1006 }
 0xa06   :  { %v2751_v48 = vadd.f32 %v1007_v46, %v999_v45 }
 0xa08   :  { %2361 = vtanh.f32 %v2751_v48  ;;  %v1189_v35 = vrot.slane %v2751_v48, 6 }
 0xa09   :  { %v1104_v50 = vpop.permute.xlu1 %1103 }
 0xa0a   :  { %v2754_v51 = vadd.f32 %v1104_v50, %v1096_v49 }
 0xa0c   :  { %2363 = vtanh.f32 %v2754_v51  ;;  %v1286_v38 = vrot.slane %v2754_v51, 2 }
 0xa15   :  { %v2362_v52 = vpop.eup %2361 }
 0xa16   :  { %1012 = vrot.lane.b32.xlu0 %v2362_v52, %s2432_s4 }
 0xa19   :  { %v2364_v53 = vpop.eup %2363 }
 0xa1a   :  { %1109 = vrot.lane.b32.xlu1 %v2364_v53, %s2432_s4 }
 0xa88   :  { %v1013_v54 = vpop.permute.xlu0 %1012 }
 0xa89   :  { %v1015_v55 = vmul.f32 %v2358_v44, %v1013_v54 }
 0xa8b   :  { %v2759_v56 = vpack.c.bf16 %v1015_v55, %v1015_v55 }
 0xa8c   :  { %v1110_v57 = vpop.permute.xlu1 %1109 }
 0xa8d   :  { %v1134_v58 = vrot.slane %v2759_v56, 3  ;;  %v1112_v59 = vmul.f32 %v2360_v40, %v1110_v57 }
 0xa8f   :  { %v2762_v60 = vpack.c.bf16 %v1112_v59, %v1112_v59  ;;  %1135 = vrot.lane.b32.xlu0 %v1134_v58, %s2431_s16 }
 0xa91   :  { %1229 = vrot.lane.b32.xlu1 %v2762_v60, %s2431_s16 }
 0xb01   :  { %v1136_v61 = vpop.permute.xlu0 %1135 }
 0xb02   :  { %2214 = vmatmul.mubr.msk.bf16.vlgmr.msra.gmra.mxu0 %vm338_vm2, %v1136_v61 }
 0xb03   :  { %v1230_v62 = vpop.permute.xlu1 %1229  ;;  %2226 = vmatpush3.bf16.msra.mxu0 %v2571_v20  ;;  %2229 = vmatprep.mubr.msk.bf16.mxu0 %vm2430_vm1, %v2429_v0 }
 0xb04   :  { %2222 = vmatmul.mubr.msk.bf16.vlgmr.msra.gmra.mxu1 %vm338_vm2, %v1230_v62  ;;  %2227 = vmatprep.subr.bf16.mxu0 %v2429_v0 }
 0xb05   :  { %2234 = vmatpush3.bf16.msra.mxu1 %v2577_v21  ;;  %2237 = vmatprep.mubr.msk.bf16.mxu1 %vm2430_vm1, %v2429_v0 }
 0xb06   :  { %2235 = vmatprep.subr.bf16.mxu1 %v2429_v0 }
 0xb07   :  { %2228 = vmatpush3.bf16.msra.mxu0 %v2584_v22 }
 0xb08   :  { %2241 = vmatprep.subr.bf16.mxu0 %v2429_v0 }
 0xb09   :  { %2236 = vmatpush3.bf16.msra.mxu1 %v2591_v24 }
 0xb0a   :  { %2249 = vmatprep.subr.bf16.mxu1 %v2429_v0 }
 0xbc2   :  { %v1174_v63 = vpop.f32.mrf.mxu0 }
 0xbc3   :  { %v1180_v2 = vadd.f32 %v1174_v63, %v2624_v36 }
 0xbc4   :  { %v2215_v3 = vpop.f32.mrf.mxu0  ;;  %v1268_v4 = vpop.f32.mrf.mxu1 }
 0xbc5   :  { %2365 = vtanh.f32 %v1180_v2  ;;  %v1275_v6 = vrot.slane %v1268_v4, 2  ;;  %v2017_v17 = vmul.f32 -1.442695, %v1180_v2 }
 0xbc6   :  { %v1177_v7 = vpop.f32.mrf.mxu0  ;;  %v2223_v9 = vpop.f32.mrf.mxu1 }
 0xbc7   :  { %v1277_v10 = vadd.f32 %v1275_v6, %v2619_v31 }
 0xbc8   :  { %v2216_v11 = vpop.f32.mrf.mxu0  ;;  %v1271_v13 = vpop.f32.mrf.mxu1 }
 0xbc9   :  { %2367 = vtanh.f32 %v1277_v10  ;;  %v2020_v19 = vmul.f32 -1.442695, %v1277_v10 }
 0xbca   :  { %v2224_v14 = vpop.f32.mrf.mxu1  ;;  %2369 = vpow2.f32 %v2017_v17 }
 0xbcb   :  { %2371 = vpow2.f32 %v2020_v19 }
 0xbd2   :  { %v2366_v15 = vpop.eup %2365 }
 0xbd3   :  { %1193 = vrot.lane.b32.xlu0 %v2366_v15, %s2432_s4 }
 0xbd6   :  { %v2368_v16 = vpop.eup %2367 }
 0xbd7   :  { %1290 = vrot.lane.b32.xlu1 %v2368_v16, %s2432_s4  ;;  %v2370_v23 = vpop.eup %2369 }
 0xbd8   :  { %v1184_v26 = vadd.f32 1.0, %v2370_v23  ;;  %v2372_v27 = vpop.eup %2371 }
 0xbd9   :  { %v1281_v28 = vadd.f32 1.0, %v2372_v27 }
 0xbda   :  { %2373 = vrcp.f32 %v1184_v26 }
 0xbdb   :  { %2375 = vrcp.f32 %v1281_v28 }
 0xbe7   :  { %v2374_v29 = vpop.eup %2373 }
 0xbe8   :  { %v2376_v39 = vpop.eup %2375  ;;  %v1191_v44 = vmul.f32 %v2374_v29, %v1189_v35 }
 0xbe9   :  { %v1288_v41 = vmul.f32 %v2376_v39, %v1286_v38 }
 0xc45   :  { %v1194_v30 = vpop.permute.xlu0 %1193 }
 0xc46   :  { %v1196_v32 = vmul.f32 %v2374_v29, %v1194_v30 }
 0xc48   :  { %1198 = vrot.lane.b32.xlu0 %v1196_v32, %s2431_s16 }
 0xc49   :  { %v1291_v33 = vpop.permute.xlu1 %1290 }
 0xc4a   :  { %v1293_v34 = vmul.f32 %v2376_v39, %v1291_v33 }
 0xc4c   :  { %1295 = vrot.lane.b32.xlu1 %v1293_v34, %s2431_s16 }
 0xcba   :  { %v1199_v37 = vpop.permute.xlu0 %1198 }
 0xcbb   :  { %v2789_v40 = vadd.f32 %v1199_v37, %v1191_v44 }
 0xcbd   :  { %2377 = vtanh.f32 %v2789_v40  ;;  %v1385_v32 = vrot.slane %v2789_v40, 6 }
 0xcbe   :  { %v1296_v42 = vpop.permute.xlu1 %1295 }
 0xcbf   :  { %v2792_v43 = vadd.f32 %v1296_v42, %v1288_v41 }
 0xcc1   :  { %2379 = vtanh.f32 %v2792_v43  ;;  %v1484_v35 = vrot.slane %v2792_v43, 2 }
 0xcca   :  { %v2378_v45 = vpop.eup %2377 }
 0xccb   :  { %1204 = vrot.lane.b32.xlu0 %v2378_v45, %s2432_s4 }
 0xcce   :  { %v2380_v46 = vpop.eup %2379 }
 0xccf   :  { %1301 = vrot.lane.b32.xlu1 %v2380_v46, %s2432_s4 }
 0xd3d   :  { %v1205_v47 = vpop.permute.xlu0 %1204 }
 0xd3e   :  { %v1207_v48 = vmul.f32 %v2374_v29, %v1205_v47 }
 0xd40   :  { %v2797_v49 = vpack.c.bf16 %v1207_v48, %v1207_v48 }
 0xd41   :  { %v1302_v50 = vpop.permute.xlu1 %1301 }
 0xd42   :  { %v1304_v51 = vmul.f32 %v2376_v39, %v1302_v50  ;;  %1328 = vrot.lane.b32.xlu0 %v2797_v49, %s2431_s16 }
 0xd44   :  { %v2801_v52 = vpack.c.bf16 %v1304_v51, %v1304_v51 }
 0xd46   :  { %v1426_v53 = vrot.slane %v2801_v52, 3 }
 0xd48   :  { %1427 = vrot.lane.b32.xlu1 %v1426_v53, %s2431_s16 }
 0xdb4   :  { %v1329_v54 = vpop.permute.xlu0 %1328 }
 0xdb5   :  { %2230 = vmatmul.mubr.msk.bf16.vlgmr.msra.gmra.mxu0 %vm338_vm2, %v1329_v54 }
 0xdb6   :  { %2242 = vmatpush3.bf16.msra.mxu0 %v2571_v20  ;;  %2245 = vmatprep.mubr.msk.bf16.mxu0 %vm2430_vm1, %v2429_v0 }
 0xdb7   :  { %2243 = vmatprep.subr.bf16.mxu0 %v2429_v0 }
 0xdba   :  { %v1428_v55 = vpop.permute.xlu1 %1427  ;;  %2244 = vmatpush3.bf16.msra.mxu0 %v2584_v22 }
 0xdbb   :  { %2238 = vmatmul.mubr.msk.bf16.vlgmr.msra.gmra.mxu1 %vm338_vm2, %v1428_v55  ;;  %2257 = vmatprep.subr.bf16.mxu0 %v2429_v0 }
 0xdbc   :  { %2250 = vmatpush3.bf16.msra.mxu1 %v2577_v21  ;;  %2253 = vmatprep.mubr.msk.bf16.mxu1 %vm2430_vm1, %v2429_v0 }
 0xdbd   :  { %2251 = vmatprep.subr.bf16.mxu1 %v2429_v0 }
 0xdc0   :  { %2252 = vmatpush3.bf16.msra.mxu1 %v2591_v24 }
 0xdc1   :  { %2265 = vmatprep.subr.bf16.mxu1 %v2429_v0 }
 0xe75   :  { %v1367_v57 = vpop.f32.mrf.mxu0 }
 0xe76   :  { %v1374_v58 = vrot.slane %v1367_v57, 6 }
 0xe77   :  { %v2231_v59 = vpop.f32.mrf.mxu0 }
 0xe78   :  { %v1376_v61 = vadd.f32 %v1374_v58, %v2624_v36 }
 0xe79   :  { %v1370_v62 = vpop.f32.mrf.mxu0 }
 0xe7a   :  { %2381 = vtanh.f32 %v1376_v61  ;;  %v2023_v13 = vmul.f32 -1.442695, %v1376_v61 }
 0xe7b   :  { %v2232_v63 = vpop.f32.mrf.mxu0  ;;  %v1466_v2 = vpop.f32.mrf.mxu1 }
 0xe7c   :  { %v1473_v3 = vrot.slane %v1466_v2, 4 }
 0xe7d   :  { %v2239_v4 = vpop.f32.mrf.mxu1 }
 0xe7e   :  { %v1475_v6 = vadd.f32 %v1473_v3, %v2619_v31 }
 0xe7f   :  { %v1469_v7 = vpop.f32.mrf.mxu1 }
 0xe80   :  { %2383 = vtanh.f32 %v1475_v6  ;;  %v2026_v14 = vmul.f32 -1.442695, %v1475_v6 }
 0xe81   :  { %v2240_v9 = vpop.f32.mrf.mxu1  ;;  %2385 = vpow2.f32 %v2023_v13 }
 0xe82   :  { %2387 = vpow2.f32 %v2026_v14 }
 0xe87   :  { %v2382_v10 = vpop.eup %2381 }
 0xe88   :  { %1389 = vrot.lane.b32.xlu0 %v2382_v10, %s2432_s4 }
 0xe8d   :  { %v2384_v11 = vpop.eup %2383 }
 0xe8e   :  { %1488 = vrot.lane.b32.xlu1 %v2384_v11, %s2432_s4  ;;  %v2386_v15 = vpop.eup %2385 }
 0xe8f   :  { %v1380_v16 = vadd.f32 1.0, %v2386_v15  ;;  %v2388_v17 = vpop.eup %2387 }
 0xe90   :  { %v1479_v19 = vadd.f32 1.0, %v2388_v17 }
 0xe91   :  { %2389 = vrcp.f32 %v1380_v16 }
 0xe92   :  { %2391 = vrcp.f32 %v1479_v19 }
 0xe9e   :  { %v2390_v23 = vpop.eup %2389 }
 0xe9f   :  { %v2392_v28 = vpop.eup %2391  ;;  %v1387_v39 = vmul.f32 %v2390_v23, %v1385_v32 }
 0xea0   :  { %v1486_v44 = vmul.f32 %v2392_v28, %v1484_v35 }
 0xefa   :  { %v1390_v26 = vpop.permute.xlu0 %1389 }
 0xefb   :  { %v1392_v27 = vmul.f32 %v2390_v23, %v1390_v26 }
 0xefd   :  { %1394 = vrot.lane.b32.xlu0 %v1392_v27, %s2431_s16 }
 0xf00   :  { %v1489_v29 = vpop.permute.xlu1 %1488 }
 0xf01   :  { %v1491_v30 = vmul.f32 %v2392_v28, %v1489_v29 }
 0xf03   :  { %1493 = vrot.lane.b32.xlu1 %v1491_v30, %s2431_s16 }
 0xf6f   :  { %v1395_v33 = vpop.permute.xlu0 %1394 }
 0xf70   :  { %v2826_v34 = vadd.f32 %v1395_v33, %v1387_v39 }
 0xf72   :  { %2393 = vtanh.f32 %v2826_v34 }
 0xf75   :  { %v1494_v37 = vpop.permute.xlu1 %1493 }
 0xf76   :  { %v2830_v38 = vadd.f32 %v1494_v37, %v1486_v44 }
 0xf78   :  { %2395 = vtanh.f32 %v2830_v38  ;;  %v1682_v29 = vrot.slane %v2830_v38, 2 }
 0xf7f   :  { %v2394_v41 = vpop.eup %2393 }
 0xf80   :  { %1400 = vrot.lane.b32.xlu0 %v2394_v41, %s2432_s4 }
 0xf85   :  { %v2396_v42 = vpop.eup %2395 }
 0xf86   :  { %1499 = vrot.lane.b32.xlu1 %v2396_v42, %s2432_s4 }
 0xff2   :  { %v1401_v40 = vpop.permute.xlu0 %1400 }
 0xff3   :  { %v1403_v45 = vmul.f32 %v2390_v23, %v1401_v40  ;;  %v1583_v23 = vrot.slane %v2826_v34, 6 }
 0xff5   :  { %v2835_v46 = vpack.c.bf16 %v1403_v45, %v1403_v45 }
 0xff7   :  { %v1525_v43 = vrot.slane %v2835_v46, 1 }
 0xff8   :  { %v1500_v47 = vpop.permute.xlu1 %1499 }
 0xff9   :  { %v1502_v48 = vmul.f32 %v2392_v28, %v1500_v47  ;;  %1526 = vrot.lane.b32.xlu0 %v1525_v43, %s2431_s16 }
 0xffb   :  { %v2839_v50 = vpack.c.bf16 %v1502_v48, %v1502_v48 }
 0xffd   :  { %v1624_v51 = vrot.slane %v2839_v50, 2 }
 0xfff   :  { %1625 = vrot.lane.b32.xlu1 %v1624_v51, %s2431_s16 }
0x106b   :  { %v1527_v53 = vpop.permute.xlu0 %1526 }
0x106c   :  { %2246 = vmatmul.mubr.msk.bf16.vlgmr.msra.gmra.mxu0 %vm338_vm2, %v1527_v53 }
0x106d   :  { %2258 = vmatpush3.bf16.msra.mxu0 %v2571_v20  ;;  %2261 = vmatprep.mubr.msk.bf16.mxu0 %vm2430_vm1, %v2429_v0 }
0x106e   :  { %2259 = vmatprep.subr.bf16.mxu0 %v2429_v0 }
0x1071   :  { %v1626_v54 = vpop.permute.xlu1 %1625  ;;  %2260 = vmatpush3.bf16.msra.mxu0 %v2584_v22 }
0x1072   :  { %2254 = vmatmul.mubr.msk.bf16.vlgmr.msra.gmra.mxu1 %vm338_vm2, %v1626_v54 }
0x1073   :  { %2266 = vmatpush3.bf16.msra.mxu1 %v2577_v21  ;;  %2269 = vmatprep.mubr.msk.bf16.mxu1 %vm2430_vm1, %v2429_v0 }
0x1074   :  { %2267 = vmatprep.subr.bf16.mxu1 %v2429_v0 }
0x1077   :  { %2268 = vmatpush3.bf16.msra.mxu1 %v2591_v24 }
0x112c   :  { %v1565_v20 = vpop.f32.mrf.mxu0 }
0x112d   :  { %v1572_v55 = vrot.slane %v1565_v20, 4 }
0x112e   :  { %v2247_v57 = vpop.f32.mrf.mxu0 }
0x112f   :  { %v1574_v58 = vadd.f32 %v1572_v55, %v2624_v36 }
0x1130   :  { %v1568_v59 = vpop.f32.mrf.mxu0 }
0x1131   :  { %2397 = vtanh.f32 %v1574_v58  ;;  %v2029_v24 = vmul.f32 -1.442695, %v1574_v58 }
0x1132   :  { %v2248_v61 = vpop.f32.mrf.mxu0  ;;  %v1664_v22 = vpop.f32.mrf.mxu1 }
0x1133   :  { %v1671_v62 = vrot.slane %v1664_v22, 6 }
0x1134   :  { %v2255_v63 = vpop.f32.mrf.mxu1 }
0x1135   :  { %v1673_v21 = vadd.f32 %v1671_v62, %v2619_v31 }
0x1136   :  { %v1667_v2 = vpop.f32.mrf.mxu1 }
0x1137   :  { %2399 = vtanh.f32 %v1673_v21  ;;  %v2032_v6 = vmul.f32 -1.442695, %v1673_v21 }
0x1138   :  { %v2256_v3 = vpop.f32.mrf.mxu1  ;;  %2401 = vpow2.f32 %v2029_v24 }
0x1139   :  { %2403 = vpow2.f32 %v2032_v6 }
0x113e   :  { %v2398_v4 = vpop.eup %2397 }
0x113f   :  { %1587 = vrot.lane.b32.xlu0 %v2398_v4, %s2432_s4 }
0x1144   :  { %v2400_v0 = vpop.eup %2399 }
0x1145   :  { %1686 = vrot.lane.b32.xlu1 %v2400_v0, %s2432_s4  ;;  %v2402_v7 = vpop.eup %2401 }
0x1146   :  { %v1578_v9 = vadd.f32 1.0, %v2402_v7  ;;  %v2404_v10 = vpop.eup %2403 }
0x1147   :  { %v1677_v11 = vadd.f32 1.0, %v2404_v10 }
0x1148   :  { %2405 = vrcp.f32 %v1578_v9 }
0x1149   :  { %2407 = vrcp.f32 %v1677_v11 }
0x1155   :  { %v2406_v13 = vpop.eup %2405 }
0x1156   :  { %v2408_v16 = vpop.eup %2407  ;;  %v1585_v26 = vmul.f32 %v2406_v13, %v1583_v23 }
0x1157   :  { %v1684_v30 = vmul.f32 %v2408_v16, %v1682_v29 }
0x11b1   :  { %v1588_v14 = vpop.permute.xlu0 %1587 }
0x11b2   :  { %v1590_v15 = vmul.f32 %v2406_v13, %v1588_v14  ;;  %v2433_v14 = vmov 1966171168  }
0x11b4   :  { %1592 = vrot.lane.b32.xlu0 %v1590_v15, %s2431_s16  ;;  %v414_v15 = vunpack.c.l.s4 %v2433_v14 }
0x11b7   :  { %v1687_v17 = vpop.permute.xlu1 %1686 }
0x11b8   :  { %v1689_v19 = vmul.f32 %v2408_v16, %v1687_v17 }
0x11ba   :  { %1691 = vrot.lane.b32.xlu1 %v1689_v19, %s2431_s16 }
0x1226   :  { %v1593_v27 = vpop.permute.xlu0 %1592 }
0x1227   :  { %v1595_v28 = vadd.f32 %v1593_v27, %v1585_v26  ;;  %v415_v27 = vunpack.c.0.s8 %v414_v15 }
0x1229   :  { %2409 = vtanh.f32 %v1595_v28  ;;  %v1781_v11 = vrot.slane %v1595_v28, 6 }
0x122c   :  { %v1692_v32 = vpop.permute.xlu1 %1691 }
0x122d   :  { %v2863_v39 = vadd.f32 %v1692_v32, %v1684_v30 }
0x122f   :  { %2411 = vtanh.f32 %v2863_v39  ;;  %v1878_v19 = vrot.slane %v2863_v39, 2 }
0x1236   :  { %v2410_v33 = vpop.eup %2409 }
0x1237   :  { %1598 = vrot.lane.b32.xlu0 %v2410_v33, %s2432_s4 }
0x123c   :  { %v2412_v35 = vpop.eup %2411 }
0x123d   :  { %1697 = vrot.lane.b32.xlu1 %v2412_v35, %s2432_s4 }
0x12a9   :  { %v1599_v44 = vpop.permute.xlu0 %1598 }
0x12aa   :  { %v1601_v34 = vmul.f32 %v2406_v13, %v1599_v44 }
0x12ac   :  { %v2868_v37 = vpack.c.bf16 %v1601_v34, %v1601_v34 }
0x12ae   :  { %v1723_v41 = vrot.slane %v2868_v37, 2 }
0x12af   :  { %v1698_v38 = vpop.permute.xlu1 %1697 }
0x12b0   :  { %v1700_v42 = vmul.f32 %v2408_v16, %v1698_v38  ;;  %1724 = vrot.lane.b32.xlu0 %v1723_v41, %s2431_s16  ;;  %v416_v16 = vlaneseq }
0x12b2   :  { %v2872_v40 = vpack.c.bf16 %v1700_v42, %v1700_v42  ;;  %v417_v29 = vshrl.u32 %v416_v16, 7 }
0x12b4   :  { %v1823_v45 = vrot.slane %v2872_v40, 1  ;;  %v2899_v28 = vsub.s32 %v415_v27, %v417_v29 }
0x12b6   :  { %1824 = vrot.lane.b32.xlu1 %v1823_v45, %s2431_s16  ;;  %v529_v33 = vrot.slane %v2649_v25, %v2899_v28  ;;  %v628_v39 = vrot.slane %v2683_v8, %v2899_v28  ;;  %v419_v44 = vrot.slane %v2645_v18, %v2899_v28  ;;  %v727_v42 = vrot.slane %v2687_v12, %v2899_v28 }
0x12b7   :  { %v826_v45 = vrot.slane %v2721_v1, %v2899_v28  ;;  %v1024_v25 = vrot.slane %v2759_v56, %v2899_v28  ;;  %v1313_v56 = vrot.slane %v2801_v52, %v2899_v28 }
0x12b8   :  { %v530_v35 = vcombine.high %v529_v33, %v529_v33  ;;  %v629_v41 = vcombine.high %v628_v39, %v628_v39  ;;  %v426_v8 = vrot.slane %v419_v44, %v2899_v28 }
0x12b9   :  { %v1025_v12 = vcombine.high %v1024_v25, %v1024_v25  ;;  %v833_v1 = vrot.slane %v826_v45, %v2899_v28 }
0x12ba   :  { %v537_v38 = vrot.slane %v530_v35, %v2899_v28 }
0x12bc   :  { %v538_v18 = vcombine.high %v537_v38, %v537_v38 }
0x1322   :  { %v1725_v43 = vpop.permute.xlu0 %1724 }
0x1323   :  { %2262 = vmatmul.mubr.msk.bf16.vlgmr.msra.gmra.mxu0 %vm338_vm2, %v1725_v43 }
0x1328   :  { %v1825_v47 = vpop.permute.xlu1 %1824 }
0x1329   :  { %2270 = vmatmul.mubr.msk.bf16.vlgmr.msra.gmra.mxu1 %vm338_vm2, %v1825_v47  ;;  %v636_v47 = vrot.slane %v629_v41, %v2899_v28 }
0x13e3   :  { %v1763_v48 = vpop.f32.mrf.mxu0 }
0x13e4   :  { %v1770_v51 = vrot.slane %v1763_v48, 2  ;;  %v925_v48 = vrot.slane %v2725_v5, %v2899_v28  ;;  %v1121_v5 = vrot.slane %v2762_v60, %v2899_v28  ;;  %v1511_v60 = vrot.slane %v2839_v50, %v2899_v28 }
0x13e5   :  { %v2263_v53 = vpop.f32.mrf.mxu0 }
0x13e6   :  { %v1772_v54 = vadd.f32 %v1770_v51, %v2624_v36  ;;  %v734_v51 = vrot.slane %v727_v42, %v2899_v28  ;;  %v926_v53 = vcombine.high %v925_v48, %v925_v48 }
0x13e7   :  { %v1766_v20 = vpop.f32.mrf.mxu0 }
0x13e8   :  { %2413 = vtanh.f32 %v1772_v54  ;;  %v2035_v21 = vmul.f32 -1.442695, %v1772_v54  ;;  %v735_v54 = vcombine.high %v734_v51, %v734_v51  ;;  %v834_v20 = vcombine.high %v833_v1, %v833_v1 }
0x13e9   :  { %v2264_v55 = vpop.f32.mrf.mxu0  ;;  %v1863_v57 = vpop.f32.mrf.mxu1  ;;  %v933_v52 = vrot.slane %v926_v53, %v2899_v28 }
0x13ea   :  { %v1869_v58 = vadd.f32 %v1863_v57, %v2619_v31  ;;  %v1032_v55 = vrot.slane %v1025_v12, %v2899_v28  ;;  %v1314_v57 = vcombine.high %v1313_v56, %v1313_v56 }
0x13eb   :  { %v2271_v59 = vpop.f32.mrf.mxu1 }
0x13ec   :  { %2415 = vtanh.f32 %v1869_v58  ;;  %v2038_v2 = vmul.f32 -1.442695, %v1869_v58  ;;  %v1216_v58 = vrot.slane %v2797_v49, %v2899_v28  ;;  %v1412_v59 = vrot.slane %v2835_v46, %v2899_v28 }
0x13ed   :  { %v1866_v61 = vpop.f32.mrf.mxu1  ;;  %2417 = vpow2.f32 %v2035_v21  ;;  %v1610_v49 = vrot.slane %v2868_v37, %v2899_v28 }
0x13ee   :  { %2419 = vpow2.f32 %v2038_v2  ;;  %v1033_v61 = vcombine.high %v1032_v55, %v1032_v55  ;;  %v1223_v46 = vrot.slane %v1216_v58, %v2899_v28  ;;  %v1709_v2 = vrot.slane %v2872_v40, %v2899_v28 }
0x13ef   :  { %v2272_v22 = vpop.f32.mrf.mxu1 }
0x13f0   :  { %v1128_v22 = vrot.slane %v1121_v5, %v2899_v28  ;;  %v1710_v50 = vcombine.high %v1709_v2, %v1709_v2 }
0x13f5   :  { %v2414_v62 = vpop.eup %2413 }
0x13f6   :  { %1785 = vrot.lane.b32.xlu0 %v2414_v62, %s2432_s4  ;;  %v1321_v62 = vrot.slane %v1314_v57, %v2899_v28 }
0x13f8   :  { %v1322_v21 = vcombine.high %v1321_v62, %v1321_v62 }
0x13f9   :  { %v2416_v63 = vpop.eup %2415 }
0x13fa   :  { %1882 = vrot.lane.b32.xlu1 %v2416_v63, %s2432_s4  ;;  %v2418_v36 = vpop.eup %2417  ;;  %v1413_v63 = vcombine.high %v1412_v59, %v1412_v59 }
0x13fb   :  { %v1776_v3 = vadd.f32 1.0, %v2418_v36  ;;  %v2420_v4 = vpop.eup %2419 }
0x13fc   :  { %v1873_v0 = vadd.f32 1.0, %v2420_v4  ;;  %v1420_v36 = vrot.slane %v1413_v63, %v2899_v28  ;;  %v1617_v4 = vrot.slane %v1610_v49, %v2899_v28 }
0x13fd   :  { %2421 = vrcp.f32 %v1776_v3  ;;  %v1518_v3 = vrot.slane %v1511_v60, %v2899_v28 }
0x13fe   :  { %2423 = vrcp.f32 %v1873_v0  ;;  %v1618_v0 = vcombine.high %v1617_v4, %v1617_v4 }
0x13ff   :  { %v1519_v37 = vcombine.high %v1518_v3, %v1518_v3 }
0x140a   :  { %v2882_v31 = vpop.eup %2421 }
0x140b   :  { %v2886_v7 = vpop.eup %2423  ;;  %v1783_v13 = vmul.f32 %v2882_v31, %v1781_v11 }
0x140c   :  { %v1880_v26 = vmul.f32 %v2886_v7, %v1878_v19 }
0x1468   :  { %v1786_v24 = vpop.permute.xlu0 %1785 }
0x1469   :  { %v1788_v6 = vmul.f32 %v2882_v31, %v1786_v24  ;;  %v1717_v24 = vrot.slane %v1710_v50, %v2899_v28 }
0x146b   :  { %1790 = vrot.lane.b32.xlu0 %v1788_v6, %s2431_s16 }
0x146c   :  { %v1883_v9 = vpop.permute.xlu1 %1882 }
0x146d   :  { %v1885_v10 = vmul.f32 %v2886_v7, %v1883_v9 }
0x146f   :  { %1887 = vrot.lane.b32.xlu1 %v1885_v10, %s2431_s16 }
0x14dd   :  { %v1791_v17 = vpop.permute.xlu0 %1790 }
0x14de   :  { %v2892_v23 = vadd.f32 %v1791_v17, %v1783_v13 }
0x14e0   :  { %2425 = vtanh.f32 %v2892_v23 }
0x14e1   :  { %v1888_v30 = vpop.permute.xlu1 %1887 }
0x14e2   :  { %v2896_v32 = vadd.f32 %v1888_v30, %v1880_v26 }
0x14e4   :  { %2427 = vtanh.f32 %v2896_v32 }
0x14ed   :  { %v2426_v34 = vpop.eup %2425 }
0x14ee   :  { %1796 = vrot.lane.b32.xlu0 %v2426_v34, %s2432_s4 }
0x14f1   :  { %v2428_v43 = vpop.eup %2427 }
0x14f2   :  { %1893 = vrot.lane.b32.xlu1 %v2428_v43, %s2432_s4  ;;  %427 = vrot.lane.b32.xlu0 %v426_v8, %s2431_s16 }
0x14f6   :  { %539 = vrot.lane.b32.xlu1 %v538_v18, %s2431_s16  ;;  %637 = vrot.lane.b32.xlu0 %v636_v47, %s2431_s16 }
0x14fa   :  { %736 = vrot.lane.b32.xlu1 %v735_v54, %s2431_s16  ;;  %835 = vrot.lane.b32.xlu0 %v834_v20, %s2431_s16 }
0x14fe   :  { %934 = vrot.lane.b32.xlu1 %v933_v52, %s2431_s16  ;;  %1034 = vrot.lane.b32.xlu0 %v1033_v61, %s2431_s16 }
0x1502   :  { %1129 = vrot.lane.b32.xlu1 %v1128_v22, %s2431_s16  ;;  %1224 = vrot.lane.b32.xlu0 %v1223_v46, %s2431_s16 }
0x1506   :  { %1323 = vrot.lane.b32.xlu1 %v1322_v21, %s2431_s16  ;;  %1421 = vrot.lane.b32.xlu0 %v1420_v36, %s2431_s16 }
0x150a   :  { %1520 = vrot.lane.b32.xlu1 %v1519_v37, %s2431_s16  ;;  %1619 = vrot.lane.b32.xlu0 %v1618_v0, %s2431_s16 }
0x150e   :  { %1718 = vrot.lane.b32.xlu1 %v1717_v24, %s2431_s16 }
0x1512   :  { %1924 = vrot.lane.b32.xlu1 %v2892_v23, %s2434_s5 }
0x1560   :  { %v1797_v40 = vpop.permute.xlu0 %1796 }
0x1561   :  { %v1799_v6 = vmul.f32 %v2882_v31, %v1797_v40 }
0x1563   :  { %v1800_v9 = vpack.c.bf16 %v1799_v6, %v1799_v6  ;;  %1918 = vrot.lane.b32.xlu0 %v1799_v6, %s2431_s16 }
0x1564   :  { %v1894_v10 = vpop.permute.xlu1 %1893  ;;  %v428_v11 = vpop.permute.xlu0 %427 }
0x1565   :  { %v1808_v13 = vrot.slane %v1800_v9, %v2899_v28  ;;  %v1896_v14 = vmul.f32 %v2886_v7, %v1894_v10  ;;  %431 = vst.msk [vmem:[%s3047_s8] sm:$0x1] %vm430_vm3, %v428_v11 }
0x1567   :  { %v1809_v15 = vcombine.high %v1808_v13, %v1808_v13  ;;  %v1897_v16 = vpack.c.bf16 %v1896_v14, %v1896_v14 }
0x1568   :  { %v540_v17 = vpop.permute.xlu1 %539  ;;  %v638_v19 = vpop.permute.xlu0 %637 }
0x1569   :  { %v1905_v31 = vrot.slane %v1897_v16, %v2899_v28  ;;  %1997 = vst.msk [vmem:[%s3048_s9 + $0x7] sm:$0x1] %vm430_vm3, %v540_v17  ;;  %2000 = vst.msk [vmem:[%s3047_s8 + $0x1] sm:$0x1] %vm430_vm3, %v638_v19  ;;  %v1816_v7 = vrot.slane %v1809_v15, %v2899_v28 }
0x156b   :  { %v1912_v23 = vrot.slane %v1905_v31, %v2899_v28  ;;  %v1817_v26 = vcombine.high %v1816_v7, %v1816_v7 }
0x156c   :  { %v737_v27 = vpop.permute.xlu1 %736  ;;  %v836_v29 = vpop.permute.xlu0 %835 }
0x156d   :  { %2003 = vst.msk [vmem:[%s3048_s9 + $0x6] sm:$0x1] %vm430_vm3, %v737_v27  ;;  %2006 = vst.msk [vmem:[%s3047_s8 + $0x2] sm:$0x1] %vm430_vm3, %v836_v29  ;;  %1913 = vrot.lane.b32.xlu1 %v1912_v23, %s2431_s16  ;;  %1818 = vrot.lane.b32.xlu0 %v1817_v26, %s2431_s16 }
0x1570   :  { %v935_v30 = vpop.permute.xlu1 %934  ;;  %v1035_v33 = vpop.permute.xlu0 %1034 }
0x1571   :  { %2009 = vst.msk [vmem:[%s3048_s9 + $0x5] sm:$0x1] %vm430_vm3, %v935_v30  ;;  %2012 = vst.msk [vmem:[%s3047_s8 + $0x3] sm:$0x1] %vm430_vm3, %v1035_v33  ;;  %1935 = vrot.lane.b32.xlu1 %v2896_v32, %s2434_s5  ;;  %1929 = vrot.lane.b32.xlu0 %v1896_v14, %s2431_s16 }
0x1574   :  { %v1130_v28 = vpop.permute.xlu1 %1129  ;;  %v1225_v35 = vpop.permute.xlu0 %1224 }
0x1575   :  { %2015 = vst.msk [vmem:[%s3048_s9 + $0x4] sm:$0x1] %vm430_vm3, %v1130_v28  ;;  %2018 = vst.msk [vmem:[%s3047_s8 + $0x4] sm:$0x1] %vm430_vm3, %v1225_v35 }
0x1578   :  { %v1324_v39 = vpop.permute.xlu1 %1323  ;;  %v1422_v44 = vpop.permute.xlu0 %1421 }
0x1579   :  { %2021 = vst.msk [vmem:[%s3048_s9 + $0x3] sm:$0x1] %vm430_vm3, %v1324_v39  ;;  %2024 = vst.msk [vmem:[%s3047_s8 + $0x5] sm:$0x1] %vm430_vm3, %v1422_v44 }
0x157c   :  { %v1521_v32 = vpop.permute.xlu1 %1520  ;;  %v1620_v34 = vpop.permute.xlu0 %1619 }
0x157d   :  { %2027 = vst.msk [vmem:[%s3048_s9 + $0x2] sm:$0x1] %vm430_vm3, %v1521_v32  ;;  %2030 = vst.msk [vmem:[%s3047_s8 + $0x6] sm:$0x1] %vm430_vm3, %v1620_v34 }
0x1580   :  { %v1719_v41 = vpop.permute.xlu1 %1718 }
0x1581   :  { %2033 = vst.msk [vmem:[%s3048_s9 + $0x1] sm:$0x1] %vm430_vm3, %v1719_v41 }
0x1584   :  { %v1925_v38 = vpop.permute.xlu1 %1924 }
0x1585   :  { %1927 = vst.msk [vmem:[#allocation3 - $0x6] sm:$0xc0] %vm1921_vm4, %v1925_v38 }
0x15d5   :  { %v1919_v42 = vpop.permute.xlu0 %1918 }
0x15d6   :  { %1922 = vst.msk [vmem:[#allocation2 - $0x6] sm:$0xc0] %vm1921_vm4, %v1919_v42 }
0x15df   :  { %v1914_v45 = vpop.permute.xlu1 %1913  ;;  %v1819_v25 = vpop.permute.xlu0 %1818 }
0x15e0   :  { %1916 = vst.msk [vmem:[%s3048_s9] sm:$0x1] %vm430_vm3, %v1914_v45  ;;  %2036 = vst.msk [vmem:[%s3047_s8 + $0x7] sm:$0x1] %vm430_vm3, %v1819_v25 }
0x15e3   :  { %v1936_v8 = vpop.permute.xlu1 %1935  ;;  %v1930_v43 = vpop.permute.xlu0 %1929 }
0x15e4   :  { %1938 = vst.msk [vmem:[#allocation5] sm:$0x3] %vm68_vm0, %v1936_v8  ;;  %1933 = vst.msk [vmem:[#allocation4] sm:$0x3] %vm68_vm0, %v1930_v43 }

// kernel: listener_pre_trainer_forward.11
= control target key start
LH: loop header
LB: loop body
LE: loop exit
PB: predicated region body
PF: predicated region fallthrough
CT: control target
= control target key end

     0   :  { %v134_v0 = vmov 0.0   ;;  %vm135_vm0 = vmmov 0   ;;  %vm55_vm1 = vcmask 523264   ;;  %s177_s1 = inlined_call_operand.vmem [shape: bf16[64,128], index: 1, kind: input, shape index: {}]   ;;  %s178_s0 = inlined_call_operand.vmem [shape: bf16[4,64], index: 0, kind: input, shape index: {}]   ;;  %s179_s2 = inlined_call_operand.vmem [shape: f32[1,128], index: 2, kind: input, shape index: {}]   ;;  %s180_s3 = inlined_call_operand.vmem [shape: bf16[4,128], index: 3, kind: output, shape index: {}]  }
   0x1   :  { %116 = vmatprep.subr.bf16.mxu0 %v134_v0  ;;  %v130_v1 = vld [vmem:[%s177_s1 + $0x18] sm:$0xff]   ;;  %124 = vmatprep.mubr.msk.bf16.mxu0 %vm135_vm0, %v134_v0  ;;  %v131_v2 = vld [vmem:[%s177_s1 + $0x10] sm:$0xff]   ;;  %v132_v3 = vld [vmem:[%s177_s1 + $0x8] sm:$0xff]  }
   0x2   :  { %117 = vmatpush3.bf16.msra.mxu0 %v130_v1  ;;  %v133_v4 = vld [vmem:[%s177_s1] sm:$0xff]  }
   0x3   :  { %118 = vmatprep.subr.bf16.mxu0 %v134_v0  ;;  %v15_v5 = vld [vmem:[%s178_s0] sm:$0x3] }
   0x4   :  { %v105_v6 = vld [vmem:[%s179_s2] ss:$0 sm:$0xff] }
   0x6   :  { %119 = vmatpush3.bf16.msra.mxu0 %v131_v2 }
   0x7   :  { %120 = vmatprep.subr.bf16.mxu0 %v134_v0 }
   0xa   :  { %121 = vmatpush3.bf16.msra.mxu0 %v132_v3 }
   0xb   :  { %122 = vmatprep.subr.bf16.mxu0 %v134_v0 }
   0xe   :  { %123 = vmatpush3.bf16.msra.mxu0 %v133_v4 }
  0x11   :  { %125 = vmatmul.mubr.msk.bf16.vlgmr.msra.gmra.mxu0 %vm55_vm1, %v15_v5 }
  0xd1   :  { %v93_v7 = vpop.f32.mrf.mxu0 }
  0xd2   :  { %v94_v8 = vadd.f32 %v105_v6, %v93_v7 }
  0xd3   :  { %v126_v9 = vpop.f32.mrf.mxu0 }
  0xd4   :  { %v99_v10 = vpack.c.bf16 %v94_v8, %v94_v8 }
  0xd5   :  { %v96_v11 = vpop.f32.mrf.mxu0 }
  0xd6   :  { %100 = vst [vmem:[%s180_s3] sm:$0x3] %v99_v10 }
  0xd7   :  { %v127_v12 = vpop.f32.mrf.mxu0 }

// kernel: listener_pre_trainer_forward.12
= control target key start
LH: loop header
LB: loop body
LE: loop exit
PB: predicated region body
PF: predicated region fallthrough
CT: control target
= control target key end

     0   :  { %v135_v0 = vmov 0.0   ;;  %vm136_vm0 = vmmov 0   ;;  %vm55_vm1 = vcmask 523264   ;;  %vm100_vm2 = vcmask 519168   ;;  %s178_s1 = inlined_call_operand.vmem [shape: bf16[64,64], index: 1, kind: input, shape index: {}]   ;;  %s179_s0 = inlined_call_operand.vmem [shape: bf16[8,64], index: 0, kind: input, shape index: {}]   ;;  %s180_s2 = inlined_call_operand.vmem [shape: f32[1,64], index: 2, kind: input, shape index: {}]   ;;  %s181_s3 = inlined_call_operand.vmem [shape: bf16[8,64], index: 3, kind: output, shape index: {}]  }
   0x1   :  { %117 = vmatprep.subr.bf16.mxu0 %v135_v0  ;;  %v131_v1 = vld [vmem:[%s178_s1 + $0x18] sm:$0xff]   ;;  %125 = vmatprep.mubr.msk.bf16.mxu0 %vm136_vm0, %v135_v0  ;;  %v132_v2 = vld [vmem:[%s178_s1 + $0x10] sm:$0xff]   ;;  %v133_v3 = vld [vmem:[%s178_s1 + $0x8] sm:$0xff]  }
   0x2   :  { %118 = vmatpush3.bf16.msra.mxu0 %v131_v1  ;;  %v134_v4 = vld [vmem:[%s178_s1] sm:$0xff]  }
   0x3   :  { %119 = vmatprep.subr.bf16.mxu0 %v135_v0  ;;  %v15_v5 = vld [vmem:[%s179_s0] sm:$0xf] }
   0x4   :  { %v106_v6 = vld [vmem:[%s180_s2] ss:$0 sm:$0xff] }
   0x6   :  { %120 = vmatpush3.bf16.msra.mxu0 %v132_v2 }
   0x7   :  { %121 = vmatprep.subr.bf16.mxu0 %v135_v0 }
   0xa   :  { %122 = vmatpush3.bf16.msra.mxu0 %v133_v3 }
   0xb   :  { %123 = vmatprep.subr.bf16.mxu0 %v135_v0 }
   0xe   :  { %124 = vmatpush3.bf16.msra.mxu0 %v134_v4 }
  0x11   :  { %126 = vmatmul.mubr.msk.bf16.vlgmr.msra.gmra.mxu0 %vm55_vm1, %v15_v5 }
  0xd1   :  { %v93_v7 = vpop.f32.mrf.mxu0 }
  0xd2   :  { %v94_v8 = vadd.f32 %v106_v6, %v93_v7 }
  0xd3   :  { %v127_v9 = vpop.f32.mrf.mxu0 }
  0xd4   :  { %v99_v10 = vpack.c.bf16 %v94_v8, %v94_v8 }
  0xd5   :  { %v96_v11 = vpop.f32.mrf.mxu0 }
  0xd6   :  { %101 = vst.msk [vmem:[%s181_s3] sm:$0xf] %vm100_vm2, %v99_v10 }
  0xd7   :  { %v128_v12 = vpop.f32.mrf.mxu0 }

// kernel: listener_pre_trainer_forward.7
= control target key start
LH: loop header
LB: loop body
LE: loop exit
PB: predicated region body
PF: predicated region fallthrough
CT: control target
= control target key end

     0   :  { %vm68_vm0 = vcmask 254976   ;;  %v4222_v1 = vmov 0.0   ;;  %vm102_vm1 = vcmask 130048   ;;  %vm4223_vm2 = vmmov 0   ;;  %s4224_s25 = smov 32   ;;  %s4227_s15 = smov 96   ;;  %s5244_s2 = inlined_call_operand.vmem [shape: bf16[16,128], index: 2, kind: input, shape index: {}]   ;;  %s5245_s3 = inlined_call_operand.vmem [shape: bf16[16,128], index: 3, kind: input, shape index: {}]   ;;  %s5246_s0 = inlined_call_operand.vmem [shape: bf16[1,32,16], index: 0, kind: input, shape index: {}, may-alias: {0,1}]   ;;  %s5247_s1 = inlined_call_operand.vmem [shape: bf16[1,32,16], index: 1, kind: input, shape index: {}, may-alias: {0,1}]   ;;  %s5248_s6 = inlined_call_operand.vmem [shape: bf16[32,128], index: 6, kind: input, shape index: {}]   ;;  %s5249_s7 = inlined_call_operand.vmem [shape: bf16[32,128], index: 7, kind: input, shape index: {}]   ;;  %s5250_s4 = inlined_call_operand.vmem [shape: f32[1,128], index: 4, kind: input, shape index: {}]   ;;  %s5251_s5 = inlined_call_operand.vmem [shape: f32[1,128], index: 5, kind: input, shape index: {}]   ;;  %s5252_s9 = inlined_call_operand.vmem [shape: bf16[16,2,32], index: 9, kind: output, shape index: {1}]   ;;  %s5253_s8 = inlined_call_operand.vmem [shape: bf16[16,2,32], index: 8, kind: output, shape index: {0}]  }
   0x1   :  { %v3952_v0 = vld [vmem:[%s5244_s2] sm:$0xff]   ;;  %69 = vst.msk [vmem:[#allocation2] sm:$0x3] %vm68_vm0, %v4222_v1  ;;  %70 = vst.msk [vmem:[#allocation3] sm:$0x3] %vm68_vm0, %v4222_v1  ;;  %v3956_v5 = vld [vmem:[%s5246_s0 + $0x8] sm:$0xff]  }
   0x2   :  { %71 = vst.msk [vmem:[#allocation4] sm:$0x3] %vm68_vm0, %v4222_v1  ;;  %72 = vst.msk [vmem:[#allocation5] sm:$0x3] %vm68_vm0, %v4222_v1  ;;  %v3953_v2 = vld [vmem:[%s5245_s3] sm:$0xff]   ;;  %3678 = vmatprep.subr.bf16.mxu0 %v3952_v0  ;;  %v3957_v6 = vld [vmem:[%s5247_s1 + $0x8] sm:$0xff]  }
   0x3   :  { %v3954_v3 = vld [vmem:[%s5246_s0] sm:$0xff]   ;;  %3684 = vmatprep.subr.bf16.mxu1 %v3953_v2  ;;  %3679 = vmatpush3.bf16.msra.mxu0 %v3952_v0  ;;  %v4312_v7 = vld [vmem:[%s5248_s6 + $0x8] sm:$0xff]   ;;  %vm267_vm3 = vcmask 261120   ;;  %vm359_vm4 = vcmask 253952   ;;  %vm3418_vm5 = vcmask 261126  }
   0x4   :  { %v3955_v4 = vld [vmem:[%s5247_s1] sm:$0xff]   ;;  %3685 = vmatpush3.bf16.msra.mxu1 %v3953_v2  ;;  %3680 = vmatprep.mubr.msk.bf16.mxu0 %vm102_vm1, %v3954_v3  ;;  %v4318_v8 = vld [vmem:[%s5249_s7 + $0x8] sm:$0xff]  }
   0x5   :  { %3686 = vmatprep.mubr.msk.bf16.mxu1 %vm102_vm1, %v3955_v4  ;;  %3690 = vmatprep.subr.bf16.mxu0 %v4222_v1  ;;  %v4326_v9 = vld [vmem:[%s5248_s6] sm:$0xff]  }
   0x6   :  { %3681 = vmatmul.mubr.msk.bf16.vlgmr.msra.gmra.mxu0 %vm102_vm1, %v3956_v5  ;;  %3698 = vmatprep.subr.bf16.mxu1 %v4222_v1  ;;  %v4335_v10 = vld [vmem:[%s5249_s7] sm:$0xff]  }
   0x7   :  { %3687 = vmatmul.mubr.msk.bf16.vlgmr.msra.gmra.mxu1 %vm102_vm1, %v3957_v6  ;;  %3694 = vmatprep.mubr.msk.bf16.mxu0 %vm4223_vm2, %v4222_v1  ;;  %v3466_v16 = vld [vmem:[%s5250_s4] ss:$0 sm:$0xff]  ;;  %s4225_s4 = smov 64  }
   0x8   :  { %3691 = vmatpush3.bf16.msra.mxu0 %v4312_v7  ;;  %3702 = vmatprep.mubr.msk.bf16.mxu1 %vm4223_vm2, %v4222_v1  ;;  %v250_v11 = vld [vmem:[#allocation2] sm:$0x3]  ;;  %v251_v13 = vld [vmem:[#allocation3] sm:$0x3] }
   0x9   :  { %3699 = vmatpush3.bf16.msra.mxu1 %v4318_v8  ;;  %3692 = vmatprep.subr.bf16.mxu0 %v4222_v1  ;;  %v252_v12 = vld [vmem:[#allocation4] sm:$0x3]  ;;  %v254_v14 = vpack.c.bf16 %v250_v11, %v250_v11  ;;  %v3472_v17 = vld [vmem:[%s5251_s5] ss:$0 sm:$0xff]  ;;  %v253_v46 = vld [vmem:[#allocation5] sm:$0x3] }
   0xa   :  { %3700 = vmatprep.subr.bf16.mxu1 %v4222_v1  ;;  %320 = vrot.lane.b32.xlu1 %v251_v13, %s4224_s25  ;;  %v361_v15 = vpack.c.bf16 %v252_v12, %v252_v12  ;;  %v429_v48 = vrot.slane %v253_v46, 2 }
   0xc   :  { %3693 = vmatpush3.bf16.msra.mxu0 %v4326_v9 }
   0xd   :  { %3701 = vmatpush3.bf16.msra.mxu1 %v4335_v10  ;;  %3706 = vmatprep.subr.bf16.mxu0 %v4222_v1 }
   0xe   :  { %3714 = vmatprep.subr.bf16.mxu1 %v4222_v1 }
   0xf   :  { %3695 = vmatmul.mubr.msk.bf16.vlgmr.msra.gmra.mxu0 %vm267_vm3, %v254_v14 }
  0x10   :  { %3703 = vmatmul.mubr.msk.bf16.vlgmr.msra.gmra.mxu1 %vm267_vm3, %v361_v15  ;;  %3707 = vmatpush3.bf16.msra.mxu0 %v4312_v7 }
  0x11   :  { %3708 = vmatprep.subr.bf16.mxu0 %v4222_v1  ;;  %3710 = vmatprep.mubr.msk.bf16.mxu0 %vm4223_vm2, %v4222_v1 }
  0x12   :  { %3715 = vmatpush3.bf16.msra.mxu1 %v4318_v8  ;;  %3718 = vmatprep.mubr.msk.bf16.mxu1 %vm4223_vm2, %v4222_v1 }
  0x13   :  { %3716 = vmatprep.subr.bf16.mxu1 %v4222_v1 }
  0x14   :  { %3709 = vmatpush3.bf16.msra.mxu0 %v4326_v9 }
  0x15   :  { %3722 = vmatprep.subr.bf16.mxu0 %v4222_v1 }
  0x16   :  { %3717 = vmatpush3.bf16.msra.mxu1 %v4335_v10 }
  0x17   :  { %3730 = vmatprep.subr.bf16.mxu1 %v4222_v1 }
  0x7c   :  { %v321_v61 = vpop.permute.xlu1 %320 }
  0xc6   :  { %v3682_v18 = vpop.f32.mrf.mxu0 }
  0xc7   :  { %v4363_v19 = vadd.f32 %v3682_v18, %v3466_v16  ;;  %v3688_v20 = vpop.f32.mrf.mxu1 }
  0xc8   :  { %v4365_v21 = vadd.f32 %v3688_v20, %v3472_v17  ;;  %v143_v22 = vpop.f32.mrf.mxu0 }
  0xc9   :  { %v227_v23 = vpop.f32.mrf.mxu1  ;;  %v4373_v31 = vadd.f32 %v3466_v16, %v143_v22 }
  0xca   :  { %v4367_v24 = vadd.f32 %v3472_v17, %v227_v23  ;;  %v3683_v25 = vpop.f32.mrf.mxu0 }
  0xcb   :  { %v4369_v26 = vadd.f32 %v3683_v25, %v3466_v16  ;;  %v3689_v27 = vpop.f32.mrf.mxu1 }
  0xcc   :  { %v146_v28 = vpop.f32.mrf.mxu0  ;;  %v4378_v36 = vadd.f32 %v3689_v27, %v3472_v17 }
  0xcd   :  { %v4371_v29 = vadd.f32 %v3466_v16, %v146_v28  ;;  %v230_v30 = vpop.f32.mrf.mxu1 }
  0xce   :  { %v4375_v32 = vadd.f32 %v3472_v17, %v230_v30 }
  0xcf   :  { %v305_v33 = vpop.f32.mrf.mxu0 }
  0xd0   :  { %v311_v34 = vadd.f32 %v305_v33, %v4373_v31  ;;  %v411_v35 = vpop.f32.mrf.mxu1 }
  0xd1   :  { %v418_v37 = vrot.slane %v411_v35, 2  ;;  %v3696_v38 = vpop.f32.mrf.mxu0 }
  0xd2   :  { %3962 = vtanh.f32 %v311_v34  ;;  %v3704_v39 = vpop.f32.mrf.mxu1  ;;  %v3481_v49 = vmul.f32 -1.442695, %v311_v34 }
  0xd3   :  { %v420_v40 = vadd.f32 %v418_v37, %v4378_v36  ;;  %v308_v41 = vpop.f32.mrf.mxu0 }
  0xd4   :  { %v414_v42 = vpop.f32.mrf.mxu1 }
  0xd5   :  { %v3697_v43 = vpop.f32.mrf.mxu0  ;;  %3964 = vtanh.f32 %v420_v40  ;;  %v3485_v50 = vmul.f32 -1.442695, %v420_v40 }
  0xd6   :  { %v3705_v44 = vpop.f32.mrf.mxu1  ;;  %3966 = vpow2.f32 %v3481_v49 }
  0xd7   :  { %3968 = vpow2.f32 %v3485_v50 }
  0xdf   :  { %v3963_v45 = vpop.eup %3962 }
  0xe0   :  { %325 = vrot.lane.b32.xlu0 %v3963_v45, %s4225_s4 }
  0xe2   :  { %v3965_v47 = vpop.eup %3964 }
  0xe3   :  { %v3967_v51 = vpop.eup %3966 }
  0xe4   :  { %435 = vrot.lane.b32.xlu0 %v3965_v47, %s4225_s4  ;;  %v315_v52 = vadd.f32 1.0, %v3967_v51  ;;  %v3969_v53 = vpop.eup %3968 }
  0xe5   :  { %v424_v54 = vadd.f32 1.0, %v3969_v53 }
  0xe6   :  { %3970 = vrcp.f32 %v315_v52 }
  0xe7   :  { %3972 = vrcp.f32 %v424_v54 }
  0xe8   :  { %430 = vrot.lane.b32.xlu0 %v429_v48, %s4224_s25 }
  0xf3   :  { %v3971_v55 = vpop.eup %3970 }
  0xf4   :  { %v3973_v58 = vpop.eup %3972  ;;  %v323_v62 = vmul.f32 %v3971_v55, %v321_v61 }
 0x152   :  { %v326_v56 = vpop.permute.xlu0 %325 }
 0x153   :  { %v328_v57 = vmul.f32 %v3971_v55, %v326_v56 }
 0x155   :  { %330 = vrot.lane.b32.xlu1 %v328_v57, %s4224_s25 }
 0x156   :  { %v436_v59 = vpop.permute.xlu0 %435 }
 0x157   :  { %v438_v60 = vmul.f32 %v3973_v58, %v436_v59 }
 0x159   :  { %440 = vrot.lane.b32.xlu1 %v438_v60, %s4224_s25 }
 0x15a   :  { %v431_v63 = vpop.permute.xlu0 %430 }
 0x15b   :  { %v433_v3 = vmul.f32 %v3973_v58, %v431_v63 }
 0x1c7   :  { %v331_v0 = vpop.permute.xlu1 %330 }
 0x1c8   :  { %v4386_v2 = vadd.f32 %v331_v0, %v323_v62 }
 0x1ca   :  { %3974 = vtanh.f32 %v4386_v2 }
 0x1cb   :  { %v441_v4 = vpop.permute.xlu1 %440 }
 0x1cc   :  { %v4389_v5 = vadd.f32 %v441_v4, %v433_v3 }
 0x1ce   :  { %3976 = vtanh.f32 %v4389_v5  ;;  %v629_v59 = vrot.slane %v4389_v5, 2 }
 0x1d7   :  { %v3975_v6 = vpop.eup %3974 }
 0x1d8   :  { %336 = vrot.lane.b32.xlu0 %v3975_v6, %s4225_s4 }
 0x1db   :  { %v3977_v11 = vpop.eup %3976 }
 0x1dc   :  { %446 = vrot.lane.b32.xlu1 %v3977_v11, %s4225_s4 }
 0x24a   :  { %v337_v12 = vpop.permute.xlu0 %336 }
 0x24b   :  { %v339_v13 = vmul.f32 %v3971_v55, %v337_v12  ;;  %v530_v55 = vrot.slane %v4386_v2, 6 }
 0x24d   :  { %v4394_v14 = vpack.c.bf16 %v339_v13, %v339_v13 }
 0x24e   :  { %v447_v15 = vpop.permute.xlu1 %446 }
 0x24f   :  { %v449_v16 = vmul.f32 %v3973_v58, %v447_v15  ;;  %473 = vrot.lane.b32.xlu0 %v4394_v14, %s4224_s25 }
 0x251   :  { %v4398_v17 = vpack.c.bf16 %v449_v16, %v449_v16 }
 0x253   :  { %v571_v18 = vrot.slane %v4398_v17, 3 }
 0x255   :  { %572 = vrot.lane.b32.xlu1 %v571_v18, %s4224_s25 }
 0x2c1   :  { %v474_v20 = vpop.permute.xlu0 %473 }
 0x2c2   :  { %3711 = vmatmul.mubr.msk.bf16.vlgmr.msra.gmra.mxu0 %vm267_vm3, %v474_v20 }
 0x2c3   :  { %3723 = vmatpush3.bf16.msra.mxu0 %v4312_v7  ;;  %3726 = vmatprep.mubr.msk.bf16.mxu0 %vm4223_vm2, %v4222_v1 }
 0x2c4   :  { %3724 = vmatprep.subr.bf16.mxu0 %v4222_v1 }
 0x2c7   :  { %v573_v22 = vpop.permute.xlu1 %572  ;;  %3725 = vmatpush3.bf16.msra.mxu0 %v4326_v9 }
 0x2c8   :  { %3719 = vmatmul.mubr.msk.bf16.vlgmr.msra.gmra.mxu1 %vm267_vm3, %v573_v22  ;;  %3738 = vmatprep.subr.bf16.mxu0 %v4222_v1 }
 0x2c9   :  { %3731 = vmatpush3.bf16.msra.mxu1 %v4318_v8  ;;  %3734 = vmatprep.mubr.msk.bf16.mxu1 %vm4223_vm2, %v4222_v1 }
 0x2ca   :  { %3732 = vmatprep.subr.bf16.mxu1 %v4222_v1 }
 0x2cd   :  { %3733 = vmatpush3.bf16.msra.mxu1 %v4335_v10 }
 0x2ce   :  { %3746 = vmatprep.subr.bf16.mxu1 %v4222_v1 }
 0x382   :  { %v512_v23 = vpop.f32.mrf.mxu0 }
 0x383   :  { %v519_v25 = vrot.slane %v512_v23, 6 }
 0x384   :  { %v3712_v27 = vpop.f32.mrf.mxu0 }
 0x385   :  { %v521_v28 = vadd.f32 %v519_v25, %v4373_v31 }
 0x386   :  { %v515_v30 = vpop.f32.mrf.mxu0 }
 0x387   :  { %3978 = vtanh.f32 %v521_v28  ;;  %v3488_v43 = vmul.f32 -1.442695, %v521_v28 }
 0x388   :  { %v3713_v33 = vpop.f32.mrf.mxu0  ;;  %v611_v34 = vpop.f32.mrf.mxu1 }
 0x389   :  { %v618_v35 = vrot.slane %v611_v34, 4 }
 0x38a   :  { %v3720_v37 = vpop.f32.mrf.mxu1 }
 0x38b   :  { %v620_v38 = vadd.f32 %v618_v35, %v4378_v36 }
 0x38c   :  { %v614_v39 = vpop.f32.mrf.mxu1 }
 0x38d   :  { %3980 = vtanh.f32 %v620_v38  ;;  %v3491_v44 = vmul.f32 -1.442695, %v620_v38 }
 0x38e   :  { %v3721_v40 = vpop.f32.mrf.mxu1  ;;  %3982 = vpow2.f32 %v3488_v43 }
 0x38f   :  { %3984 = vpow2.f32 %v3491_v44 }
 0x394   :  { %v3979_v41 = vpop.eup %3978 }
 0x395   :  { %534 = vrot.lane.b32.xlu0 %v3979_v41, %s4225_s4 }
 0x39a   :  { %v3981_v42 = vpop.eup %3980 }
 0x39b   :  { %633 = vrot.lane.b32.xlu1 %v3981_v42, %s4225_s4  ;;  %v3983_v45 = vpop.eup %3982 }
 0x39c   :  { %v525_v46 = vadd.f32 1.0, %v3983_v45  ;;  %v3985_v47 = vpop.eup %3984 }
 0x39d   :  { %v624_v48 = vadd.f32 1.0, %v3985_v47 }
 0x39e   :  { %3986 = vrcp.f32 %v525_v46 }
 0x39f   :  { %3988 = vrcp.f32 %v624_v48 }
 0x3ab   :  { %v3987_v49 = vpop.eup %3986 }
 0x3ac   :  { %v3989_v52 = vpop.eup %3988  ;;  %v532_v56 = vmul.f32 %v3987_v49, %v530_v55 }
 0x3ad   :  { %v631_v60 = vmul.f32 %v3989_v52, %v629_v59 }
 0x407   :  { %v535_v50 = vpop.permute.xlu0 %534 }
 0x408   :  { %v537_v51 = vmul.f32 %v3987_v49, %v535_v50 }
 0x40a   :  { %539 = vrot.lane.b32.xlu0 %v537_v51, %s4224_s25 }
 0x40d   :  { %v634_v53 = vpop.permute.xlu1 %633 }
 0x40e   :  { %v636_v54 = vmul.f32 %v3989_v52, %v634_v53 }
 0x410   :  { %638 = vrot.lane.b32.xlu1 %v636_v54, %s4224_s25 }
 0x47c   :  { %v540_v57 = vpop.permute.xlu0 %539 }
 0x47d   :  { %v4423_v58 = vadd.f32 %v540_v57, %v532_v56 }
 0x47f   :  { %3990 = vtanh.f32 %v4423_v58 }
 0x482   :  { %v639_v61 = vpop.permute.xlu1 %638 }
 0x483   :  { %v4427_v62 = vadd.f32 %v639_v61, %v631_v60 }
 0x485   :  { %3992 = vtanh.f32 %v4427_v62  ;;  %v827_v56 = vrot.slane %v4427_v62, 2 }
 0x48c   :  { %v3991_v63 = vpop.eup %3990 }
 0x48d   :  { %545 = vrot.lane.b32.xlu0 %v3991_v63, %s4225_s4 }
 0x492   :  { %v3993_v0 = vpop.eup %3992 }
 0x493   :  { %644 = vrot.lane.b32.xlu1 %v3993_v0, %s4225_s4 }
 0x4ff   :  { %v546_v2 = vpop.permute.xlu0 %545 }
 0x500   :  { %v548_v3 = vmul.f32 %v3987_v49, %v546_v2 }
 0x502   :  { %v4432_v4 = vpack.c.bf16 %v548_v3, %v548_v3 }
 0x504   :  { %v670_v5 = vrot.slane %v4432_v4, 1 }
 0x505   :  { %v645_v6 = vpop.permute.xlu1 %644 }
 0x506   :  { %v647_v11 = vmul.f32 %v3989_v52, %v645_v6  ;;  %671 = vrot.lane.b32.xlu0 %v670_v5, %s4224_s25  ;;  %v728_v52 = vrot.slane %v4423_v58, 6 }
 0x508   :  { %v4436_v12 = vpack.c.bf16 %v647_v11, %v647_v11 }
 0x50a   :  { %v769_v13 = vrot.slane %v4436_v12, 2 }
 0x50c   :  { %770 = vrot.lane.b32.xlu1 %v769_v13, %s4224_s25 }
 0x578   :  { %v672_v15 = vpop.permute.xlu0 %671 }
 0x579   :  { %3727 = vmatmul.mubr.msk.bf16.vlgmr.msra.gmra.mxu0 %vm267_vm3, %v672_v15 }
 0x57a   :  { %3739 = vmatpush3.bf16.msra.mxu0 %v4312_v7  ;;  %3742 = vmatprep.mubr.msk.bf16.mxu0 %vm4223_vm2, %v4222_v1 }
 0x57b   :  { %3740 = vmatprep.subr.bf16.mxu0 %v4222_v1 }
 0x57e   :  { %v771_v16 = vpop.permute.xlu1 %770  ;;  %3741 = vmatpush3.bf16.msra.mxu0 %v4326_v9 }
 0x57f   :  { %3735 = vmatmul.mubr.msk.bf16.vlgmr.msra.gmra.mxu1 %vm267_vm3, %v771_v16  ;;  %3754 = vmatprep.subr.bf16.mxu0 %v4222_v1 }
 0x580   :  { %3747 = vmatpush3.bf16.msra.mxu1 %v4318_v8  ;;  %3750 = vmatprep.mubr.msk.bf16.mxu1 %vm4223_vm2, %v4222_v1 }
 0x581   :  { %3748 = vmatprep.subr.bf16.mxu1 %v4222_v1 }
 0x584   :  { %3749 = vmatpush3.bf16.msra.mxu1 %v4335_v10 }
 0x585   :  { %3762 = vmatprep.subr.bf16.mxu1 %v4222_v1 }
 0x639   :  { %v710_v18 = vpop.f32.mrf.mxu0 }
 0x63a   :  { %v717_v20 = vrot.slane %v710_v18, 4 }
 0x63b   :  { %v3728_v22 = vpop.f32.mrf.mxu0 }
 0x63c   :  { %v719_v23 = vadd.f32 %v717_v20, %v4373_v31 }
 0x63d   :  { %v713_v25 = vpop.f32.mrf.mxu0 }
 0x63e   :  { %3994 = vtanh.f32 %v719_v23  ;;  %v3494_v40 = vmul.f32 -1.442695, %v719_v23 }
 0x63f   :  { %v3729_v27 = vpop.f32.mrf.mxu0  ;;  %v809_v28 = vpop.f32.mrf.mxu1 }
 0x640   :  { %v816_v30 = vrot.slane %v809_v28, 6 }
 0x641   :  { %v3736_v33 = vpop.f32.mrf.mxu1 }
 0x642   :  { %v818_v34 = vadd.f32 %v816_v30, %v4378_v36 }
 0x643   :  { %v812_v35 = vpop.f32.mrf.mxu1 }
 0x644   :  { %3996 = vtanh.f32 %v818_v34  ;;  %v3497_v41 = vmul.f32 -1.442695, %v818_v34 }
 0x645   :  { %v3737_v37 = vpop.f32.mrf.mxu1  ;;  %3998 = vpow2.f32 %v3494_v40 }
 0x646   :  { %4000 = vpow2.f32 %v3497_v41 }
 0x64b   :  { %v3995_v38 = vpop.eup %3994 }
 0x64c   :  { %732 = vrot.lane.b32.xlu0 %v3995_v38, %s4225_s4 }
 0x651   :  { %v3997_v39 = vpop.eup %3996 }
 0x652   :  { %831 = vrot.lane.b32.xlu1 %v3997_v39, %s4225_s4  ;;  %v3999_v42 = vpop.eup %3998 }
 0x653   :  { %v723_v43 = vadd.f32 1.0, %v3999_v42  ;;  %v4001_v44 = vpop.eup %4000 }
 0x654   :  { %v822_v45 = vadd.f32 1.0, %v4001_v44 }
 0x655   :  { %4002 = vrcp.f32 %v723_v43 }
 0x656   :  { %4004 = vrcp.f32 %v822_v45 }
 0x662   :  { %v4003_v46 = vpop.eup %4002 }
 0x663   :  { %v4005_v49 = vpop.eup %4004  ;;  %v730_v53 = vmul.f32 %v4003_v46, %v728_v52 }
 0x664   :  { %v829_v57 = vmul.f32 %v4005_v49, %v827_v56 }
 0x6be   :  { %v733_v47 = vpop.permute.xlu0 %732 }
 0x6bf   :  { %v735_v48 = vmul.f32 %v4003_v46, %v733_v47 }
 0x6c1   :  { %737 = vrot.lane.b32.xlu0 %v735_v48, %s4224_s25 }
 0x6c4   :  { %v832_v50 = vpop.permute.xlu1 %831 }
 0x6c5   :  { %v834_v51 = vmul.f32 %v4005_v49, %v832_v50 }
 0x6c7   :  { %836 = vrot.lane.b32.xlu1 %v834_v51, %s4224_s25 }
 0x733   :  { %v738_v54 = vpop.permute.xlu0 %737 }
 0x734   :  { %v4461_v55 = vadd.f32 %v738_v54, %v730_v53 }
 0x736   :  { %4006 = vtanh.f32 %v4461_v55  ;;  %v926_v48 = vrot.slane %v4461_v55, 6 }
 0x739   :  { %v837_v59 = vpop.permute.xlu1 %836 }
 0x73a   :  { %v4465_v60 = vadd.f32 %v837_v59, %v829_v57 }
 0x73c   :  { %4008 = vtanh.f32 %v4465_v60  ;;  %v1023_v51 = vrot.slane %v4465_v60, 2 }
 0x743   :  { %v4007_v61 = vpop.eup %4006 }
 0x744   :  { %743 = vrot.lane.b32.xlu0 %v4007_v61, %s4225_s4 }
 0x749   :  { %v4009_v63 = vpop.eup %4008 }
 0x74a   :  { %842 = vrot.lane.b32.xlu1 %v4009_v63, %s4225_s4 }
 0x7b6   :  { %v744_v58 = vpop.permute.xlu0 %743 }
 0x7b7   :  { %v746_v0 = vmul.f32 %v4003_v46, %v744_v58 }
 0x7b9   :  { %v4470_v2 = vpack.c.bf16 %v746_v0, %v746_v0 }
 0x7bb   :  { %v868_v62 = vrot.slane %v4470_v2, 2 }
 0x7bc   :  { %v843_v3 = vpop.permute.xlu1 %842 }
 0x7bd   :  { %v845_v5 = vmul.f32 %v4005_v49, %v843_v3  ;;  %869 = vrot.lane.b32.xlu0 %v868_v62, %s4224_s25 }
 0x7bf   :  { %v4474_v6 = vpack.c.bf16 %v845_v5, %v845_v5 }
 0x7c1   :  { %v968_v11 = vrot.slane %v4474_v6, 1 }
 0x7c3   :  { %969 = vrot.lane.b32.xlu1 %v968_v11, %s4224_s25 }
 0x82f   :  { %v870_v13 = vpop.permute.xlu0 %869 }
 0x830   :  { %3743 = vmatmul.mubr.msk.bf16.vlgmr.msra.gmra.mxu0 %vm267_vm3, %v870_v13 }
 0x831   :  { %3755 = vmatpush3.bf16.msra.mxu0 %v4312_v7  ;;  %3758 = vmatprep.mubr.msk.bf16.mxu0 %vm4223_vm2, %v4222_v1 }
 0x832   :  { %3756 = vmatprep.subr.bf16.mxu0 %v4222_v1 }
 0x835   :  { %v970_v15 = vpop.permute.xlu1 %969  ;;  %3757 = vmatpush3.bf16.msra.mxu0 %v4326_v9 }
 0x836   :  { %3751 = vmatmul.mubr.msk.bf16.vlgmr.msra.gmra.mxu1 %vm267_vm3, %v970_v15  ;;  %3770 = vmatprep.subr.bf16.mxu0 %v4222_v1 }
 0x837   :  { %3763 = vmatpush3.bf16.msra.mxu1 %v4318_v8  ;;  %3766 = vmatprep.mubr.msk.bf16.mxu1 %vm4223_vm2, %v4222_v1 }
 0x838   :  { %3764 = vmatprep.subr.bf16.mxu1 %v4222_v1 }
 0x83b   :  { %3765 = vmatpush3.bf16.msra.mxu1 %v4335_v10 }
 0x83c   :  { %3778 = vmatprep.subr.bf16.mxu1 %v4222_v1 }
 0x8f0   :  { %v908_v16 = vpop.f32.mrf.mxu0 }
 0x8f1   :  { %v915_v18 = vrot.slane %v908_v16, 2 }
 0x8f2   :  { %v3744_v20 = vpop.f32.mrf.mxu0 }
 0x8f3   :  { %v917_v22 = vadd.f32 %v915_v18, %v4373_v31 }
 0x8f4   :  { %v911_v23 = vpop.f32.mrf.mxu0 }
 0x8f5   :  { %4010 = vtanh.f32 %v917_v22  ;;  %v3500_v38 = vmul.f32 -1.442695, %v917_v22 }
 0x8f6   :  { %v3745_v25 = vpop.f32.mrf.mxu0  ;;  %v1008_v27 = vpop.f32.mrf.mxu1 }
 0x8f7   :  { %v1014_v28 = vadd.f32 %v1008_v27, %v4378_v36 }
 0x8f8   :  { %v3752_v30 = vpop.f32.mrf.mxu1 }
 0x8f9   :  { %4012 = vtanh.f32 %v1014_v28  ;;  %v3503_v39 = vmul.f32 -1.442695, %v1014_v28 }
 0x8fa   :  { %v1011_v33 = vpop.f32.mrf.mxu1  ;;  %4014 = vpow2.f32 %v3500_v38 }
 0x8fb   :  { %4016 = vpow2.f32 %v3503_v39 }
 0x8fc   :  { %v3753_v34 = vpop.f32.mrf.mxu1 }
 0x902   :  { %v4011_v35 = vpop.eup %4010 }
 0x903   :  { %930 = vrot.lane.b32.xlu0 %v4011_v35, %s4225_s4 }
 0x906   :  { %v4013_v37 = vpop.eup %4012 }
 0x907   :  { %1027 = vrot.lane.b32.xlu1 %v4013_v37, %s4225_s4  ;;  %v4015_v31 = vpop.eup %4014 }
 0x908   :  { %v921_v40 = vadd.f32 1.0, %v4015_v31  ;;  %v4017_v41 = vpop.eup %4016 }
 0x909   :  { %v1018_v42 = vadd.f32 1.0, %v4017_v41 }
 0x90a   :  { %4018 = vrcp.f32 %v921_v40 }
 0x90b   :  { %4020 = vrcp.f32 %v1018_v42 }
 0x917   :  { %v4019_v36 = vpop.eup %4018 }
 0x918   :  { %v4021_v45 = vpop.eup %4020  ;;  %v928_v49 = vmul.f32 %v4019_v36, %v926_v48 }
 0x919   :  { %v1025_v53 = vmul.f32 %v4021_v45, %v1023_v51 }
 0x975   :  { %v931_v43 = vpop.permute.xlu0 %930 }
 0x976   :  { %v933_v44 = vmul.f32 %v4019_v36, %v931_v43 }
 0x978   :  { %935 = vrot.lane.b32.xlu0 %v933_v44, %s4224_s25 }
 0x979   :  { %v1028_v46 = vpop.permute.xlu1 %1027 }
 0x97a   :  { %v1030_v47 = vmul.f32 %v4021_v45, %v1028_v46 }
 0x97c   :  { %1032 = vrot.lane.b32.xlu1 %v1030_v47, %s4224_s25 }
 0x9ea   :  { %v936_v50 = vpop.permute.xlu0 %935 }
 0x9eb   :  { %v4500_v52 = vadd.f32 %v936_v50, %v928_v49 }
 0x9ed   :  { %4022 = vtanh.f32 %v4500_v52 }
 0x9ee   :  { %v1033_v54 = vpop.permute.xlu1 %1032 }
 0x9ef   :  { %v4503_v56 = vadd.f32 %v1033_v54, %v1025_v53 }
 0x9f1   :  { %4024 = vtanh.f32 %v4503_v56  ;;  %v1215_v48 = vrot.slane %v4503_v56, 2 }
 0x9fa   :  { %v4023_v57 = vpop.eup %4022 }
 0x9fb   :  { %941 = vrot.lane.b32.xlu0 %v4023_v57, %s4225_s4 }
 0x9fe   :  { %v4025_v59 = vpop.eup %4024 }
 0x9ff   :  { %1038 = vrot.lane.b32.xlu1 %v4025_v59, %s4225_s4 }
 0xa6d   :  { %v942_v55 = vpop.permute.xlu0 %941 }
 0xa6e   :  { %v944_v61 = vmul.f32 %v4019_v36, %v942_v55 }
 0xa70   :  { %v4508_v63 = vpack.c.bf16 %v944_v61, %v944_v61 }
 0xa71   :  { %v1039_v60 = vpop.permute.xlu1 %1038 }
 0xa72   :  { %v1041_v58 = vmul.f32 %v4021_v45, %v1039_v60  ;;  %v1063_v0 = vrot.slane %v4508_v63, 3  ;;  %v1118_v45 = vrot.slane %v4500_v52, 6 }
 0xa74   :  { %v4511_v62 = vpack.c.bf16 %v1041_v58, %v1041_v58  ;;  %1064 = vrot.lane.b32.xlu0 %v1063_v0, %s4224_s25 }
 0xa76   :  { %1158 = vrot.lane.b32.xlu1 %v4511_v62, %s4224_s25 }
 0xae6   :  { %v1065_v3 = vpop.permute.xlu0 %1064 }
 0xae7   :  { %3759 = vmatmul.mubr.msk.bf16.vlgmr.msra.gmra.mxu0 %vm267_vm3, %v1065_v3 }
 0xae8   :  { %v1159_v5 = vpop.permute.xlu1 %1158  ;;  %3771 = vmatpush3.bf16.msra.mxu0 %v4312_v7  ;;  %3774 = vmatprep.mubr.msk.bf16.mxu0 %vm4223_vm2, %v4222_v1 }
 0xae9   :  { %3767 = vmatmul.mubr.msk.bf16.vlgmr.msra.gmra.mxu1 %vm267_vm3, %v1159_v5  ;;  %3772 = vmatprep.subr.bf16.mxu0 %v4222_v1 }
 0xaea   :  { %3779 = vmatpush3.bf16.msra.mxu1 %v4318_v8  ;;  %3782 = vmatprep.mubr.msk.bf16.mxu1 %vm4223_vm2, %v4222_v1 }
 0xaeb   :  { %3780 = vmatprep.subr.bf16.mxu1 %v4222_v1 }
 0xaec   :  { %3773 = vmatpush3.bf16.msra.mxu0 %v4326_v9 }
 0xaed   :  { %3786 = vmatprep.subr.bf16.mxu0 %v4222_v1 }
 0xaee   :  { %3781 = vmatpush3.bf16.msra.mxu1 %v4335_v10 }
 0xaef   :  { %3794 = vmatprep.subr.bf16.mxu1 %v4222_v1 }
 0xba7   :  { %v1103_v11 = vpop.f32.mrf.mxu0 }
 0xba8   :  { %v1109_v13 = vadd.f32 %v1103_v11, %v4371_v29 }
 0xba9   :  { %v3760_v15 = vpop.f32.mrf.mxu0  ;;  %v1197_v16 = vpop.f32.mrf.mxu1 }
 0xbaa   :  { %4026 = vtanh.f32 %v1109_v13  ;;  %v1204_v18 = vrot.slane %v1197_v16, 2  ;;  %v3506_v34 = vmul.f32 -1.442695, %v1109_v13 }
 0xbab   :  { %v1106_v20 = vpop.f32.mrf.mxu0  ;;  %v3768_v22 = vpop.f32.mrf.mxu1 }
 0xbac   :  { %v1206_v23 = vadd.f32 %v1204_v18, %v4365_v21 }
 0xbad   :  { %v3761_v25 = vpop.f32.mrf.mxu0  ;;  %v1200_v27 = vpop.f32.mrf.mxu1 }
 0xbae   :  { %4028 = vtanh.f32 %v1206_v23  ;;  %v3509_v35 = vmul.f32 -1.442695, %v1206_v23 }
 0xbaf   :  { %v3769_v28 = vpop.f32.mrf.mxu1  ;;  %4030 = vpow2.f32 %v3506_v34 }
 0xbb0   :  { %4032 = vpow2.f32 %v3509_v35 }
 0xbb7   :  { %v4027_v30 = vpop.eup %4026 }
 0xbb8   :  { %1122 = vrot.lane.b32.xlu0 %v4027_v30, %s4225_s4 }
 0xbbb   :  { %v4029_v33 = vpop.eup %4028 }
 0xbbc   :  { %1219 = vrot.lane.b32.xlu1 %v4029_v33, %s4225_s4  ;;  %v4031_v37 = vpop.eup %4030 }
 0xbbd   :  { %v1113_v38 = vadd.f32 1.0, %v4031_v37  ;;  %v4033_v39 = vpop.eup %4032 }
 0xbbe   :  { %v1210_v31 = vadd.f32 1.0, %v4033_v39 }
 0xbbf   :  { %4034 = vrcp.f32 %v1113_v38 }
 0xbc0   :  { %4036 = vrcp.f32 %v1210_v31 }
 0xbcc   :  { %v4035_v40 = vpop.eup %4034 }
 0xbcd   :  { %v4037_v36 = vpop.eup %4036  ;;  %v1120_v46 = vmul.f32 %v4035_v40, %v1118_v45 }
 0xbce   :  { %v1217_v50 = vmul.f32 %v4037_v36, %v1215_v48 }
 0xc2a   :  { %v1123_v41 = vpop.permute.xlu0 %1122 }
 0xc2b   :  { %v1125_v42 = vmul.f32 %v4035_v40, %v1123_v41 }
 0xc2d   :  { %1127 = vrot.lane.b32.xlu0 %v1125_v42, %s4224_s25 }
 0xc2e   :  { %v1220_v43 = vpop.permute.xlu1 %1219 }
 0xc2f   :  { %v1222_v44 = vmul.f32 %v4037_v36, %v1220_v43 }
 0xc31   :  { %1224 = vrot.lane.b32.xlu1 %v1222_v44, %s4224_s25 }
 0xc9f   :  { %v1128_v47 = vpop.permute.xlu0 %1127 }
 0xca0   :  { %v4538_v49 = vadd.f32 %v1128_v47, %v1120_v46 }
 0xca2   :  { %4038 = vtanh.f32 %v4538_v49  ;;  %v1314_v45 = vrot.slane %v4538_v49, 6 }
 0xca3   :  { %v1225_v51 = vpop.permute.xlu1 %1224 }
 0xca4   :  { %v4541_v53 = vadd.f32 %v1225_v51, %v1217_v50 }
 0xca6   :  { %4040 = vtanh.f32 %v4541_v53  ;;  %v1413_v50 = vrot.slane %v4541_v53, 2 }
 0xcaf   :  { %v4039_v54 = vpop.eup %4038 }
 0xcb0   :  { %1133 = vrot.lane.b32.xlu0 %v4039_v54, %s4225_s4 }
 0xcb3   :  { %v4041_v57 = vpop.eup %4040 }
 0xcb4   :  { %1230 = vrot.lane.b32.xlu1 %v4041_v57, %s4225_s4 }
 0xd22   :  { %v1134_v52 = vpop.permute.xlu0 %1133 }
 0xd23   :  { %v1136_v59 = vmul.f32 %v4035_v40, %v1134_v52 }
 0xd25   :  { %v4546_v55 = vpack.c.bf16 %v1136_v59, %v1136_v59 }
 0xd26   :  { %v1231_v56 = vpop.permute.xlu1 %1230 }
 0xd27   :  { %v1233_v61 = vmul.f32 %v4037_v36, %v1231_v56  ;;  %1257 = vrot.lane.b32.xlu0 %v4546_v55, %s4224_s25 }
 0xd29   :  { %v4550_v60 = vpack.c.bf16 %v1233_v61, %v1233_v61 }
 0xd2b   :  { %v1355_v58 = vrot.slane %v4550_v60, 3 }
 0xd2d   :  { %1356 = vrot.lane.b32.xlu1 %v1355_v58, %s4224_s25 }
 0xd99   :  { %v1258_v0 = vpop.permute.xlu0 %1257 }
 0xd9a   :  { %3775 = vmatmul.mubr.msk.bf16.vlgmr.msra.gmra.mxu0 %vm267_vm3, %v1258_v0 }
 0xd9b   :  { %3787 = vmatpush3.bf16.msra.mxu0 %v4312_v7  ;;  %3790 = vmatprep.mubr.msk.bf16.mxu0 %vm4223_vm2, %v4222_v1 }
 0xd9c   :  { %3788 = vmatprep.subr.bf16.mxu0 %v4222_v1 }
 0xd9f   :  { %v1357_v3 = vpop.permute.xlu1 %1356  ;;  %3789 = vmatpush3.bf16.msra.mxu0 %v4326_v9 }
 0xda0   :  { %3783 = vmatmul.mubr.msk.bf16.vlgmr.msra.gmra.mxu1 %vm267_vm3, %v1357_v3  ;;  %3802 = vmatprep.subr.bf16.mxu0 %v4222_v1 }
 0xda1   :  { %3795 = vmatpush3.bf16.msra.mxu1 %v4318_v8  ;;  %3798 = vmatprep.mubr.msk.bf16.mxu1 %vm4223_vm2, %v4222_v1 }
 0xda2   :  { %3796 = vmatprep.subr.bf16.mxu1 %v4222_v1 }
 0xda5   :  { %3797 = vmatpush3.bf16.msra.mxu1 %v4335_v10 }
 0xda6   :  { %3810 = vmatprep.subr.bf16.mxu1 %v4222_v1 }
 0xe5a   :  { %v1296_v5 = vpop.f32.mrf.mxu0 }
 0xe5b   :  { %v1303_v11 = vrot.slane %v1296_v5, 6 }
 0xe5c   :  { %v3776_v13 = vpop.f32.mrf.mxu0 }
 0xe5d   :  { %v1305_v15 = vadd.f32 %v1303_v11, %v4371_v29 }
 0xe5e   :  { %v1299_v16 = vpop.f32.mrf.mxu0 }
 0xe5f   :  { %4042 = vtanh.f32 %v1305_v15  ;;  %v3512_v34 = vmul.f32 -1.442695, %v1305_v15 }
 0xe60   :  { %v3777_v18 = vpop.f32.mrf.mxu0  ;;  %v1395_v20 = vpop.f32.mrf.mxu1 }
 0xe61   :  { %v1402_v22 = vrot.slane %v1395_v20, 4 }
 0xe62   :  { %v3784_v23 = vpop.f32.mrf.mxu1 }
 0xe63   :  { %v1404_v25 = vadd.f32 %v1402_v22, %v4365_v21 }
 0xe64   :  { %v1398_v27 = vpop.f32.mrf.mxu1 }
 0xe65   :  { %4044 = vtanh.f32 %v1404_v25  ;;  %v3515_v35 = vmul.f32 -1.442695, %v1404_v25 }
 0xe66   :  { %v3785_v28 = vpop.f32.mrf.mxu1  ;;  %4046 = vpow2.f32 %v3512_v34 }
 0xe67   :  { %4048 = vpow2.f32 %v3515_v35 }
 0xe6c   :  { %v4043_v30 = vpop.eup %4042 }
 0xe6d   :  { %1318 = vrot.lane.b32.xlu0 %v4043_v30, %s4225_s4 }
 0xe72   :  { %v4045_v33 = vpop.eup %4044 }
 0xe73   :  { %1417 = vrot.lane.b32.xlu1 %v4045_v33, %s4225_s4  ;;  %v4047_v37 = vpop.eup %4046 }
 0xe74   :  { %v1309_v38 = vadd.f32 1.0, %v4047_v37  ;;  %v4049_v39 = vpop.eup %4048 }
 0xe75   :  { %v1408_v31 = vadd.f32 1.0, %v4049_v39 }
 0xe76   :  { %4050 = vrcp.f32 %v1309_v38 }
 0xe77   :  { %4052 = vrcp.f32 %v1408_v31 }
 0xe83   :  { %v4051_v40 = vpop.eup %4050 }
 0xe84   :  { %v4053_v36 = vpop.eup %4052  ;;  %v1316_v46 = vmul.f32 %v4051_v40, %v1314_v45 }
 0xe85   :  { %v1415_v51 = vmul.f32 %v4053_v36, %v1413_v50 }
 0xedf   :  { %v1319_v41 = vpop.permute.xlu0 %1318 }
 0xee0   :  { %v1321_v42 = vmul.f32 %v4051_v40, %v1319_v41 }
 0xee2   :  { %1323 = vrot.lane.b32.xlu0 %v1321_v42, %s4224_s25 }
 0xee5   :  { %v1418_v43 = vpop.permute.xlu1 %1417 }
 0xee6   :  { %v1420_v44 = vmul.f32 %v4053_v36, %v1418_v43 }
 0xee8   :  { %1422 = vrot.lane.b32.xlu1 %v1420_v44, %s4224_s25 }
 0xf54   :  { %v1324_v47 = vpop.permute.xlu0 %1323 }
 0xf55   :  { %v4575_v48 = vadd.f32 %v1324_v47, %v1316_v46 }
 0xf57   :  { %4054 = vtanh.f32 %v4575_v48  ;;  %v1512_v44 = vrot.slane %v4575_v48, 6 }
 0xf5a   :  { %v1423_v54 = vpop.permute.xlu1 %1422 }
 0xf5b   :  { %v4579_v57 = vadd.f32 %v1423_v54, %v1415_v51 }
 0xf5d   :  { %4056 = vtanh.f32 %v4579_v57  ;;  %v1611_v50 = vrot.slane %v4579_v57, 2 }
 0xf64   :  { %v4055_v52 = vpop.eup %4054 }
 0xf65   :  { %1329 = vrot.lane.b32.xlu0 %v4055_v52, %s4225_s4 }
 0xf6a   :  { %v4057_v59 = vpop.eup %4056 }
 0xf6b   :  { %1428 = vrot.lane.b32.xlu1 %v4057_v59, %s4225_s4 }
 0xfd7   :  { %v1330_v49 = vpop.permute.xlu0 %1329 }
 0xfd8   :  { %v1332_v56 = vmul.f32 %v4051_v40, %v1330_v49 }
 0xfda   :  { %v4584_v61 = vpack.c.bf16 %v1332_v56, %v1332_v56 }
 0xfdc   :  { %v1454_v53 = vrot.slane %v4584_v61, 1 }
 0xfdd   :  { %v1429_v58 = vpop.permute.xlu1 %1428 }
 0xfde   :  { %v1431_v0 = vmul.f32 %v4053_v36, %v1429_v58  ;;  %1455 = vrot.lane.b32.xlu0 %v1454_v53, %s4224_s25 }
 0xfe0   :  { %v4588_v3 = vpack.c.bf16 %v1431_v0, %v1431_v0 }
 0xfe2   :  { %v1553_v5 = vrot.slane %v4588_v3, 2 }
 0xfe4   :  { %1554 = vrot.lane.b32.xlu1 %v1553_v5, %s4224_s25 }
0x1050   :  { %v1456_v11 = vpop.permute.xlu0 %1455 }
0x1051   :  { %3791 = vmatmul.mubr.msk.bf16.vlgmr.msra.gmra.mxu0 %vm267_vm3, %v1456_v11 }
0x1052   :  { %3803 = vmatpush3.bf16.msra.mxu0 %v4312_v7  ;;  %3806 = vmatprep.mubr.msk.bf16.mxu0 %vm4223_vm2, %v4222_v1 }
0x1053   :  { %3804 = vmatprep.subr.bf16.mxu0 %v4222_v1 }
0x1056   :  { %v1555_v13 = vpop.permute.xlu1 %1554  ;;  %3805 = vmatpush3.bf16.msra.mxu0 %v4326_v9 }
0x1057   :  { %3799 = vmatmul.mubr.msk.bf16.vlgmr.msra.gmra.mxu1 %vm267_vm3, %v1555_v13  ;;  %3818 = vmatprep.subr.bf16.mxu0 %v4222_v1 }
0x1058   :  { %3811 = vmatpush3.bf16.msra.mxu1 %v4318_v8  ;;  %3814 = vmatprep.mubr.msk.bf16.mxu1 %vm4223_vm2, %v4222_v1 }
0x1059   :  { %3812 = vmatprep.subr.bf16.mxu1 %v4222_v1 }
0x105c   :  { %3813 = vmatpush3.bf16.msra.mxu1 %v4335_v10 }
0x105d   :  { %3826 = vmatprep.subr.bf16.mxu1 %v4222_v1 }
0x1111   :  { %v1494_v7 = vpop.f32.mrf.mxu0 }
0x1112   :  { %v1501_v15 = vrot.slane %v1494_v7, 4  ;;  %v4634_v7 = vld [vmem:[%s5248_s6 + $0x8] sm:$0xff]  }
0x1113   :  { %v3792_v16 = vpop.f32.mrf.mxu0 }
0x1114   :  { %v1503_v9 = vadd.f32 %v1501_v15, %v4371_v29  ;;  %v4643_v16 = vld [vmem:[%s5248_s6] sm:$0xff]  }
0x1115   :  { %v1497_v18 = vpop.f32.mrf.mxu0 }
0x1116   :  { %4058 = vtanh.f32 %v1503_v9  ;;  %v3518_v33 = vmul.f32 -1.442695, %v1503_v9  ;;  %v4651_v9 = vld [vmem:[%s5249_s7 + $0x8] sm:$0xff]   ;;  %v4660_v18 = vld [vmem:[%s5249_s7] sm:$0xff]  }
0x1117   :  { %v3793_v20 = vpop.f32.mrf.mxu0  ;;  %v1593_v22 = vpop.f32.mrf.mxu1 }
0x1118   :  { %v1600_v23 = vrot.slane %v1593_v22, 6 }
0x1119   :  { %v3800_v8 = vpop.f32.mrf.mxu1 }
0x111a   :  { %v1602_v25 = vadd.f32 %v1600_v23, %v4365_v21 }
0x111b   :  { %v1596_v27 = vpop.f32.mrf.mxu1 }
0x111c   :  { %4060 = vtanh.f32 %v1602_v25  ;;  %v3521_v34 = vmul.f32 -1.442695, %v1602_v25 }
0x111d   :  { %v3801_v28 = vpop.f32.mrf.mxu1  ;;  %4062 = vpow2.f32 %v3518_v33 }
0x111e   :  { %4064 = vpow2.f32 %v3521_v34 }
0x1123   :  { %v4059_v30 = vpop.eup %4058 }
0x1124   :  { %1516 = vrot.lane.b32.xlu0 %v4059_v30, %s4225_s4 }
0x1129   :  { %v4061_v10 = vpop.eup %4060 }
0x112a   :  { %1615 = vrot.lane.b32.xlu1 %v4061_v10, %s4225_s4  ;;  %v4063_v35 = vpop.eup %4062 }
0x112b   :  { %v1507_v37 = vadd.f32 1.0, %v4063_v35  ;;  %v4065_v38 = vpop.eup %4064 }
0x112c   :  { %v1606_v39 = vadd.f32 1.0, %v4065_v38 }
0x112d   :  { %4066 = vrcp.f32 %v1507_v37 }
0x112e   :  { %4068 = vrcp.f32 %v1606_v39 }
0x113a   :  { %v4067_v31 = vpop.eup %4066 }
0x113b   :  { %v4069_v42 = vpop.eup %4068  ;;  %v1514_v45 = vmul.f32 %v4067_v31, %v1512_v44 }
0x113c   :  { %v1613_v51 = vmul.f32 %v4069_v42, %v1611_v50 }
0x1196   :  { %v1517_v40 = vpop.permute.xlu0 %1516 }
0x1197   :  { %v1519_v41 = vmul.f32 %v4067_v31, %v1517_v40 }
0x1199   :  { %1521 = vrot.lane.b32.xlu0 %v1519_v41, %s4224_s25 }
0x119c   :  { %v1616_v36 = vpop.permute.xlu1 %1615 }
0x119d   :  { %v1618_v43 = vmul.f32 %v4069_v42, %v1616_v36 }
0x119f   :  { %1620 = vrot.lane.b32.xlu1 %v1618_v43, %s4224_s25 }
0x120b   :  { %v1522_v46 = vpop.permute.xlu0 %1521 }
0x120c   :  { %v4613_v47 = vadd.f32 %v1522_v46, %v1514_v45 }
0x120e   :  { %4070 = vtanh.f32 %v4613_v47  ;;  %v1710_v46 = vrot.slane %v4613_v47, 6 }
0x1211   :  { %v1621_v54 = vpop.permute.xlu1 %1620 }
0x1212   :  { %v4617_v52 = vadd.f32 %v1621_v54, %v1613_v51 }
0x1214   :  { %4072 = vtanh.f32 %v4617_v52  ;;  %v1807_v54 = vrot.slane %v4617_v52, 2 }
0x121b   :  { %v4071_v59 = vpop.eup %4070 }
0x121c   :  { %1527 = vrot.lane.b32.xlu0 %v4071_v59, %s4225_s4 }
0x1221   :  { %v4073_v49 = vpop.eup %4072 }
0x1222   :  { %1626 = vrot.lane.b32.xlu1 %v4073_v49, %s4225_s4 }
0x128e   :  { %v1528_v48 = vpop.permute.xlu0 %1527 }
0x128f   :  { %v1530_v56 = vmul.f32 %v4067_v31, %v1528_v48 }
0x1291   :  { %v4622_v53 = vpack.c.bf16 %v1530_v56, %v1530_v56 }
0x1293   :  { %v1652_v57 = vrot.slane %v4622_v53, 2 }
0x1294   :  { %v1627_v58 = vpop.permute.xlu1 %1626 }
0x1295   :  { %v1629_v0 = vmul.f32 %v4069_v42, %v1627_v58  ;;  %1653 = vrot.lane.b32.xlu0 %v1652_v57, %s4224_s25 }
0x1297   :  { %v4626_v5 = vpack.c.bf16 %v1629_v0, %v1629_v0 }
0x1299   :  { %v1752_v11 = vrot.slane %v4626_v5, 1 }
0x129b   :  { %1753 = vrot.lane.b32.xlu1 %v1752_v11, %s4224_s25 }
0x1307   :  { %v1654_v13 = vpop.permute.xlu0 %1653 }
0x1308   :  { %3807 = vmatmul.mubr.msk.bf16.vlgmr.msra.gmra.mxu0 %vm267_vm3, %v1654_v13 }
0x1309   :  { %3819 = vmatpush3.bf16.msra.mxu0 %v4634_v7  ;;  %3822 = vmatprep.mubr.msk.bf16.mxu0 %vm4223_vm2, %v4222_v1 }
0x130a   :  { %3820 = vmatprep.subr.bf16.mxu0 %v4222_v1 }
0x130d   :  { %v1754_v15 = vpop.permute.xlu1 %1753  ;;  %3821 = vmatpush3.bf16.msra.mxu0 %v4643_v16 }
0x130e   :  { %3815 = vmatmul.mubr.msk.bf16.vlgmr.msra.gmra.mxu1 %vm267_vm3, %v1754_v15  ;;  %3834 = vmatprep.subr.bf16.mxu0 %v4222_v1 }
0x130f   :  { %3827 = vmatpush3.bf16.msra.mxu1 %v4651_v9  ;;  %3830 = vmatprep.mubr.msk.bf16.mxu1 %vm4223_vm2, %v4222_v1 }
0x1310   :  { %3828 = vmatprep.subr.bf16.mxu1 %v4222_v1 }
0x1313   :  { %3829 = vmatpush3.bf16.msra.mxu1 %v4660_v18 }
0x1314   :  { %3842 = vmatprep.subr.bf16.mxu1 %v4222_v1 }
0x13c8   :  { %v1692_v20 = vpop.f32.mrf.mxu0 }
0x13c9   :  { %v1699_v22 = vrot.slane %v1692_v20, 2 }
0x13ca   :  { %v3808_v23 = vpop.f32.mrf.mxu0 }
0x13cb   :  { %v1701_v8 = vadd.f32 %v1699_v22, %v4371_v29 }
0x13cc   :  { %v1695_v25 = vpop.f32.mrf.mxu0 }
0x13cd   :  { %4074 = vtanh.f32 %v1701_v8  ;;  %v3524_v38 = vmul.f32 -1.442695, %v1701_v8 }
0x13ce   :  { %v3809_v27 = vpop.f32.mrf.mxu0  ;;  %v1792_v28 = vpop.f32.mrf.mxu1 }
0x13cf   :  { %v1798_v30 = vadd.f32 %v1792_v28, %v4365_v21 }
0x13d0   :  { %v3816_v10 = vpop.f32.mrf.mxu1 }
0x13d1   :  { %4076 = vtanh.f32 %v1798_v30  ;;  %v3527_v39 = vmul.f32 -1.442695, %v1798_v30 }
0x13d2   :  { %v1795_v33 = vpop.f32.mrf.mxu1  ;;  %4078 = vpow2.f32 %v3524_v38 }
0x13d3   :  { %4080 = vpow2.f32 %v3527_v39 }
0x13d4   :  { %v3817_v34 = vpop.f32.mrf.mxu1 }
0x13da   :  { %v4075_v35 = vpop.eup %4074 }
0x13db   :  { %1714 = vrot.lane.b32.xlu0 %v4075_v35, %s4225_s4 }
0x13de   :  { %v4077_v37 = vpop.eup %4076 }
0x13df   :  { %1811 = vrot.lane.b32.xlu1 %v4077_v37, %s4225_s4  ;;  %v4079_v29 = vpop.eup %4078 }
0x13e0   :  { %v1705_v31 = vadd.f32 1.0, %v4079_v29  ;;  %v4081_v40 = vpop.eup %4080 }
0x13e1   :  { %v1802_v41 = vadd.f32 1.0, %v4081_v40 }
0x13e2   :  { %4082 = vrcp.f32 %v1705_v31 }
0x13e3   :  { %4084 = vrcp.f32 %v1802_v41 }
0x13ef   :  { %v4083_v21 = vpop.eup %4082 }
0x13f0   :  { %v4085_v43 = vpop.eup %4084  ;;  %v1712_v50 = vmul.f32 %v4083_v21, %v1710_v46 }
0x13f1   :  { %v1809_v49 = vmul.f32 %v4085_v43, %v1807_v54 }
0x144d   :  { %v1715_v42 = vpop.permute.xlu0 %1714 }
0x144e   :  { %v1717_v36 = vmul.f32 %v4083_v21, %v1715_v42 }
0x1450   :  { %1719 = vrot.lane.b32.xlu0 %v1717_v36, %s4224_s25 }
0x1451   :  { %v1812_v44 = vpop.permute.xlu1 %1811 }
0x1452   :  { %v1814_v45 = vmul.f32 %v4085_v43, %v1812_v44 }
0x1454   :  { %1816 = vrot.lane.b32.xlu1 %v1814_v45, %s4224_s25 }
0x14c2   :  { %v1720_v51 = vpop.permute.xlu0 %1719 }
0x14c3   :  { %v4672_v59 = vadd.f32 %v1720_v51, %v1712_v50 }
0x14c5   :  { %4086 = vtanh.f32 %v4672_v59  ;;  %v1902_v54 = vrot.slane %v4672_v59, 6 }
0x14c6   :  { %v1817_v48 = vpop.permute.xlu1 %1816 }
0x14c7   :  { %v4675_v56 = vadd.f32 %v1817_v48, %v1809_v49 }
0x14c9   :  { %4088 = vtanh.f32 %v4675_v56 }
0x14d2   :  { %v4087_v57 = vpop.eup %4086 }
0x14d3   :  { %1725 = vrot.lane.b32.xlu0 %v4087_v57, %s4225_s4  ;;  %v1999_v57 = vrot.slane %v4675_v56, 2 }
0x14d6   :  { %v4089_v58 = vpop.eup %4088 }
0x14d7   :  { %1822 = vrot.lane.b32.xlu1 %v4089_v58, %s4225_s4 }
0x1545   :  { %v1726_v47 = vpop.permute.xlu0 %1725 }
0x1546   :  { %v1728_v0 = vmul.f32 %v4083_v21, %v1726_v47 }
0x1548   :  { %v4680_v11 = vpack.c.bf16 %v1728_v0, %v1728_v0 }
0x1549   :  { %v1823_v52 = vpop.permute.xlu1 %1822 }
0x154a   :  { %v1825_v13 = vmul.f32 %v4085_v43, %v1823_v52  ;;  %v1847_v15 = vrot.slane %v4680_v11, 3 }
0x154c   :  { %v4683_v20 = vpack.c.bf16 %v1825_v13, %v1825_v13  ;;  %1848 = vrot.lane.b32.xlu0 %v1847_v15, %s4224_s25 }
0x154e   :  { %1942 = vrot.lane.b32.xlu1 %v4683_v20, %s4224_s25 }
0x15be   :  { %v1849_v22 = vpop.permute.xlu0 %1848 }
0x15bf   :  { %3823 = vmatmul.mubr.msk.bf16.vlgmr.msra.gmra.mxu0 %vm267_vm3, %v1849_v22 }
0x15c0   :  { %v1943_v23 = vpop.permute.xlu1 %1942  ;;  %3835 = vmatpush3.bf16.msra.mxu0 %v4634_v7  ;;  %3838 = vmatprep.mubr.msk.bf16.mxu0 %vm4223_vm2, %v4222_v1 }
0x15c1   :  { %3831 = vmatmul.mubr.msk.bf16.vlgmr.msra.gmra.mxu1 %vm267_vm3, %v1943_v23  ;;  %3836 = vmatprep.subr.bf16.mxu0 %v4222_v1 }
0x15c2   :  { %3843 = vmatpush3.bf16.msra.mxu1 %v4651_v9  ;;  %3846 = vmatprep.mubr.msk.bf16.mxu1 %vm4223_vm2, %v4222_v1 }
0x15c3   :  { %3844 = vmatprep.subr.bf16.mxu1 %v4222_v1 }
0x15c4   :  { %3837 = vmatpush3.bf16.msra.mxu0 %v4643_v16 }
0x15c5   :  { %3850 = vmatprep.subr.bf16.mxu0 %v4222_v1 }
0x15c6   :  { %3845 = vmatpush3.bf16.msra.mxu1 %v4660_v18 }
0x15c7   :  { %3858 = vmatprep.subr.bf16.mxu1 %v4222_v1 }
0x167f   :  { %v1887_v8 = vpop.f32.mrf.mxu0 }
0x1680   :  { %v1893_v25 = vadd.f32 %v1887_v8, %v4363_v19 }
0x1681   :  { %v3824_v27 = vpop.f32.mrf.mxu0  ;;  %v1981_v28 = vpop.f32.mrf.mxu1 }
0x1682   :  { %4090 = vtanh.f32 %v1893_v25  ;;  %v1988_v30 = vrot.slane %v1981_v28, 2  ;;  %v3530_v31 = vmul.f32 -1.442695, %v1893_v25 }
0x1683   :  { %v1890_v10 = vpop.f32.mrf.mxu0  ;;  %v3832_v33 = vpop.f32.mrf.mxu1 }
0x1684   :  { %v1990_v34 = vadd.f32 %v1988_v30, %v4375_v32 }
0x1685   :  { %v3825_v35 = vpop.f32.mrf.mxu0  ;;  %v1984_v37 = vpop.f32.mrf.mxu1 }
0x1686   :  { %4092 = vtanh.f32 %v1990_v34  ;;  %v3533_v40 = vmul.f32 -1.442695, %v1990_v34 }
0x1687   :  { %v3833_v38 = vpop.f32.mrf.mxu1  ;;  %4094 = vpow2.f32 %v3530_v31 }
0x1688   :  { %4096 = vpow2.f32 %v3533_v40 }
0x168f   :  { %v4091_v39 = vpop.eup %4090 }
0x1690   :  { %1906 = vrot.lane.b32.xlu0 %v4091_v39, %s4225_s4 }
0x1693   :  { %v4093_v29 = vpop.eup %4092 }
0x1694   :  { %2003 = vrot.lane.b32.xlu1 %v4093_v29, %s4225_s4  ;;  %v4095_v41 = vpop.eup %4094 }
0x1695   :  { %v1897_v21 = vadd.f32 1.0, %v4095_v41  ;;  %v4097_v42 = vpop.eup %4096 }
0x1696   :  { %v1994_v36 = vadd.f32 1.0, %v4097_v42 }
0x1697   :  { %4098 = vrcp.f32 %v1897_v21 }
0x1698   :  { %4100 = vrcp.f32 %v1994_v36 }
0x16a4   :  { %v4099_v43 = vpop.eup %4098 }
0x16a5   :  { %v4101_v46 = vpop.eup %4100  ;;  %v1904_v49 = vmul.f32 %v4099_v43, %v1902_v54 }
0x16a6   :  { %v2001_v47 = vmul.f32 %v4101_v46, %v1999_v57 }
0x1702   :  { %v1907_v44 = vpop.permute.xlu0 %1906 }
0x1703   :  { %v1909_v45 = vmul.f32 %v4099_v43, %v1907_v44 }
0x1705   :  { %1911 = vrot.lane.b32.xlu0 %v1909_v45, %s4224_s25 }
0x1706   :  { %v2004_v50 = vpop.permute.xlu1 %2003 }
0x1707   :  { %v2006_v51 = vmul.f32 %v4101_v46, %v2004_v50 }
0x1709   :  { %2008 = vrot.lane.b32.xlu1 %v2006_v51, %s4224_s25 }
0x1777   :  { %v1912_v48 = vpop.permute.xlu0 %1911 }
0x1778   :  { %v4710_v58 = vadd.f32 %v1912_v48, %v1904_v49 }
0x177a   :  { %4102 = vtanh.f32 %v4710_v58 }
0x177b   :  { %v2009_v0 = vpop.permute.xlu1 %2008 }
0x177c   :  { %v4713_v52 = vadd.f32 %v2009_v0, %v2001_v47 }
0x177e   :  { %4104 = vtanh.f32 %v4713_v52 }
0x1787   :  { %v4103_v13 = vpop.eup %4102 }
0x1788   :  { %1917 = vrot.lane.b32.xlu0 %v4103_v13, %s4225_s4  ;;  %v2098_v13 = vrot.slane %v4710_v58, 6 }
0x178b   :  { %v4105_v15 = vpop.eup %4104 }
0x178c   :  { %2014 = vrot.lane.b32.xlu1 %v4105_v15, %s4225_s4 }
0x17fa   :  { %v1918_v59 = vpop.permute.xlu0 %1917 }
0x17fb   :  { %v1920_v22 = vmul.f32 %v4099_v43, %v1918_v59 }
0x17fd   :  { %v4718_v23 = vpack.c.bf16 %v1920_v22, %v1920_v22 }
0x17fe   :  { %v2015_v56 = vpop.permute.xlu1 %2014 }
0x17ff   :  { %v2017_v8 = vmul.f32 %v4101_v46, %v2015_v56  ;;  %2041 = vrot.lane.b32.xlu0 %v4718_v23, %s4224_s25  ;;  %v2197_v56 = vrot.slane %v4713_v52, 2 }
0x1801   :  { %v4722_v25 = vpack.c.bf16 %v2017_v8, %v2017_v8 }
0x1803   :  { %v2139_v27 = vrot.slane %v4722_v25, 3 }
0x1805   :  { %2140 = vrot.lane.b32.xlu1 %v2139_v27, %s4224_s25 }
0x1871   :  { %v2042_v28 = vpop.permute.xlu0 %2041 }
0x1872   :  { %3839 = vmatmul.mubr.msk.bf16.vlgmr.msra.gmra.mxu0 %vm267_vm3, %v2042_v28 }
0x1873   :  { %3851 = vmatpush3.bf16.msra.mxu0 %v4634_v7  ;;  %3854 = vmatprep.mubr.msk.bf16.mxu0 %vm4223_vm2, %v4222_v1 }
0x1874   :  { %3852 = vmatprep.subr.bf16.mxu0 %v4222_v1 }
0x1877   :  { %v2141_v30 = vpop.permute.xlu1 %2140  ;;  %3853 = vmatpush3.bf16.msra.mxu0 %v4643_v16 }
0x1878   :  { %3847 = vmatmul.mubr.msk.bf16.vlgmr.msra.gmra.mxu1 %vm267_vm3, %v2141_v30  ;;  %3866 = vmatprep.subr.bf16.mxu0 %v4222_v1 }
0x1879   :  { %3859 = vmatpush3.bf16.msra.mxu1 %v4651_v9  ;;  %3862 = vmatprep.mubr.msk.bf16.mxu1 %vm4223_vm2, %v4222_v1 }
0x187a   :  { %3860 = vmatprep.subr.bf16.mxu1 %v4222_v1 }
0x187d   :  { %3861 = vmatpush3.bf16.msra.mxu1 %v4660_v18 }
0x187e   :  { %3874 = vmatprep.subr.bf16.mxu1 %v4222_v1 }
0x1932   :  { %v2080_v10 = vpop.f32.mrf.mxu0 }
0x1933   :  { %v2087_v33 = vrot.slane %v2080_v10, 6 }
0x1934   :  { %v3840_v34 = vpop.f32.mrf.mxu0 }
0x1935   :  { %v2089_v35 = vadd.f32 %v2087_v33, %v4363_v19 }
0x1936   :  { %v2083_v37 = vpop.f32.mrf.mxu0 }
0x1937   :  { %4106 = vtanh.f32 %v2089_v35  ;;  %v3536_v43 = vmul.f32 -1.442695, %v2089_v35 }
0x1938   :  { %v3841_v38 = vpop.f32.mrf.mxu0  ;;  %v2179_v39 = vpop.f32.mrf.mxu1 }
0x1939   :  { %v2186_v29 = vrot.slane %v2179_v39, 4 }
0x193a   :  { %v3848_v31 = vpop.f32.mrf.mxu1 }
0x193b   :  { %v2188_v40 = vadd.f32 %v2186_v29, %v4375_v32 }
0x193c   :  { %v2182_v41 = vpop.f32.mrf.mxu1 }
0x193d   :  { %4108 = vtanh.f32 %v2188_v40  ;;  %v3539_v44 = vmul.f32 -1.442695, %v2188_v40 }
0x193e   :  { %v3849_v21 = vpop.f32.mrf.mxu1  ;;  %4110 = vpow2.f32 %v3536_v43 }
0x193f   :  { %4112 = vpow2.f32 %v3539_v44 }
0x1944   :  { %v4107_v42 = vpop.eup %4106 }
0x1945   :  { %2102 = vrot.lane.b32.xlu0 %v4107_v42, %s4225_s4 }
0x194a   :  { %v4109_v36 = vpop.eup %4108 }
0x194b   :  { %2201 = vrot.lane.b32.xlu1 %v4109_v36, %s4225_s4  ;;  %v4111_v45 = vpop.eup %4110 }
0x194c   :  { %v2093_v46 = vadd.f32 1.0, %v4111_v45  ;;  %v4113_v50 = vpop.eup %4112 }
0x194d   :  { %v2192_v51 = vadd.f32 1.0, %v4113_v50 }
0x194e   :  { %4114 = vrcp.f32 %v2093_v46 }
0x194f   :  { %4116 = vrcp.f32 %v2192_v51 }
0x195b   :  { %v4115_v54 = vpop.eup %4114 }
0x195c   :  { %v4117_v57 = vpop.eup %4116  ;;  %v2100_v15 = vmul.f32 %v4115_v54, %v2098_v13 }
0x195d   :  { %v2199_v8 = vmul.f32 %v4117_v57, %v2197_v56 }
0x19b7   :  { %v2103_v49 = vpop.permute.xlu0 %2102 }
0x19b8   :  { %v2105_v48 = vmul.f32 %v4115_v54, %v2103_v49 }
0x19ba   :  { %2107 = vrot.lane.b32.xlu0 %v2105_v48, %s4224_s25 }
0x19bd   :  { %v2202_v47 = vpop.permute.xlu1 %2201 }
0x19be   :  { %v2204_v0 = vmul.f32 %v4117_v57, %v2202_v47 }
0x19c0   :  { %2206 = vrot.lane.b32.xlu1 %v2204_v0, %s4224_s25 }
0x1a2c   :  { %v2108_v59 = vpop.permute.xlu0 %2107 }
0x1a2d   :  { %v4747_v22 = vadd.f32 %v2108_v59, %v2100_v15 }
0x1a2f   :  { %4118 = vtanh.f32 %v4747_v22 }
0x1a32   :  { %v2207_v27 = vpop.permute.xlu1 %2206 }
0x1a33   :  { %v4751_v28 = vadd.f32 %v2207_v27, %v2199_v8 }
0x1a35   :  { %4120 = vtanh.f32 %v4751_v28 }
0x1a3c   :  { %v4119_v30 = vpop.eup %4118 }
0x1a3d   :  { %2113 = vrot.lane.b32.xlu0 %v4119_v30, %s4225_s4 }
0x1a42   :  { %v4121_v10 = vpop.eup %4120 }
0x1a43   :  { %2212 = vrot.lane.b32.xlu1 %v4121_v10, %s4225_s4 }
0x1aaf   :  { %v2114_v58 = vpop.permute.xlu0 %2113 }
0x1ab0   :  { %v2116_v33 = vmul.f32 %v4115_v54, %v2114_v58 }
0x1ab2   :  { %v4756_v34 = vpack.c.bf16 %v2116_v33, %v2116_v33  ;;  %v2296_v33 = vrot.slane %v4747_v22, 6 }
0x1ab4   :  { %v2238_v52 = vrot.slane %v4756_v34, 1 }
0x1ab5   :  { %v2213_v35 = vpop.permute.xlu1 %2212 }
0x1ab6   :  { %v2215_v37 = vmul.f32 %v4117_v57, %v2213_v35  ;;  %2239 = vrot.lane.b32.xlu0 %v2238_v52, %s4224_s25 }
0x1ab8   :  { %v4760_v38 = vpack.c.bf16 %v2215_v37, %v2215_v37 }
0x1aba   :  { %v2337_v39 = vrot.slane %v4760_v38, 2 }
0x1abc   :  { %2338 = vrot.lane.b32.xlu1 %v2337_v39, %s4224_s25  ;;  %v2395_v39 = vrot.slane %v4751_v28, 2 }
0x1b28   :  { %v2240_v29 = vpop.permute.xlu0 %2239 }
0x1b29   :  { %3855 = vmatmul.mubr.msk.bf16.vlgmr.msra.gmra.mxu0 %vm267_vm3, %v2240_v29 }
0x1b2a   :  { %3867 = vmatpush3.bf16.msra.mxu0 %v4634_v7  ;;  %3870 = vmatprep.mubr.msk.bf16.mxu0 %vm4223_vm2, %v4222_v1 }
0x1b2b   :  { %3868 = vmatprep.subr.bf16.mxu0 %v4222_v1 }
0x1b2e   :  { %v2339_v31 = vpop.permute.xlu1 %2338  ;;  %3869 = vmatpush3.bf16.msra.mxu0 %v4643_v16 }
0x1b2f   :  { %3863 = vmatmul.mubr.msk.bf16.vlgmr.msra.gmra.mxu1 %vm267_vm3, %v2339_v31  ;;  %3882 = vmatprep.subr.bf16.mxu0 %v4222_v1 }
0x1b30   :  { %3875 = vmatpush3.bf16.msra.mxu1 %v4651_v9  ;;  %3878 = vmatprep.mubr.msk.bf16.mxu1 %vm4223_vm2, %v4222_v1 }
0x1b31   :  { %3876 = vmatprep.subr.bf16.mxu1 %v4222_v1 }
0x1b34   :  { %3877 = vmatpush3.bf16.msra.mxu1 %v4660_v18 }
0x1b35   :  { %3890 = vmatprep.subr.bf16.mxu1 %v4222_v1 }
0x1be9   :  { %v2278_v40 = vpop.f32.mrf.mxu0 }
0x1bea   :  { %v2285_v41 = vrot.slane %v2278_v40, 4 }
0x1beb   :  { %v3856_v21 = vpop.f32.mrf.mxu0 }
0x1bec   :  { %v2287_v42 = vadd.f32 %v2285_v41, %v4363_v19 }
0x1bed   :  { %v2281_v36 = vpop.f32.mrf.mxu0 }
0x1bee   :  { %4122 = vtanh.f32 %v2287_v42  ;;  %v3542_v57 = vmul.f32 -1.442695, %v2287_v42 }
0x1bef   :  { %v3857_v43 = vpop.f32.mrf.mxu0  ;;  %v2377_v44 = vpop.f32.mrf.mxu1 }
0x1bf0   :  { %v2384_v45 = vrot.slane %v2377_v44, 6 }
0x1bf1   :  { %v3864_v46 = vpop.f32.mrf.mxu1 }
0x1bf2   :  { %v2386_v50 = vadd.f32 %v2384_v45, %v4375_v32 }
0x1bf3   :  { %v2380_v51 = vpop.f32.mrf.mxu1 }
0x1bf4   :  { %4124 = vtanh.f32 %v2386_v50  ;;  %v3545_v47 = vmul.f32 -1.442695, %v2386_v50 }
0x1bf5   :  { %v3865_v54 = vpop.f32.mrf.mxu1  ;;  %4126 = vpow2.f32 %v3542_v57 }
0x1bf6   :  { %4128 = vpow2.f32 %v3545_v47 }
0x1bfb   :  { %v4123_v49 = vpop.eup %4122 }
0x1bfc   :  { %2300 = vrot.lane.b32.xlu0 %v4123_v49, %s4225_s4 }
0x1c01   :  { %v4125_v48 = vpop.eup %4124 }
0x1c02   :  { %2399 = vrot.lane.b32.xlu1 %v4125_v48, %s4225_s4  ;;  %v4127_v0 = vpop.eup %4126 }
0x1c03   :  { %v2291_v13 = vadd.f32 1.0, %v4127_v0  ;;  %v4129_v15 = vpop.eup %4128 }
0x1c04   :  { %v2390_v59 = vadd.f32 1.0, %v4129_v15 }
0x1c05   :  { %4130 = vrcp.f32 %v2291_v13 }
0x1c06   :  { %4132 = vrcp.f32 %v2390_v59 }
0x1c12   :  { %v4131_v56 = vpop.eup %4130 }
0x1c13   :  { %v4133_v30 = vpop.eup %4132  ;;  %v2298_v52 = vmul.f32 %v4131_v56, %v2296_v33 }
0x1c14   :  { %v2397_v29 = vmul.f32 %v4133_v30, %v2395_v39 }
0x1c6e   :  { %v2301_v8 = vpop.permute.xlu0 %2300 }
0x1c6f   :  { %v2303_v27 = vmul.f32 %v4131_v56, %v2301_v8 }
0x1c71   :  { %2305 = vrot.lane.b32.xlu0 %v2303_v27, %s4224_s25 }
0x1c74   :  { %v2400_v10 = vpop.permute.xlu1 %2399 }
0x1c75   :  { %v2402_v58 = vmul.f32 %v4133_v30, %v2400_v10 }
0x1c77   :  { %2404 = vrot.lane.b32.xlu1 %v2402_v58, %s4224_s25 }
0x1ce3   :  { %v2306_v35 = vpop.permute.xlu0 %2305 }
0x1ce4   :  { %v4785_v37 = vadd.f32 %v2306_v35, %v2298_v52 }
0x1ce6   :  { %4134 = vtanh.f32 %v4785_v37 }
0x1ce9   :  { %v2405_v31 = vpop.permute.xlu1 %2404 }
0x1cea   :  { %v4789_v40 = vadd.f32 %v2405_v31, %v2397_v29 }
0x1cec   :  { %4136 = vtanh.f32 %v4789_v40 }
0x1cf3   :  { %v4135_v41 = vpop.eup %4134 }
0x1cf4   :  { %2311 = vrot.lane.b32.xlu0 %v4135_v41, %s4225_s4 }
0x1cf9   :  { %v4137_v21 = vpop.eup %4136 }
0x1cfa   :  { %2410 = vrot.lane.b32.xlu1 %v4137_v21, %s4225_s4 }
0x1d66   :  { %v2312_v22 = vpop.permute.xlu0 %2311 }
0x1d67   :  { %v2314_v42 = vmul.f32 %v4131_v56, %v2312_v22  ;;  %v2494_v22 = vrot.slane %v4785_v37, 6 }
0x1d69   :  { %v4794_v36 = vpack.c.bf16 %v2314_v42, %v2314_v42 }
0x1d6b   :  { %v2436_v28 = vrot.slane %v4794_v36, 2 }
0x1d6c   :  { %v2411_v43 = vpop.permute.xlu1 %2410 }
0x1d6d   :  { %v2413_v44 = vmul.f32 %v4133_v30, %v2411_v43  ;;  %2437 = vrot.lane.b32.xlu0 %v2436_v28, %s4224_s25  ;;  %v2591_v43 = vrot.slane %v4789_v40, 2 }
0x1d6f   :  { %v4798_v45 = vpack.c.bf16 %v2413_v44, %v2413_v44 }
0x1d71   :  { %v2536_v46 = vrot.slane %v4798_v45, 1 }
0x1d73   :  { %2537 = vrot.lane.b32.xlu1 %v2536_v46, %s4224_s25 }
0x1ddf   :  { %v2438_v50 = vpop.permute.xlu0 %2437 }
0x1de0   :  { %3871 = vmatmul.mubr.msk.bf16.vlgmr.msra.gmra.mxu0 %vm267_vm3, %v2438_v50 }
0x1de1   :  { %3883 = vmatpush3.bf16.msra.mxu0 %v4634_v7  ;;  %3886 = vmatprep.mubr.msk.bf16.mxu0 %vm4223_vm2, %v4222_v1 }
0x1de2   :  { %3884 = vmatprep.subr.bf16.mxu0 %v4222_v1 }
0x1de5   :  { %v2538_v51 = vpop.permute.xlu1 %2537  ;;  %3885 = vmatpush3.bf16.msra.mxu0 %v4643_v16 }
0x1de6   :  { %3879 = vmatmul.mubr.msk.bf16.vlgmr.msra.gmra.mxu1 %vm267_vm3, %v2538_v51  ;;  %3898 = vmatprep.subr.bf16.mxu0 %v4222_v1 }
0x1de7   :  { %3891 = vmatpush3.bf16.msra.mxu1 %v4651_v9  ;;  %3894 = vmatprep.mubr.msk.bf16.mxu1 %vm4223_vm2, %v4222_v1 }
0x1de8   :  { %3892 = vmatprep.subr.bf16.mxu1 %v4222_v1 }
0x1deb   :  { %3893 = vmatpush3.bf16.msra.mxu1 %v4660_v18 }
0x1dec   :  { %3906 = vmatprep.subr.bf16.mxu1 %v4222_v1 }
0x1ea0   :  { %v2476_v54 = vpop.f32.mrf.mxu0 }
0x1ea1   :  { %v2483_v49 = vrot.slane %v2476_v54, 2 }
0x1ea2   :  { %v3872_v48 = vpop.f32.mrf.mxu0 }
0x1ea3   :  { %v2485_v57 = vadd.f32 %v2483_v49, %v4363_v19 }
0x1ea4   :  { %v2479_v47 = vpop.f32.mrf.mxu0 }
0x1ea5   :  { %4138 = vtanh.f32 %v2485_v57  ;;  %v3548_v10 = vmul.f32 -1.442695, %v2485_v57 }
0x1ea6   :  { %v3873_v0 = vpop.f32.mrf.mxu0  ;;  %v2576_v13 = vpop.f32.mrf.mxu1 }
0x1ea7   :  { %v2582_v15 = vadd.f32 %v2576_v13, %v4375_v32 }
0x1ea8   :  { %v3880_v59 = vpop.f32.mrf.mxu1 }
0x1ea9   :  { %4140 = vtanh.f32 %v2582_v15  ;;  %v3551_v58 = vmul.f32 -1.442695, %v2582_v15 }
0x1eaa   :  { %v2579_v56 = vpop.f32.mrf.mxu1  ;;  %4142 = vpow2.f32 %v3548_v10 }
0x1eab   :  { %4144 = vpow2.f32 %v3551_v58 }
0x1eac   :  { %v3881_v8 = vpop.f32.mrf.mxu1 }
0x1eb2   :  { %v4139_v27 = vpop.eup %4138 }
0x1eb3   :  { %2498 = vrot.lane.b32.xlu0 %v4139_v27, %s4225_s4 }
0x1eb6   :  { %v4141_v30 = vpop.eup %4140 }
0x1eb7   :  { %2595 = vrot.lane.b32.xlu1 %v4141_v30, %s4225_s4  ;;  %v4143_v19 = vpop.eup %4142 }
0x1eb8   :  { %v2489_v33 = vadd.f32 1.0, %v4143_v19  ;;  %v4145_v52 = vpop.eup %4144 }
0x1eb9   :  { %v2586_v35 = vadd.f32 1.0, %v4145_v52 }
0x1eba   :  { %4146 = vrcp.f32 %v2489_v33 }
0x1ebb   :  { %4148 = vrcp.f32 %v2586_v35 }
0x1ec7   :  { %v4147_v32 = vpop.eup %4146 }
0x1ec8   :  { %v4149_v31 = vpop.eup %4148  ;;  %v2496_v42 = vmul.f32 %v4147_v32, %v2494_v22 }
0x1ec9   :  { %v2593_v46 = vmul.f32 %v4149_v31, %v2591_v43 }
0x1f25   :  { %v2499_v39 = vpop.permute.xlu0 %2498 }
0x1f26   :  { %v2501_v29 = vmul.f32 %v4147_v32, %v2499_v39 }
0x1f28   :  { %2503 = vrot.lane.b32.xlu0 %v2501_v29, %s4224_s25 }
0x1f29   :  { %v2596_v41 = vpop.permute.xlu1 %2595 }
0x1f2a   :  { %v2598_v21 = vmul.f32 %v4149_v31, %v2596_v41 }
0x1f2c   :  { %2600 = vrot.lane.b32.xlu1 %v2598_v21, %s4224_s25 }
0x1f9a   :  { %v2504_v28 = vpop.permute.xlu0 %2503 }
0x1f9b   :  { %v4824_v44 = vadd.f32 %v2504_v28, %v2496_v42 }
0x1f9d   :  { %4150 = vtanh.f32 %v4824_v44 }
0x1f9e   :  { %v2601_v50 = vpop.permute.xlu1 %2600 }
0x1f9f   :  { %v4827_v51 = vadd.f32 %v2601_v50, %v2593_v46 }
0x1fa1   :  { %4152 = vtanh.f32 %v4827_v51 }
0x1faa   :  { %v4151_v54 = vpop.eup %4150 }
0x1fab   :  { %2509 = vrot.lane.b32.xlu0 %v4151_v54, %s4225_s4 }
0x1fae   :  { %v4153_v49 = vpop.eup %4152 }
0x1faf   :  { %2606 = vrot.lane.b32.xlu1 %v4153_v49, %s4225_s4 }
0x201d   :  { %v2510_v37 = vpop.permute.xlu0 %2509 }
0x201e   :  { %v2512_v48 = vmul.f32 %v4147_v32, %v2510_v37 }
0x2020   :  { %v4832_v57 = vpack.c.bf16 %v2512_v48, %v2512_v48  ;;  %v2686_v48 = vrot.slane %v4824_v44, 6 }
0x2021   :  { %v2607_v40 = vpop.permute.xlu1 %2606 }
0x2022   :  { %v2631_v47 = vrot.slane %v4832_v57, 3  ;;  %v2609_v0 = vmul.f32 %v4149_v31, %v2607_v40 }
0x2024   :  { %v4835_v13 = vpack.c.bf16 %v2609_v0, %v2609_v0  ;;  %2632 = vrot.lane.b32.xlu0 %v2631_v47, %s4224_s25  ;;  %v2783_v0 = vrot.slane %v4827_v51, 2 }
0x2026   :  { %2726 = vrot.lane.b32.xlu1 %v4835_v13, %s4224_s25 }
0x2096   :  { %v2633_v15 = vpop.permute.xlu0 %2632 }
0x2097   :  { %3887 = vmatmul.mubr.msk.bf16.vlgmr.msra.gmra.mxu0 %vm267_vm3, %v2633_v15 }
0x2098   :  { %v2727_v59 = vpop.permute.xlu1 %2726  ;;  %3899 = vmatpush3.bf16.msra.mxu0 %v4634_v7  ;;  %3902 = vmatprep.mubr.msk.bf16.mxu0 %vm4223_vm2, %v4222_v1 }
0x2099   :  { %3895 = vmatmul.mubr.msk.bf16.vlgmr.msra.gmra.mxu1 %vm267_vm3, %v2727_v59  ;;  %3900 = vmatprep.subr.bf16.mxu0 %v4222_v1 }
0x209a   :  { %3907 = vmatpush3.bf16.msra.mxu1 %v4651_v9  ;;  %3910 = vmatprep.mubr.msk.bf16.mxu1 %vm4223_vm2, %v4222_v1 }
0x209b   :  { %3908 = vmatprep.subr.bf16.mxu1 %v4222_v1 }
0x209c   :  { %3901 = vmatpush3.bf16.msra.mxu0 %v4643_v16 }
0x209d   :  { %3914 = vmatprep.subr.bf16.mxu0 %v4222_v1 }
0x209e   :  { %3909 = vmatpush3.bf16.msra.mxu1 %v4660_v18 }
0x209f   :  { %3922 = vmatprep.subr.bf16.mxu1 %v4222_v1 }
0x2157   :  { %v2671_v56 = vpop.f32.mrf.mxu0 }
0x2158   :  { %v2677_v8 = vadd.f32 %v2671_v56, %v4369_v26 }
0x2159   :  { %v3888_v27 = vpop.f32.mrf.mxu0  ;;  %v2765_v30 = vpop.f32.mrf.mxu1 }
0x215a   :  { %4154 = vtanh.f32 %v2677_v8  ;;  %v2772_v10 = vrot.slane %v2765_v30, 2  ;;  %v3554_v31 = vmul.f32 -1.442695, %v2677_v8 }
0x215b   :  { %v2674_v58 = vpop.f32.mrf.mxu0  ;;  %v3896_v19 = vpop.f32.mrf.mxu1 }
0x215c   :  { %v2774_v33 = vadd.f32 %v2772_v10, %v4367_v24 }
0x215d   :  { %v3889_v52 = vpop.f32.mrf.mxu0  ;;  %v2768_v35 = vpop.f32.mrf.mxu1 }
0x215e   :  { %4156 = vtanh.f32 %v2774_v33  ;;  %v3557_v41 = vmul.f32 -1.442695, %v2774_v33 }
0x215f   :  { %v3897_v32 = vpop.f32.mrf.mxu1  ;;  %4158 = vpow2.f32 %v3554_v31 }
0x2160   :  { %4160 = vpow2.f32 %v3557_v41 }
0x2167   :  { %v4155_v39 = vpop.eup %4154 }
0x2168   :  { %2690 = vrot.lane.b32.xlu0 %v4155_v39, %s4225_s4 }
0x216b   :  { %v4157_v29 = vpop.eup %4156 }
0x216c   :  { %2787 = vrot.lane.b32.xlu1 %v4157_v29, %s4225_s4  ;;  %v4159_v21 = vpop.eup %4158 }
0x216d   :  { %v2681_v22 = vadd.f32 1.0, %v4159_v21  ;;  %v4161_v42 = vpop.eup %4160 }
0x216e   :  { %v2778_v28 = vadd.f32 1.0, %v4161_v42 }
0x216f   :  { %4162 = vrcp.f32 %v2681_v22 }
0x2170   :  { %4164 = vrcp.f32 %v2778_v28 }
0x217c   :  { %v4163_v43 = vpop.eup %4162 }
0x217d   :  { %v4165_v54 = vpop.eup %4164  ;;  %v2688_v40 = vmul.f32 %v4163_v43, %v2686_v48 }
0x217e   :  { %v2785_v59 = vmul.f32 %v4165_v54, %v2783_v0 }
0x21da   :  { %v2691_v46 = vpop.permute.xlu0 %2690 }
0x21db   :  { %v2693_v50 = vmul.f32 %v4163_v43, %v2691_v46 }
0x21dd   :  { %2695 = vrot.lane.b32.xlu0 %v2693_v50, %s4224_s25 }
0x21de   :  { %v2788_v49 = vpop.permute.xlu1 %2787 }
0x21df   :  { %v2790_v37 = vmul.f32 %v4165_v54, %v2788_v49 }
0x21e1   :  { %2792 = vrot.lane.b32.xlu1 %v2790_v37, %s4224_s25 }
0x224f   :  { %v2696_v47 = vpop.permute.xlu0 %2695 }
0x2250   :  { %v4862_v15 = vadd.f32 %v2696_v47, %v2688_v40 }
0x2252   :  { %4166 = vtanh.f32 %v4862_v15 }
0x2253   :  { %v2793_v56 = vpop.permute.xlu1 %2792 }
0x2254   :  { %v4865_v8 = vadd.f32 %v2793_v56, %v2785_v59 }
0x2256   :  { %4168 = vtanh.f32 %v4865_v8 }
0x225f   :  { %v4167_v27 = vpop.eup %4166 }
0x2260   :  { %2701 = vrot.lane.b32.xlu0 %v4167_v27, %s4225_s4 }
0x2263   :  { %v4169_v30 = vpop.eup %4168 }
0x2264   :  { %2798 = vrot.lane.b32.xlu1 %v4169_v30, %s4225_s4 }
0x22d2   :  { %v2702_v44 = vpop.permute.xlu0 %2701 }
0x22d3   :  { %v2704_v10 = vmul.f32 %v4163_v43, %v2702_v44 }
0x22d5   :  { %v4870_v58 = vpack.c.bf16 %v2704_v10, %v2704_v10 }
0x22d6   :  { %v2799_v51 = vpop.permute.xlu1 %2798 }
0x22d7   :  { %v2801_v19 = vmul.f32 %v4165_v54, %v2799_v51  ;;  %2825 = vrot.lane.b32.xlu0 %v4870_v58, %s4224_s25 }
0x22d9   :  { %v4874_v33 = vpack.c.bf16 %v2801_v19, %v2801_v19 }
0x22db   :  { %v2923_v52 = vrot.slane %v4874_v33, 3 }
0x22dd   :  { %2924 = vrot.lane.b32.xlu1 %v2923_v52, %s4224_s25  ;;  %v2882_v52 = vrot.slane %v4862_v15, 6 }
0x2349   :  { %v2826_v35 = vpop.permute.xlu0 %2825 }
0x234a   :  { %3903 = vmatmul.mubr.msk.bf16.vlgmr.msra.gmra.mxu0 %vm267_vm3, %v2826_v35 }
0x234b   :  { %3915 = vmatpush3.bf16.msra.mxu0 %v4634_v7  ;;  %3918 = vmatprep.mubr.msk.bf16.mxu0 %vm4223_vm2, %v4222_v1 }
0x234c   :  { %3916 = vmatprep.subr.bf16.mxu0 %v4222_v1 }
0x234f   :  { %v2925_v32 = vpop.permute.xlu1 %2924  ;;  %3917 = vmatpush3.bf16.msra.mxu0 %v4643_v16 }
0x2350   :  { %3911 = vmatmul.mubr.msk.bf16.vlgmr.msra.gmra.mxu1 %vm267_vm3, %v2925_v32  ;;  %3930 = vmatprep.subr.bf16.mxu0 %v4222_v1 }
0x2351   :  { %3923 = vmatpush3.bf16.msra.mxu1 %v4651_v9  ;;  %3926 = vmatprep.mubr.msk.bf16.mxu1 %vm4223_vm2, %v4222_v1 }
0x2352   :  { %3924 = vmatprep.subr.bf16.mxu1 %v4222_v1 }
0x2355   :  { %3925 = vmatpush3.bf16.msra.mxu1 %v4660_v18 }
0x2356   :  { %3938 = vmatprep.subr.bf16.mxu1 %v4222_v1 }
0x240a   :  { %v2864_v39 = vpop.f32.mrf.mxu0 }
0x240b   :  { %v2871_v29 = vrot.slane %v2864_v39, 6 }
0x240c   :  { %v3904_v31 = vpop.f32.mrf.mxu0 }
0x240d   :  { %v2873_v41 = vadd.f32 %v2871_v29, %v4369_v26  ;;  %v2981_v29 = vrot.slane %v4865_v8, 2 }
0x240e   :  { %v2867_v21 = vpop.f32.mrf.mxu0 }
0x240f   :  { %4170 = vtanh.f32 %v2873_v41  ;;  %v3560_v48 = vmul.f32 -1.442695, %v2873_v41 }
0x2410   :  { %v3905_v22 = vpop.f32.mrf.mxu0  ;;  %v2963_v42 = vpop.f32.mrf.mxu1 }
0x2411   :  { %v2970_v28 = vrot.slane %v2963_v42, 4 }
0x2412   :  { %v3912_v43 = vpop.f32.mrf.mxu1 }
0x2413   :  { %v2972_v46 = vadd.f32 %v2970_v28, %v4367_v24 }
0x2414   :  { %v2966_v50 = vpop.f32.mrf.mxu1 }
0x2415   :  { %4172 = vtanh.f32 %v2972_v46  ;;  %v3563_v40 = vmul.f32 -1.442695, %v2972_v46 }
0x2416   :  { %v3913_v54 = vpop.f32.mrf.mxu1  ;;  %4174 = vpow2.f32 %v3560_v48 }
0x2417   :  { %4176 = vpow2.f32 %v3563_v40 }
0x241c   :  { %v4171_v49 = vpop.eup %4170 }
0x241d   :  { %2886 = vrot.lane.b32.xlu0 %v4171_v49, %s4225_s4 }
0x2422   :  { %v4173_v37 = vpop.eup %4172 }
0x2423   :  { %2985 = vrot.lane.b32.xlu1 %v4173_v37, %s4225_s4  ;;  %v4175_v47 = vpop.eup %4174 }
0x2424   :  { %v2877_v0 = vadd.f32 1.0, %v4175_v47  ;;  %v4177_v59 = vpop.eup %4176 }
0x2425   :  { %v2976_v56 = vadd.f32 1.0, %v4177_v59 }
0x2426   :  { %4178 = vrcp.f32 %v2877_v0 }
0x2427   :  { %4180 = vrcp.f32 %v2976_v56 }
0x2433   :  { %v4179_v27 = vpop.eup %4178 }
0x2434   :  { %v4181_v10 = vpop.eup %4180  ;;  %v2884_v35 = vmul.f32 %v4179_v27, %v2882_v52 }
0x2435   :  { %v2983_v31 = vmul.f32 %v4181_v10, %v2981_v29 }
0x248f   :  { %v2887_v30 = vpop.permute.xlu0 %2886 }
0x2490   :  { %v2889_v44 = vmul.f32 %v4179_v27, %v2887_v30 }
0x2492   :  { %2891 = vrot.lane.b32.xlu0 %v2889_v44, %s4224_s25 }
0x2495   :  { %v2986_v51 = vpop.permute.xlu1 %2985 }
0x2496   :  { %v2988_v19 = vmul.f32 %v4181_v10, %v2986_v51 }
0x2498   :  { %2990 = vrot.lane.b32.xlu1 %v2988_v19, %s4224_s25 }
0x2504   :  { %v2892_v32 = vpop.permute.xlu0 %2891 }
0x2505   :  { %v4899_v39 = vadd.f32 %v2892_v32, %v2884_v35 }
0x2507   :  { %4182 = vtanh.f32 %v4899_v39 }
0x250a   :  { %v2991_v41 = vpop.permute.xlu1 %2990 }
0x250b   :  { %v4903_v21 = vadd.f32 %v2991_v41, %v2983_v31 }
0x250d   :  { %4184 = vtanh.f32 %v4903_v21 }
0x2514   :  { %v4183_v22 = vpop.eup %4182 }
0x2515   :  { %2897 = vrot.lane.b32.xlu0 %v4183_v22, %s4225_s4 }
0x251a   :  { %v4185_v42 = vpop.eup %4184 }
0x251b   :  { %2996 = vrot.lane.b32.xlu1 %v4185_v42, %s4225_s4 }
0x2587   :  { %v2898_v15 = vpop.permute.xlu0 %2897 }
0x2588   :  { %v2900_v28 = vmul.f32 %v4179_v27, %v2898_v15 }
0x258a   :  { %v4908_v43 = vpack.c.bf16 %v2900_v28, %v2900_v28 }
0x258c   :  { %v3022_v8 = vrot.slane %v4908_v43, 1 }
0x258d   :  { %v2997_v46 = vpop.permute.xlu1 %2996 }
0x258e   :  { %v2999_v50 = vmul.f32 %v4181_v10, %v2997_v46  ;;  %3023 = vrot.lane.b32.xlu0 %v3022_v8, %s4224_s25  ;;  %v3080_v8 = vrot.slane %v4899_v39, 6 }
0x2590   :  { %v4912_v54 = vpack.c.bf16 %v2999_v50, %v2999_v50 }
0x2592   :  { %v3121_v49 = vrot.slane %v4912_v54, 2 }
0x2594   :  { %3122 = vrot.lane.b32.xlu1 %v3121_v49, %s4224_s25 }
0x2600   :  { %v3024_v37 = vpop.permute.xlu0 %3023 }
0x2601   :  { %3919 = vmatmul.mubr.msk.bf16.vlgmr.msra.gmra.mxu0 %vm267_vm3, %v3024_v37  ;;  %v3179_v37 = vrot.slane %v4903_v21, 2 }
0x2602   :  { %3931 = vmatpush3.bf16.msra.mxu0 %v4634_v7  ;;  %3934 = vmatprep.mubr.msk.bf16.mxu0 %vm4223_vm2, %v4222_v1 }
0x2603   :  { %3932 = vmatprep.subr.bf16.mxu0 %v4222_v1 }
0x2606   :  { %v3123_v48 = vpop.permute.xlu1 %3122  ;;  %3933 = vmatpush3.bf16.msra.mxu0 %v4643_v16 }
0x2607   :  { %3927 = vmatmul.mubr.msk.bf16.vlgmr.msra.gmra.mxu1 %vm267_vm3, %v3123_v48 }
0x2608   :  { %3939 = vmatpush3.bf16.msra.mxu1 %v4651_v9  ;;  %3942 = vmatprep.mubr.msk.bf16.mxu1 %vm4223_vm2, %v4222_v1 }
0x2609   :  { %3940 = vmatprep.subr.bf16.mxu1 %v4222_v1 }
0x260c   :  { %3941 = vmatpush3.bf16.msra.mxu1 %v4660_v18 }
0x26c1   :  { %v3062_v7 = vpop.f32.mrf.mxu0 }
0x26c2   :  { %v3069_v40 = vrot.slane %v3062_v7, 4 }
0x26c3   :  { %v3920_v47 = vpop.f32.mrf.mxu0 }
0x26c4   :  { %v3071_v0 = vadd.f32 %v3069_v40, %v4369_v26 }
0x26c5   :  { %v3065_v59 = vpop.f32.mrf.mxu0 }
0x26c6   :  { %4186 = vtanh.f32 %v3071_v0  ;;  %v3566_v18 = vmul.f32 -1.442695, %v3071_v0 }
0x26c7   :  { %v3921_v56 = vpop.f32.mrf.mxu0  ;;  %v3161_v16 = vpop.f32.mrf.mxu1 }
0x26c8   :  { %v3168_v27 = vrot.slane %v3161_v16, 6 }
0x26c9   :  { %v3928_v30 = vpop.f32.mrf.mxu1 }
0x26ca   :  { %v3170_v9 = vadd.f32 %v3168_v27, %v4367_v24 }
0x26cb   :  { %v3164_v44 = vpop.f32.mrf.mxu1 }
0x26cc   :  { %4188 = vtanh.f32 %v3170_v9  ;;  %v3569_v19 = vmul.f32 -1.442695, %v3170_v9 }
0x26cd   :  { %v3929_v10 = vpop.f32.mrf.mxu1  ;;  %4190 = vpow2.f32 %v3566_v18 }
0x26ce   :  { %4192 = vpow2.f32 %v3569_v19 }
0x26d3   :  { %v4187_v51 = vpop.eup %4186 }
0x26d4   :  { %3084 = vrot.lane.b32.xlu0 %v4187_v51, %s4225_s4 }
0x26d9   :  { %v4189_v1 = vpop.eup %4188 }
0x26da   :  { %3183 = vrot.lane.b32.xlu1 %v4189_v1, %s4225_s4  ;;  %v4191_v52 = vpop.eup %4190 }
0x26db   :  { %v3075_v35 = vadd.f32 1.0, %v4191_v52  ;;  %v4193_v32 = vpop.eup %4192 }
0x26dc   :  { %v3174_v29 = vadd.f32 1.0, %v4193_v32 }
0x26dd   :  { %4194 = vrcp.f32 %v3075_v35 }
0x26de   :  { %4196 = vrcp.f32 %v3174_v29 }
0x26ea   :  { %v4195_v31 = vpop.eup %4194 }
0x26eb   :  { %v4197_v42 = vpop.eup %4196  ;;  %v3082_v46 = vmul.f32 %v4195_v31, %v3080_v8 }
0x26ec   :  { %v3181_v48 = vmul.f32 %v4197_v42, %v3179_v37  ;;  %v4226_v37 = vmov 1966171168  }
0x2746   :  { %v3085_v41 = vpop.permute.xlu0 %3084 }
0x2747   :  { %v3087_v22 = vmul.f32 %v4195_v31, %v3085_v41 }
0x2749   :  { %3089 = vrot.lane.b32.xlu0 %v3087_v22, %s4224_s25 }
0x274c   :  { %v3184_v15 = vpop.permute.xlu1 %3183 }
0x274d   :  { %v3186_v28 = vmul.f32 %v4197_v42, %v3184_v15 }
0x274f   :  { %3188 = vrot.lane.b32.xlu1 %v3186_v28, %s4224_s25 }
0x27bb   :  { %v3090_v50 = vpop.permute.xlu0 %3089 }
0x27bc   :  { %v4935_v49 = vadd.f32 %v3090_v50, %v3082_v46 }
0x27be   :  { %4198 = vtanh.f32 %v4935_v49 }
0x27c1   :  { %v3189_v7 = vpop.permute.xlu1 %3188 }
0x27c2   :  { %v4939_v40 = vadd.f32 %v3189_v7, %v3181_v48  ;;  %v343_v48 = vunpack.c.l.s4 %v4226_v37 }
0x27c4   :  { %4200 = vtanh.f32 %v4939_v40 }
0x27cb   :  { %v4199_v47 = vpop.eup %4198 }
0x27cc   :  { %3095 = vrot.lane.b32.xlu0 %v4199_v47, %s4225_s4  ;;  %v344_v47 = vunpack.c.0.s8 %v343_v48 }
0x27d1   :  { %v4201_v0 = vpop.eup %4200 }
0x27d2   :  { %3194 = vrot.lane.b32.xlu1 %v4201_v0, %s4225_s4 }
0x283e   :  { %v3096_v39 = vpop.permute.xlu0 %3095 }
0x283f   :  { %v3098_v59 = vmul.f32 %v4195_v31, %v3096_v39 }
0x2841   :  { %v4944_v56 = vpack.c.bf16 %v3098_v59, %v3098_v59 }
0x2843   :  { %v3220_v21 = vrot.slane %v4944_v56, 2 }
0x2844   :  { %v3195_v16 = vpop.permute.xlu1 %3194 }
0x2845   :  { %v3197_v27 = vmul.f32 %v4197_v42, %v3195_v16  ;;  %3221 = vrot.lane.b32.xlu0 %v3220_v21, %s4224_s25 }
0x2847   :  { %v4948_v30 = vpack.c.bf16 %v3197_v27, %v3197_v27 }
0x2849   :  { %v3320_v9 = vrot.slane %v4948_v30, 1 }
0x284b   :  { %3321 = vrot.lane.b32.xlu1 %v3320_v9, %s4224_s25 }
0x28b7   :  { %v3222_v44 = vpop.permute.xlu0 %3221 }
0x28b8   :  { %3935 = vmatmul.mubr.msk.bf16.vlgmr.msra.gmra.mxu0 %vm267_vm3, %v3222_v44 }
0x28bd   :  { %v3322_v10 = vpop.permute.xlu1 %3321 }
0x28be   :  { %3943 = vmatmul.mubr.msk.bf16.vlgmr.msra.gmra.mxu1 %vm267_vm3, %v3322_v10 }
0x2978   :  { %v3260_v51 = vpop.f32.mrf.mxu0 }
0x2979   :  { %v3267_v1 = vrot.slane %v3260_v51, 2 }
0x297a   :  { %v3936_v18 = vpop.f32.mrf.mxu0 }
0x297b   :  { %v3269_v19 = vadd.f32 %v3267_v1, %v4369_v26 }
0x297c   :  { %v3263_v52 = vpop.f32.mrf.mxu0 }
0x297d   :  { %4202 = vtanh.f32 %v3269_v19  ;;  %v3572_v28 = vmul.f32 -1.442695, %v3269_v19 }
0x297e   :  { %v3937_v35 = vpop.f32.mrf.mxu0  ;;  %v3360_v32 = vpop.f32.mrf.mxu1 }
0x297f   :  { %v3366_v29 = vadd.f32 %v3360_v32, %v4367_v24  ;;  %v345_v24 = vlaneseq  ;;  %v3375_v35 = vrot.slane %v4939_v40, 2 }
0x2980   :  { %v3944_v31 = vpop.f32.mrf.mxu1 }
0x2981   :  { %4204 = vtanh.f32 %v3366_v29  ;;  %v3575_v8 = vmul.f32 -1.442695, %v3366_v29  ;;  %v346_v0 = vshrl.u32 %v345_v24, 7 }
0x2982   :  { %v3363_v41 = vpop.f32.mrf.mxu1  ;;  %4206 = vpow2.f32 %v3572_v28 }
0x2983   :  { %4208 = vpow2.f32 %v3575_v8  ;;  %v4958_v39 = vsub.s32 %v344_v47, %v346_v0 }
0x2984   :  { %v3945_v22 = vpop.f32.mrf.mxu1 }
0x2985   :  { %v458_v59 = vrot.slane %v4398_v17, %v4958_v39  ;;  %v3278_v17 = vrot.slane %v4935_v49, 6  ;;  %v348_v49 = vrot.slane %v4394_v14, %v4958_v39  ;;  %v557_v40 = vrot.slane %v4432_v4, %v4958_v39 }
0x2986   :  { %v854_v14 = vrot.slane %v4474_v6, %v4958_v39  ;;  %v953_v4 = vrot.slane %v4508_v63, %v4958_v39  ;;  %v1242_v37 = vrot.slane %v4550_v60, %v4958_v39  ;;  %v1145_v60 = vrot.slane %v4546_v55, %v4958_v39 }
0x2987   :  { %v459_v27 = vcombine.high %v458_v59, %v458_v59  ;;  %v355_v28 = vrot.slane %v348_v49, %v4958_v39  ;;  %v558_v8 = vcombine.high %v557_v40, %v557_v40  ;;  %v1050_v59 = vrot.slane %v4511_v62, %v4958_v39 }
0x2988   :  { %v1243_v6 = vcombine.high %v1242_v37, %v1242_v37  ;;  %v1152_v62 = vrot.slane %v1145_v60, %v4958_v39  ;;  %v1834_v40 = vrot.slane %v4683_v20, %v4958_v39  ;;  %v3008_v60 = vrot.slane %v4912_v54, %v4958_v39 }
0x2989   :  { %v466_v51 = vrot.slane %v459_v27, %v4958_v39  ;;  %v1341_v27 = vrot.slane %v4584_v61, %v4958_v39  ;;  %v1638_v61 = vrot.slane %v4626_v5, %v4958_v39 }
0x298a   :  { %v4203_v42 = vpop.eup %4202 }
0x298b   :  { %3282 = vrot.lane.b32.xlu0 %v4203_v42, %s4225_s4  ;;  %v467_v18 = vcombine.high %v466_v51, %v466_v51  ;;  %v656_v42 = vrot.slane %v4436_v12, %v4958_v39  ;;  %v565_v12 = vrot.slane %v558_v8, %v4958_v39  ;;  %v1440_v51 = vrot.slane %v4588_v3, %v4958_v39 }
0x298c   :  { %v1841_v8 = vrot.slane %v1834_v40, %v4958_v39 }
0x298d   :  { %v1447_v55 = vrot.slane %v1440_v51, %v4958_v39 }
0x298e   :  { %v4205_v15 = vpop.eup %4204 }
0x298f   :  { %3379 = vrot.lane.b32.xlu1 %v4205_v15, %s4225_s4  ;;  %v4207_v26 = vpop.eup %4206 }
0x2990   :  { %v3273_v46 = vadd.f32 1.0, %v4207_v26  ;;  %v4209_v50 = vpop.eup %4208  ;;  %v663_v26 = vrot.slane %v656_v42, %v4958_v39 }
0x2991   :  { %v3370_v7 = vadd.f32 1.0, %v4209_v50 }
0x2992   :  { %4210 = vrcp.f32 %v3273_v46  ;;  %v755_v46 = vrot.slane %v4470_v2, %v4958_v39  ;;  %v664_v48 = vcombine.high %v663_v26, %v663_v26  ;;  %v855_v2 = vcombine.high %v854_v14, %v854_v14 }
0x2993   :  { %4212 = vrcp.f32 %v3370_v7  ;;  %v954_v7 = vcombine.high %v953_v4, %v953_v4  ;;  %v2224_v26 = vrot.slane %v4760_v38, %v4958_v39  ;;  %v2323_v4 = vrot.slane %v4794_v36, %v4958_v39 }
0x2994   :  { %v762_v24 = vrot.slane %v755_v46, %v4958_v39  ;;  %v862_v47 = vrot.slane %v855_v2, %v4958_v39 }
0x2995   :  { %v961_v0 = vrot.slane %v954_v7, %v4958_v39 }
0x2996   :  { %v763_v63 = vcombine.high %v762_v24, %v762_v24 }
0x299f   :  { %v4962_v21 = vpop.eup %4210 }
0x29a0   :  { %v4966_v44 = vpop.eup %4212  ;;  %v3280_v19 = vmul.f32 %v4962_v21, %v3278_v17  ;;  %v1539_v17 = vrot.slane %v4622_v53, %v4958_v39 }
0x29a1   :  { %v3377_v29 = vmul.f32 %v4966_v44, %v3375_v35  ;;  %v1448_v35 = vcombine.high %v1447_v55, %v1447_v55 }
0x29fd   :  { %v3283_v16 = vpop.permute.xlu0 %3282 }
0x29fe   :  { %v3285_v9 = vmul.f32 %v4962_v21, %v3283_v16  ;;  %v1250_v16 = vrot.slane %v1243_v6, %v4958_v39  ;;  %v2618_v6 = vrot.slane %v4835_v13, %v4958_v39 }
0x2a00   :  { %3287 = vrot.lane.b32.xlu0 %v3285_v9, %s4224_s25  ;;  %v962_v9 = vcombine.high %v961_v0, %v961_v0  ;;  %v2625_v0 = vrot.slane %v2618_v6, %v4958_v39 }
0x2a01   :  { %v3380_v10 = vpop.permute.xlu1 %3379 }
0x2a02   :  { %v3382_v1 = vmul.f32 %v4966_v44, %v3380_v10  ;;  %v1057_v10 = vrot.slane %v1050_v59, %v4958_v39  ;;  %v2909_v59 = vrot.slane %v4908_v43, %v4958_v39 }
0x2a04   :  { %3384 = vrot.lane.b32.xlu1 %v3382_v1, %s4224_s25  ;;  %v1251_v1 = vcombine.high %v1250_v16, %v1250_v16 }
0x2a08   :  { %468 = vrot.lane.b32.xlu1 %v467_v18, %s4224_s25  ;;  %v1342_v18 = vcombine.high %v1341_v27, %v1341_v27  ;;  %v2910_v27 = vcombine.high %v2909_v59, %v2909_v59 }
0x2a0a   :  { %v1349_v3 = vrot.slane %v1342_v18, %v4958_v39  ;;  %v2917_v43 = vrot.slane %v2910_v27, %v4958_v39 }
0x2a72   :  { %v3288_v52 = vpop.permute.xlu0 %3287 }
0x2a73   :  { %v4975_v32 = vadd.f32 %v3288_v52, %v3280_v19  ;;  %v1737_v19 = vrot.slane %v4680_v11, %v4958_v39  ;;  %v2026_v52 = vrot.slane %v4722_v25, %v4958_v39  ;;  %v1929_v25 = vrot.slane %v4718_v23, %v4958_v39 }
0x2a74   :  { %v2231_v23 = vrot.slane %v2224_v26, %v4958_v39 }
0x2a75   :  { %4214 = vtanh.f32 %v4975_v32  ;;  %v1738_v53 = vcombine.high %v1737_v19, %v1737_v19  ;;  %v2027_v5 = vcombine.high %v2026_v52, %v2026_v52  ;;  %v1936_v20 = vrot.slane %v1929_v25, %v4958_v39 }
0x2a76   :  { %v3385_v31 = vpop.permute.xlu1 %3384  ;;  %v2232_v37 = vcombine.high %v2231_v23, %v2231_v23 }
0x2a77   :  { %v4979_v41 = vadd.f32 %v3385_v31, %v3377_v29  ;;  %v1546_v29 = vrot.slane %v1539_v17, %v4958_v39  ;;  %v1639_v31 = vcombine.high %v1638_v61, %v1638_v61  ;;  %v1745_v49 = vrot.slane %v1738_v53, %v4958_v39 }
0x2a78   :  { %v2034_v42 = vrot.slane %v2027_v5, %v4958_v39 }
0x2a79   :  { %4216 = vtanh.f32 %v4979_v41  ;;  %v1547_v11 = vcombine.high %v1546_v29, %v1546_v29 }
0x2a7a   :  { %v469_v22 = vpop.permute.xlu1 %468  ;;  %v2035_v46 = vcombine.high %v2034_v42, %v2034_v42 }
0x2a7b   :  { %3486 = vst.msk [vmem:[%s5252_s9 + $0xf] sm:$0x1] %vm359_vm4, %v469_v22  ;;  %v1646_v22 = vrot.slane %v1639_v31, %v4958_v39 }
0x2a82   :  { %v4215_v15 = vpop.eup %4214 }
0x2a83   :  { %3293 = vrot.lane.b32.xlu0 %v4215_v15, %s4225_s4  ;;  %v2125_v15 = vrot.slane %v4756_v34, %v4958_v39  ;;  %v2422_v34 = vrot.slane %v4798_v45, %v4958_v39 }
0x2a85   :  { %v2126_v14 = vcombine.high %v2125_v15, %v2125_v15  ;;  %v2423_v24 = vcombine.high %v2422_v34, %v2422_v34 }
0x2a86   :  { %v4217_v50 = vpop.eup %4216 }
0x2a87   :  { %3390 = vrot.lane.b32.xlu1 %v4217_v50, %s4225_s4  ;;  %356 = vrot.lane.b32.xlu0 %v355_v28, %s4224_s25  ;;  %v1746_v28 = vcombine.high %v1745_v49, %v1745_v49  ;;  %v2521_v50 = vrot.slane %v4832_v57, %v4958_v39  ;;  %v2133_v38 = vrot.slane %v2126_v14, %v4958_v39 }
0x2a88   :  { %v2430_v2 = vrot.slane %v2423_v24, %v4958_v39 }
0x2a89   :  { %v2522_v36 = vcombine.high %v2521_v50, %v2521_v50 }
0x2a8b   :  { %665 = vrot.lane.b32.xlu1 %v664_v48, %s4224_s25  ;;  %566 = vrot.lane.b32.xlu0 %v565_v12, %s4224_s25  ;;  %v2810_v12 = vrot.slane %v4874_v33, %v4958_v39  ;;  %v2330_v48 = vrot.slane %v2323_v4, %v4958_v39  ;;  %v2529_v7 = vrot.slane %v2522_v36, %v4958_v39 }
0x2a8c   :  { %v2713_v33 = vrot.slane %v4870_v58, %v4958_v39  ;;  %v3015_v58 = vrot.slane %v3008_v60, %v4958_v39 }
0x2a8d   :  { %v2811_v45 = vcombine.high %v2810_v12, %v2810_v12  ;;  %v2331_v57 = vcombine.high %v2330_v48, %v2330_v48 }
0x2a8e   :  { %v2720_v13 = vrot.slane %v2713_v33, %v4958_v39  ;;  %v3016_v54 = vcombine.high %v3015_v58, %v3015_v58 }
0x2a8f   :  { %863 = vrot.lane.b32.xlu1 %v862_v47, %s4224_s25  ;;  %764 = vrot.lane.b32.xlu0 %v763_v63, %s4224_s25  ;;  %v2818_v63 = vrot.slane %v2811_v45, %v4958_v39  ;;  %v2530_v47 = vcombine.high %v2529_v7, %v2529_v7 }
0x2a91   :  { %v2819_v16 = vcombine.high %v2818_v63, %v2818_v63 }
0x2a93   :  { %1058 = vrot.lane.b32.xlu1 %v1057_v10, %s4224_s25  ;;  %963 = vrot.lane.b32.xlu0 %v962_v9, %s4224_s25  ;;  %v3107_v9 = vrot.slane %v4944_v56, %v4958_v39  ;;  %v3206_v10 = vrot.slane %v4948_v30, %v4958_v39 }
0x2a95   :  { %v3114_v51 = vrot.slane %v3107_v9, %v4958_v39 }
0x2a97   :  { %1252 = vrot.lane.b32.xlu1 %v1251_v1, %s4224_s25  ;;  %1153 = vrot.lane.b32.xlu0 %v1152_v62, %s4224_s25  ;;  %v3207_v62 = vcombine.high %v3206_v10, %v3206_v10  ;;  %v3115_v1 = vcombine.high %v3114_v51, %v3114_v51 }
0x2a99   :  { %v3214_v56 = vrot.slane %v3207_v62, %v4958_v39 }
0x2a9b   :  { %1449 = vrot.lane.b32.xlu1 %v1448_v35, %s4224_s25  ;;  %1350 = vrot.lane.b32.xlu0 %v1349_v3, %s4224_s25 }
0x2a9f   :  { %1647 = vrot.lane.b32.xlu1 %v1646_v22, %s4224_s25  ;;  %1548 = vrot.lane.b32.xlu0 %v1547_v11, %s4224_s25 }
0x2aa3   :  { %1842 = vrot.lane.b32.xlu1 %v1841_v8, %s4224_s25  ;;  %1747 = vrot.lane.b32.xlu0 %v1746_v28, %s4224_s25 }
0x2aa7   :  { %2036 = vrot.lane.b32.xlu1 %v2035_v46, %s4224_s25  ;;  %1937 = vrot.lane.b32.xlu0 %v1936_v20, %s4224_s25 }
0x2aab   :  { %2233 = vrot.lane.b32.xlu1 %v2232_v37, %s4224_s25  ;;  %2134 = vrot.lane.b32.xlu0 %v2133_v38, %s4224_s25 }
0x2aaf   :  { %2431 = vrot.lane.b32.xlu1 %v2430_v2, %s4224_s25  ;;  %2332 = vrot.lane.b32.xlu0 %v2331_v57, %s4224_s25 }
0x2ab3   :  { %2626 = vrot.lane.b32.xlu1 %v2625_v0, %s4224_s25  ;;  %2531 = vrot.lane.b32.xlu0 %v2530_v47, %s4224_s25 }
0x2ab7   :  { %2820 = vrot.lane.b32.xlu1 %v2819_v16, %s4224_s25  ;;  %2721 = vrot.lane.b32.xlu0 %v2720_v13, %s4224_s25 }
0x2abb   :  { %3017 = vrot.lane.b32.xlu1 %v3016_v54, %s4224_s25  ;;  %2918 = vrot.lane.b32.xlu0 %v2917_v43, %s4224_s25 }
0x2abf   :  { %3215 = vrot.lane.b32.xlu1 %v3214_v56, %s4224_s25  ;;  %3116 = vrot.lane.b32.xlu0 %v3115_v1, %s4224_s25 }
0x2ac3   :  { %3421 = vrot.lane.b32.xlu1 %v4975_v32, %s4227_s15 }
0x2af5   :  { %v3294_v30 = vpop.permute.xlu0 %3293 }
0x2af6   :  { %v3296_v18 = vmul.f32 %v4962_v21, %v3294_v30 }
0x2af8   :  { %v3297_v55 = vpack.c.bf16 %v3296_v18, %v3296_v18  ;;  %3415 = vrot.lane.b32.xlu0 %v3296_v18, %s4224_s25 }
0x2af9   :  { %v3391_v17 = vpop.permute.xlu1 %3390  ;;  %v357_v61 = vpop.permute.xlu0 %356 }
0x2afa   :  { %v3305_v19 = vrot.slane %v3297_v55, %v4958_v39  ;;  %v3393_v3 = vmul.f32 %v4966_v44, %v3391_v17  ;;  %360 = vst.msk [vmem:[%s5253_s8] sm:$0x1] %vm359_vm4, %v357_v61 }
0x2afc   :  { %v3306_v52 = vcombine.high %v3305_v19, %v3305_v19  ;;  %v3394_v35 = vpack.c.bf16 %v3393_v3, %v3393_v3 }
0x2afd   :  { %v666_v32 = vpop.permute.xlu1 %665  ;;  %v567_v29 = vpop.permute.xlu0 %566 }
0x2afe   :  { %v3313_v21 = vrot.slane %v3306_v52, %v4958_v39  ;;  %v3402_v31 = vrot.slane %v3394_v35, %v4958_v39  ;;  %3492 = vst.msk [vmem:[%s5252_s9 + $0xe] sm:$0x1] %vm359_vm4, %v666_v32  ;;  %3489 = vst.msk [vmem:[%s5253_s8 + $0x1] sm:$0x1] %vm359_vm4, %v567_v29 }
0x2b00   :  { %v3409_v44 = vrot.slane %v3402_v31, %v4958_v39  ;;  %v3314_v53 = vcombine.high %v3313_v21, %v3313_v21 }
0x2b01   :  { %v864_v5 = vpop.permute.xlu1 %863  ;;  %v765_v11 = vpop.permute.xlu0 %764 }
0x2b02   :  { %3498 = vst.msk [vmem:[%s5252_s9 + $0xd] sm:$0x1] %vm359_vm4, %v864_v5  ;;  %3495 = vst.msk [vmem:[%s5253_s8 + $0x2] sm:$0x1] %vm359_vm4, %v765_v11  ;;  %3410 = vrot.lane.b32.xlu1 %v3409_v44, %s4224_s25  ;;  %3315 = vrot.lane.b32.xlu0 %v3314_v53, %s4224_s25 }
0x2b05   :  { %v1059_v22 = vpop.permute.xlu1 %1058  ;;  %v964_v49 = vpop.permute.xlu0 %963 }
0x2b06   :  { %3504 = vst.msk [vmem:[%s5252_s9 + $0xc] sm:$0x1] %vm359_vm4, %v1059_v22  ;;  %3501 = vst.msk [vmem:[%s5253_s8 + $0x3] sm:$0x1] %vm359_vm4, %v964_v49  ;;  %3432 = vrot.lane.b32.xlu1 %v4979_v41, %s4227_s15  ;;  %3426 = vrot.lane.b32.xlu0 %v3393_v3, %s4224_s25 }
0x2b09   :  { %v1253_v39 = vpop.permute.xlu1 %1252  ;;  %v1154_v40 = vpop.permute.xlu0 %1153 }
0x2b0a   :  { %3510 = vst.msk [vmem:[%s5252_s9 + $0xb] sm:$0x1] %vm359_vm4, %v1253_v39  ;;  %3507 = vst.msk [vmem:[%s5253_s8 + $0x4] sm:$0x1] %vm359_vm4, %v1154_v40 }
0x2b0d   :  { %v1450_v25 = vpop.permute.xlu1 %1449  ;;  %v1351_v42 = vpop.permute.xlu0 %1350 }
0x2b0e   :  { %3516 = vst.msk [vmem:[%s5252_s9 + $0xa] sm:$0x1] %vm359_vm4, %v1450_v25  ;;  %3513 = vst.msk [vmem:[%s5253_s8 + $0x5] sm:$0x1] %vm359_vm4, %v1351_v42 }
0x2b11   :  { %v1648_v41 = vpop.permute.xlu1 %1647  ;;  %v1549_v15 = vpop.permute.xlu0 %1548 }
0x2b12   :  { %3522 = vst.msk [vmem:[%s5252_s9 + $0x9] sm:$0x1] %vm359_vm4, %v1648_v41  ;;  %3519 = vst.msk [vmem:[%s5253_s8 + $0x6] sm:$0x1] %vm359_vm4, %v1549_v15 }
0x2b15   :  { %v1843_v28 = vpop.permute.xlu1 %1842  ;;  %v1748_v8 = vpop.permute.xlu0 %1747 }
0x2b16   :  { %3528 = vst.msk [vmem:[%s5252_s9 + $0x8] sm:$0x1] %vm359_vm4, %v1843_v28  ;;  %3525 = vst.msk [vmem:[%s5253_s8 + $0x7] sm:$0x1] %vm359_vm4, %v1748_v8 }
0x2b19   :  { %v2037_v26 = vpop.permute.xlu1 %2036  ;;  %v1938_v20 = vpop.permute.xlu0 %1937 }
0x2b1a   :  { %3534 = vst.msk [vmem:[%s5252_s9 + $0x7] sm:$0x1] %vm359_vm4, %v2037_v26  ;;  %3531 = vst.msk [vmem:[%s5253_s8 + $0x8] sm:$0x1] %vm359_vm4, %v1938_v20 }
0x2b1d   :  { %v2234_v46 = vpop.permute.xlu1 %2233  ;;  %v2135_v14 = vpop.permute.xlu0 %2134 }
0x2b1e   :  { %3540 = vst.msk [vmem:[%s5252_s9 + $0x6] sm:$0x1] %vm359_vm4, %v2234_v46  ;;  %3537 = vst.msk [vmem:[%s5253_s8 + $0x9] sm:$0x1] %vm359_vm4, %v2135_v14 }
0x2b21   :  { %v2432_v23 = vpop.permute.xlu1 %2431  ;;  %v2333_v4 = vpop.permute.xlu0 %2332 }
0x2b22   :  { %3546 = vst.msk [vmem:[%s5252_s9 + $0x5] sm:$0x1] %vm359_vm4, %v2432_v23  ;;  %3543 = vst.msk [vmem:[%s5253_s8 + $0xa] sm:$0x1] %vm359_vm4, %v2333_v4 }
0x2b25   :  { %v2627_v34 = vpop.permute.xlu1 %2626  ;;  %v2532_v50 = vpop.permute.xlu0 %2531 }
0x2b26   :  { %3552 = vst.msk [vmem:[%s5252_s9 + $0x4] sm:$0x1] %vm359_vm4, %v2627_v34  ;;  %3549 = vst.msk [vmem:[%s5253_s8 + $0xb] sm:$0x1] %vm359_vm4, %v2532_v50 }
0x2b29   :  { %v2821_v38 = vpop.permute.xlu1 %2820  ;;  %v2722_v12 = vpop.permute.xlu0 %2721 }
0x2b2a   :  { %3558 = vst.msk [vmem:[%s5252_s9 + $0x3] sm:$0x1] %vm359_vm4, %v2821_v38  ;;  %3555 = vst.msk [vmem:[%s5253_s8 + $0xc] sm:$0x1] %vm359_vm4, %v2722_v12 }
0x2b2d   :  { %v3018_v37 = vpop.permute.xlu1 %3017  ;;  %v2919_v48 = vpop.permute.xlu0 %2918 }
0x2b2e   :  { %3564 = vst.msk [vmem:[%s5252_s9 + $0x2] sm:$0x1] %vm359_vm4, %v3018_v37  ;;  %3561 = vst.msk [vmem:[%s5253_s8 + $0xd] sm:$0x1] %vm359_vm4, %v2919_v48 }
0x2b31   :  { %v3216_v24 = vpop.permute.xlu1 %3215  ;;  %v3117_v36 = vpop.permute.xlu0 %3116 }
0x2b32   :  { %3570 = vst.msk [vmem:[%s5252_s9 + $0x1] sm:$0x1] %vm359_vm4, %v3216_v24  ;;  %3567 = vst.msk [vmem:[%s5253_s8 + $0xe] sm:$0x1] %vm359_vm4, %v3117_v36 }
0x2b35   :  { %v3422_v45 = vpop.permute.xlu1 %3421 }
0x2b36   :  { %3424 = vst.msk [vmem:[#allocation3 - $0x6] sm:$0xc0] %vm3418_vm5, %v3422_v45 }
0x2b6a   :  { %v3416_v57 = vpop.permute.xlu0 %3415 }
0x2b6b   :  { %3419 = vst.msk [vmem:[#allocation2 - $0x6] sm:$0xc0] %vm3418_vm5, %v3416_v57 }
0x2b74   :  { %v3411_v2 = vpop.permute.xlu1 %3410  ;;  %v3316_v7 = vpop.permute.xlu0 %3315 }
0x2b75   :  { %3413 = vst.msk [vmem:[%s5252_s9] sm:$0x1] %vm359_vm4, %v3411_v2  ;;  %3573 = vst.msk [vmem:[%s5253_s8 + $0xf] sm:$0x1] %vm359_vm4, %v3316_v7 }
0x2b78   :  { %v3433_v6 = vpop.permute.xlu1 %3432  ;;  %v3427_v33 = vpop.permute.xlu0 %3426 }
0x2b79   :  { %3435 = vst.msk [vmem:[#allocation5] sm:$0x3] %vm68_vm0, %v3433_v6  ;;  %3430 = vst.msk [vmem:[#allocation4] sm:$0x3] %vm68_vm0, %v3427_v33 }

// kernel: listener_pre_trainer_forward.13
= control target key start
LH: loop header
LB: loop body
LE: loop exit
PB: predicated region body
PF: predicated region fallthrough
CT: control target
= control target key end

     0   :  { %v117_v0 = vmov 0.0   ;;  %vm118_vm0 = vmmov 0   ;;  %vm45_vm1 = vcmask 261120   ;;  %s157_s1 = inlined_call_operand.vmem [shape: bf16[32,32], index: 1, kind: input, shape index: {}]   ;;  %s158_s0 = inlined_call_operand.vmem [shape: bf16[16,32], index: 0, kind: input, shape index: {}]   ;;  %s159_s2 = inlined_call_operand.vmem [shape: f32[1,32], index: 2, kind: input, shape index: {}]   ;;  %s160_s3 = inlined_call_operand.vmem [shape: f32[16,32], index: 3, kind: output, shape index: {}]  }
   0x1   :  { %104 = vmatprep.subr.bf16.mxu0 %v117_v0  ;;  %v114_v1 = vld [vmem:[%s157_s1 + $0x8] sm:$0xff]   ;;  %108 = vmatprep.mubr.msk.bf16.mxu0 %vm118_vm0, %v117_v0  ;;  %v115_v2 = vld [vmem:[%s157_s1] sm:$0xff]  }
   0x2   :  { %105 = vmatpush3.bf16.msra.mxu0 %v114_v1  ;;  %v116_v3 = vld [vmem:[%s158_s0] sm:$0xff]  }
   0x3   :  { %106 = vmatprep.subr.bf16.mxu0 %v117_v0  ;;  %v96_v4 = vld [vmem:[%s159_s2] ss:$0 sm:$0xff] }
   0x6   :  { %107 = vmatpush3.bf16.msra.mxu0 %v115_v2 }
   0x9   :  { %109 = vmatmul.mubr.msk.bf16.vlgmr.msra.gmra.mxu0 %vm45_vm1, %v116_v3 }
  0xc9   :  { %v83_v5 = vpop.f32.mrf.mxu0 }
  0xca   :  { %v84_v6 = vadd.f32 %v96_v4, %v83_v5 }
  0xcb   :  { %v110_v7 = vpop.f32.mrf.mxu0 }
  0xcc   :  { %90 = vst.msk [vmem:[%s160_s3] sm:$0xff] %vm45_vm1, %v84_v6 }
  0xcd   :  { %v86_v8 = vpop.f32.mrf.mxu0 }
  0xce   :  { %v87_v9 = vadd.f32 %v96_v4, %v86_v8 }
  0xcf   :  { %v111_v10 = vpop.f32.mrf.mxu0 }
  0xd0   :  { %91 = vst.msk [vmem:[%s160_s3 + $0x8] sm:$0xff] %vm45_vm1, %v87_v9 }

</bundles_post_ra>
